<compile_context>
chip_gen: v5e
topology: v5e:2x2
jax: 0.10.0
libtpu: 0.0.40
codegen_flags: <defaults>
</compile_context>

<pallas_src>
import jax
import jax.numpy as jnp
from jax.experimental import pallas as pl
from jax.experimental.pallas import tpu as pltpu


# ----------------------------------------------------------------------------- kernel

def _ec_embedding_kernel(x_ref, m_ref, w_init_ref, w_hw1_ref, w_hw2_ref,
                         w_hw3_ref, b_ref, out_ref):
    # x_ref : (Bt*L, word_dim) f32      m_ref : (Bt*L, 1) f32
    # w_init_ref : (7, word_dim, C4) bf16
    # w_hw*_ref  : (3, C4, 2*C4)    bf16
    # b_ref : (4, 2*C4) f32   row 0 = [init bias | zeros], rows 1..3 = highway biases
    # out_ref : (Bt, C4) f32
    M = x_ref.shape[0]
    Bt, C4 = out_ref.shape
    L = M // Bt

    x = x_ref[...]                                            # f32 activations
    b_all = b_ref[...]                                        # (4, 2*C4)

    # Position of each row inside its own sequence; used to (a) realize the
    # causal zero-padding and (b) kill cross-batch-element leakage of the roll.
    lpos = jax.lax.broadcasted_iota(jnp.int32, (M, 1), 0) % L

    def causal_conv(h, w_ref, bias):
        # h: (M, Cin) f32, w_ref: (k, Cin, Cout) bf16, bias: (1, Cout) f32
        k = w_ref.shape[0]
        acc = None
        for j in range(k):                                    # static unroll, k <= 7
            shift = k - 1 - j                                 # causal lag of tap j
            if shift == 0:
                hs = h
            else:
                hs = jnp.where(lpos >= shift,
                               pltpu.roll(h, shift, axis=0),  # XLU sublane rotate
                               0.0)
            contrib = jnp.dot(hs.astype(w_ref.dtype), w_ref[j],
                              preferred_element_type=jnp.float32)
            acc = contrib if acc is None else acc + contrib
        return acc + bias                                     # bias added once

    # Fused init convs: one k=7 conv producing all 4*conv_dim channels at once.
    h = causal_conv(x, w_init_ref, b_all[0:1, :C4])           # (M, C4)

    def highway(hin, w_ref, bias):
        tz = causal_conv(hin, w_ref, bias)                    # (M, 2*C4) fused t|z
        t = jax.nn.sigmoid(tz[:, :C4])                        # EUP
        z = tz[:, C4:]
        return t * z + (1.0 - t) * hin

    h = jnp.maximum(highway(h, w_hw1_ref, b_all[1:2, :]), 0.0)
    h = jnp.maximum(highway(h, w_hw2_ref, b_all[2:3, :]), 0.0)
    h = jnp.maximum(highway(h, w_hw3_ref, b_all[3:4, :]), 0.0)

    h = h * m_ref[...]                                        # mask (broadcast over C4)
    # AdaptiveMaxPool1d(1) over L, per sequence -> dense (Bt, C4) store.
    out_ref[...] = jnp.max(h.reshape(Bt, L, C4), axis=1)


# ----------------------------------------------------------------------------- param fusion

_PARAM_ORDER = ["w1", "b1", "w2", "b2", "w3", "b3", "w4", "b4",
                "wt1", "bt1", "wz1", "bz1",
                "wt2", "bt2", "wz2", "bz2",
                "wt3", "bt3", "wz3", "bz3"]


def _fuse_params(params):
    """Trace-time fusion of the 20 raw parameters into 4 bf16 weights + 1 bias pack."""
    conv_dim = params["w1"].shape[2]
    C4 = 4 * conv_dim

    def pad_to_k7(w):
        k = w.shape[0]
        if k == 7:
            return w
        return jnp.concatenate(
            [jnp.zeros((7 - k,) + w.shape[1:], w.dtype), w], axis=0)

    w_init = jnp.concatenate([pad_to_k7(params["w1"]), pad_to_k7(params["w2"]),
                              pad_to_k7(params["w3"]), pad_to_k7(params["w4"])],
                             axis=2)                                   # (7, Dw, C4)
    b_init = jnp.concatenate([params["b1"], params["b2"],
                              params["b3"], params["b4"]], axis=1)      # (1, C4)

    w_hw, b_hw = [], []
    for i in (1, 2, 3):
        w_hw.append(jnp.concatenate([params[f"wt{i}"], params[f"wz{i}"]],
                                    axis=2))                            # (3, C4, 2*C4)
        b_hw.append(jnp.concatenate([params[f"bt{i}"], params[f"bz{i}"]],
                                    axis=1))                            # (1, 2*C4)

    biases = jnp.concatenate(
        [jnp.concatenate([b_init, jnp.zeros((1, C4), b_init.dtype)], axis=1),
         b_hw[0], b_hw[1], b_hw[2]], axis=0).astype(jnp.float32)        # (4, 2*C4)

    to_bf16 = lambda w: w.astype(jnp.bfloat16)
    return (to_bf16(w_init), to_bf16(w_hw[0]), to_bf16(w_hw[1]),
            to_bf16(w_hw[2]), biases)


# ----------------------------------------------------------------------------- wrapper

def ec_embedding(x, mask, params, *, batch_tile=16):
    """x: (B, L, word_dim) float32, mask: (B, L) float32 -> (B, 4*conv_dim) float32."""
    B, L, Dw = x.shape
    conv_dim = params["w1"].shape[2]
    C4 = 4 * conv_dim

    w_init, w_hw1, w_hw2, w_hw3, biases = _fuse_params(params)

    Bt = max(1, min(batch_tile, B))
    num_groups = -(-B // Bt)                      # cdiv
    Bp = num_groups * Bt
    # Tiling constraints (sublane axis divisible by 8 unless a single block).
    assert num_groups == 1 or ((Bt * L) % 8 == 0 and Bt % 8 == 0), (Bt, L)

    if Bp != B:                                   # pad batch to a whole number of groups
        pad = Bp - B
        x = jnp.concatenate([x, jnp.zeros((pad, L, Dw), x.dtype)], axis=0)
        mask = jnp.concatenate([mask, jnp.zeros((pad, L), mask.dtype)], axis=0)

    xf = x.reshape(Bp * L, Dw).astype(jnp.float32)
    mf = mask.reshape(Bp * L, 1).astype(jnp.float32)
    M = Bt * L

    out = pl.pallas_call(
        _ec_embedding_kernel,
        out_shape=jax.ShapeDtypeStruct((Bp, C4), jnp.float32),
        grid=(num_groups,),
        in_specs=[
            pl.BlockSpec((M, Dw), lambda g: (g, 0)),        # activations, per group
            pl.BlockSpec((M, 1), lambda g: (g, 0)),         # mask, per group
            pl.BlockSpec(w_init.shape, lambda g: (0, 0, 0)),  # fused init conv weight
            pl.BlockSpec(w_hw1.shape, lambda g: (0, 0, 0)),   # fused highway weights
            pl.BlockSpec(w_hw2.shape, lambda g: (0, 0, 0)),
            pl.BlockSpec(w_hw3.shape, lambda g: (0, 0, 0)),
            pl.BlockSpec(biases.shape, lambda g: (0, 0)),     # packed biases
        ],
        out_specs=pl.BlockSpec((Bt, C4), lambda g: (g, 0)),
        compiler_params=pltpu.CompilerParams(
            dimension_semantics=("parallel",)),
    )(xf, mf, w_init, w_hw1, w_hw2, w_hw3, biases)
    return out[:B]


# ----------------------------------------------------------------------------- params

def init_params(key, word_dim, conv_dim):
    C4 = 4 * conv_dim
    shapes = {
        "w1": (1, word_dim, conv_dim), "b1": (1, conv_dim),
        "w2": (3, word_dim, conv_dim), "b2": (1, conv_dim),
        "w3": (5, word_dim, conv_dim), "b3": (1, conv_dim),
        "w4": (7, word_dim, conv_dim), "b4": (1, conv_dim),
        "wt1": (3, C4, C4), "bt1": (1, C4), "wz1": (3, C4, C4), "bz1": (1, C4),
        "wt2": (3, C4, C4), "bt2": (1, C4), "wz2": (3, C4, C4), "bz2": (1, C4),
        "wt3": (3, C4, C4), "bt3": (1, C4), "wz3": (3, C4, C4), "bz3": (1, C4),
    }
    keys = jax.random.split(key, len(_PARAM_ORDER))
    params = {}
    for k, name in zip(keys, _PARAM_ORDER):
        scale = 0.1 if name.startswith("w") else 0.05
        params[name] = (scale * jax.random.normal(k, shapes[name])).astype(jnp.float32)
    return params


# ----------------------------------------------------------------------------- pure-JAX reference

def _causal_conv_ref(x, w, b):
    k = w.shape[0]
    xp = jnp.pad(x, ((0, 0), (k - 1, 0), (0, 0)))
    y = jax.lax.conv_general_dilated(
        xp, w, window_strides=(1,), padding="VALID",
        dimension_numbers=("NWC", "WIO", "NWC"))
    return y + b


def ec_embedding_ref(x, mask, p):
    c = jnp.concatenate([_causal_conv_ref(x, p["w1"], p["b1"]),
                         _causal_conv_ref(x, p["w2"], p["b2"]),
                         _causal_conv_ref(x, p["w3"], p["b3"]),
                         _causal_conv_ref(x, p["w4"], p["b4"])], axis=-1)

    def hw(h, wt, bt, wz, bz):
        t = jax.nn.sigmoid(_causal_conv_ref(h, wt, bt))
        return t * _causal_conv_ref(h, wz, bz) + (1.0 - t) * h

    h = jax.nn.relu(hw(c, p["wt1"], p["bt1"], p["wz1"], p["bz1"]))
    h = jax.nn.relu(hw(h, p["wt2"], p["bt2"], p["wz2"], p["bz2"]))
    h = jax.nn.relu(hw(h, p["wt3"], p["bt3"], p["wz3"], p["bz3"]))
    h = h * mask[:, :, None]
    return jnp.max(h, axis=1)


# ----------------------------------------------------------------------------- main

if __name__ == "__main__":
    # C4 = 128 lanes; Bt=16 -> M = Bt*L = 128 MXU rows per matmul; grid=(2,)
    # (even step count so both v7x TensorCores are used).
    B, L, word_dim, conv_dim = 32, 8, 32, 32

    key = jax.random.PRNGKey(0)
    kx, kp = jax.random.split(key, 2)
    x = jax.random.normal(kx, (B, L, word_dim), jnp.float32)
    lengths = 1 + (jnp.arange(B) % L)                       # deterministic ragged lengths
    mask = (jnp.arange(L)[None, :] < lengths[:, None]).astype(jnp.float32)
    params = init_params(kp, word_dim, conv_dim)

    out = ec_embedding(x, mask, params, batch_tile=16)
    out = jax.block_until_ready(out)

    ref = ec_embedding_ref(x, mask, params)
    assert out.shape == (B, 4 * conv_dim), out.shape
    # bf16 matmul operands with f32 accumulation -> slightly looser tolerance.
    assert jnp.allclose(out, ref, rtol=3e-2, atol=3e-2), \
        float(jnp.max(jnp.abs(out - ref)))

    print("KERNEL_OK")
</pallas_src>

<mosaic_0001>
module attributes {stable_mosaic.version = 11 : i64} {
  func.func @_ec_embedding_kernel(%arg0: i32, %arg1: memref<128x32xf32, #tpu.memory_space<vmem>>, %arg2: memref<128x1xf32, #tpu.memory_space<vmem>>, %arg3: memref<7x32x128xbf16, #tpu.memory_space<vmem>>, %arg4: memref<3x128x256xbf16, #tpu.memory_space<vmem>>, %arg5: memref<3x128x256xbf16, #tpu.memory_space<vmem>>, %arg6: memref<3x128x256xbf16, #tpu.memory_space<vmem>>, %arg7: memref<4x256xf32, #tpu.memory_space<vmem>>, %arg8: memref<16x128xf32, #tpu.memory_space<vmem>>) attributes {dimension_semantics = [#tpu.dimension_semantics<parallel>], iteration_bounds = array<i64: 2>, scalar_prefetch = 0 : i64, scratch_operands = 0 : i64, tpu.core_type = #tpu.core_type<tc>, window_params = [{transform_indices = @transform_0, window_bounds = array<i64: 128, 32>}, {transform_indices = @transform_1, window_bounds = array<i64: 128, 1>}, {pipeline_mode = #tpu.pipeline_mode<synchronous>, transform_indices = @transform_2, window_bounds = array<i64: 7, 32, 128>}, {pipeline_mode = #tpu.pipeline_mode<synchronous>, transform_indices = @transform_3, window_bounds = array<i64: 3, 128, 256>}, {pipeline_mode = #tpu.pipeline_mode<synchronous>, transform_indices = @transform_4, window_bounds = array<i64: 3, 128, 256>}, {pipeline_mode = #tpu.pipeline_mode<synchronous>, transform_indices = @transform_5, window_bounds = array<i64: 3, 128, 256>}, {pipeline_mode = #tpu.pipeline_mode<synchronous>, transform_indices = @transform_6, window_bounds = array<i64: 4, 256>}, {transform_indices = @transform_7, window_bounds = array<i64: 16, 128>}]} {
    %c0 = arith.constant 0 : index
    %c0_0 = arith.constant 0 : index
    %0 = vector.load %arg1[%c0, %c0_0] : memref<128x32xf32, #tpu.memory_space<vmem>>, vector<128x32xf32>
    %c0_1 = arith.constant 0 : index
    %c0_2 = arith.constant 0 : index
    %1 = vector.load %arg7[%c0_1, %c0_2] : memref<4x256xf32, #tpu.memory_space<vmem>>, vector<4x256xf32>
    %2 = tpu.iota {dimensions = array<i32: 0>} : vector<128x1xi32>
    %c8_i32 = arith.constant 8 : i32
    %c0_i32 = arith.constant 0 : i32
    %3 = arith.cmpi eq, %c8_i32, %c0_i32 : i32
    %c1_i32 = arith.constant 1 : i32
    %4 = arith.select %3, %c1_i32, %c8_i32 : i32
    %5 = vector.broadcast %4 : i32 to vector<128x1xi32>
    %6 = arith.remsi %2, %5 : vector<128x1xi32>
    %c0_i32_3 = arith.constant 0 : i32
    %7 = vector.broadcast %c0_i32_3 : i32 to vector<128x1xi32>
    %8 = arith.cmpi ne, %6, %7 : vector<128x1xi32>
    %c0_i32_4 = arith.constant 0 : i32
    %9 = vector.broadcast %c0_i32_4 : i32 to vector<128x1xi32>
    %10 = arith.cmpi slt, %6, %9 : vector<128x1xi32>
    %c0_i32_5 = arith.constant 0 : i32
    %11 = arith.cmpi slt, %4, %c0_i32_5 : i32
    %12 = vector.broadcast %11 : i1 to vector<128x1xi1>
    %13 = vector.broadcast %12 : vector<128x1xi1> to vector<128x1xi1>
    %14 = arith.xori %10, %13 : vector<128x1xi1>
    %15 = arith.andi %14, %8 : vector<128x1xi1>
    %16 = vector.broadcast %4 : i32 to vector<128x1xi32>
    %17 = arith.addi %6, %16 : vector<128x1xi32>
    %18 = arith.select %15, %17, %6 : vector<128x1xi1>, vector<128x1xi32>
    %19 = vector.extract_strided_slice %1 {offsets = [0, 0], sizes = [1, 128], strides = [1, 1]} : vector<4x256xf32> to vector<1x128xf32>
    %c6_i32 = arith.constant 6 : i32
    %20 = vector.broadcast %c6_i32 : i32 to vector<128x1xi32>
    %21 = arith.cmpi sge, %18, %20 : vector<128x1xi32>
    %c6_i32_6 = arith.constant 6 : i32
    %22 = tpu.dynamic_rotate %0 by %c6_i32_6 dim 0 : vector<128x32xf32>, i32 -> vector<128x32xf32>
    %cst = arith.constant 0.000000e+00 : f32
    %23 = vector.shape_cast %21 : vector<128x1xi1> to vector<128x1xi1>
    %24 = vector.broadcast %23 : vector<128x1xi1> to vector<128x32xi1>
    %25 = vector.broadcast %cst : f32 to vector<128x32xf32>
    %26 = arith.select %24, %22, %25 : vector<128x32xi1>, vector<128x32xf32>
    %27 = arith.truncf %26 : vector<128x32xf32> to vector<128x32xbf16>
    %c0_7 = arith.constant 0 : index
    %c0_8 = arith.constant 0 : index
    %c0_9 = arith.constant 0 : index
    %28 = vector.load %arg3[%c0_7, %c0_8, %c0_9] : memref<7x32x128xbf16, #tpu.memory_space<vmem>>, vector<1x32x128xbf16>
    %29 = vector.shape_cast %28 : vector<1x32x128xbf16> to vector<32x128xbf16>
    %cst_10 = arith.constant dense<0.000000e+00> : vector<128x128xf32>
    %30 = tpu.matmul %27, %29, %cst_10 {dimension_numbers = #tpu.dot_dimension_numbers<[1], [0], [0], [1], [0, 0, 1, 1], [], []>} : vector<128x32xbf16>, vector<32x128xbf16>, vector<128x128xf32> -> vector<128x128xf32>
    %c5_i32 = arith.constant 5 : i32
    %31 = vector.broadcast %c5_i32 : i32 to vector<128x1xi32>
    %32 = arith.cmpi sge, %18, %31 : vector<128x1xi32>
    %c5_i32_11 = arith.constant 5 : i32
    %33 = tpu.dynamic_rotate %0 by %c5_i32_11 dim 0 : vector<128x32xf32>, i32 -> vector<128x32xf32>
    %cst_12 = arith.constant 0.000000e+00 : f32
    %34 = vector.shape_cast %32 : vector<128x1xi1> to vector<128x1xi1>
    %35 = vector.broadcast %34 : vector<128x1xi1> to vector<128x32xi1>
    %36 = vector.broadcast %cst_12 : f32 to vector<128x32xf32>
    %37 = arith.select %35, %33, %36 : vector<128x32xi1>, vector<128x32xf32>
    %38 = arith.truncf %37 : vector<128x32xf32> to vector<128x32xbf16>
    %c1 = arith.constant 1 : index
    %c0_13 = arith.constant 0 : index
    %c0_14 = arith.constant 0 : index
    %39 = vector.load %arg3[%c1, %c0_13, %c0_14] : memref<7x32x128xbf16, #tpu.memory_space<vmem>>, vector<1x32x128xbf16>
    %40 = vector.shape_cast %39 : vector<1x32x128xbf16> to vector<32x128xbf16>
    %cst_15 = arith.constant dense<0.000000e+00> : vector<128x128xf32>
    %41 = tpu.matmul %38, %40, %cst_15 {dimension_numbers = #tpu.dot_dimension_numbers<[1], [0], [0], [1], [0, 0, 1, 1], [], []>} : vector<128x32xbf16>, vector<32x128xbf16>, vector<128x128xf32> -> vector<128x128xf32>
    %42 = arith.addf %30, %41 : vector<128x128xf32>
    %c4_i32 = arith.constant 4 : i32
    %43 = vector.broadcast %c4_i32 : i32 to vector<128x1xi32>
    %44 = arith.cmpi sge, %18, %43 : vector<128x1xi32>
    %c4_i32_16 = arith.constant 4 : i32
    %45 = tpu.dynamic_rotate %0 by %c4_i32_16 dim 0 : vector<128x32xf32>, i32 -> vector<128x32xf32>
    %cst_17 = arith.constant 0.000000e+00 : f32
    %46 = vector.shape_cast %44 : vector<128x1xi1> to vector<128x1xi1>
    %47 = vector.broadcast %46 : vector<128x1xi1> to vector<128x32xi1>
    %48 = vector.broadcast %cst_17 : f32 to vector<128x32xf32>
    %49 = arith.select %47, %45, %48 : vector<128x32xi1>, vector<128x32xf32>
    %50 = arith.truncf %49 : vector<128x32xf32> to vector<128x32xbf16>
    %c2 = arith.constant 2 : index
    %c0_18 = arith.constant 0 : index
    %c0_19 = arith.constant 0 : index
    %51 = vector.load %arg3[%c2, %c0_18, %c0_19] : memref<7x32x128xbf16, #tpu.memory_space<vmem>>, vector<1x32x128xbf16>
    %52 = vector.shape_cast %51 : vector<1x32x128xbf16> to vector<32x128xbf16>
    %cst_20 = arith.constant dense<0.000000e+00> : vector<128x128xf32>
    %53 = tpu.matmul %50, %52, %cst_20 {dimension_numbers = #tpu.dot_dimension_numbers<[1], [0], [0], [1], [0, 0, 1, 1], [], []>} : vector<128x32xbf16>, vector<32x128xbf16>, vector<128x128xf32> -> vector<128x128xf32>
    %54 = arith.addf %42, %53 : vector<128x128xf32>
    %c3_i32 = arith.constant 3 : i32
    %55 = vector.broadcast %c3_i32 : i32 to vector<128x1xi32>
    %56 = arith.cmpi sge, %18, %55 : vector<128x1xi32>
    %c3_i32_21 = arith.constant 3 : i32
    %57 = tpu.dynamic_rotate %0 by %c3_i32_21 dim 0 : vector<128x32xf32>, i32 -> vector<128x32xf32>
    %cst_22 = arith.constant 0.000000e+00 : f32
    %58 = vector.shape_cast %56 : vector<128x1xi1> to vector<128x1xi1>
    %59 = vector.broadcast %58 : vector<128x1xi1> to vector<128x32xi1>
    %60 = vector.broadcast %cst_22 : f32 to vector<128x32xf32>
    %61 = arith.select %59, %57, %60 : vector<128x32xi1>, vector<128x32xf32>
    %62 = arith.truncf %61 : vector<128x32xf32> to vector<128x32xbf16>
    %c3 = arith.constant 3 : index
    %c0_23 = arith.constant 0 : index
    %c0_24 = arith.constant 0 : index
    %63 = vector.load %arg3[%c3, %c0_23, %c0_24] : memref<7x32x128xbf16, #tpu.memory_space<vmem>>, vector<1x32x128xbf16>
    %64 = vector.shape_cast %63 : vector<1x32x128xbf16> to vector<32x128xbf16>
    %cst_25 = arith.constant dense<0.000000e+00> : vector<128x128xf32>
    %65 = tpu.matmul %62, %64, %cst_25 {dimension_numbers = #tpu.dot_dimension_numbers<[1], [0], [0], [1], [0, 0, 1, 1], [], []>} : vector<128x32xbf16>, vector<32x128xbf16>, vector<128x128xf32> -> vector<128x128xf32>
    %66 = arith.addf %54, %65 : vector<128x128xf32>
    %c2_i32 = arith.constant 2 : i32
    %67 = vector.broadcast %c2_i32 : i32 to vector<128x1xi32>
    %68 = arith.cmpi sge, %18, %67 : vector<128x1xi32>
    %c2_i32_26 = arith.constant 2 : i32
    %69 = tpu.dynamic_rotate %0 by %c2_i32_26 dim 0 : vector<128x32xf32>, i32 -> vector<128x32xf32>
    %cst_27 = arith.constant 0.000000e+00 : f32
    %70 = vector.shape_cast %68 : vector<128x1xi1> to vector<128x1xi1>
    %71 = vector.broadcast %70 : vector<128x1xi1> to vector<128x32xi1>
    %72 = vector.broadcast %cst_27 : f32 to vector<128x32xf32>
    %73 = arith.select %71, %69, %72 : vector<128x32xi1>, vector<128x32xf32>
    %74 = arith.truncf %73 : vector<128x32xf32> to vector<128x32xbf16>
    %c4 = arith.constant 4 : index
    %c0_28 = arith.constant 0 : index
    %c0_29 = arith.constant 0 : index
    %75 = vector.load %arg3[%c4, %c0_28, %c0_29] : memref<7x32x128xbf16, #tpu.memory_space<vmem>>, vector<1x32x128xbf16>
    %76 = vector.shape_cast %75 : vector<1x32x128xbf16> to vector<32x128xbf16>
    %cst_30 = arith.constant dense<0.000000e+00> : vector<128x128xf32>
    %77 = tpu.matmul %74, %76, %cst_30 {dimension_numbers = #tpu.dot_dimension_numbers<[1], [0], [0], [1], [0, 0, 1, 1], [], []>} : vector<128x32xbf16>, vector<32x128xbf16>, vector<128x128xf32> -> vector<128x128xf32>
    %78 = arith.addf %66, %77 : vector<128x128xf32>
    %c1_i32_31 = arith.constant 1 : i32
    %79 = vector.broadcast %c1_i32_31 : i32 to vector<128x1xi32>
    %80 = arith.cmpi sge, %18, %79 : vector<128x1xi32>
    %c1_i32_32 = arith.constant 1 : i32
    %81 = tpu.dynamic_rotate %0 by %c1_i32_32 dim 0 : vector<128x32xf32>, i32 -> vector<128x32xf32>
    %cst_33 = arith.constant 0.000000e+00 : f32
    %82 = vector.shape_cast %80 : vector<128x1xi1> to vector<128x1xi1>
    %83 = vector.broadcast %82 : vector<128x1xi1> to vector<128x32xi1>
    %84 = vector.broadcast %cst_33 : f32 to vector<128x32xf32>
    %85 = arith.select %83, %81, %84 : vector<128x32xi1>, vector<128x32xf32>
    %86 = arith.truncf %85 : vector<128x32xf32> to vector<128x32xbf16>
    %c5 = arith.constant 5 : index
    %c0_34 = arith.constant 0 : index
    %c0_35 = arith.constant 0 : index
    %87 = vector.load %arg3[%c5, %c0_34, %c0_35] : memref<7x32x128xbf16, #tpu.memory_space<vmem>>, vector<1x32x128xbf16>
    %88 = vector.shape_cast %87 : vector<1x32x128xbf16> to vector<32x128xbf16>
    %cst_36 = arith.constant dense<0.000000e+00> : vector<128x128xf32>
    %89 = tpu.matmul %86, %88, %cst_36 {dimension_numbers = #tpu.dot_dimension_numbers<[1], [0], [0], [1], [0, 0, 1, 1], [], []>} : vector<128x32xbf16>, vector<32x128xbf16>, vector<128x128xf32> -> vector<128x128xf32>
    %90 = arith.addf %78, %89 : vector<128x128xf32>
    %91 = arith.truncf %0 : vector<128x32xf32> to vector<128x32xbf16>
    %c6 = arith.constant 6 : index
    %c0_37 = arith.constant 0 : index
    %c0_38 = arith.constant 0 : index
    %92 = vector.load %arg3[%c6, %c0_37, %c0_38] : memref<7x32x128xbf16, #tpu.memory_space<vmem>>, vector<1x32x128xbf16>
    %93 = vector.shape_cast %92 : vector<1x32x128xbf16> to vector<32x128xbf16>
    %cst_39 = arith.constant dense<0.000000e+00> : vector<128x128xf32>
    %94 = tpu.matmul %91, %93, %cst_39 {dimension_numbers = #tpu.dot_dimension_numbers<[1], [0], [0], [1], [0, 0, 1, 1], [], []>} : vector<128x32xbf16>, vector<32x128xbf16>, vector<128x128xf32> -> vector<128x128xf32>
    %95 = arith.addf %90, %94 : vector<128x128xf32>
    %96 = vector.broadcast %19 : vector<1x128xf32> to vector<128x128xf32>
    %97 = arith.addf %95, %96 : vector<128x128xf32>
    %98 = vector.extract_strided_slice %1 {offsets = [1, 0], sizes = [1, 256], strides = [1, 1]} : vector<4x256xf32> to vector<1x256xf32>
    %c2_i32_40 = arith.constant 2 : i32
    %99 = vector.broadcast %c2_i32_40 : i32 to vector<128x1xi32>
    %100 = arith.cmpi sge, %18, %99 : vector<128x1xi32>
    %c2_i32_41 = arith.constant 2 : i32
    %101 = tpu.dynamic_rotate %97 by %c2_i32_41 dim 0 : vector<128x128xf32>, i32 -> vector<128x128xf32>
    %cst_42 = arith.constant 0.000000e+00 : f32
    %102 = vector.shape_cast %100 : vector<128x1xi1> to vector<128x1xi1>
    %103 = vector.broadcast %102 : vector<128x1xi1> to vector<128x128xi1>
    %104 = vector.broadcast %cst_42 : f32 to vector<128x128xf32>
    %105 = arith.select %103, %101, %104 : vector<128x128xi1>, vector<128x128xf32>
    %106 = arith.truncf %105 : vector<128x128xf32> to vector<128x128xbf16>
    %c0_43 = arith.constant 0 : index
    %c0_44 = arith.constant 0 : index
    %c0_45 = arith.constant 0 : index
    %107 = vector.load %arg4[%c0_43, %c0_44, %c0_45] : memref<3x128x256xbf16, #tpu.memory_space<vmem>>, vector<1x128x256xbf16>
    %108 = vector.shape_cast %107 : vector<1x128x256xbf16> to vector<128x256xbf16>
    %cst_46 = arith.constant dense<0.000000e+00> : vector<128x256xf32>
    %109 = tpu.matmul %106, %108, %cst_46 {dimension_numbers = #tpu.dot_dimension_numbers<[1], [0], [0], [1], [0, 0, 1, 1], [], []>} : vector<128x128xbf16>, vector<128x256xbf16>, vector<128x256xf32> -> vector<128x256xf32>
    %c1_i32_47 = arith.constant 1 : i32
    %110 = vector.broadcast %c1_i32_47 : i32 to vector<128x1xi32>
    %111 = arith.cmpi sge, %18, %110 : vector<128x1xi32>
    %c1_i32_48 = arith.constant 1 : i32
    %112 = tpu.dynamic_rotate %97 by %c1_i32_48 dim 0 : vector<128x128xf32>, i32 -> vector<128x128xf32>
    %cst_49 = arith.constant 0.000000e+00 : f32
    %113 = vector.shape_cast %111 : vector<128x1xi1> to vector<128x1xi1>
    %114 = vector.broadcast %113 : vector<128x1xi1> to vector<128x128xi1>
    %115 = vector.broadcast %cst_49 : f32 to vector<128x128xf32>
    %116 = arith.select %114, %112, %115 : vector<128x128xi1>, vector<128x128xf32>
    %117 = arith.truncf %116 : vector<128x128xf32> to vector<128x128xbf16>
    %c1_50 = arith.constant 1 : index
    %c0_51 = arith.constant 0 : index
    %c0_52 = arith.constant 0 : index
    %118 = vector.load %arg4[%c1_50, %c0_51, %c0_52] : memref<3x128x256xbf16, #tpu.memory_space<vmem>>, vector<1x128x256xbf16>
    %119 = vector.shape_cast %118 : vector<1x128x256xbf16> to vector<128x256xbf16>
    %cst_53 = arith.constant dense<0.000000e+00> : vector<128x256xf32>
    %120 = tpu.matmul %117, %119, %cst_53 {dimension_numbers = #tpu.dot_dimension_numbers<[1], [0], [0], [1], [0, 0, 1, 1], [], []>} : vector<128x128xbf16>, vector<128x256xbf16>, vector<128x256xf32> -> vector<128x256xf32>
    %121 = arith.addf %109, %120 : vector<128x256xf32>
    %122 = arith.truncf %97 : vector<128x128xf32> to vector<128x128xbf16>
    %c2_54 = arith.constant 2 : index
    %c0_55 = arith.constant 0 : index
    %c0_56 = arith.constant 0 : index
    %123 = vector.load %arg4[%c2_54, %c0_55, %c0_56] : memref<3x128x256xbf16, #tpu.memory_space<vmem>>, vector<1x128x256xbf16>
    %124 = vector.shape_cast %123 : vector<1x128x256xbf16> to vector<128x256xbf16>
    %cst_57 = arith.constant dense<0.000000e+00> : vector<128x256xf32>
    %125 = tpu.matmul %122, %124, %cst_57 {dimension_numbers = #tpu.dot_dimension_numbers<[1], [0], [0], [1], [0, 0, 1, 1], [], []>} : vector<128x128xbf16>, vector<128x256xbf16>, vector<128x256xf32> -> vector<128x256xf32>
    %126 = arith.addf %121, %125 : vector<128x256xf32>
    %127 = vector.broadcast %98 : vector<1x256xf32> to vector<128x256xf32>
    %128 = arith.addf %126, %127 : vector<128x256xf32>
    %129 = vector.extract_strided_slice %128 {offsets = [0, 0], sizes = [128, 128], strides = [1, 1]} : vector<128x256xf32> to vector<128x128xf32>
    %130 = arith.negf %129 : vector<128x128xf32>
    %131 = math.exp %130 : vector<128x128xf32>
    %cst_58 = arith.constant 1.000000e+00 : f32
    %132 = vector.broadcast %cst_58 : f32 to vector<128x128xf32>
    %133 = arith.addf %132, %131 : vector<128x128xf32>
    %134 = arith.divf %132, %133 : vector<128x128xf32>
    %135 = vector.extract_strided_slice %128 {offsets = [0, 128], sizes = [128, 128], strides = [1, 1]} : vector<128x256xf32> to vector<128x128xf32>
    %136 = arith.mulf %134, %135 : vector<128x128xf32>
    %cst_59 = arith.constant 1.000000e+00 : f32
    %137 = vector.broadcast %cst_59 : f32 to vector<128x128xf32>
    %138 = arith.subf %137, %134 : vector<128x128xf32>
    %139 = arith.mulf %138, %97 : vector<128x128xf32>
    %140 = arith.addf %136, %139 : vector<128x128xf32>
    %cst_60 = arith.constant 0.000000e+00 : f32
    %141 = vector.broadcast %cst_60 : f32 to vector<128x128xf32>
    %142 = arith.maximumf %140, %141 : vector<128x128xf32>
    %143 = vector.extract_strided_slice %1 {offsets = [2, 0], sizes = [1, 256], strides = [1, 1]} : vector<4x256xf32> to vector<1x256xf32>
    %c2_i32_61 = arith.constant 2 : i32
    %144 = vector.broadcast %c2_i32_61 : i32 to vector<128x1xi32>
    %145 = arith.cmpi sge, %18, %144 : vector<128x1xi32>
    %c2_i32_62 = arith.constant 2 : i32
    %146 = tpu.dynamic_rotate %142 by %c2_i32_62 dim 0 : vector<128x128xf32>, i32 -> vector<128x128xf32>
    %cst_63 = arith.constant 0.000000e+00 : f32
    %147 = vector.shape_cast %145 : vector<128x1xi1> to vector<128x1xi1>
    %148 = vector.broadcast %147 : vector<128x1xi1> to vector<128x128xi1>
    %149 = vector.broadcast %cst_63 : f32 to vector<128x128xf32>
    %150 = arith.select %148, %146, %149 : vector<128x128xi1>, vector<128x128xf32>
    %151 = arith.truncf %150 : vector<128x128xf32> to vector<128x128xbf16>
    %c0_64 = arith.constant 0 : index
    %c0_65 = arith.constant 0 : index
    %c0_66 = arith.constant 0 : index
    %152 = vector.load %arg5[%c0_64, %c0_65, %c0_66] : memref<3x128x256xbf16, #tpu.memory_space<vmem>>, vector<1x128x256xbf16>
    %153 = vector.shape_cast %152 : vector<1x128x256xbf16> to vector<128x256xbf16>
    %cst_67 = arith.constant dense<0.000000e+00> : vector<128x256xf32>
    %154 = tpu.matmul %151, %153, %cst_67 {dimension_numbers = #tpu.dot_dimension_numbers<[1], [0], [0], [1], [0, 0, 1, 1], [], []>} : vector<128x128xbf16>, vector<128x256xbf16>, vector<128x256xf32> -> vector<128x256xf32>
    %c1_i32_68 = arith.constant 1 : i32
    %155 = vector.broadcast %c1_i32_68 : i32 to vector<128x1xi32>
    %156 = arith.cmpi sge, %18, %155 : vector<128x1xi32>
    %c1_i32_69 = arith.constant 1 : i32
    %157 = tpu.dynamic_rotate %142 by %c1_i32_69 dim 0 : vector<128x128xf32>, i32 -> vector<128x128xf32>
    %cst_70 = arith.constant 0.000000e+00 : f32
    %158 = vector.shape_cast %156 : vector<128x1xi1> to vector<128x1xi1>
    %159 = vector.broadcast %158 : vector<128x1xi1> to vector<128x128xi1>
    %160 = vector.broadcast %cst_70 : f32 to vector<128x128xf32>
    %161 = arith.select %159, %157, %160 : vector<128x128xi1>, vector<128x128xf32>
    %162 = arith.truncf %161 : vector<128x128xf32> to vector<128x128xbf16>
    %c1_71 = arith.constant 1 : index
    %c0_72 = arith.constant 0 : index
    %c0_73 = arith.constant 0 : index
    %163 = vector.load %arg5[%c1_71, %c0_72, %c0_73] : memref<3x128x256xbf16, #tpu.memory_space<vmem>>, vector<1x128x256xbf16>
    %164 = vector.shape_cast %163 : vector<1x128x256xbf16> to vector<128x256xbf16>
    %cst_74 = arith.constant dense<0.000000e+00> : vector<128x256xf32>
    %165 = tpu.matmul %162, %164, %cst_74 {dimension_numbers = #tpu.dot_dimension_numbers<[1], [0], [0], [1], [0, 0, 1, 1], [], []>} : vector<128x128xbf16>, vector<128x256xbf16>, vector<128x256xf32> -> vector<128x256xf32>
    %166 = arith.addf %154, %165 : vector<128x256xf32>
    %167 = arith.truncf %142 : vector<128x128xf32> to vector<128x128xbf16>
    %c2_75 = arith.constant 2 : index
    %c0_76 = arith.constant 0 : index
    %c0_77 = arith.constant 0 : index
    %168 = vector.load %arg5[%c2_75, %c0_76, %c0_77] : memref<3x128x256xbf16, #tpu.memory_space<vmem>>, vector<1x128x256xbf16>
    %169 = vector.shape_cast %168 : vector<1x128x256xbf16> to vector<128x256xbf16>
    %cst_78 = arith.constant dense<0.000000e+00> : vector<128x256xf32>
    %170 = tpu.matmul %167, %169, %cst_78 {dimension_numbers = #tpu.dot_dimension_numbers<[1], [0], [0], [1], [0, 0, 1, 1], [], []>} : vector<128x128xbf16>, vector<128x256xbf16>, vector<128x256xf32> -> vector<128x256xf32>
    %171 = arith.addf %166, %170 : vector<128x256xf32>
    %172 = vector.broadcast %143 : vector<1x256xf32> to vector<128x256xf32>
    %173 = arith.addf %171, %172 : vector<128x256xf32>
    %174 = vector.extract_strided_slice %173 {offsets = [0, 0], sizes = [128, 128], strides = [1, 1]} : vector<128x256xf32> to vector<128x128xf32>
    %175 = arith.negf %174 : vector<128x128xf32>
    %176 = math.exp %175 : vector<128x128xf32>
    %cst_79 = arith.constant 1.000000e+00 : f32
    %177 = vector.broadcast %cst_79 : f32 to vector<128x128xf32>
    %178 = arith.addf %177, %176 : vector<128x128xf32>
    %179 = arith.divf %177, %178 : vector<128x128xf32>
    %180 = vector.extract_strided_slice %173 {offsets = [0, 128], sizes = [128, 128], strides = [1, 1]} : vector<128x256xf32> to vector<128x128xf32>
    %181 = arith.mulf %179, %180 : vector<128x128xf32>
    %cst_80 = arith.constant 1.000000e+00 : f32
    %182 = vector.broadcast %cst_80 : f32 to vector<128x128xf32>
    %183 = arith.subf %182, %179 : vector<128x128xf32>
    %184 = arith.mulf %183, %142 : vector<128x128xf32>
    %185 = arith.addf %181, %184 : vector<128x128xf32>
    %cst_81 = arith.constant 0.000000e+00 : f32
    %186 = vector.broadcast %cst_81 : f32 to vector<128x128xf32>
    %187 = arith.maximumf %185, %186 : vector<128x128xf32>
    %188 = vector.extract_strided_slice %1 {offsets = [3, 0], sizes = [1, 256], strides = [1, 1]} : vector<4x256xf32> to vector<1x256xf32>
    %c2_i32_82 = arith.constant 2 : i32
    %189 = vector.broadcast %c2_i32_82 : i32 to vector<128x1xi32>
    %190 = arith.cmpi sge, %18, %189 : vector<128x1xi32>
    %c2_i32_83 = arith.constant 2 : i32
    %191 = tpu.dynamic_rotate %187 by %c2_i32_83 dim 0 : vector<128x128xf32>, i32 -> vector<128x128xf32>
    %cst_84 = arith.constant 0.000000e+00 : f32
    %192 = vector.shape_cast %190 : vector<128x1xi1> to vector<128x1xi1>
    %193 = vector.broadcast %192 : vector<128x1xi1> to vector<128x128xi1>
    %194 = vector.broadcast %cst_84 : f32 to vector<128x128xf32>
    %195 = arith.select %193, %191, %194 : vector<128x128xi1>, vector<128x128xf32>
    %196 = arith.truncf %195 : vector<128x128xf32> to vector<128x128xbf16>
    %c0_85 = arith.constant 0 : index
    %c0_86 = arith.constant 0 : index
    %c0_87 = arith.constant 0 : index
    %197 = vector.load %arg6[%c0_85, %c0_86, %c0_87] : memref<3x128x256xbf16, #tpu.memory_space<vmem>>, vector<1x128x256xbf16>
    %198 = vector.shape_cast %197 : vector<1x128x256xbf16> to vector<128x256xbf16>
    %cst_88 = arith.constant dense<0.000000e+00> : vector<128x256xf32>
    %199 = tpu.matmul %196, %198, %cst_88 {dimension_numbers = #tpu.dot_dimension_numbers<[1], [0], [0], [1], [0, 0, 1, 1], [], []>} : vector<128x128xbf16>, vector<128x256xbf16>, vector<128x256xf32> -> vector<128x256xf32>
    %c1_i32_89 = arith.constant 1 : i32
    %200 = vector.broadcast %c1_i32_89 : i32 to vector<128x1xi32>
    %201 = arith.cmpi sge, %18, %200 : vector<128x1xi32>
    %c1_i32_90 = arith.constant 1 : i32
    %202 = tpu.dynamic_rotate %187 by %c1_i32_90 dim 0 : vector<128x128xf32>, i32 -> vector<128x128xf32>
    %cst_91 = arith.constant 0.000000e+00 : f32
    %203 = vector.shape_cast %201 : vector<128x1xi1> to vector<128x1xi1>
    %204 = vector.broadcast %203 : vector<128x1xi1> to vector<128x128xi1>
    %205 = vector.broadcast %cst_91 : f32 to vector<128x128xf32>
    %206 = arith.select %204, %202, %205 : vector<128x128xi1>, vector<128x128xf32>
    %207 = arith.truncf %206 : vector<128x128xf32> to vector<128x128xbf16>
    %c1_92 = arith.constant 1 : index
    %c0_93 = arith.constant 0 : index
    %c0_94 = arith.constant 0 : index
    %208 = vector.load %arg6[%c1_92, %c0_93, %c0_94] : memref<3x128x256xbf16, #tpu.memory_space<vmem>>, vector<1x128x256xbf16>
    %209 = vector.shape_cast %208 : vector<1x128x256xbf16> to vector<128x256xbf16>
    %cst_95 = arith.constant dense<0.000000e+00> : vector<128x256xf32>
    %210 = tpu.matmul %207, %209, %cst_95 {dimension_numbers = #tpu.dot_dimension_numbers<[1], [0], [0], [1], [0, 0, 1, 1], [], []>} : vector<128x128xbf16>, vector<128x256xbf16>, vector<128x256xf32> -> vector<128x256xf32>
    %211 = arith.addf %199, %210 : vector<128x256xf32>
    %212 = arith.truncf %187 : vector<128x128xf32> to vector<128x128xbf16>
    %c2_96 = arith.constant 2 : index
    %c0_97 = arith.constant 0 : index
    %c0_98 = arith.constant 0 : index
    %213 = vector.load %arg6[%c2_96, %c0_97, %c0_98] : memref<3x128x256xbf16, #tpu.memory_space<vmem>>, vector<1x128x256xbf16>
    %214 = vector.shape_cast %213 : vector<1x128x256xbf16> to vector<128x256xbf16>
    %cst_99 = arith.constant dense<0.000000e+00> : vector<128x256xf32>
    %215 = tpu.matmul %212, %214, %cst_99 {dimension_numbers = #tpu.dot_dimension_numbers<[1], [0], [0], [1], [0, 0, 1, 1], [], []>} : vector<128x128xbf16>, vector<128x256xbf16>, vector<128x256xf32> -> vector<128x256xf32>
    %216 = arith.addf %211, %215 : vector<128x256xf32>
    %217 = vector.broadcast %188 : vector<1x256xf32> to vector<128x256xf32>
    %218 = arith.addf %216, %217 : vector<128x256xf32>
    %219 = vector.extract_strided_slice %218 {offsets = [0, 0], sizes = [128, 128], strides = [1, 1]} : vector<128x256xf32> to vector<128x128xf32>
    %220 = arith.negf %219 : vector<128x128xf32>
    %221 = math.exp %220 : vector<128x128xf32>
    %cst_100 = arith.constant 1.000000e+00 : f32
    %222 = vector.broadcast %cst_100 : f32 to vector<128x128xf32>
    %223 = arith.addf %222, %221 : vector<128x128xf32>
    %224 = arith.divf %222, %223 : vector<128x128xf32>
    %225 = vector.extract_strided_slice %218 {offsets = [0, 128], sizes = [128, 128], strides = [1, 1]} : vector<128x256xf32> to vector<128x128xf32>
    %226 = arith.mulf %224, %225 : vector<128x128xf32>
    %cst_101 = arith.constant 1.000000e+00 : f32
    %227 = vector.broadcast %cst_101 : f32 to vector<128x128xf32>
    %228 = arith.subf %227, %224 : vector<128x128xf32>
    %229 = arith.mulf %228, %187 : vector<128x128xf32>
    %230 = arith.addf %226, %229 : vector<128x128xf32>
    %cst_102 = arith.constant 0.000000e+00 : f32
    %231 = vector.broadcast %cst_102 : f32 to vector<128x128xf32>
    %232 = arith.maximumf %230, %231 : vector<128x128xf32>
    %c0_103 = arith.constant 0 : index
    %c0_104 = arith.constant 0 : index
    %233 = vector.load %arg2[%c0_103, %c0_104] : memref<128x1xf32, #tpu.memory_space<vmem>>, vector<128x1xf32>
    %234 = vector.broadcast %233 : vector<128x1xf32> to vector<128x128xf32>
    %235 = arith.mulf %232, %234 : vector<128x128xf32>
    %236 = vector.shape_cast %235 : vector<128x128xf32> to vector<16x8x128xf32>
    %cst_105 = arith.constant dense<0xFF800000> : vector<16x128xf32>
    %237 = vector.multi_reduction <maximumf>, %236, %cst_105 [1] : vector<16x8x128xf32> to vector<16x128xf32>
    %c0_106 = arith.constant 0 : index
    %c0_107 = arith.constant 0 : index
    %238 = vector.load %arg8[%c0_106, %c0_107] : memref<16x128xf32, #tpu.memory_space<vmem>>, vector<16x128xf32>
    tpu.vector_store %arg8[%c0_106, %c0_107], %237 {strides = array<i32>} : memref<16x128xf32, #tpu.memory_space<vmem>>, vector<16x128xf32>,
    return
  }
  func.func @transform_0(%arg0: i32) -> (i32, i32) {
    %c0_i32 = arith.constant 0 : i32
    %c0_i32_0 = arith.constant 0 : i32
    return %arg0, %c0_i32 : i32, i32
  }
  func.func @transform_1(%arg0: i32) -> (i32, i32) {
    %c0_i32 = arith.constant 0 : i32
    %c0_i32_0 = arith.constant 0 : i32
    return %arg0, %c0_i32 : i32, i32
  }
  func.func @transform_2(%arg0: i32) -> (i32, i32, i32) {
    %c0_i32 = arith.constant 0 : i32
    %c0_i32_0 = arith.constant 0 : i32
    %c0_i32_1 = arith.constant 0 : i32
    %c0_i32_2 = arith.constant 0 : i32
    return %c0_i32, %c0_i32_0, %c0_i32_1 : i32, i32, i32
  }
  func.func @transform_3(%arg0: i32) -> (i32, i32, i32) {
    %c0_i32 = arith.constant 0 : i32
    %c0_i32_0 = arith.constant 0 : i32
    %c0_i32_1 = arith.constant 0 : i32
    %c0_i32_2 = arith.constant 0 : i32
    return %c0_i32, %c0_i32_0, %c0_i32_1 : i32, i32, i32
  }
  func.func @transform_4(%arg0: i32) -> (i32, i32, i32) {
    %c0_i32 = arith.constant 0 : i32
    %c0_i32_0 = arith.constant 0 : i32
    %c0_i32_1 = arith.constant 0 : i32
    %c0_i32_2 = arith.constant 0 : i32
    return %c0_i32, %c0_i32_0, %c0_i32_1 : i32, i32, i32
  }
  func.func @transform_5(%arg0: i32) -> (i32, i32, i32) {
    %c0_i32 = arith.constant 0 : i32
    %c0_i32_0 = arith.constant 0 : i32
    %c0_i32_1 = arith.constant 0 : i32
    %c0_i32_2 = arith.constant 0 : i32
    return %c0_i32, %c0_i32_0, %c0_i32_1 : i32, i32, i32
  }
  func.func @transform_6(%arg0: i32) -> (i32, i32) {
    %c0_i32 = arith.constant 0 : i32
    %c0_i32_0 = arith.constant 0 : i32
    %c0_i32_1 = arith.constant 0 : i32
    return %c0_i32, %c0_i32_0 : i32, i32
  }
  func.func @transform_7(%arg0: i32) -> (i32, i32) {
    %c0_i32 = arith.constant 0 : i32
    %c0_i32_0 = arith.constant 0 : i32
    return %arg0, %c0_i32 : i32, i32
  }
}

</mosaic_0001>

<bundles_post_ra>
// kernel: tpu_custom_call.1
= control target key start
LH: loop header
LB: loop body
LE: loop exit
PB: predicated region body
PF: predicated region fallthrough
CT: control target
= control target key end

     0   :  { %12 = vsyncpa [#allocation3], 0  ;;  %s10991_s0 = inlined_call_operand.vmem [shape: f32[256,32], index: 0, kind: input, shape index: {}]   ;;  %s10992_s1 = inlined_call_operand.vmem [shape: f32[256,1], index: 1, kind: input, shape index: {}]   ;;  %s10993_s2 = inlined_call_operand.vmem [shape: bf16[7,32,128], index: 2, kind: input, shape index: {}]   ;;  %s10994_s3 = inlined_call_operand.vmem [shape: bf16[3,128,256], index: 3, kind: input, shape index: {}]   ;;  %s10995_s4 = inlined_call_operand.hbm [shape: bf16[3,128,256], index: 4, kind: input, shape index: {}]   ;;  %s10996_s5 = inlined_call_operand.hbm [shape: bf16[3,128,256], index: 5, kind: input, shape index: {}]   ;;  %s10997_s6 = inlined_call_operand.vmem [shape: f32[4,256], index: 6, kind: input, shape index: {}]   ;;  %s10998_s7 = inlined_call_operand.hbm [shape: f32[32,128], index: 7, kind: output, shape index: {}]  }
   0x1   :  { %13 = vsyncpa [#allocation6], 0 }
   0x2   :  { %14 = vsyncpa [#allocation4], 0 }
   0x3   :  { %16 = vsyncpa [#allocation4 + $0x1], 0  ;;  %s7481_s24 = smov 0   ;;  %s7483_s25 = smov 0  }
   0x4   :  { %s7485_s26 = smov 0   ;;  %s7487_s27 = smov 0  }
   0x5 LB: > { %s7502_s28 = sadd.s32 4294967295, %s7432_s27   ;;  %s5764_s29 = sadd.s32 4294967294, %s7432_s27   ;;  %s7432_s27 = sphi %s7487_s27, %s11527_s27   ;;  %s7428_s26 = sphi %s7485_s26, %s11526_s26   ;;  %s7424_s25 = sphi %s7483_s25, %s11525_s25   ;;  %s7420_s24 = sphi %s7481_s24, %s11524_s24  }
   0x6   : > { %s7506_s30 = sadd.s32 1, %s7432_s27   ;;  %s186_s8 = sadd.s32 1, %s7428_s26 }
   0x7   : > { %s183_s9 = ssub.s32 %s7432_s27, %s7506_s30  ;;  %p196_p0 = scmp.ne.s32.totalorder %s7428_s26, %s7424_s25 }
   0x8   : > { %p184_p1 = scmp.eq.s32.totalorder %s183_s9, 0  ;;  %p197_p2 = scmp.eq.s32.totalorder %s7502_s28, 1 }
   0x9   : > { %p202_p3 = scmp.ne.s32.totalorder %s7424_s25, %s7420_s24  ;;  %p203_p4 = scmp.eq.s32.totalorder %s5764_s29, 1 }
   0xa   : > { %s7517_s10 = scalar_select %p184_p1, %s7428_s26, %s186_s8  }
   0xb   : > { %p7519_p5 = por %p197_p2, %p196_p0  ;;  %p7523_p6 = por %p203_p4, %p202_p3 }
   0xc   : > { %p5765_p7 = scmp.ge.s32.totalorder %s7432_s27, 1  ;;  %p210_p8 = scmp.lt.s32.totalorder %s7432_s27, 3 }
   0xd   : > { %p7048_p9 = scmp.eq.s32.totalorder %s7502_s28, 0  ;;  %s227_s16 = sshll.u32 %s10995_s4, 4  ;;  %s228_s16 = int_to_ptr.hbm [resolvable:$true] %s227_s16 }
   0xe   : > { %p7530_p10 = pnand %p5765_p7, %p210_p8  ;;  %s7434_s17 = smov [#allocation2]  }
   0xf   : > { %s229_s18 = sshll.u32 %s7434_s17, 4  ;;  %s241_s21 = sshll.u32 %s10996_s5, 4  ;;  %s230_s18 = int_to_ptr.vmem [resolvable:$true] %s229_s18  ;;  %s242_s21 = int_to_ptr.hbm [resolvable:$true] %s241_s21 }
  0x10   : > { %p7037_p11 = pneg %p7530_p10  ;;  %s7435_s22 = smov 128  }
  0x11   : > { %s7436_s23 = smov 8   ;;  %s7437_s29 = smov [#allocation5]  }
  0x12   : > { %p7038_p12 = pnand %p7048_p9, %p7037_p11  ;;  %s243_s8 = sshll.u32 %s7437_s29, 4  ;;  %s244_s8 = int_to_ptr.vmem [resolvable:$true] %s243_s8 }
  0x13   : > { %280 = sbr.rel (%p7530_p10) target bundleno = 1751 (0x6d7), region = 48 }
  0x14   : > { %7040 = dma.hbm_to_vmem [thread:$0]  (!%p7038_p12), %s228_s16, 6144, %s230_s18, [#allocation3], %s7435_s22, %s7435_s22, %s7436_s23  }
  0x15   : > { %7043 = dma.hbm_to_vmem [thread:$0]  (!%p7038_p12), %s242_s21, 6144, %s244_s8, [#allocation6], %s7435_s22, %s7435_s22, %s7436_s23  }
  0x18   : > { %7407 = dma.done.wait (%p7048_p9), [#allocation3], 6144  }
  0x19   : > { %7409 = vsyncadd (%p7048_p9), [#allocation3], 4294961152 }
  0x1a   : > { %7411 = dma.done.wait (%p7048_p9), [#allocation6], 6144  }
  0x1b   : > { %7413 = vsyncadd (%p7048_p9), [#allocation6], 4294961152  ;;  %s7555_s9 = sshll.u32 %s7502_s28, 4  ;;  %v354_v0 = vlaneseq  ;;  %vm11008_vm0 = vcmask 261120   ;;  %v6865_v10 = vld [vmem:[%s10993_s2 + $0x18] sm:$0xff]  ;;  %v6864_v11 = vld [vmem:[%s10993_s2 + $0x10] sm:$0xff] }
  0x1c   : > { %p324_p13 = scmp.lt.s32.totalorder %s7555_s9, 31  ;;  %7021 = vmatpush.bf16.msra.mxu1 %v6865_v10  ;;  %7022 = vmatpush.bf16.msra.mxu2 %v6865_v10  ;;  %v6867_v28 = vld [vmem:[%s10993_s2 + $0x28] sm:$0xff]  ;;  %v6866_v50 = vld [vmem:[%s10993_s2 + $0x20] sm:$0xff]  ;;  %v6869_v51 = vld [vmem:[%s10993_s2 + $0x38] sm:$0xff]  ;;  %s320_s18 = sand.u32 1, %s7424_s25  }
  0x1d   : > { %v7558_v1 = vshrl.u32 %v354_v0, 7  ;;  %7023 = vmatpush.bf16.msra.mxu3 %v6865_v10  ;;  %825 = vmatpush.bf16.msra.mxu0 %v6865_v10  ;;  %v6863_v35 = vld [vmem:[%s10993_s2 + $0x8] sm:$0xff]  ;;  %v6862_v56 = vld [vmem:[%s10993_s2] sm:$0xff]  ;;  %s5772_s19 = sshll.u32 %s320_s18, 4  ;;  %s5664_s23 = scalar_lea.hbm %s10998_s7, %s7555_s9 }
  0x1e   : > { %s7561_s13 = scalar_select %p324_p13, %s7555_s9, 31  ;;  %v6875_v62 = vld [vmem:[%s10993_s2 + $0x68] sm:$0xff] }
  0x1f   : > { %11132 = vst [vmem:[#allocation11_spill] sm:$0xff] %v7558_v1  ;;  %v359_v2 = vadd.s32 32, %v7558_v1  ;;  %v360_v3 = vadd.s32 40, %v7558_v1  ;;  %v363_v4 = vadd.s32 64, %v7558_v1  ;;  %v364_v5 = vadd.s32 72, %v7558_v1  ;;  %s10899_s20 = scalar_lea.vmem [#allocation7], %s5772_s19 }
  0x20   : > { %s5774_s14 = sshll.u32 %s7561_s13, 3  ;;  %v367_v6 = vadd.s32 96, %v7558_v1  ;;  %vm704_vm1 = vcmp.lt.s32.totalorder %v7558_v1, 5  ;;  %v368_v9 = vadd.s32 104, %v7558_v1  ;;  %v356_v20 = vadd.s32 8, %v7558_v1  ;;  %7024 = vmatpush.bf16.msra.mxu1 %v6864_v11  ;;  %7025 = vmatpush.bf16.msra.mxu2 %v6864_v11  ;;  %s5665_s29 = sshll.u32 %s10899_s20, 4  ;;  %s5666_s29 = int_to_ptr.vmem [resolvable:$true] %s5665_s29 }
  0x21   : > { %s7574_s16 = scalar_lea.vmem %s10991_s0, %s5774_s14  ;;  %v7576_v7 = vand.u32 7, %v359_v2  ;;  %v7578_v8 = vand.u32 7, %v360_v3  ;;  %v7591_v13 = vand.u32 7, %v363_v4  ;;  %v7593_v14 = vand.u32 7, %v364_v5  ;;  %7026 = vmatpush.bf16.msra.mxu3 %v6864_v11  ;;  %826 = vmatpush.bf16.msra.mxu0 %v6864_v11  ;;  %v6868_v2 = vld [vmem:[%s10993_s2 + $0x30] sm:$0xff]  ;;  %s10397_s17 = scalar_lea.vmem %s10992_s1, %s5774_s14 }
  0x22   : > { %v7589_v12 = vld [vmem:[%s7574_s16 + $0x18] sm:$0xff]  ;;  %v7595_v15 = vand.u32 7, %v367_v6  ;;  %v7598_v16 = vld [vmem:[%s7574_s16 + $0x20] sm:$0xff]  ;;  %v7601_v17 = vld [vmem:[%s7574_s16 + $0x28] sm:$0xff]  ;;  %v7643_v34 = vand.u32 7, %v368_v9  ;;  %v7685_v52 = vand.u32 7, %v7558_v1 }
  0x23   : > { %11133 = vst [vmem:[#allocation12_spill] sm:$0xff] %v7591_v13  ;;  %vm676_vm2 = vcmp.ge.s32.totalorder %v7576_v7, 5  ;;  %v691_v18 = vrot.slane %v7589_v12, 3  ;;  %v7606_v19 = vld [vmem:[%s7574_s16 + $0x38] sm:$0xff]  ;;  %vm677_vm3 = vcmp.ge.s32.totalorder %v7578_v8, 5  ;;  %v692_v21 = vrot.slane %v7598_v16, 3 }
  0x24   : > { %11134 = vst [vmem:[#allocation13_spill] sm:$0xff] %v7593_v14  ;;  %v693_v22 = vrot.slane %v7601_v17, 3  ;;  %v7613_v23 = vld [vmem:[%s7574_s16 + $0x40] sm:$0xff]  ;;  %v7616_v24 = vld [vmem:[%s7574_s16 + $0x48] sm:$0xff]  ;;  %vm680_vm4 = vcmp.ge.s32.totalorder %v7591_v13, 5  ;;  %vm681_vm5 = vcmp.ge.s32.totalorder %v7593_v14, 5  ;;  %1105 = vmatpush.bf16.msrb.mxu2 %v6867_v28  ;;  %910 = vmatpush.bf16.msrb.mxu1 %v6863_v35 }
  0x25   : > { %11135 = vst [vmem:[#allocation14_spill] sm:$0xff] %v7595_v15  ;;  %v695_v25 = vrot.slane %v7606_v19, 3  ;;  %v696_v26 = vrot.slane %v7613_v23, 3  ;;  %v697_v27 = vrot.slane %v7616_v24, 3  ;;  %v7627_v29 = vld [vmem:[%s7574_s16 + $0x58] sm:$0xff]  ;;  %v716_v31 = vsel %vm704_vm1, %v691_v18, %v692_v21  ;;  %v7638_v32 = vld [vmem:[%s7574_s16 + $0x60] sm:$0xff]  ;;  %1316 = vmatpush.bf16.msrb.mxu3 %v6869_v51 }
  0x26   : > { %v715_v30 = vsel %vm704_vm1, %v692_v21, %v693_v22  ;;  %v7641_v33 = vld [vmem:[%s7574_s16 + $0x68] sm:$0xff]  ;;  %11136 = vst [vmem:[#allocation15_spill] sm:$0xff] %v7643_v34  ;;  %vm684_vm6 = vcmp.ge.s32.totalorder %v7595_v15, 5  ;;  %v757_v36 = vsel %vm676_vm2, %v716_v31, 0.0  ;;  %v7662_v40 = vld [vmem:[%s7574_s16] sm:$0xff]  ;;  %vm685_vm7 = vcmp.ge.s32.totalorder %v7643_v34, 5 }
  0x27   : > { %v758_v37 = vsel %vm677_vm3, %v715_v30, 0.0  ;;  %v711_v38 = vsel %vm704_vm1, %v696_v26, %v697_v27  ;;  %v712_v39 = vsel %vm704_vm1, %v695_v25, %v696_v26  ;;  %v7665_v41 = vld [vmem:[%s7574_s16 + $0x8] sm:$0xff]  ;;  %v7673_v45 = vld [vmem:[%s7574_s16 + $0x78] sm:$0xff]  ;;  %v699_v47 = vrot.slane %v7627_v29, 3  ;;  %v7704_v60 = vld [vmem:[%s7574_s16 + $0x30] sm:$0xff]  ;;  %s5667_s8 = sshll.u32 %s5664_s23, 4  ;;  %s5668_s8 = int_to_ptr.hbm [resolvable:$true] %s5667_s8 }
  0x28   : > { %v771_v42 = vpack.c.bf16 %v758_v37, %v757_v36  ;;  %v761_v43 = vsel %vm680_vm4, %v712_v39, 0.0  ;;  %v762_v44 = vsel %vm681_vm5, %v711_v38, 0.0  ;;  %v700_v48 = vrot.slane %v7638_v32, 3  ;;  %v7727_v9 = vld [vmem:[%s7574_s16 + $0x50] sm:$0xff]  ;;  %1106 = vmatpush.bf16.msrb.mxu2 %v6866_v50  ;;  %911 = vmatpush.bf16.msrb.mxu1 %v6862_v56  ;;  %v6871_v26 = vld [vmem:[%s10993_s2 + $0x48] sm:$0xff]  ;;  %v6873_v36 = vld [vmem:[%s10993_s2 + $0x58] sm:$0xff] }
  0x29   : > { %v773_v46 = vpack.c.bf16 %v762_v44, %v761_v43  ;;  %v701_v49 = vrot.slane %v7641_v33, 3  ;;  %v7687_v53 = vand.u32 7, %v356_v20  ;;  %v688_v54 = vrot.slane %v7662_v40, 3  ;;  %1317 = vmatpush.bf16.msrb.mxu3 %v6868_v2  ;;  %1527 = vmatpush.bf16.msrb.mxu0 %v6871_v26  ;;  %v7776_v56 = vld [vmem:[%s7574_s16 + $0x10] sm:$0xff]  ;;  %s5653_s28 = scalar_lea.sflag [#allocation4], %s320_s18  ;;  %s7382_s13 = scalar_lea.hbm %s10998_s7, 32 }
  0x2a   : > { %v689_v55 = vrot.slane %v7665_v41, 3  ;;  %5791 = vmatmul.msk.bf16.vlgmr.msra.gmra.mxu1 %vm11008_vm0, %v771_v42  ;;  %v708_v58 = vsel %vm704_vm1, %v699_v47, %v700_v48  ;;  %v703_v59 = vrot.slane %v7673_v45, 3  ;;  %v361_v61 = vadd.s32 48, %v7558_v1  ;;  %v6870_v42 = vld [vmem:[%s10993_s2 + $0x40] sm:$0xff] }
  0x2b   : > { %5793 = vmatmul.msk.bf16.vlgmr.msra.gmra.mxu2 %vm11008_vm0, %v773_v46  ;;  %v707_v57 = vsel %vm704_vm1, %v700_v48, %v701_v49  ;;  %v765_v63 = vsel %vm684_vm6, %v708_v58, 0.0  ;;  %vm672_vm8 = vcmp.ge.s32.totalorder %v7685_v52, 5  ;;  %vm673_vm9 = vcmp.ge.s32.totalorder %v7687_v53, 5  ;;  %v7763_v46 = vld [vmem:[%s7574_s16 + $0x70] sm:$0xff] }
  0x2c   : > { %v766_v0 = vsel %vm685_vm7, %v707_v57, 0.0  ;;  %v719_v4 = vsel %vm704_vm1, %v688_v54, %v689_v55  ;;  %v720_v5 = vsel %vm704_vm1, %v703_v59, %v688_v54  ;;  %v362_v6 = vadd.s32 56, %v7558_v1  ;;  %1852 = vmatpush.bf16.msra.mxu2 %v6875_v62  ;;  %1738 = vmatpush.bf16.msra.mxu1 %v6873_v36 }
  0x2d   : > { %v775_v3 = vpack.c.bf16 %v766_v0, %v765_v63  ;;  %v753_v10 = vsel %vm672_vm8, %v720_v5, 0.0  ;;  %v754_v11 = vsel %vm673_vm9, %v719_v4, 0.0  ;;  %v7729_v20 = vand.u32 7, %v361_v61  ;;  %1528 = vmatpush.bf16.msrb.mxu0 %v6870_v42 }
  0x2e   : > { %v694_v21 = vrot.slane %v7704_v60, 3  ;;  %v769_v28 = vpack.c.bf16 %v754_v11, %v753_v10  ;;  %v7736_v30 = vand.u32 7, %v362_v6  ;;  %v365_v31 = vadd.s32 80, %v7558_v1 }
  0x2f   : > { %5795 = vmatmul.msk.bf16.vlgmr.msra.gmra.mxu3 %vm11008_vm0, %v775_v3  ;;  %v366_v35 = vadd.s32 88, %v7558_v1  ;;  %vm678_vm10 = vcmp.ge.s32.totalorder %v7729_v20, 5  ;;  %v698_v39 = vrot.slane %v7727_v9, 3  ;;  %v369_v51 = vadd.s32 112, %v7558_v1 }
  0x30   : > { %v713_v37 = vsel %vm704_vm1, %v694_v21, %v695_v25  ;;  %v714_v38 = vsel %vm704_vm1, %v693_v22, %v694_v21  ;;  %5789 = vmatmul.msk.bf16.vlgmr.msra.gmra.mxu0 %vm11008_vm0, %v769_v28  ;;  %vm679_vm11 = vcmp.ge.s32.totalorder %v7736_v30, 5  ;;  %v7758_v25 = vand.u32 7, %v365_v31 }
  0x31   : > { %v759_v43 = vsel %vm678_vm10, %v714_v38, 0.0  ;;  %v7760_v44 = vand.u32 7, %v366_v35  ;;  %v760_v22 = vsel %vm679_vm11, %v713_v37, 0.0  ;;  %v709_v48 = vsel %vm704_vm1, %v698_v39, %v699_v47 }
  0x32   : > { %11137 = vst [vmem:[#allocation16_spill] sm:$0xff] %v7758_v25  ;;  %v710_v50 = vsel %vm704_vm1, %v697_v27, %v698_v39  ;;  %vm682_vm12 = vcmp.ge.s32.totalorder %v7758_v25, 5  ;;  %v370_v54 = vadd.s32 120, %v7558_v1  ;;  %v7778_v61 = vand.u32 7, %v369_v51 }
  0x33   : > { %11138 = vst [vmem:[#allocation17_spill] sm:$0xff] %v7760_v44  ;;  %vm683_vm13 = vcmp.ge.s32.totalorder %v7760_v44, 5  ;;  %v763_v57 = vsel %vm682_vm12, %v710_v50, 0.0  ;;  %v702_v47 = vrot.slane %v7763_v46, 3  ;;  %v772_v62 = vpack.c.bf16 %v760_v22, %v759_v43 }
  0x34   : > { %v764_v58 = vsel %vm683_vm13, %v709_v48, 0.0  ;;  %11139 = vst [vmem:[#allocation18_spill] sm:$0xff] %v7778_v61  ;;  %v7781_v63 = vand.u32 7, %v370_v54  ;;  %v357_v27 = vadd.s32 16, %v7558_v1  ;;  %v358_v0 = vadd.s32 24, %v7558_v1 }
  0x35   : > { %vm686_vm14 = vcmp.ge.s32.totalorder %v7778_v61, 5  ;;  %v705_v2 = vsel %vm704_vm1, %v702_v47, %v703_v59  ;;  %v706_v3 = vsel %vm704_vm1, %v701_v49, %v702_v47  ;;  %v690_v4 = vrot.slane %v7776_v56, 3 }
  0x36   : > { %11140 = vst [vmem:[#allocation19_spill] sm:$0xff] %v7781_v63  ;;  %v774_v5 = vpack.c.bf16 %v764_v58, %v763_v57  ;;  %vm687_vm15 = vcmp.ge.s32.totalorder %v7781_v63, 5  ;;  %v7794_v6 = vand.u32 7, %v357_v27  ;;  %v7796_v10 = vand.u32 7, %v358_v0 }
  0x37   : > { %v767_v11 = vsel %vm686_vm14, %v706_v3, 0.0  ;;  %v768_v21 = vsel %vm687_vm15, %v705_v2, 0.0  ;;  %v717_v59 = vsel %vm704_vm1, %v690_v4, %v691_v18  ;;  %v718_v49 = vsel %vm704_vm1, %v689_v55, %v690_v4 }
  0x38   : > { %vm674_vm2 = vcmp.ge.s32.totalorder %v7794_v6, 5  ;;  %vm675_vm3 = vcmp.ge.s32.totalorder %v7796_v10, 5  ;;  %v776_v31 = vpack.c.bf16 %v768_v21, %v767_v11  ;;  %v579_v35 = vrot.slane %v7662_v40, 2 }
  0x39   : > { %v755_v26 = vsel %vm674_vm2, %v718_v49, 0.0  ;;  %v756_v28 = vsel %vm675_vm3, %v717_v59, 0.0  ;;  %v580_v18 = vrot.slane %v7665_v41, 2  ;;  %v594_v36 = vrot.slane %v7673_v45, 2 }
  0x3a   : > { %5792 = vmatmul.msk.bf16.gmra.mxu1 %vm11008_vm0, %v772_v62  ;;  %vm11002_vm4 = vcmp.lt.s32.totalorder %v7558_v1, 6  ;;  %v969_v55 = vrot.slane %v7662_v40, 4  ;;  %v970_v37 = vrot.slane %v7665_v41, 4  ;;  %v770_v38 = vpack.c.bf16 %v756_v28, %v755_v26 }
  0x3b   : > { %5794 = vmatmul.msk.bf16.gmra.mxu2 %vm11008_vm0, %v774_v5  ;;  %v984_v39 = vrot.slane %v7673_v45, 4  ;;  %vm11001_vm1 = vcmp.lt.s32.totalorder %v7558_v1, 4  ;;  %vm563_vm5 = vcmp.ge.s32.totalorder %v7685_v52, 6  ;;  %vm564_vm6 = vcmp.ge.s32.totalorder %v7687_v53, 6 }
  0x3c   : > { %v610_v42 = vsel %vm11002_vm4, %v579_v35, %v580_v18  ;;  %v611_v43 = vsel %vm11002_vm4, %v594_v36, %v579_v35  ;;  %vm954_vm7 = vcmp.ge.s32.totalorder %v7687_v53, 4  ;;  %v1000_v22 = vsel %vm11001_vm1, %v969_v55, %v970_v37 }
  0x3d   : > { %vm953_vm8 = vcmp.ge.s32.totalorder %v7685_v52, 4  ;;  %v1001_v48 = vsel %vm11001_vm1, %v984_v39, %v969_v55  ;;  %v1180_v50 = vrot.slane %v7662_v40, 5  ;;  %v1181_v51 = vrot.slane %v7665_v41, 5 }
  0x3e   : > { %v1195_v54 = vrot.slane %v7673_v45, 5  ;;  %v644_v57 = vsel %vm563_vm5, %v611_v43, 0.0  ;;  %v645_v58 = vsel %vm564_vm6, %v610_v42, 0.0  ;;  %v1035_v47 = vsel %vm954_vm7, %v1000_v22, 0.0 }
  0x3f   : > { %5796 = vmatmul.msk.bf16.gmra.mxu3 %vm11008_vm0, %v776_v31  ;;  %vm11013_vm9 = vcmp.lt.s32.totalorder %v7558_v1, 3  ;;  %v1034_v62 = vsel %vm953_vm8, %v1001_v48, 0.0  ;;  %v1391_v27 = vrot.slane %v7662_v40, 6  ;;  %v1392_v0 = vrot.slane %v7665_v41, 6 }
  0x40   : > { %5790 = vmatmul.msk.bf16.gmra.mxu0 %vm11008_vm0, %v770_v38  ;;  %v1406_v2 = vrot.slane %v7673_v45, 6  ;;  %vm11006_vm10 = vcmp.lt.s32.totalorder %v7558_v1, 2  ;;  %vm1164_vm11 = vcmp.ge.s32.totalorder %v7685_v52, 3  ;;  %vm1165_vm12 = vcmp.ge.s32.totalorder %v7687_v53, 3 }
  0x41   : > { %v1211_v3 = vsel %vm11013_vm9, %v1180_v50, %v1181_v51  ;;  %v1212_v4 = vsel %vm11013_vm9, %v1195_v54, %v1180_v50  ;;  %v660_v5 = vpack.c.bf16 %v645_v58, %v644_v57  ;;  %v1050_v11 = vpack.c.bf16 %v1035_v47, %v1034_v62 }
  0x42   : > { %vm11000_vm13 = vcmp.ge.s32.totalorder %v7685_v52, 2  ;;  %vm10999_vm14 = vcmp.ge.s32.totalorder %v7687_v53, 2  ;;  %v1422_v21 = vsel %vm11006_vm10, %v1391_v27, %v1392_v0  ;;  %v1423_v59 = vsel %vm11006_vm10, %v1406_v2, %v1391_v27 }
  0x43   : > { %v1245_v49 = vsel %vm1164_vm11, %v1212_v4, 0.0  ;;  %v1246_v26 = vsel %vm1165_vm12, %v1211_v3, 0.0  ;;  %v1456_v28 = vsel %vm11000_vm13, %v1423_v59, 0.0  ;;  %v1457_v31 = vsel %vm10999_vm14, %v1422_v21, 0.0 }
  0x44   : > { %vm1377_vm15 = vcmp.ge.s32.totalorder %v7794_v6, 2  ;;  %vm1378_vm2 = vcmp.ge.s32.totalorder %v7796_v10, 2  ;;  %v1261_v35 = vpack.c.bf16 %v1246_v26, %v1245_v49  ;;  %v11141_v55 = vmov 0 }
  0x45   : > { %vm7872_vm3 = vmpackc.low %vm1378_vm2, %vm1377_vm15  ;;  %v581_v38 = vrot.slane %v7776_v56, 2  ;;  %v582_v42 = vrot.slane %v7589_v12, 2  ;;  %v1472_v43 = vpack.c.bf16 %v1457_v31, %v1456_v28  ;;  %v971_v22 = vrot.slane %v7776_v56, 4 }
  0x46   : > { %v11142_v55 = vsel %vm7872_vm3, 4294967295, %v11141_v55  ;;  %v972_v48 = vrot.slane %v7589_v12, 4  ;;  %vm565_vm5 = vcmp.ge.s32.totalorder %v7794_v6, 6  ;;  %vm566_vm6 = vcmp.ge.s32.totalorder %v7796_v10, 6 }
  0x47   : > { %11143 = vst [vmem:[#allocation20_spill] sm:$0xff] %v11142_v55  ;;  %v608_v50 = vsel %vm11002_vm4, %v581_v38, %v582_v42  ;;  %v609_v57 = vsel %vm11002_vm4, %v580_v18, %v581_v38  ;;  %vm955_vm7 = vcmp.ge.s32.totalorder %v7794_v6, 4  ;;  %vm956_vm8 = vcmp.ge.s32.totalorder %v7796_v10, 4 }
  0x48   : > { %v998_v58 = vsel %vm11001_vm1, %v971_v22, %v972_v48  ;;  %v999_v47 = vsel %vm11001_vm1, %v970_v37, %v971_v22  ;;  %v1182_v62 = vrot.slane %v7776_v56, 5  ;;  %v1183_v27 = vrot.slane %v7589_v12, 5 }
  0x49   : > { %v1393_v3 = vrot.slane %v7776_v56, 6  ;;  %v1394_v18 = vrot.slane %v7589_v12, 6  ;;  %vm1379_vm11 = vcmp.ge.s32.totalorder %v7576_v7, 2  ;;  %vm1380_vm12 = vcmp.ge.s32.totalorder %v7578_v8, 2 }
  0x4a   : > { %5805 = vmatmul.msk.bf16.vlgmr.msrb.gmra.mxu1 %vm11008_vm0, %v660_v5  ;;  %v646_v4 = vsel %vm565_vm5, %v609_v57, 0.0  ;;  %v647_v5 = vsel %vm566_vm6, %v608_v50, 0.0  ;;  %v1037_v21 = vsel %vm956_vm8, %v998_v58, 0.0  ;;  %vm7904_vm14 = vmpackc.low %vm1380_vm12, %vm1379_vm11  ;;  %v11144_v37 = vmov 0 }
  0x4b   : > { %5825 = vmatmul.msk.bf16.vlgmr.msrb.gmra.mxu2 %vm11008_vm0, %v1050_v11  ;;  %v1036_v11 = vsel %vm955_vm7, %v999_v47, 0.0  ;;  %v11145_v37 = vsel %vm7904_vm14, 4294967295, %v11144_v37  ;;  %vm1166_vm13 = vcmp.ge.s32.totalorder %v7794_v6, 3  ;;  %vm1167_vm1 = vcmp.ge.s32.totalorder %v7796_v10, 3 }
  0x4c   : > { %11146 = vst [vmem:[#allocation21_spill] sm:$0xff] %v11145_v37  ;;  %v1209_v12 = vsel %vm11013_vm9, %v1182_v62, %v1183_v27  ;;  %v1210_v59 = vsel %vm11013_vm9, %v1181_v51, %v1182_v62  ;;  %v661_v49 = vpack.c.bf16 %v647_v5, %v646_v4  ;;  %v1051_v26 = vpack.c.bf16 %v1037_v21, %v1036_v11 }
  0x4d   : > { %v1420_v28 = vsel %vm11006_vm10, %v1393_v3, %v1394_v18  ;;  %v1421_v31 = vsel %vm11006_vm10, %v1392_v0, %v1393_v3  ;;  %v1248_v38 = vsel %vm1167_vm1, %v1209_v12, 0.0  ;;  %v583_v50 = vrot.slane %v7598_v16, 2 }
  0x4e   : > { %v1459_v22 = vsel %vm1378_vm2, %v1420_v28, 0.0  ;;  %v584_v57 = vrot.slane %v7601_v17, 2  ;;  %v973_v0 = vrot.slane %v7598_v16, 4  ;;  %v974_v47 = vrot.slane %v7601_v17, 4 }
  0x4f   : > { %5845 = vmatmul.msk.bf16.vlgmr.msrb.gmra.mxu3 %vm11008_vm0, %v1261_v35  ;;  %v1247_v35 = vsel %vm1166_vm13, %v1210_v59, 0.0  ;;  %vm567_vm1 = vcmp.ge.s32.totalorder %v7576_v7, 6  ;;  %vm568_vm13 = vcmp.ge.s32.totalorder %v7578_v8, 6  ;;  %vm958_vm2 = vcmp.ge.s32.totalorder %v7578_v8, 4 }
  0x50   : > { %5865 = vmatmul.msk.bf16.vlgmr.msrb.gmra.mxu0 %vm11008_vm0, %v1472_v43  ;;  %v1458_v43 = vsel %vm1377_vm15, %v1421_v31, 0.0  ;;  %v1262_v51 = vpack.c.bf16 %v1248_v38, %v1247_v35  ;;  %vm957_vm15 = vcmp.ge.s32.totalorder %v7576_v7, 4  ;;  %v606_v62 = vsel %vm11002_vm4, %v583_v50, %v584_v57 }
  0x51   : > { %v1473_v58 = vpack.c.bf16 %v1459_v22, %v1458_v43  ;;  %v607_v3 = vsel %vm11002_vm4, %v582_v42, %v583_v50  ;;  %vm1381_vm5 = vcmp.ge.s32.totalorder %v7729_v20, 2  ;;  %vm11003_vm6 = vcmp.ge.s32.totalorder %v7736_v30, 2 }
  0x52   : > { %vm11147_vm7 = vcmp.lt.s32.totalorder %v7558_v1, 4  ;;  %v1184_v11 = vrot.slane %v7598_v16, 5  ;;  %v1185_v21 = vrot.slane %v7601_v17, 5  ;;  %vm7950_vm4 = vmpackc.low %vm11003_vm6, %vm1381_vm5  ;;  %v11149_v42 = vmov 0 }
  0x53   : > { %v996_v4 = vsel %vm11147_vm7, %v973_v0, %v974_v47  ;;  %vm11148_vm8 = vmmov %vm11147_vm7  ;;  %v11150_v42 = vsel %vm7950_vm4, 4294967295, %v11149_v42  ;;  %v1395_v12 = vrot.slane %v7598_v16, 6  ;;  %v1396_v59 = vrot.slane %v7601_v17, 6 }
  0x54   : > { %v997_v5 = vsel %vm11148_vm8, %v972_v48, %v973_v0  ;;  %11151 = vst [vmem:[#allocation22_spill] sm:$0xff] %v11150_v42  ;;  %v649_v48 = vsel %vm568_vm13, %v606_v62, 0.0  ;;  %v1039_v28 = vsel %vm958_vm2, %v996_v4, 0.0  ;;  %vm1168_vm7 = vcmp.ge.s32.totalorder %v7576_v7, 3 }
  0x55   : > { %vm1169_vm8 = vcmp.ge.s32.totalorder %v7578_v8, 3  ;;  %v1207_v16 = vsel %vm11013_vm9, %v1184_v11, %v1185_v21  ;;  %v1208_v17 = vsel %vm11013_vm9, %v1183_v27, %v1184_v11  ;;  %v1418_v38 = vsel %vm11006_vm10, %v1395_v12, %v1396_v59 }
  0x56   : > { %v1419_v43 = vsel %vm11006_vm10, %v1394_v18, %v1395_v12  ;;  %v1249_v22 = vsel %vm1168_vm7, %v1208_v17, 0.0  ;;  %v585_v0 = vrot.slane %v7704_v60, 2  ;;  %v586_v62 = vrot.slane %v7606_v19, 2  ;;  %v6874_v18 = vld [vmem:[%s10993_s2 + $0x60] sm:$0xff] }
  0x57   : > { %v1460_v50 = vsel %vm1379_vm11, %v1419_v43, 0.0  ;;  %v975_v4 = vrot.slane %v7704_v60, 4  ;;  %1853 = vmatpush.bf16.msra.mxu2 %v6874_v18  ;;  %vm569_vm11 = vcmp.ge.s32.totalorder %v7729_v20, 6  ;;  %vm960_vm2 = vcmp.ge.s32.totalorder %v7736_v30, 4 }
  0x58   : > { %vm11005_vm7 = vcmp.ge.s32.totalorder %v7591_v13, 2  ;;  %vm11154_vm6 = vcmp.lt.s32.totalorder %v7558_v1, 4  ;;  %v1397_v17 = vrot.slane %v7704_v60, 6 }
  0x5a   : > { %5806 = vmatmul.msk.bf16.gmra.mxu1 %vm11008_vm0, %v661_v49  ;;  %v648_v49 = vsel %vm567_vm1, %v607_v3, 0.0  ;;  %vm11152_vm1 = vcmp.lt.s32.totalorder %v7558_v1, 6 }
  0x5b   : > { %5826 = vmatmul.msk.bf16.gmra.mxu2 %vm11008_vm0, %v1051_v26  ;;  %v1038_v26 = vsel %vm957_vm15, %v997_v5, 0.0  ;;  %v662_v31 = vpack.c.bf16 %v649_v48, %v648_v49  ;;  %v976_v5 = vrot.slane %v7606_v19, 4  ;;  %v604_v11 = vsel %vm11152_vm1, %v585_v0, %v586_v62  ;;  %vm11153_vm13 = vmmov %vm11152_vm1  ;;  %v6872_v49 = vld [vmem:[%s10993_s2 + $0x50] sm:$0xff] }
  0x5c   : > { %v1052_v35 = vpack.c.bf16 %v1039_v28, %v1038_v26  ;;  %v605_v12 = vsel %vm11153_vm13, %v584_v57, %v585_v0  ;;  %vm959_vm15 = vcmp.ge.s32.totalorder %v7729_v20, 4  ;;  %vm11155_vm1 = vmmov %vm11154_vm6  ;;  %v1186_v26 = vrot.slane %v7704_v60, 5  ;;  %1739 = vmatpush.bf16.msra.mxu1 %v6872_v49 }
  0x5d   : > { %v994_v48 = vsel %vm11154_vm6, %v975_v4, %v976_v5  ;;  %v995_v57 = vsel %vm11155_vm1, %v974_v47, %v975_v4  ;;  %v1187_v28 = vrot.slane %v7606_v19, 5  ;;  %v650_v47 = vsel %vm569_vm11, %v605_v12, 0.0 }
  0x5e   : > { %v1041_v43 = vsel %vm960_vm2, %v994_v48, 0.0  ;;  %vm1170_vm6 = vcmp.ge.s32.totalorder %v7729_v20, 3  ;;  %vm1171_vm1 = vcmp.ge.s32.totalorder %v7736_v30, 3  ;;  %vm11159_vm11 = vcmp.ge.s32.totalorder %v7736_v30, 2 }
  0x5f   : > { %5846 = vmatmul.msk.bf16.gmra.mxu3 %vm11008_vm0, %v1262_v51  ;;  %v1250_v51 = vsel %vm1169_vm8, %v1207_v16, 0.0  ;;  %vm11004_vm8 = vcmp.ge.s32.totalorder %v7593_v14, 2  ;;  %v11156_v16 = vmov 0  ;;  %v588_v12 = vrot.slane %v7616_v24, 2 }
  0x60   : > { %5866 = vmatmul.msk.bf16.gmra.mxu0 %vm11008_vm0, %v1473_v58  ;;  %v1461_v58 = vsel %vm1380_vm12, %v1418_v38, 0.0  ;;  %v1263_v27 = vpack.c.bf16 %v1250_v51, %v1249_v22  ;;  %vm570_vm12 = vcmp.ge.s32.totalorder %v7736_v30, 6  ;;  %vm8012_vm13 = vmpackc.low %vm11004_vm8, %vm11005_vm7  ;;  %v1040_v38 = vsel %vm959_vm15, %v995_v57, 0.0 }
  0x61   : > { %v1474_v3 = vpack.c.bf16 %v1461_v58, %v1460_v50  ;;  %v11157_v16 = vsel %vm8012_vm13, 4294967295, %v11156_v16  ;;  %v1205_v22 = vsel %vm11013_vm9, %v1186_v26, %v1187_v28  ;;  %v1206_v51 = vsel %vm11013_vm9, %v1185_v21, %v1186_v26 }
  0x62   : > { %11158 = vst [vmem:[#allocation23_spill] sm:$0xff] %v11157_v16  ;;  %v1251_v0 = vsel %vm1170_vm6, %v1206_v51, 0.0  ;;  %v1252_v18 = vsel %vm1171_vm1, %v1205_v22, 0.0  ;;  %v978_v48 = vrot.slane %v7616_v24, 4  ;;  %vm11160_vm15 = vcmp.lt.s32.totalorder %v7558_v1, 6 }
  0x63   : > { %v1264_v21 = vpack.c.bf16 %v1252_v18, %v1251_v0  ;;  %vm11161_vm2 = vmmov %vm11160_vm15  ;;  %vm961_vm6 = vcmp.ge.s32.totalorder %v7591_v13, 4  ;;  %vm962_vm1 = vcmp.ge.s32.totalorder %v7593_v14, 4  ;;  %vm11007_vm8 = vcmp.ge.s32.totalorder %v7760_v44, 2 }
  0x64   : > { %vm11162_vm7 = vcmp.lt.s32.totalorder %v7558_v1, 4  ;;  %v1400_v22 = vrot.slane %v7616_v24, 6 }
  0x6a   : > { %5807 = vmatmul.msk.bf16.gmra.mxu1 %vm11008_vm0, %v662_v31  ;;  %v1398_v31 = vrot.slane %v7606_v19, 6  ;;  %v1053_v19 = vpack.c.bf16 %v1041_v43, %v1040_v38  ;;  %v11164_v38 = vmov 0  ;;  %v1399_v43 = vrot.slane %v7613_v23, 6 }
  0x6b   : > { %5827 = vmatmul.msk.bf16.gmra.mxu2 %vm11008_vm0, %v1052_v35  ;;  %v651_v35 = vsel %vm570_vm12, %v604_v11, 0.0  ;;  %v587_v11 = vrot.slane %v7613_v23, 2  ;;  %vm572_vm12 = vcmp.ge.s32.totalorder %v7593_v14, 6 }
  0x6c   : > { %v663_v50 = vpack.c.bf16 %v651_v35, %v650_v47  ;;  %v1416_v58 = vsel %vm11006_vm10, %v1397_v17, %v1398_v31  ;;  %v1188_v35 = vrot.slane %v7613_v23, 5 }
  0x6d   : > { %v1463_v4 = vsel %vm11159_vm11, %v1416_v58, 0.0  ;;  %v602_v57 = vsel %vm11160_vm15, %v587_v11, %v588_v12  ;;  %v603_v26 = vsel %vm11161_vm2, %v586_v62, %v587_v11  ;;  %vm1385_vm11 = vcmp.ge.s32.totalorder %v7758_v25, 2 }
  0x6e   : > { %v1189_v62 = vrot.slane %v7616_v24, 5  ;;  %vm8064_vm15 = vmpackc.low %vm11007_vm8, %vm1385_vm11  ;;  %vm11167_vm2 = vcmp.lt.s32.totalorder %v7558_v1, 2 }
  0x6f   : > { %5847 = vmatmul.msk.bf16.gmra.mxu3 %vm11008_vm0, %v1263_v27  ;;  %v1417_v27 = vsel %vm11006_vm10, %v1396_v59, %v1397_v17  ;;  %v977_v59 = vrot.slane %v7613_v23, 4  ;;  %vm11163_vm10 = vmmov %vm11162_vm7  ;;  %v11165_v38 = vsel %vm8064_vm15, 4294967295, %v11164_v38  ;;  %v1204_v23 = vsel %vm11013_vm9, %v1187_v28, %v1188_v35 }
  0x70   : > { %5867 = vmatmul.msk.bf16.gmra.mxu0 %vm11008_vm0, %v1474_v3  ;;  %v1462_v3 = vsel %vm1381_vm5, %v1417_v27, 0.0  ;;  %vm571_vm5 = vcmp.ge.s32.totalorder %v7591_v13, 6  ;;  %11166 = vst [vmem:[#allocation24_spill] sm:$0xff] %v11165_v38  ;;  %v1203_v58 = vsel %vm11013_vm9, %v1188_v35, %v1189_v62  ;;  %v1414_v0 = vsel %vm11167_vm2, %v1399_v43, %v1400_v22 }
  0x71   : > { %v1475_v49 = vpack.c.bf16 %v1463_v4, %v1462_v3  ;;  %v992_v17 = vsel %vm11162_vm7, %v977_v59, %v978_v48  ;;  %v993_v47 = vsel %vm11163_vm10, %v976_v5, %v977_v59  ;;  %v652_v51 = vsel %vm571_vm5, %v603_v26, 0.0  ;;  %vm11168_vm5 = vmmov %vm11167_vm2 }
  0x72   : > { %v653_v5 = vsel %vm572_vm12, %v602_v57, 0.0  ;;  %vm1172_vm10 = vcmp.ge.s32.totalorder %v7591_v13, 3  ;;  %vm1173_vm7 = vcmp.ge.s32.totalorder %v7593_v14, 3  ;;  %v1415_v18 = vsel %vm11168_vm5, %v1398_v31, %v1399_v43 }
  0x73   : > { %v664_v27 = vpack.c.bf16 %v653_v5, %v652_v51  ;;  %v1253_v3 = vsel %vm1172_vm10, %v1204_v23, 0.0  ;;  %v1254_v4 = vsel %vm1173_vm7, %v1203_v58, 0.0  ;;  %vm11169_vm12 = vcmp.ge.s32.totalorder %v7591_v13, 2 }
  0x74   : > { %v1265_v28 = vpack.c.bf16 %v1254_v4, %v1253_v3  ;;  %v590_v59 = vrot.slane %v7627_v29, 2  ;;  %v979_v31 = vrot.slane %v7727_v9, 4  ;;  %v980_v26 = vrot.slane %v7627_v29, 4 }
  0x75   : > { %vm574_vm10 = vcmp.ge.s32.totalorder %v7760_v44, 6  ;;  %vm11171_vm7 = vcmp.lt.s32.totalorder %v7558_v1, 6  ;;  %vm963_vm5 = vcmp.ge.s32.totalorder %v7758_v25, 4  ;;  %v1190_v51 = vrot.slane %v7727_v9, 5 }
  0x76   : > { %vm11172_vm2 = vmmov %vm11171_vm7  ;;  %v1191_v5 = vrot.slane %v7627_v29, 5 }
  0x7a   : > { %5808 = vmatmul.msk.bf16.gmra.mxu1 %vm11008_vm0, %v663_v50  ;;  %v1042_v50 = vsel %vm961_vm6, %v993_v47, 0.0  ;;  %vm11170_vm6 = vcmp.ge.s32.totalorder %v7593_v14, 2 }
  0x7b   : > { %5828 = vmatmul.msk.bf16.gmra.mxu2 %vm11008_vm0, %v1053_v19  ;;  %v1043_v19 = vsel %vm962_vm1, %v992_v17, 0.0  ;;  %v1465_v11 = vsel %vm11170_vm6, %v1414_v0, 0.0  ;;  %vm573_vm1 = vcmp.ge.s32.totalorder %v7758_v25, 6  ;;  %vm11173_vm6 = vcmp.lt.s32.totalorder %v7558_v1, 4 }
  0x7c   : > { %v1054_v24 = vpack.c.bf16 %v1043_v19, %v1042_v50  ;;  %v990_v35 = vsel %vm11173_vm6, %v979_v31, %v980_v26  ;;  %vm11174_vm8 = vmmov %vm11173_vm6  ;;  %v1402_v50 = vrot.slane %v7627_v29, 6  ;;  %v11175_v19 = vmov 0 }
  0x7d   : > { %v991_v43 = vsel %vm11174_vm8, %v978_v48, %v979_v31  ;;  %vm1174_vm8 = vcmp.ge.s32.totalorder %v7758_v25, 3  ;;  %v1201_v29 = vsel %vm11013_vm9, %v1190_v51, %v1191_v5 }
  0x7e   : > { %v1044_v23 = vsel %vm963_vm5, %v991_v43, 0.0  ;;  %vm11181_vm5 = vcmask 261120  }
  0x7f   : > { %5848 = vmatmul.msk.bf16.gmra.mxu3 %vm11008_vm0, %v1264_v21  ;;  %v1464_v21 = vsel %vm11169_vm12, %v1415_v18, 0.0  ;;  %vm964_vm12 = vcmp.ge.s32.totalorder %v7760_v44, 4 }
  0x80   : > { %5868 = vmatmul.msk.bf16.gmra.mxu0 %vm11008_vm0, %v1475_v49  ;;  %v589_v49 = vrot.slane %v7727_v9, 2  ;;  %v1476_v57 = vpack.c.bf16 %v1465_v11, %v1464_v21 }
  0x82   : > { %v600_v17 = vsel %vm11171_vm7, %v589_v49, %v590_v59  ;;  %v601_v47 = vsel %vm11172_vm2, %v588_v12, %v589_v49  ;;  %vm11010_vm7 = vcmp.ge.s32.totalorder %v7595_v15, 2  ;;  %vm11009_vm2 = vcmp.ge.s32.totalorder %v7643_v34, 2 }
  0x83   : > { %v1401_v12 = vrot.slane %v7727_v9, 6  ;;  %vm8118_vm6 = vmpackc.low %vm11009_vm2, %vm11010_vm7  ;;  %v654_v48 = vsel %vm573_vm1, %v601_v47, 0.0  ;;  %v655_v58 = vsel %vm574_vm10, %v600_v17, 0.0  ;;  %v1202_v9 = vsel %vm11013_vm9, %v1189_v62, %v1190_v51 }
  0x84   : > { %v11176_v19 = vsel %vm8118_vm6, 4294967295, %v11175_v19  ;;  %vm11178_vm2 = vcmp.lt.s32.totalorder %v7558_v1, 2  ;;  %v1255_v4 = vsel %vm1174_vm8, %v1202_v9, 0.0  ;;  %vm11180_vm10 = vcmp.ge.s32.totalorder %v7760_v44, 2 }
  0x85   : > { %11177 = vst [vmem:[#allocation25_spill] sm:$0xff] %v11176_v19  ;;  %v1412_v18 = vsel %vm11178_vm2, %v1401_v12, %v1402_v50  ;;  %vm11179_vm1 = vmmov %vm11178_vm2  ;;  %v591_v49 = vrot.slane %v7638_v32, 2  ;;  %v982_v17 = vrot.slane %v7641_v33, 4  ;;  %vm576_vm2 = vcmp.ge.s32.totalorder %v7643_v34, 6 }
  0x86   : > { %v1413_v3 = vsel %vm11179_vm1, %v1400_v22, %v1401_v12  ;;  %v981_v22 = vrot.slane %v7638_v32, 4  ;;  %vm11184_vm8 = vcmp.lt.s32.totalorder %v7558_v1, 6  ;;  %vm11187_vm7 = vcmp.lt.s32.totalorder %v7558_v1, 4 }
  0x87   : > { %v1466_v11 = vsel %vm1385_vm11, %v1413_v3, 0.0  ;;  %vm575_vm11 = vcmp.ge.s32.totalorder %v7595_v15, 6  ;;  %vm11185_vm1 = vmmov %vm11184_vm8  ;;  %v1192_v12 = vrot.slane %v7638_v32, 5 }
  0x88   : > { %v988_v43 = vsel %vm11187_vm7, %v981_v22, %v982_v17 }
  0x8a   : > { %5809 = vmatmul.msk.bf16.gmra.mxu1 %vm11008_vm0, %v664_v27  ;;  %v1045_v27 = vsel %vm964_vm12, %v990_v35, 0.0  ;;  %vm11182_vm12 = vmmov %vm11181_vm5  ;;  %v599_v35 = vsel %vm11185_vm1, %v590_v59, %v591_v49  ;;  %vm11011_vm1 = vcmp.ge.s32.totalorder %v7781_v63, 2  ;;  %v1403_v59 = vrot.slane %v7638_v32, 6 }
  0x8b   : > { %5829 = vmatmul.msk.bf16.gmra.mxu2 %vm11008_vm0, %v1054_v24  ;;  %v665_v24 = vpack.c.bf16 %v655_v58, %v654_v48  ;;  %v1055_v0 = vpack.c.bf16 %v1045_v27, %v1044_v23  ;;  %v1193_v48 = vrot.slane %v7641_v33, 5  ;;  %v1404_v58 = vrot.slane %v7641_v33, 6 }
  0x8c   : > { %v11189_v23 = vmov 0 }
  0x8d   : > { %v1199_v32 = vsel %vm11013_vm9, %v1192_v12, %v1193_v48 }
  0x8f   : > { %5849 = vmatmul.msk.bf16.gmra.mxu3 %vm11008_vm0, %v1265_v28  ;;  %v1467_v28 = vsel %vm11180_vm10, %v1412_v18, 0.0  ;;  %vm965_vm10 = vcmp.ge.s32.totalorder %v7595_v15, 4 }
  0x90   : > { %5869 = vmatmul.msk.bf16.gmra.mxu0 %vm11008_vm0, %v1476_v57  ;;  %vm1175_vm0 = vcmp.ge.s32.totalorder %v7760_v44, 3  ;;  %v592_v57 = vrot.slane %v7641_v33, 2  ;;  %v1477_v31 = vpack.c.bf16 %v1467_v28, %v1466_v11  ;;  %v1200_v33 = vsel %vm11013_vm9, %v1191_v5, %v1192_v12 }
  0x91   : > { %v1256_v21 = vsel %vm1175_vm0, %v1201_v29, 0.0  ;;  %vm11183_vm0 = vmmov %vm11181_vm5 }
  0x92   : > { %v1266_v62 = vpack.c.bf16 %v1256_v21, %v1255_v4  ;;  %v598_v47 = vsel %vm11184_vm8, %v591_v49, %v592_v57  ;;  %vm11012_vm8 = vcmp.ge.s32.totalorder %v7778_v61, 2  ;;  %v593_v49 = vrot.slane %v7763_v46, 2 }
  0x93   : > { %v657_v27 = vsel %vm576_vm2, %v598_v47, 0.0  ;;  %vm11194_vm2 = vcmp.ge.s32.totalorder %v7595_v15, 2 }
  0x9a   : > { %5810 = vmatmul.msk.bf16.gmra.mxu1 %vm11181_vm5, %v665_v24  ;;  %vm966_vm5 = vcmp.ge.s32.totalorder %v7643_v34, 4 }
  0x9b   : > { %5830 = vmatmul.msk.bf16.gmra.mxu2 %vm11182_vm12, %v1055_v0  ;;  %vm11186_vm12 = vmmov %vm11183_vm0  ;;  %v1047_v9 = vsel %vm966_vm5, %v988_v43, 0.0  ;;  %vm11196_vm5 = vcmask 261120  }
  0x9f   : > { %5850 = vmatmul.msk.bf16.gmra.mxu3 %vm11183_vm0, %v1266_v62  ;;  %vm11188_vm0 = vmmov %vm11187_vm7 }
  0xa0   : > { %5870 = vmatmul.msk.bf16.gmra.mxu0 %vm11186_vm12, %v1477_v31  ;;  %v989_v51 = vsel %vm11188_vm0, %v980_v26, %v981_v22  ;;  %vm8170_vm7 = vmpackc.low %vm11011_vm1, %vm11012_vm8  ;;  %v656_v26 = vsel %vm575_vm11, %v599_v35, 0.0  ;;  %vm1176_vm12 = vcmp.ge.s32.totalorder %v7595_v15, 3  ;;  %vm1177_vm0 = vcmp.ge.s32.totalorder %v7643_v34, 3 }
  0xa1   : > { %v11190_v23 = vsel %vm8170_vm7, 4294967295, %v11189_v23  ;;  %v1046_v29 = vsel %vm965_vm10, %v989_v51, 0.0  ;;  %v666_v24 = vpack.c.bf16 %v657_v27, %v656_v26  ;;  %vm11192_vm1 = vcmp.lt.s32.totalorder %v7558_v1, 2  ;;  %vm11197_vm8 = vmmov %vm11196_vm5 }
  0xa2   : > { %11191 = vst [vmem:[#allocation26_spill] sm:$0xff] %v11190_v23  ;;  %v1056_v0 = vpack.c.bf16 %v1047_v9, %v1046_v29  ;;  %v1410_v18 = vsel %vm11192_vm1, %v1403_v59, %v1404_v58  ;;  %vm11193_vm11 = vmmov %vm11192_vm1  ;;  %v1257_v21 = vsel %vm1176_vm12, %v1200_v33, 0.0  ;;  %v1258_v11 = vsel %vm1177_vm0, %v1199_v32, 0.0 }
  0xa3   : > { %v1411_v3 = vsel %vm11193_vm11, %v1402_v50, %v1403_v59  ;;  %vm11195_vm10 = vcmp.ge.s32.totalorder %v7643_v34, 2  ;;  %v1267_v5 = vpack.c.bf16 %v1258_v11, %v1257_v21  ;;  %v983_v50 = vrot.slane %v7763_v46, 4  ;;  %vm11198_vm1 = vmmov %vm11196_vm5 }
  0xa4   : > { %v1468_v28 = vsel %vm11194_vm2, %v1411_v3, 0.0  ;;  %v1469_v62 = vsel %vm11195_vm10, %v1410_v18, 0.0  ;;  %vm577_vm12 = vcmp.ge.s32.totalorder %v7778_v61, 6  ;;  %vm578_vm0 = vcmp.ge.s32.totalorder %v7781_v63, 6  ;;  %vm11201_vm10 = vmmov %vm11198_vm1 }
  0xa5   : > { %v1478_v31 = vpack.c.bf16 %v1469_v62, %v1468_v28  ;;  %vm967_vm2 = vcmp.ge.s32.totalorder %v7778_v61, 4  ;;  %v1194_v26 = vrot.slane %v7763_v46, 5 }
  0xa7   : > { %v8188_v4 = vpop.f32.mrf.mxu1 }
  0xaa   : > { %5811 = vmatmul.msk.bf16.gmra.mxu1 %vm11196_vm5, %v666_v24  ;;  %vm968_vm5 = vcmp.ge.s32.totalorder %v7781_v63, 4 }
  0xab   : > { %5831 = vmatmul.msk.bf16.gmra.mxu2 %vm11197_vm8, %v1056_v0  ;;  %vm11199_vm8 = vcmp.lt.s32.totalorder %v7558_v1, 6 }
  0xac   : > { %v596_v43 = vsel %vm11199_vm8, %v593_v49, %v594_v36  ;;  %vm11200_vm11 = vmmov %vm11199_vm8  ;;  %vm1178_vm8 = vcmp.ge.s32.totalorder %v7778_v61, 3 }
  0xad   : > { %v8200_v47 = vpop.f32.mrf.mxu0  ;;  %v597_v51 = vsel %vm11200_vm11, %v592_v57, %v593_v49  ;;  %v1405_v57 = vrot.slane %v7763_v46, 6  ;;  %v659_v29 = vsel %vm578_vm0, %v596_v43, 0.0  ;;  %vm1179_vm11 = vcmp.ge.s32.totalorder %v7781_v63, 3 }
  0xae   : > { %v8198_v22 = vpop.f32.mrf.mxu2  ;;  %v658_v27 = vsel %vm577_vm12, %v597_v51, 0.0  ;;  %vm11206_vm12 = vcmp.lt.s32.totalorder %v7558_v1, 2  ;;  %v1603_v49 = vrot.slane %v7665_v41, 7 }
  0xaf   : > { %5851 = vmatmul.msk.bf16.gmra.mxu3 %vm11198_vm1, %v1267_v5  ;;  %v8204_v35 = vpop.f32.mrf.mxu1  ;;  %vm11202_vm1 = vcmp.lt.s32.totalorder %v7558_v1, 4  ;;  %v667_v46 = vpack.c.bf16 %v659_v29, %v658_v27  ;;  %v1408_v18 = vsel %vm11206_vm12, %v1405_v57, %v1406_v2  ;;  %vm11207_vm0 = vmmov %vm11206_vm12  ;;  %vm1589_vm12 = vcmp.ge.s32.totalorder %v7796_v10, 1 }
  0xb0   : > { %5871 = vmatmul.msk.bf16.gmra.mxu0 %vm11201_vm10, %v1478_v31  ;;  %v986_v12 = vsel %vm11202_vm1, %v983_v50, %v984_v39  ;;  %vm11203_vm9 = vmmov %vm11202_vm1  ;;  %vm11204_vm10 = vcmp.lt.s32.totalorder %v7558_v1, 3  ;;  %v1409_v3 = vsel %vm11207_vm0, %v1404_v58, %v1405_v57  ;;  %vm11211_vm1 = vcmask 261120  }
  0xb1   : > { %v987_v59 = vsel %vm11203_vm9, %v982_v17, %v983_v50  ;;  %v1049_v32 = vsel %vm968_vm5, %v986_v12, 0.0  ;;  %v1197_v39 = vsel %vm11204_vm10, %v1194_v26, %v1195_v54  ;;  %vm11205_vm9 = vmmov %vm11204_vm10  ;;  %vm11210_vm5 = vcmp.ge.s32.totalorder %v7781_v63, 2 }
  0xb2   : > { %v8223_v36 = vpop.f32.mrf.mxu3  ;;  %v1048_v9 = vsel %vm967_vm2, %v987_v59, 0.0  ;;  %v1198_v17 = vsel %vm11205_vm9, %v1193_v48, %v1194_v26  ;;  %v1260_v54 = vsel %vm1179_vm11, %v1197_v39, 0.0  ;;  %vm11209_vm2 = vcmp.ge.s32.totalorder %v7778_v61, 2  ;;  %vm11212_vm10 = vmmov %vm11211_vm1 }
  0xb3   : > { %v1057_v0 = vpack.c.bf16 %v1049_v32, %v1048_v9  ;;  %v1259_v11 = vsel %vm1178_vm8, %v1198_v17, 0.0  ;;  %v1470_v48 = vsel %vm11209_vm2, %v1409_v3, 0.0  ;;  %v1471_v62 = vsel %vm11210_vm5, %v1408_v18, 0.0  ;;  %vm11216_vm0 = vmmov %vm11211_vm1 }
  0xb4   : > { %v1268_v2 = vpack.c.bf16 %v1260_v54, %v1259_v11  ;;  %vm1588_vm9 = vcmp.ge.s32.totalorder %v7794_v6, 1  ;;  %v1479_v58 = vpack.c.bf16 %v1471_v62, %v1470_v48  ;;  %v1602_v5 = vrot.slane %v7662_v40, 7  ;;  %vm11217_vm2 = vmmov %vm11216_vm0  ;;  %v7287_v11 = vld [vmem:[%s7574_s16 + $0x18] sm:$0xff]  ;;  %v7288_v6 = vld [vmem:[%s7574_s16 + $0x20] sm:$0xff] }
  0xb5   : > { %v830_v24 = vpop.f32.mrf.mxu0  ;;  %v11017_v31 = vrot.slane %v7673_v45, 7  ;;  %vm8261_vm8 = vmpackc.low %vm1589_vm12, %vm1588_vm9  ;;  %v11213_v50 = vmov 0  ;;  %vm11115_vm11 = vcmp.lt.s32.totalorder %v7558_v1, 1  ;;  %vm1586_vm5 = vcmp.ge.s32.totalorder %v7685_v52, 1 }
  0xb6   : > { %v8234_v33 = vpop.f32.mrf.mxu2  ;;  %v11214_v50 = vsel %vm8261_vm8, 4294967295, %v11213_v50  ;;  %v1633_v59 = vsel %vm11115_vm11, %v1602_v5, %v1603_v49  ;;  %v1797_v17 = vpack.c.bf16 %v7665_v41, %v7662_v40  ;;  %v1604_v3 = vrot.slane %v7776_v56, 7 }
  0xb7   : > { %v8242_v21 = vpop.f32.mrf.mxu1  ;;  %11215 = vst [vmem:[#allocation28_spill] sm:$0xff] %v11214_v50  ;;  %v1634_v26 = vsel %vm11115_vm11, %v11017_v31, %v1602_v5  ;;  %v1605_v54 = vrot.slane %v7287_v11, 7  ;;  %v1606_v10 = vrot.slane %v7288_v6, 7 }
  0xb8   : > { %v1667_v27 = vsel %vm1586_vm5, %v1634_v26, 0.0  ;;  %v1632_v41 = vsel %vm11115_vm11, %v1603_v49, %v1604_v3  ;;  %v1798_v49 = vpack.c.bf16 %v7287_v11, %v7776_v56 }
  0xb9   : > { %v1631_v40 = vsel %vm11115_vm11, %v1604_v3, %v1605_v54 }
  0xba   : > { %v8244_v28 = vpop.f32.mrf.mxu3  ;;  %5812 = vmatmul.msk.bf16.gmra.mxu1 %vm11211_vm1, %v667_v46  ;;  %vm1587_vm1 = vcmp.ge.s32.totalorder %v7687_v53, 1  ;;  %v1670_v26 = vsel %vm1589_vm12, %v1631_v40, 0.0  ;;  %vm1590_vm12 = vcmp.ge.s32.totalorder %v7576_v7, 1 }
  0xbb   : > { %11208 = vst [vmem:[#allocation27_spill] sm:$0xff] %v8244_v28  ;;  %5832 = vmatmul.msk.bf16.gmra.mxu2 %vm11212_vm10, %v1057_v0  ;;  %v1668_v29 = vsel %vm1587_vm1, %v1633_v59, 0.0  ;;  %vm11218_vm10 = vmmov %vm11216_vm0  ;;  %v1669_v59 = vsel %vm1588_vm9, %v1632_v41, 0.0 }
  0xbc   : > { %v1683_v39 = vpack.c.bf16 %v1668_v29, %v1667_v27  ;;  %vm11219_vm9 = vmmov %vm11216_vm0 }
  0xbd   : > { %v833_v51 = vpop.f32.mrf.mxu0 }
  0xbe   : > { %v8266_v43 = vpop.f32.mrf.mxu2 }
  0xbf   : > { %5852 = vmatmul.msk.bf16.gmra.mxu3 %vm11216_vm0, %v1268_v2  ;;  %v8269_v12 = vpop.f32.mrf.mxu1 }
  0xc0   : > { %5872 = vmatmul.msk.bf16.gmra.mxu0 %vm11217_vm2, %v1479_v58  ;;  %vm11220_vm2 = vmmov %vm11216_vm0 }
  0xc2   : > { %v8280_v57 = vpop.f32.mrf.mxu3 }
  0xc5   : > { %v835_v32 = vpop.f32.mrf.mxu0 }
  0xc6   : > { %v8286_v9 = vpop.f32.mrf.mxu2 }
  0xc7   : > { %v913_v46 = vpop.f32.mrf.mxu1 }
  0xc8   : > { %v914_v0 = vadd.f32 %v913_v46, %v8200_v47 }
  0xca   : > { %v8291_v18 = vpop.f32.mrf.mxu3  ;;  %5885 = vmatmul.msk.bf16.vlgmr.msra.gmra.mxu1 %vm11218_vm10, %v1683_v39  ;;  %vm11014_vm10 = vcmp.ge.s32.totalorder %v7578_v8, 1 }
  0xcb   : > { %5905 = vmatmul.msk.bf16.vlgmr.msra.gmra.mxu2 %vm11216_vm0, %v1797_v17 }
  0xcd   : > { %v1530_v62 = vpop.f32.mrf.mxu0 }
  0xce   : > { %v1108_v48 = vpop.f32.mrf.mxu2 }
  0xcf   : > { %v1148_v2 = vadd.f32 %v1108_v48, %v914_v0  ;;  %v915_v58 = vpop.f32.mrf.mxu1  ;;  %v1684_v0 = vpack.c.bf16 %v1670_v26, %v1669_v59 }
  0xd0   : > { %v916_v27 = vadd.f32 %v915_v58, %v830_v24  ;;  %v7289_v24 = vld [vmem:[%s7574_s16 + $0x28] sm:$0xff] }
  0xd2   : > { %v1319_v47 = vpop.f32.mrf.mxu3 }
  0xd3   : > { %v1359_v5 = vadd.f32 %v1319_v47, %v1148_v2 }
  0xd5   : > { %v8305_v29 = vadd.f32 %v1530_v62, %v1359_v5  ;;  %v8307_v17 = vpop.f32.mrf.mxu0  ;;  %v1607_v62 = vrot.slane %v7289_v24, 7 }
  0xd6   : > { %v1110_v39 = vpop.f32.mrf.mxu2 }
  0xd7   : > { %v8309_v46 = vadd.f32 %v1110_v39, %v916_v27  ;;  %v918_v3 = vpop.f32.mrf.mxu1  ;;  %v1629_v56 = vsel %vm11115_vm11, %v1606_v10, %v1607_v62 }
  0xd8   : > { %v919_v48 = vadd.f32 %v918_v3, %v833_v51  ;;  %v1630_v51 = vsel %vm11115_vm11, %v1605_v54, %v1606_v10  ;;  %v1672_v26 = vsel %vm11014_vm10, %v1629_v56, 0.0  ;;  %vm11015_vm10 = vcmp.ge.s32.totalorder %v7736_v30, 1 }
  0xd9   : > { %v1671_v59 = vsel %vm1590_vm12, %v1630_v51, 0.0 }
  0xda   : > { %v8312_v2 = vpop.f32.mrf.mxu3  ;;  %5886 = vmatmul.msk.bf16.gmra.mxu1 %vm11219_vm9, %v1684_v0  ;;  %vm11221_vm9 = vmmov %vm11216_vm0 }
  0xdb   : > { %5906 = vmatmul.msk.bf16.gmra.mxu2 %vm11220_vm2, %v1798_v49  ;;  %vm11016_vm2 = vcmp.ge.s32.totalorder %v7729_v20, 1 }
  0xdd   : > { %v1535_v40 = vpop.f32.mrf.mxu0 }
  0xde   : > { %v1113_v58 = vpop.f32.mrf.mxu2 }
  0xdf   : > { %v1150_v41 = vadd.f32 %v1113_v58, %v919_v48  ;;  %v920_v47 = vpop.f32.mrf.mxu1  ;;  %v1685_v48 = vpack.c.bf16 %v1672_v26, %v1671_v59  ;;  %v1799_v58 = vpack.c.bf16 %v7289_v24, %v7288_v6 }
  0xe0   : > { %v921_v27 = vadd.f32 %v920_v47, %v835_v32  ;;  %v1608_v32 = vrot.slane %v7704_v60, 7 }
  0xe2   : > { %v1324_v11 = vpop.f32.mrf.mxu3  ;;  %v1628_v24 = vsel %vm11115_vm11, %v1607_v62, %v1608_v32 }
  0xe3   : > { %v1361_v5 = vadd.f32 %v1324_v11, %v1150_v41  ;;  %v1673_v26 = vsel %vm11016_vm2, %v1628_v24, 0.0  ;;  %vm11022_vm2 = vcmp.ge.s32.totalorder %v7593_v14, 1 }
  0xe5   : > { %v8328_v39 = vadd.f32 %v1535_v40, %v1361_v5  ;;  %v8330_v49 = vpop.f32.mrf.mxu0  ;;  %v7290_v40 = vld [vmem:[%s7574_s16 + $0x38] sm:$0xff] }
  0xe6   : > { %v1115_v0 = vpop.f32.mrf.mxu2  ;;  %v1609_v47 = vrot.slane %v7290_v40, 7 }
  0xe7   : > { %v8332_v3 = vadd.f32 %v1115_v0, %v921_v27  ;;  %v923_v54 = vpop.f32.mrf.mxu1 }
  0xe8   : > { %v924_v10 = vadd.f32 %v923_v54, %v8188_v4  ;;  %v1627_v4 = vsel %vm11115_vm11, %v1608_v32, %v1609_v47 }
  0xe9   : > { %v1674_v27 = vsel %vm11015_vm10, %v1627_v4, 0.0  ;;  %v7293_v4 = vld [vmem:[%s7574_s16 + $0x48] sm:$0xff]  ;;  %vm11023_vm10 = vcmp.ge.s32.totalorder %v7591_v13, 1 }
  0xea   : > { %v8335_v41 = vpop.f32.mrf.mxu3  ;;  %5887 = vmatmul.msk.bf16.gmra.mxu1 %vm11216_vm0, %v1685_v48  ;;  %v1686_v54 = vpack.c.bf16 %v1674_v27, %v1673_v26  ;;  %v1611_v24 = vrot.slane %v7293_v4, 7 }
  0xeb   : > { %5907 = vmatmul.msk.bf16.gmra.mxu2 %vm11221_vm9, %v1799_v58  ;;  %vm11222_vm9 = vmmov %vm11216_vm0 }
  0xed   : > { %v1540_v51 = vpop.f32.mrf.mxu0 }
  0xee   : > { %v1118_v56 = vpop.f32.mrf.mxu2 }
  0xef   : > { %v1152_v11 = vadd.f32 %v1118_v56, %v924_v10  ;;  %v925_v5 = vpop.f32.mrf.mxu1  ;;  %v7291_v10 = vld [vmem:[%s7574_s16 + $0x30] sm:$0xff] }
  0xf0   : > { %v926_v6 = vadd.f32 %v925_v5, %v8204_v35  ;;  %v1800_v62 = vpack.c.bf16 %v7290_v40, %v7291_v10  ;;  %v7292_v5 = vld [vmem:[%s7574_s16 + $0x40] sm:$0xff] }
  0xf1   : > { %v1801_v31 = vpack.c.bf16 %v7293_v4, %v7292_v5 }
  0xf2   : > { %v1329_v60 = vpop.f32.mrf.mxu3 }
  0xf3   : > { %v1363_v59 = vadd.f32 %v1329_v60, %v1152_v11 }
  0xf5   : > { %v8352_v0 = vadd.f32 %v1540_v51, %v1363_v59  ;;  %v8354_v48 = vpop.f32.mrf.mxu0  ;;  %v1610_v51 = vrot.slane %v7292_v5, 7 }
  0xf6   : > { %v1120_v35 = vpop.f32.mrf.mxu2 }
  0xf7   : > { %v8356_v58 = vadd.f32 %v1120_v35, %v926_v6  ;;  %v928_v32 = vpop.f32.mrf.mxu1  ;;  %v1626_v26 = vsel %vm11115_vm11, %v1609_v47, %v1610_v51 }
  0xf8   : > { %v929_v56 = vadd.f32 %v928_v32, %v8242_v21  ;;  %v1625_v21 = vsel %vm11115_vm11, %v1610_v51, %v1611_v24  ;;  %v1675_v10 = vsel %vm11023_vm10, %v1626_v26, 0.0  ;;  %v7294_v26 = vld [vmem:[%s7574_s16 + $0x50] sm:$0xff]  ;;  %vm11029_vm10 = vcmp.ge.s32.totalorder %v7760_v44, 1 }
  0xfa   : > { %v8360_v11 = vpop.f32.mrf.mxu3  ;;  %5888 = vmatmul.msk.bf16.gmra.mxu1 %vm11216_vm0, %v1686_v54 }
  0xfb   : > { %5908 = vmatmul.msk.bf16.gmra.mxu2 %vm11222_vm9, %v1800_v62  ;;  %v1676_v62 = vsel %vm11022_vm2, %v1625_v21, 0.0  ;;  %vm11223_vm9 = vmmov %vm11216_vm0  ;;  %v1612_v21 = vrot.slane %v7294_v26, 7  ;;  %vm11030_vm2 = vcmp.ge.s32.totalorder %v7758_v25, 1 }
  0xfd   : > { %v1545_v59 = vpop.f32.mrf.mxu0 }
  0xfe   : > { %v1123_v60 = vpop.f32.mrf.mxu2 }
  0xff   : > { %v1154_v6 = vadd.f32 %v1123_v60, %v929_v56  ;;  %v930_v35 = vpop.f32.mrf.mxu1 }
 0x100   : > { %v931_v40 = vadd.f32 %v930_v35, %v8269_v12  ;;  %v1687_v35 = vpack.c.bf16 %v1676_v62, %v1675_v10 }
 0x102   : > { %v1334_v27 = vpop.f32.mrf.mxu3 }
 0x103   : > { %v1365_v54 = vadd.f32 %v1334_v27, %v1154_v6 }
 0x105   : > { %v8377_v32 = vadd.f32 %v1545_v59, %v1365_v54  ;;  %v8379_v56 = vpop.f32.mrf.mxu0  ;;  %v7295_v59 = vld [vmem:[%s7574_s16 + $0x58] sm:$0xff] }
 0x106   : > { %v1125_v12 = vpop.f32.mrf.mxu2  ;;  %v1613_v27 = vrot.slane %v7295_v59, 7 }
 0x107   : > { %v8381_v60 = vadd.f32 %v1125_v12, %v931_v40  ;;  %v933_v47 = vpop.f32.mrf.mxu1 }
 0x108   : > { %v934_v6 = vadd.f32 %v933_v47, %v8198_v22  ;;  %v1623_v5 = vsel %vm11115_vm11, %v1612_v21, %v1613_v27  ;;  %v1624_v22 = vsel %vm11115_vm11, %v1611_v24, %v1612_v21  ;;  %v7296_v24 = vld [vmem:[%s7574_s16 + $0x60] sm:$0xff] }
 0x109   : > { %v1677_v10 = vsel %vm11030_vm2, %v1624_v22, 0.0  ;;  %v1678_v62 = vsel %vm11029_vm10, %v1623_v5, 0.0  ;;  %v1614_v21 = vrot.slane %v7296_v24, 7  ;;  %v7297_v5 = vld [vmem:[%s7574_s16 + $0x68] sm:$0xff]  ;;  %vm11034_vm10 = vcmp.ge.s32.totalorder %v7595_v15, 1 }
 0x10a   : > { %v8383_v51 = vpop.f32.mrf.mxu3  ;;  %5889 = vmatmul.msk.bf16.gmra.mxu1 %vm11216_vm0, %v1687_v35  ;;  %vm11033_vm2 = vcmp.ge.s32.totalorder %v7643_v34, 1  ;;  %v1803_v25 = vpack.c.bf16 %v7297_v5, %v7296_v24  ;;  %v11229_v24 = vrot.slane %v7673_v45, 7 }
 0x10b   : > { %5909 = vmatmul.msk.bf16.gmra.mxu2 %vm11223_vm9, %v1801_v31  ;;  %vm11224_vm9 = vmmov %vm11216_vm0 }
 0x10d   : > { %v1550_v23 = vpop.f32.mrf.mxu0 }
 0x10e   : > { %v1128_v54 = vpop.f32.mrf.mxu2 }
 0x10f   : > { %v1156_v19 = vadd.f32 %v1128_v54, %v934_v6  ;;  %v8390_v40 = vpop.f32.mrf.mxu1  ;;  %v1688_v6 = vpack.c.bf16 %v1678_v62, %v1677_v10  ;;  %v1802_v54 = vpack.c.bf16 %v7295_v59, %v7294_v26 }
 0x110   : > { %v936_v7 = vadd.f32 %v8390_v40, %v8234_v33  ;;  %v6213_v33 = vld [vmem:[%s10994_s3 + $0x158] sm:$0xf0] }
 0x112   : > { %v1339_v31 = vpop.f32.mrf.mxu3 }
 0x113   : > { %v1367_v4 = vadd.f32 %v1339_v31, %v1156_v19 }
 0x115   : > { %v8402_v12 = vadd.f32 %v1550_v23, %v1367_v4  ;;  %v8406_v47 = vpop.f32.mrf.mxu0  ;;  %v1615_v23 = vrot.slane %v7297_v5, 7 }
 0x116   : > { %v8404_v35 = vpop.f32.mrf.mxu2 }
 0x117   : > { %v938_v38 = vpop.f32.mrf.mxu1  ;;  %v1621_v26 = vsel %vm11115_vm11, %v1614_v21, %v1615_v23  ;;  %v1157_v40 = vadd.f32 %v8404_v35, %v936_v7 }
 0x118   : > { %v939_v19 = vadd.f32 %v938_v38, %v8266_v43  ;;  %v1622_v38 = vsel %vm11115_vm11, %v1613_v27, %v1614_v21  ;;  %v1680_v62 = vsel %vm11033_vm2, %v1621_v26, 0.0  ;;  %v7298_v21 = vld [vmem:[%s7574_s16 + $0x70] sm:$0xff]  ;;  %vm11041_vm2 = vcmp.ge.s32.totalorder %v7778_v61, 1 }
 0x119   : > { %v1679_v10 = vsel %vm11034_vm10, %v1622_v38, 0.0  ;;  %vm11040_vm10 = vcmp.ge.s32.totalorder %v7781_v63, 1 }
 0x11a   : > { %v8408_v16 = vpop.f32.mrf.mxu3  ;;  %5890 = vmatmul.msk.bf16.gmra.mxu1 %vm11216_vm0, %v1688_v6 }
 0x11b   : > { %5910 = vmatmul.msk.bf16.gmra.mxu2 %vm11224_vm9, %v1802_v54  ;;  %vm11227_vm9 = vmmov %vm11216_vm0 }
 0x11d   : > { %v1555_v31 = vpop.f32.mrf.mxu0 }
 0x11e   : > { %v1133_v22 = vpop.f32.mrf.mxu2 }
 0x11f   : > { %v1158_v4 = vadd.f32 %v1133_v22, %v939_v19  ;;  %v8415_v44 = vpop.f32.mrf.mxu1  ;;  %v1689_v22 = vpack.c.bf16 %v1680_v62, %v1679_v10  ;;  %v6907_v10 = vld [vmem:[%s10994_s3 + $0xf4] sm:$0xf0] }
 0x122   : > { %v1344_v43 = vpop.f32.mrf.mxu3 }
 0x123   : > { %v1369_v59 = vadd.f32 %v1344_v43, %v1158_v4  ;;  %v1616_v4 = vrot.slane %v7298_v21, 7 }
 0x125   : > { %v8427_v6 = vadd.f32 %v1555_v31, %v1369_v59  ;;  %v8431_v19 = vpop.f32.mrf.mxu0  ;;  %v1619_v5 = vsel %vm11115_vm11, %v1616_v4, %v11229_v24  ;;  %v5987_v59 = vld [vmem:[%s10994_s3 + $0xf0] sm:$0xf] }
 0x126   : > { %v8429_v54 = vpop.f32.mrf.mxu2  ;;  %11225 = vst [vmem:[#allocation29_spill] sm:$0xff] %v8431_v19  ;;  %v1682_v45 = vsel %vm11040_vm10, %v1619_v5, 0.0  ;;  %vm11245_vm10 = vcmp.ge.s32.totalorder %v7687_v53, 2  ;;  %v6919_v53 = vld [vmem:[%s10994_s3 + $0x154] sm:$0xf0] }
 0x127   : > { %v943_v28 = vpop.f32.mrf.mxu1 }
 0x128   : > { %v944_v27 = vadd.f32 %v943_v28, %v8223_v36 }
 0x12a   : > { %v8433_v14 = vpop.f32.mrf.mxu3  ;;  %5891 = vmatmul.msk.bf16.gmra.mxu1 %vm11216_vm0, %v1689_v22  ;;  %v5988_v22 = vor.u32 %v6907_v10, %v5987_v59 }
 0x12b   : > { %11226 = vst [vmem:[#allocation30_spill] sm:$0xff] %v8433_v14  ;;  %5911 = vmatmul.msk.bf16.gmra.mxu2 %vm11227_vm9, %v1803_v25  ;;  %v1620_v25 = vsel %vm11115_vm11, %v1615_v23, %v1616_v4  ;;  %vm11233_vm9 = vmmov %vm11216_vm0  ;;  %v6886_v14 = vld [vmem:[%s10994_s3 + $0x54] sm:$0xf] }
 0x12c   : > { %v1681_v62 = vsel %vm11041_vm2, %v1620_v25, 0.0  ;;  %2153 = vmatpush.bf16.msra.mxu3 %v5988_v22 }
 0x12d   : > { %v1560_v31 = vpop.f32.mrf.mxu0  ;;  %v1690_v4 = vpack.c.bf16 %v1682_v45, %v1681_v62  ;;  %v6905_v45 = vld [vmem:[%s10994_s3 + $0xe4] sm:$0xf0] }
 0x12e   : > { %v1138_v26 = vpop.f32.mrf.mxu2 }
 0x12f   : > { %v1160_v38 = vadd.f32 %v1138_v26, %v944_v27  ;;  %v8439_v43 = vpop.f32.mrf.mxu1  ;;  %v7299_v26 = vld [vmem:[%s7574_s16 + $0x78] sm:$0xff]  ;;  %s7376_s16 = sshra.s32 %s5668_s8, 4  ;;  %s7377_s16 = int_to_ptr.hbm [resolvable:$true] %s7376_s16 }
 0x130   : > { %11228 = vst [vmem:[#allocation31_spill] sm:$0xff] %v8439_v43  ;;  %v6889_v43 = vld [vmem:[%s10994_s3 + $0x64] sm:$0xf0]  ;;  %s7378_s15 = scalar_lea.hbm %s7377_s16, 16  ;;  %p7383_p3 = scmp.lt.s32.totalorder %s7377_s16, %s10998_s7 }
 0x131   : > { %p7379_p0 = scmp.ne.s32.totalorder %s7377_s16, %s7378_s15  ;;  %p7384_p4 = scmp.lt.s32.totalorder %s7382_s13, %s7378_s15 }
 0x132   : > { %v1349_v36 = vpop.f32.mrf.mxu3 }
 0x133   : > { %v1371_v28 = vadd.f32 %v1349_v36, %v1160_v38  ;;  %v1804_v38 = vpack.c.bf16 %v7299_v26, %v7298_v21  ;;  %v5979_v21 = vld [vmem:[%s10994_s3 + $0xe0] sm:$0xf]  ;;  %p7380_p1 = pnand %p7379_p0, %p7519_p5  ;;  %p7385_p7 = por %p7384_p4, %p7383_p3 }
 0x134   : > { %v5980_v22 = vor.u32 %v6905_v45, %v5979_v21 }
 0x135   : > { %v8459_v27 = vadd.f32 %v1560_v31, %v1371_v28  ;;  %v8464_v36 = vpop.f32.mrf.mxu0  ;;  %p7381_p2 = pneg %p7380_p1 }
 0x136   : > { %v8461_v23 = vpop.f32.mrf.mxu2  ;;  %11231 = vst [vmem:[#allocation33_spill] sm:$0xff] %v8464_v36  ;;  %2154 = vmatpush.bf16.msra.mxu3 %v5980_v22 }
 0x137   : > { %11230 = vst [vmem:[#allocation32_spill] sm:$0xff] %v8461_v23  ;;  %v948_v24 = vpop.f32.mrf.mxu1  ;;  %p7386_p8 = pnand %p7385_p7, %p7381_p2 }
 0x138   : > { %v949_v5 = vadd.f32 %v948_v24, %v8280_v57 }
 0x13a   : > { %v8466_v34 = vpop.f32.mrf.mxu3  ;;  %5892 = vmatmul.msk.bf16.gmra.mxu1 %vm11216_vm0, %v1690_v4  ;;  %vm11239_vm0 = vcmp.lt.s32.totalorder %v7558_v1, 2 }
 0x13b   : > { %11232 = vst [vmem:[#allocation34_spill] sm:$0xff] %v8466_v34  ;;  %5912 = vmatmul.msk.bf16.gmra.mxu2 %vm11233_vm9, %v1804_v38  ;;  %vm11240_vm9 = vmmov %vm11239_vm0 }
 0x13d   : > { %v1565_v10 = vpop.f32.mrf.mxu0 }
 0x13e   : > { %v1143_v25 = vpop.f32.mrf.mxu2 }
 0x13f   : > { %v1162_v31 = vadd.f32 %v1143_v25, %v949_v5  ;;  %v8471_v28 = vpop.f32.mrf.mxu1 }
 0x142   : > { %v1354_v59 = vpop.f32.mrf.mxu3 }
 0x143   : > { %v1373_v62 = vadd.f32 %v1354_v59, %v1162_v31  ;;  %v5971_v31 = vld [vmem:[%s10994_s3 + $0xd0] sm:$0xf]  ;;  %v6903_v59 = vld [vmem:[%s10994_s3 + $0xd4] sm:$0xf0] }
 0x145   : > { %v8479_v4 = vadd.f32 %v1565_v10, %v1373_v62  ;;  %v5972_v10 = vor.u32 %v6903_v59, %v5971_v31  ;;  %v6906_v62 = vld [vmem:[%s10994_s3 + $0xf4] sm:$0xf]  ;;  %v5963_v59 = vld [vmem:[%s10994_s3 + $0xc0] sm:$0xf] }
 0x146   : > { %v8481_v26 = vpop.f32.mrf.mxu2 }
 0x147   : > { %v1741_v57 = vpop.f32.mrf.mxu1  ;;  %2155 = vmatpush.bf16.msra.mxu3 %v5972_v10  ;;  %v6904_v10 = vld [vmem:[%s10994_s3 + $0xe4] sm:$0xf] }
 0x148   : > { %v1781_v38 = vadd.f32 %v1741_v57, %v8305_v29  ;;  %v5989_v29 = vld [vmem:[%s10994_s3 + $0xf8] sm:$0xf0] }
 0x149   : > { %v5992_v21 = vor.u32 %v6906_v62, %v5989_v29  ;;  %v6901_v62 = vld [vmem:[%s10994_s3 + $0xc4] sm:$0xf0] }
 0x14a   : > { %v5964_v29 = vor.u32 %v6901_v62, %v5963_v59  ;;  %v5955_v62 = vld [vmem:[%s10994_s3 + $0xb0] sm:$0xf] }
 0x14b   : > { %2202 = vmatpush.bf16.msra.mxu0 %v5992_v21 }
 0x14c   : > { %2156 = vmatpush.bf16.msra.mxu3 %v5964_v29  ;;  %v6902_v29 = vld [vmem:[%s10994_s3 + $0xd4] sm:$0xf] }
 0x14e   : > { %v1855_v24 = vpop.f32.mrf.mxu2 }
 0x14f   : > { %v8484_v5 = vadd.f32 %v1855_v24, %v1781_v38  ;;  %v8486_v25 = vpop.f32.mrf.mxu1 }
 0x156   : > { %v8500_v45 = vpop.f32.mrf.mxu2 }
 0x157   : > { %v1746_v22 = vpop.f32.mrf.mxu1 }
 0x158   : > { %v1783_v57 = vadd.f32 %v1746_v22, %v8328_v39  ;;  %v5981_v39 = vld [vmem:[%s10994_s3 + $0xe8] sm:$0xf0] }
 0x159   : > { %v5984_v21 = vor.u32 %v6904_v10, %v5981_v39  ;;  %v6899_v10 = vld [vmem:[%s10994_s3 + $0xb4] sm:$0xf0] }
 0x15a   : > { %v5956_v39 = vor.u32 %v6899_v10, %v5955_v62  ;;  %v5947_v10 = vld [vmem:[%s10994_s3 + $0xa0] sm:$0xf] }
 0x15b   : > { %2203 = vmatpush.bf16.msra.mxu0 %v5984_v21 }
 0x15c   : > { %2157 = vmatpush.bf16.msra.mxu3 %v5956_v39  ;;  %v6900_v39 = vld [vmem:[%s10994_s3 + $0xc4] sm:$0xf] }
 0x15e   : > { %v1860_v38 = vpop.f32.mrf.mxu2 }
 0x15f   : > { %v8503_v24 = vadd.f32 %v1860_v38, %v1783_v57  ;;  %v8505_v31 = vpop.f32.mrf.mxu1 }
 0x166   : > { %v8519_v22 = vpop.f32.mrf.mxu2 }
 0x167   : > { %v1751_v57 = vpop.f32.mrf.mxu1 }
 0x168   : > { %v1785_v38 = vadd.f32 %v1751_v57, %v8352_v0 }
 0x16e   : > { %v1865_v63 = vpop.f32.mrf.mxu2 }
 0x16f   : > { %v8522_v61 = vadd.f32 %v1865_v63, %v1785_v38  ;;  %v8524_v59 = vpop.f32.mrf.mxu1  ;;  %v5973_v63 = vld [vmem:[%s10994_s3 + $0xd8] sm:$0xf0] }
 0x170   : > { %v5976_v0 = vor.u32 %v6902_v29, %v5973_v63  ;;  %v6897_v29 = vld [vmem:[%s10994_s3 + $0xa4] sm:$0xf0] }
 0x171   : > { %v5948_v63 = vor.u32 %v6897_v29, %v5947_v10  ;;  %v6099_v29 = vld [vmem:[%s10994_s3 + $0x70] sm:$0xf] }
 0x172   : > { %2204 = vmatpush.bf16.msra.mxu0 %v5976_v0 }
 0x173   : > { %2158 = vmatpush.bf16.msra.mxu3 %v5948_v63  ;;  %v6890_v63 = vld [vmem:[%s10994_s3 + $0x74] sm:$0xf] }
 0x176   : > { %v8538_v21 = vpop.f32.mrf.mxu2 }
 0x177   : > { %v1756_v57 = vpop.f32.mrf.mxu1 }
 0x178   : > { %v1787_v38 = vadd.f32 %v1756_v57, %v8377_v32 }
 0x17e   : > { %v1870_v15 = vpop.f32.mrf.mxu2 }
 0x17f   : > { %v8541_v36 = vadd.f32 %v1870_v15, %v1787_v38  ;;  %v8543_v62 = vpop.f32.mrf.mxu1  ;;  %v5965_v15 = vld [vmem:[%s10994_s3 + $0xc8] sm:$0xf0] }
 0x180   : > { %v5968_v32 = vor.u32 %v6900_v39, %v5965_v15  ;;  %v6891_v39 = vld [vmem:[%s10994_s3 + $0x74] sm:$0xf0] }
 0x181   : > { %v6100_v15 = vor.u32 %v6891_v39, %v6099_v29  ;;  %v6898_v29 = vld [vmem:[%s10994_s3 + $0xb4] sm:$0xf]  ;;  %v5957_v39 = vld [vmem:[%s10994_s3 + $0xb8] sm:$0xf0] }
 0x182   : > { %2205 = vmatpush.bf16.msra.mxu0 %v5968_v32  ;;  %v5939_v32 = vld [vmem:[%s10994_s3 + $0x90] sm:$0xf] }
 0x183   : > { %2331 = vmatpush.bf16.msrb.mxu1 %v6100_v15  ;;  %v6888_v15 = vld [vmem:[%s10994_s3 + $0x64] sm:$0xf] }
 0x186   : > { %v8557_v0 = vpop.f32.mrf.mxu2 }
 0x187   : > { %v1761_v57 = vpop.f32.mrf.mxu1 }
 0x188   : > { %v1789_v38 = vadd.f32 %v1761_v57, %v8402_v12  ;;  %v6895_v57 = vld [vmem:[%s10994_s3 + $0x94] sm:$0xf0] }
 0x18e   : > { %v1875_v34 = vpop.f32.mrf.mxu2 }
 0x18f   : > { %v8560_v23 = vadd.f32 %v1875_v34, %v1789_v38  ;;  %v8562_v10 = vpop.f32.mrf.mxu1  ;;  %v6101_v34 = vld [vmem:[%s10994_s3 + $0x78] sm:$0xf0]  ;;  %v5940_v38 = vor.u32 %v6895_v57, %v5939_v32 }
 0x190   : > { %v6104_v12 = vor.u32 %v6890_v63, %v6101_v34  ;;  %v6091_v63 = vld [vmem:[%s10994_s3 + $0x60] sm:$0xf]  ;;  %v5960_v34 = vor.u32 %v6898_v29, %v5957_v39  ;;  %v6083_v29 = vld [vmem:[%s10994_s3 + $0x50] sm:$0xf]  ;;  %v6887_v39 = vld [vmem:[%s10994_s3 + $0x54] sm:$0xf0] }
 0x191   : > { %11234 = vst [vmem:[#allocation35_spill] sm:$0xff] %v8560_v23  ;;  %2159 = vmatpush.bf16.msra.mxu3 %v5940_v38  ;;  %v6092_v57 = vor.u32 %v6889_v43, %v6091_v63  ;;  %v6084_v43 = vor.u32 %v6887_v39, %v6083_v29  ;;  %v6085_v63 = vld [vmem:[%s10994_s3 + $0x58] sm:$0xf0] }
 0x192   : > { %2380 = vmatpush.bf16.msrb.mxu2 %v6104_v12  ;;  %v6093_v12 = vld [vmem:[%s10994_s3 + $0x68] sm:$0xf0]  ;;  %2206 = vmatpush.bf16.msra.mxu0 %v5960_v34  ;;  %v6075_v34 = vld [vmem:[%s10994_s3 + $0x40] sm:$0xf] }
 0x193   : > { %v6096_v13 = vor.u32 %v6888_v15, %v6093_v12  ;;  %2332 = vmatpush.bf16.msrb.mxu1 %v6092_v57  ;;  %v6885_v15 = vld [vmem:[%s10994_s3 + $0x44] sm:$0xf0] }
 0x194   : > { %v6076_v12 = vor.u32 %v6885_v15, %v6075_v34 }
 0x196   : > { %v8600_v32 = vpop.f32.mrf.mxu2  ;;  %2381 = vmatpush.bf16.msrb.mxu2 %v6096_v13  ;;  %v6088_v13 = vor.u32 %v6886_v14, %v6085_v63  ;;  %v6883_v63 = vld [vmem:[%s10994_s3 + $0x34] sm:$0xf0] }
 0x197   : > { %v1766_v19 = vpop.f32.mrf.mxu1  ;;  %2333 = vmatpush.bf16.msrb.mxu1 %v6084_v43  ;;  %v6067_v43 = vld [vmem:[%s10994_s3 + $0x30] sm:$0xf] }
 0x198   : > { %v1791_v38 = vadd.f32 %v1766_v19, %v8427_v6  ;;  %v6884_v6 = vld [vmem:[%s10994_s3 + $0x44] sm:$0xf]  ;;  %v6077_v19 = vld [vmem:[%s10994_s3 + $0x48] sm:$0xf0]  ;;  %v6068_v34 = vor.u32 %v6883_v63, %v6067_v43  ;;  %v6059_v43 = vld [vmem:[%s10994_s3 + $0x20] sm:$0xf] }
 0x199   : > { %v6080_v14 = vor.u32 %v6884_v6, %v6077_v19  ;;  %v6893_v6 = vld [vmem:[%s10994_s3 + $0x84] sm:$0xf0] }
 0x19a   : > { %2382 = vmatpush.bf16.msrb.mxu2 %v6088_v13  ;;  %v6882_v13 = vld [vmem:[%s10994_s3 + $0x34] sm:$0xf] }
 0x19b   : > { %2334 = vmatpush.bf16.msrb.mxu1 %v6076_v12  ;;  %v5931_v12 = vld [vmem:[%s10994_s3 + $0x80] sm:$0xf] }
 0x19c   : > { %v5932_v19 = vor.u32 %v6893_v6, %v5931_v12 }
 0x19e   : > { %v1880_v57 = vpop.f32.mrf.mxu2  ;;  %2383 = vmatpush.bf16.msrb.mxu2 %v6080_v14  ;;  %v6896_v14 = vld [vmem:[%s10994_s3 + $0xa4] sm:$0xf]  ;;  %2160 = vmatpush.bf16.msra.mxu3 %v5932_v19 }
 0x19f   : > { %v8627_v29 = vadd.f32 %v1880_v57, %v1791_v38  ;;  %v8629_v39 = vpop.f32.mrf.mxu1  ;;  %v6069_v38 = vld [vmem:[%s10994_s3 + $0x38] sm:$0xf0]  ;;  %2335 = vmatpush.bf16.msrb.mxu1 %v6068_v34  ;;  %v5949_v57 = vld [vmem:[%s10994_s3 + $0xa8] sm:$0xf0]  ;;  %v6880_v34 = vld [vmem:[%s10994_s3 + $0x24] sm:$0xf] }
 0x1a0   : > { %11236 = vst [vmem:[#allocation37_spill] sm:$0xff] %v8629_v39  ;;  %v6072_v15 = vor.u32 %v6882_v13, %v6069_v38  ;;  %v5952_v63 = vor.u32 %v6896_v14, %v5949_v57  ;;  %v6881_v13 = vld [vmem:[%s10994_s3 + $0x24] sm:$0xf0]  ;;  %v6061_v38 = vld [vmem:[%s10994_s3 + $0x28] sm:$0xf0] }
 0x1a1   : > { %11235 = vst [vmem:[#allocation36_spill] sm:$0xff] %v8627_v29  ;;  %v6060_v12 = vor.u32 %v6881_v13, %v6059_v43  ;;  %v6064_v6 = vor.u32 %v6880_v34, %v6061_v38  ;;  %v6894_v14 = vld [vmem:[%s10994_s3 + $0x94] sm:$0xf]  ;;  %v5941_v57 = vld [vmem:[%s10994_s3 + $0x98] sm:$0xf0] }
 0x1a2   : > { %2384 = vmatpush.bf16.msrb.mxu2 %v6072_v15  ;;  %2207 = vmatpush.bf16.msra.mxu0 %v5952_v63  ;;  %v6051_v39 = vld [vmem:[%s10994_s3 + $0x10] sm:$0xf]  ;;  %v5944_v43 = vor.u32 %v6894_v14, %v5941_v57  ;;  %v6879_v63 = vld [vmem:[%s10994_s3 + $0x14] sm:$0xf0]  ;;  %v6878_v13 = vld [vmem:[%s10994_s3 + $0x14] sm:$0xf] }
 0x1a3   : > { %2336 = vmatpush.bf16.msrb.mxu1 %v6060_v12  ;;  %v6053_v34 = vld [vmem:[%s10994_s3 + $0x18] sm:$0xf0]  ;;  %v6052_v38 = vor.u32 %v6879_v63, %v6051_v39  ;;  %v6877_v39 = vld [vmem:[%s10994_s3 + $0x4] sm:$0xf0]  ;;  %v6876_v57 = vld [vmem:[%s10994_s3 + $0x4] sm:$0xf] }
 0x1a4   : > { %v6056_v12 = vor.u32 %v6878_v13, %v6053_v34 }
 0x1a6   : > { %v8667_v15 = vpop.f32.mrf.mxu2  ;;  %2385 = vmatpush.bf16.msrb.mxu2 %v6064_v6  ;;  %2208 = vmatpush.bf16.msra.mxu0 %v5944_v43  ;;  %v6043_v6 = vld [vmem:[%s10994_s3] sm:$0xf]  ;;  %v6045_v43 = vld [vmem:[%s10994_s3 + $0x8] sm:$0xf0] }
 0x1a7   : > { %11237 = vst [vmem:[#allocation38_spill] sm:$0xff] %v8667_v15  ;;  %v1771_v29 = vpop.f32.mrf.mxu1  ;;  %2337 = vmatpush.bf16.msrb.mxu1 %v6052_v38  ;;  %v6044_v13 = vor.u32 %v6877_v39, %v6043_v6  ;;  %v6048_v34 = vor.u32 %v6876_v57, %v6045_v43 }
 0x1a8   : > { %v1793_v19 = vadd.f32 %v1771_v29, %v8459_v27  ;;  %v6892_v27 = vld [vmem:[%s10994_s3 + $0x84] sm:$0xf]  ;;  %v5933_v29 = vld [vmem:[%s10994_s3 + $0x88] sm:$0xf0] }
 0x1a9   : > { %v5936_v14 = vor.u32 %v6892_v27, %v5933_v29  ;;  %v6227_v27 = vld [vmem:[%s10994_s3 + $0x170] sm:$0xf]  ;;  %v6923_v29 = vld [vmem:[%s10994_s3 + $0x174] sm:$0xf0] }
 0x1aa   : > { %2386 = vmatpush.bf16.msrb.mxu2 %v6056_v12  ;;  %v6228_v15 = vor.u32 %v6923_v29, %v6227_v27  ;;  %v8729_v27 = vld [vmem:[%s10997_s6] sm:$0xff] }
 0x1ab   : > { %2209 = vmatpush.bf16.msra.mxu0 %v5936_v14  ;;  %2338 = vmatpush.bf16.msrb.mxu1 %v6044_v13  ;;  %v951_v14 = vadd.f32 %v8471_v28, %v8291_v18  ;;  %v6219_v28 = vld [vmem:[%s10994_s3 + $0x160] sm:$0xf] }
 0x1ac   : > { %2534 = vmatpush.bf16.msrb.mxu3 %v6228_v15 }
 0x1ad   : > { %v1163_v57 = vadd.f32 %v8481_v26, %v951_v14 }
 0x1ae   : > { %v1885_v63 = vpop.f32.mrf.mxu2  ;;  %2387 = vmatpush.bf16.msrb.mxu2 %v6048_v34 }
 0x1af   : > { %v8706_v38 = vadd.f32 %v1885_v63, %v1793_v19  ;;  %v8708_v12 = vpop.f32.mrf.mxu1  ;;  %v1360_v19 = vadd.f32 %v8312_v2, %v8309_v46  ;;  %v1356_v63 = vpop.f32.mrf.mxu3 }
 0x1b0   : > { %v1374_v15 = vadd.f32 %v1356_v63, %v1163_v57  ;;  %v1567_v2 = vpop.f32.mrf.mxu0 }
 0x1b1   : > { %v1571_v43 = vadd.f32 %v8307_v17, %v1360_v19  ;;  %v6921_v17 = vld [vmem:[%s10994_s3 + $0x164] sm:$0xf0] }
 0x1b2   : > { %v1585_v29 = vadd.f32 %v1567_v2, %v1374_v15 }
 0x1b3   : > { %v1782_v13 = vadd.f32 %v8486_v25, %v1571_v43  ;;  %v6220_v25 = vor.u32 %v6921_v17, %v6219_v28 }
 0x1b5   : > { %v1896_v18 = vadd.f32 %v8500_v45, %v1782_v13  ;;  %2535 = vmatpush.bf16.msrb.mxu3 %v6220_v25 }
 0x1b6   : > { %v8716_v23 = vpop.f32.mrf.mxu2 }
 0x1b7   : > { %v1776_v6 = vpop.f32.mrf.mxu1 }
 0x1b8   : > { %v1795_v39 = vadd.f32 %v1776_v6, %v8479_v4  ;;  %v8741_v4 = vperm.slane %v8729_v27, 0 }
 0x1ba   : > { %v8744_v19 = vadd.f32 %v8741_v4, %v1896_v18  ;;  %v8748_v45 = vadd.f32 %v8741_v4, %v8484_v5 }
 0x1bc   : > { %v1929_v43 = vrot.slane %v8744_v19, 6  ;;  %v2001_v63 = vrot.slane %v8744_v19, 7  ;;  %v2000_v2 = vrot.slane %v8748_v45, 7 }
 0x1be   : > { %v1890_v34 = vpop.f32.mrf.mxu2  ;;  %v2030_v17 = vsel %vm11115_vm11, %v2000_v2, %v2001_v63 }
 0x1bf   : > { %v8731_v46 = vadd.f32 %v1890_v34, %v1795_v39  ;;  %v1778_v26 = vpop.f32.mrf.mxu1  ;;  %v1362_v39 = vadd.f32 %v8335_v41, %v8332_v3  ;;  %v1928_v34 = vrot.slane %v8748_v45, 6 }
 0x1c0   : > { %v1796_v6 = vadd.f32 %v1778_v26, %v1585_v29  ;;  %v11241_v26 = vmov 0  ;;  %v11246_v29 = vmov 0 }
 0x1c1   : > { %v1573_v15 = vadd.f32 %v8330_v49, %v1362_v39  ;;  %v1958_v3 = vsel %vm11239_vm0, %v1928_v34, %v1929_v43  ;;  %vm8779_vm0 = vmpackc.low %vm1587_vm1, %vm1586_vm5  ;;  %v6229_v39 = vld [vmem:[%s10994_s3 + $0x178] sm:$0xf0]  ;;  %vm11249_vm5 = vcmp.lt.s32.totalorder %v7558_v1, 2 }
 0x1c2   : > { %v11242_v26 = vsel %vm8779_vm0, 4294967295, %v11241_v26  ;;  %vm11250_vm1 = vmmov %vm11249_vm5 }
 0x1c3   : > { %v1784_v41 = vadd.f32 %v8505_v31, %v1573_v15  ;;  %11243 = vst [vmem:[#allocation40_spill] sm:$0xff] %v11242_v26  ;;  %v8817_v15 = vadd.f32 %v8741_v4, %v8503_v24 }
 0x1c6   : > { %v1892_v14 = vpop.f32.mrf.mxu2 }
 0x1c7   : > { %v1910_v57 = vadd.f32 %v1892_v14, %v1796_v6  ;;  %v1898_v6 = vadd.f32 %v8519_v22, %v1784_v41  ;;  %v6922_v22 = vld [vmem:[%s10994_s3 + $0x174] sm:$0xf] }
 0x1c9   : > { %v8755_v13 = vadd.f32 %v8741_v4, %v1910_v57  ;;  %v8813_v57 = vadd.f32 %v8741_v4, %v1898_v6 }
 0x1cb   : > { %11238 = vst [vmem:[#allocation39_spill] sm:$0xff] %v8755_v13  ;;  %v1943_v5 = vrot.slane %v8755_v13, 6  ;;  %v2015_v18 = vrot.slane %v8755_v13, 7  ;;  %v1931_v41 = vrot.slane %v8813_v57, 6 }
 0x1cd   : > { %v1959_v28 = vsel %vm11240_vm9, %v1943_v5, %v1928_v34  ;;  %v2031_v49 = vsel %vm11115_vm11, %v2015_v18, %v2000_v2  ;;  %vm11244_vm9 = vcmp.ge.s32.totalorder %v7685_v52, 2  ;;  %v6211_v52 = vld [vmem:[%s10994_s3 + $0x150] sm:$0xf]  ;;  %v6232_v34 = vor.u32 %v6922_v22, %v6229_v39 }
 0x1ce   : > { %v6106_v31 = vpack.c.bf16 %v1958_v3, %v1959_v28  ;;  %v5994_v25 = vpack.c.bf16 %v2030_v17, %v2031_v49  ;;  %vm8787_vm2 = vmpackc.low %vm11245_vm10, %vm11244_vm9  ;;  %v6212_v14 = vor.u32 %v6919_v53, %v6211_v52  ;;  %v1364_v2 = vadd.f32 %v8360_v11, %v8356_v58 }
 0x1cf   : > { %v11247_v29 = vsel %vm8787_vm2, 4294967295, %v11246_v29  ;;  %2583 = vmatpush.bf16.msrb.mxu0 %v6232_v34  ;;  %v2003_v3 = vrot.slane %v8813_v57, 7  ;;  %v2002_v28 = vrot.slane %v8817_v15, 7  ;;  %v1930_v17 = vrot.slane %v8817_v15, 6  ;;  %vm11251_vm10 = vmmov %vm11250_vm1 }
 0x1d0   : > { %11248 = vst [vmem:[#allocation41_spill] sm:$0xff] %v11247_v29  ;;  %5995 = vmatmul.msk.bf16.vlgmr.msra.gmra.mxu3 %vm8779_vm0, %v5994_v25  ;;  %6019 = vmatmul.msk.bf16.vlgmr.msra.gmra.mxu0 %vm8779_vm0, %v5994_v25  ;;  %v1575_v49 = vadd.f32 %v8354_v48, %v1364_v2  ;;  %v6203_v48 = vld [vmem:[%s10994_s3 + $0x140] sm:$0xf]  ;;  %v8861_v39 = vadd.f32 %v8741_v4, %v8522_v61  ;;  %vm11252_vm9 = vcmp.ge.s32.totalorder %v7578_v8, 1  ;;  %v6195_v8 = vld [vmem:[%s10994_s3 + $0x130] sm:$0xf] }
 0x1d1   : > { %6107 = vmatmul.msk.bf16.vlgmr.msrb.gmra.mxu1 %vm8787_vm2, %v6106_v31  ;;  %6131 = vmatmul.msk.bf16.vlgmr.msrb.gmra.mxu2 %vm8787_vm2, %v6106_v31  ;;  %v2028_v31 = vsel %vm11115_vm11, %v2002_v28, %v2003_v3  ;;  %v1956_v24 = vsel %vm11249_vm5, %v1930_v17, %v1931_v41  ;;  %v2029_v58 = vsel %vm11115_vm11, %v2001_v63, %v2002_v28  ;;  %v6221_v63 = vld [vmem:[%s10994_s3 + $0x168] sm:$0xf0]  ;;  %vm8881_vm5 = vmpackc.low %vm11252_vm9, %vm1590_vm12  ;;  %vm11258_vm9 = vcmp.ge.s32.totalorder %v7736_v30, 1  ;;  %v6187_v30 = vld [vmem:[%s10994_s3 + $0x120] sm:$0xf] }
 0x1d2   : > { %2536 = vmatpush.bf16.msrb.mxu3 %v6212_v14  ;;  %v1786_v25 = vadd.f32 %v8524_v59, %v1575_v49  ;;  %v5997_v11 = vpack.c.bf16 %v2028_v31, %v2029_v58  ;;  %v1957_v6 = vsel %vm11250_vm1, %v1929_v43, %v1930_v17  ;;  %v6917_v59 = vld [vmem:[%s10994_s3 + $0x144] sm:$0xf0]  ;;  %v1366_v34 = vadd.f32 %v8383_v51, %v8381_v60  ;;  %vm11256_vm12 = vmmov %vm11250_vm1 }
 0x1d3   : > { %v6109_v53 = vpack.c.bf16 %v1956_v24, %v1957_v6  ;;  %v6204_v43 = vor.u32 %v6917_v59, %v6203_v48  ;;  %v2004_v17 = vrot.slane %v8861_v39, 7  ;;  %v1932_v49 = vrot.slane %v8861_v39, 6 }
 0x1d4   : > { %v1900_v52 = vadd.f32 %v8538_v21, %v1786_v25  ;;  %v6920_v21 = vld [vmem:[%s10994_s3 + $0x164] sm:$0xf]  ;;  %v1577_v31 = vadd.f32 %v8379_v56, %v1366_v34  ;;  %v11253_v51 = vmov 0  ;;  %v1368_v48 = vadd.f32 %v8408_v16, %v1157_v40 }
 0x1d5   : > { %v6224_v14 = vor.u32 %v6920_v21, %v6221_v63  ;;  %v2027_v60 = vsel %vm11115_vm11, %v2003_v3, %v2004_v17  ;;  %v11254_v51 = vsel %vm8881_vm5, 4294967295, %v11253_v51  ;;  %v1955_v58 = vsel %vm11250_vm1, %v1931_v41, %v1932_v49 }
 0x1d6   : > { %v8857_v22 = vadd.f32 %v8741_v4, %v1900_v52  ;;  %2537 = vmatpush.bf16.msrb.mxu3 %v6204_v43  ;;  %v1788_v25 = vadd.f32 %v8543_v62, %v1577_v31  ;;  %11255 = vst [vmem:[#allocation42_spill] sm:$0xff] %v11254_v51  ;;  %v6915_v62 = vld [vmem:[%s10994_s3 + $0x134] sm:$0xf0]  ;;  %v1579_v63 = vadd.f32 %v8406_v47, %v1368_v48  ;;  %v11269_v48 = vld [vmem:[#allocation12_spill] sm:$0xff] }
 0x1d7   : > { %2584 = vmatpush.bf16.msrb.mxu0 %v6224_v14  ;;  %v6196_v3 = vor.u32 %v6915_v62, %v6195_v8  ;;  %v11266_v8 = vld [vmem:[#allocation29_spill] sm:$0xff] }
 0x1d8   : > { %v2005_v2 = vrot.slane %v8857_v22, 7  ;;  %v1933_v28 = vrot.slane %v8857_v22, 6  ;;  %v1790_v34 = vadd.f32 %v8562_v10, %v1579_v63  ;;  %v6913_v10 = vld [vmem:[%s10994_s3 + $0x124] sm:$0xf0] }
 0x1da   : > { %v2026_v24 = vsel %vm11115_vm11, %v2004_v17, %v2005_v2  ;;  %v1954_v61 = vsel %vm11251_vm10, %v1932_v49, %v1933_v28  ;;  %2538 = vmatpush.bf16.msrb.mxu3 %v6196_v3  ;;  %vm11257_vm10 = vcmp.ge.s32.totalorder %v7729_v20, 1  ;;  %v11259_v17 = vmov 0 }
 0x1db   : > { %v6000_v56 = vpack.c.bf16 %v2026_v24, %v2027_v60  ;;  %v6112_v6 = vpack.c.bf16 %v1954_v61, %v1955_v58  ;;  %vm8935_vm1 = vmpackc.low %vm11258_vm9, %vm11257_vm10  ;;  %v1904_v31 = vadd.f32 %v8600_v32, %v1790_v34  ;;  %v941_v20 = vadd.f32 %v8415_v44, %v8286_v9  ;;  %v6916_v32 = vld [vmem:[%s10994_s3 + $0x144] sm:$0xf]  ;;  %v6205_v44 = vld [vmem:[%s10994_s3 + $0x148] sm:$0xf0] }
 0x1dc   : > { %v11260_v17 = vsel %vm8935_vm1, 4294967295, %v11259_v17  ;;  %v6208_v61 = vor.u32 %v6916_v32, %v6205_v44  ;;  %v11281_v32 = vld [vmem:[#allocation32_spill] sm:$0xff] }
 0x1dd   : > { %11261 = vst [vmem:[#allocation43_spill] sm:$0xff] %v11260_v17  ;;  %v1159_v9 = vadd.f32 %v8429_v54, %v941_v20  ;;  %v6914_v20 = vld [vmem:[%s10994_s3 + $0x134] sm:$0xf] }
 0x1e0   : > { %5998 = vmatmul.msk.bf16.gmra.mxu3 %vm8261_vm8, %v5997_v11  ;;  %6022 = vmatmul.msk.bf16.gmra.mxu0 %vm8261_vm8, %v5997_v11  ;;  %v1902_v11 = vadd.f32 %v8557_v0, %v1788_v25  ;;  %v6918_v0 = vld [vmem:[%s10994_s3 + $0x154] sm:$0xf]  ;;  %v11264_v25 = vld [vmem:[#allocation35_spill] sm:$0xff] }
 0x1e1   : > { %6110 = vmatmul.msk.bf16.gmra.mxu1 %vm7872_vm3, %v6109_v53  ;;  %6134 = vmatmul.msk.bf16.gmra.mxu2 %vm7872_vm3, %v6109_v53  ;;  %v6216_v52 = vor.u32 %v6918_v0, %v6213_v33  ;;  %v8916_v53 = vadd.f32 %v8741_v4, %v8541_v36  ;;  %v8970_v60 = vadd.f32 %v8741_v4, %v11264_v25  ;;  %v11268_v33 = vld [vmem:[#allocation37_spill] sm:$0xff] }
 0x1e2   : > { %v8912_v41 = vadd.f32 %v8741_v4, %v1902_v11 }
 0x1e3   : > { %2585 = vmatpush.bf16.msrb.mxu0 %v6216_v52  ;;  %v2006_v43 = vrot.slane %v8916_v53, 7  ;;  %v1934_v35 = vrot.slane %v8916_v53, 6  ;;  %v2008_v7 = vrot.slane %v8970_v60, 7  ;;  %v1936_v54 = vrot.slane %v8970_v60, 6 }
 0x1e4   : > { %v2007_v59 = vrot.slane %v8912_v41, 7  ;;  %v1935_v21 = vrot.slane %v8912_v41, 6 }
 0x1e5   : > { %v2025_v16 = vsel %vm11115_vm11, %v2005_v2, %v2006_v43  ;;  %v6188_v2 = vor.u32 %v6913_v10, %v6187_v30  ;;  %v6197_v10 = vld [vmem:[%s10994_s3 + $0x138] sm:$0xf0] }
 0x1e6   : > { %v2024_v14 = vsel %vm11115_vm11, %v2006_v43, %v2007_v59  ;;  %v1952_v36 = vsel %vm11256_vm12, %v1934_v35, %v1935_v21  ;;  %v2023_v52 = vsel %vm11115_vm11, %v2007_v59, %v2008_v7  ;;  %v11271_v43 = vld [vmem:[#allocation13_spill] sm:$0xff]  ;;  %v11278_v59 = vld [vmem:[#allocation27_spill] sm:$0xff] }
 0x1e7   : > { %v6003_v47 = vpack.c.bf16 %v2024_v14, %v2025_v16  ;;  %2539 = vmatpush.bf16.msrb.mxu3 %v6188_v2  ;;  %2586 = vmatpush.bf16.msrb.mxu0 %v6208_v61  ;;  %vm11272_vm10 = vcmp.ge.s32.totalorder %v11271_v43, 1  ;;  %v11283_v61 = vld [vmem:[#allocation36_spill] sm:$0xff] }
 0x1e8   : > { %v9024_v25 = vadd.f32 %v8741_v4, %v11283_v61  ;;  %v11286_v43 = vld [vmem:[#allocation16_spill] sm:$0xff] }
 0x1f0   : > { %6001 = vmatmul.msk.bf16.gmra.mxu3 %vm8881_vm5, %v6000_v56  ;;  %6025 = vmatmul.msk.bf16.gmra.mxu0 %vm8881_vm5, %v6000_v56  ;;  %v11265_v56 = vld [vmem:[#allocation30_spill] sm:$0xff] }
 0x1f1   : > { %6113 = vmatmul.msk.bf16.gmra.mxu1 %vm7904_vm14, %v6112_v6  ;;  %6137 = vmatmul.msk.bf16.gmra.mxu2 %vm7904_vm14, %v6112_v6  ;;  %vm11262_vm14 = vmmov %vm11256_vm12  ;;  %v1370_v58 = vadd.f32 %v11265_v56, %v1159_v9  ;;  %v6200_v9 = vor.u32 %v6914_v20, %v6197_v10  ;;  %v11284_v56 = vld [vmem:[#allocation34_spill] sm:$0xff]  ;;  %v9081_v10 = vadd.f32 %v8741_v4, %v8706_v38  ;;  %v6908_v38 = vld [vmem:[%s10994_s3 + $0x104] sm:$0xf] }
 0x1f2   : > { %v1953_v49 = vsel %vm11262_vm14, %v1933_v28, %v1934_v35  ;;  %v8966_v28 = vadd.f32 %v8741_v4, %v1904_v31  ;;  %vm11267_vm14 = vmmov %vm11256_vm12  ;;  %vm11270_vm12 = vcmp.ge.s32.totalorder %v11269_v48, 1  ;;  %v11273_v35 = vmov 0 }
 0x1f3   : > { %v6115_v24 = vpack.c.bf16 %v1952_v36, %v1953_v49  ;;  %v1581_v62 = vadd.f32 %v11266_v8, %v1370_v58  ;;  %vm8989_vm9 = vmpackc.low %vm11272_vm10, %vm11270_vm12  ;;  %v11277_v36 = vld [vmem:[#allocation38_spill] sm:$0xff]  ;;  %2587 = vmatpush.bf16.msrb.mxu0 %v6200_v9  ;;  %v2010_v8 = vrot.slane %v9024_v25, 7  ;;  %v2012_v61 = vrot.slane %v9081_v10, 7 }
 0x1f4   : > { %11263 = vst [vmem:[#allocation44_spill] sm:$0xff] %v8966_v28  ;;  %v2009_v11 = vrot.slane %v8966_v28, 7  ;;  %v1937_v6 = vrot.slane %v8966_v28, 6  ;;  %v11274_v35 = vsel %vm8989_vm9, 4294967295, %v11273_v35 }
 0x1f5   : > { %v1792_v40 = vadd.f32 %v11268_v33, %v1581_v62  ;;  %11275 = vst [vmem:[#allocation35_spill] sm:$0xff] %v11274_v35  ;;  %v1938_v62 = vrot.slane %v9024_v25, 6 }
 0x1f6   : > { %v2022_v0 = vsel %vm11115_vm11, %v2008_v7, %v2009_v11  ;;  %v1950_v3 = vsel %vm11267_vm14, %v1936_v54, %v1937_v6  ;;  %v2021_v48 = vsel %vm11115_vm11, %v2009_v11, %v2010_v8  ;;  %v6171_v11 = vld [vmem:[%s10994_s3 + $0x100] sm:$0xf] }
 0x1f7   : > { %v6006_v63 = vpack.c.bf16 %v2022_v0, %v2023_v52  ;;  %v1906_v34 = vadd.f32 %v11277_v36, %v1792_v40  ;;  %v11285_v0 = vld [vmem:[#allocation33_spill] sm:$0xff] }
 0x1f9   : > { %v9020_v44 = vadd.f32 %v8741_v4, %v1906_v34 }
 0x1fb   : > { %11282 = vst [vmem:[#allocation30_spill] sm:$0xff] %v9020_v44  ;;  %v2011_v7 = vrot.slane %v9020_v44, 7  ;;  %v2434_v35 = vpack.c.bf16 %v9020_v44, %v9024_v25 }
 0x1fd   : > { %v2020_v33 = vsel %vm11115_vm11, %v2010_v8, %v2011_v7 }
 0x1fe   : > { %v6009_v36 = vpack.c.bf16 %v2020_v33, %v2021_v48  ;;  %v11299_v33 = vld [vmem:[#allocation15_spill] sm:$0xff] }
 0x200   : > { %6004 = vmatmul.msk.bf16.gmra.mxu3 %vm8935_vm1, %v6003_v47  ;;  %6028 = vmatmul.msk.bf16.gmra.mxu0 %vm8935_vm1, %v6003_v47  ;;  %v11279_v47 = vld [vmem:[#allocation31_spill] sm:$0xff] }
 0x201   : > { %6116 = vmatmul.msk.bf16.gmra.mxu1 %vm7950_vm4, %v6115_v24  ;;  %6140 = vmatmul.msk.bf16.gmra.mxu2 %vm7950_vm4, %v6115_v24  ;;  %vm11276_vm4 = vmmov %vm11267_vm14  ;;  %v946_v49 = vadd.f32 %v11279_v47, %v11278_v59  ;;  %v6911_v24 = vld [vmem:[%s10994_s3 + $0x114] sm:$0xf0]  ;;  %vm11287_vm14 = vcmp.ge.s32.totalorder %v11286_v43, 1 }
 0x202   : > { %v1951_v14 = vsel %vm11276_vm4, %v1935_v21, %v1936_v54  ;;  %v6179_v21 = vld [vmem:[%s10994_s3 + $0x110] sm:$0xf]  ;;  %v1939_v54 = vrot.slane %v9020_v44, 6 }
 0x203   : > { %v6118_v16 = vpack.c.bf16 %v1950_v3, %v1951_v14  ;;  %v6180_v30 = vor.u32 %v6911_v24, %v6179_v21  ;;  %v1161_v2 = vadd.f32 %v11281_v32, %v946_v49  ;;  %v11290_v14 = vmov 0  ;;  %v6189_v49 = vld [vmem:[%s10994_s3 + $0x128] sm:$0xf0]  ;;  %v6910_v21 = vld [vmem:[%s10994_s3 + $0x114] sm:$0xf] }
 0x204   : > { %v1948_v40 = vsel %vm11276_vm4, %v1938_v62, %v1939_v54  ;;  %v6181_v24 = vld [vmem:[%s10994_s3 + $0x118] sm:$0xf0] }
 0x205   : > { %2540 = vmatpush.bf16.msrb.mxu3 %v6180_v30  ;;  %v1372_v58 = vadd.f32 %v11284_v56, %v1161_v2  ;;  %v6184_v32 = vor.u32 %v6910_v21, %v6181_v24  ;;  %v1940_v56 = vrot.slane %v9081_v10, 6  ;;  %v2429_v21 = vpack.c.bf16 %v8744_v19, %v8748_v45 }
 0x207   : > { %v1583_v3 = vadd.f32 %v11285_v0, %v1372_v58  ;;  %v2019_v0 = vsel %vm11115_vm11, %v2011_v7, %v2012_v61 }
 0x209   : > { %v1794_v52 = vadd.f32 %v8708_v12, %v1583_v3  ;;  %v11297_v3 = vld [vmem:[#allocation14_spill] sm:$0xff] }
 0x210   : > { %6007 = vmatmul.msk.bf16.gmra.mxu3 %vm8989_vm9, %v6006_v63  ;;  %6031 = vmatmul.msk.bf16.gmra.mxu0 %vm8989_vm9, %v6006_v63  ;;  %v11288_v63 = vld [vmem:[#allocation17_spill] sm:$0xff] }
 0x211   : > { %6119 = vmatmul.msk.bf16.gmra.mxu1 %vm8012_vm13, %v6118_v16  ;;  %6143 = vmatmul.msk.bf16.gmra.mxu2 %vm8012_vm13, %v6118_v16  ;;  %vm11289_vm12 = vcmp.ge.s32.totalorder %v11288_v63, 1  ;;  %vm11293_vm13 = vmmov %vm11276_vm4  ;;  %v1908_v16 = vadd.f32 %v8716_v23, %v1794_v52  ;;  %v6909_v23 = vld [vmem:[%s10994_s3 + $0x104] sm:$0xf0] }
 0x212   : > { %vm9043_vm10 = vmpackc.low %vm11289_vm12, %vm11287_vm14  ;;  %v1949_v34 = vsel %vm11293_vm13, %v1937_v6, %v1938_v62  ;;  %v6912_v6 = vld [vmem:[%s10994_s3 + $0x124] sm:$0xf]  ;;  %v6172_v47 = vor.u32 %v6909_v23, %v6171_v11  ;;  %v6173_v62 = vld [vmem:[%s10994_s3 + $0x108] sm:$0xf0]  ;;  %vm11300_vm14 = vcmp.ge.s32.totalorder %v11299_v33, 1 }
 0x213   : > { %v11291_v14 = vsel %vm9043_vm10, 4294967295, %v11290_v14  ;;  %v6121_v59 = vpack.c.bf16 %v1948_v40, %v1949_v34  ;;  %v9077_v20 = vadd.f32 %v8741_v4, %v1908_v16  ;;  %v6192_v30 = vor.u32 %v6912_v6, %v6189_v49  ;;  %vm11296_vm13 = vmmov %vm11276_vm4  ;;  %v11307_v23 = vld [vmem:[#allocation18_spill] sm:$0xff] }
 0x214   : > { %11292 = vst [vmem:[#allocation29_spill] sm:$0xff] %v11291_v14  ;;  %2541 = vmatpush.bf16.msrb.mxu3 %v6172_v47  ;;  %vm11298_vm4 = vcmp.ge.s32.totalorder %v11297_v3, 1  ;;  %v11301_v40 = vmov 0  ;;  %v6176_v52 = vor.u32 %v6908_v38, %v6173_v62  ;;  %v1947_v43 = vsel %vm11296_vm13, %v1939_v54, %v1940_v56 }
 0x215   : > { %11295 = vst [vmem:[#allocation37_spill] sm:$0xff] %v9077_v20  ;;  %2588 = vmatpush.bf16.msrb.mxu0 %v6192_v30  ;;  %v2013_v2 = vrot.slane %v9077_v20, 7  ;;  %v1941_v9 = vrot.slane %v9077_v20, 6  ;;  %vm9103_vm12 = vmpackc.low %vm11300_vm14, %vm11298_vm4  ;;  %vm11308_vm14 = vcmp.ge.s32.totalorder %v11307_v23, 1  ;;  %v2435_v44 = vpack.c.bf16 %v9077_v20, %v9081_v10 }
 0x216   : > { %v11302_v40 = vsel %vm9103_vm12, 4294967295, %v11301_v40  ;;  %vm11306_vm4 = vmmov %vm11296_vm13 }
 0x217   : > { %v2018_v58 = vsel %vm11115_vm11, %v2012_v61, %v2013_v2  ;;  %v1946_v8 = vsel %vm11296_vm13, %v1940_v56, %v1941_v9  ;;  %11303 = vst [vmem:[#allocation12_spill] sm:$0xff] %v11302_v40 }
 0x218   : > { %v6012_v48 = vpack.c.bf16 %v2018_v58, %v2019_v0  ;;  %v6124_v63 = vpack.c.bf16 %v1946_v8, %v1947_v43  ;;  %v2430_v0 = vpack.c.bf16 %v8813_v57, %v8817_v15 }
 0x219   : > { %2589 = vmatpush.bf16.msrb.mxu0 %v6184_v32 }
 0x21d   : > { %2590 = vmatpush.bf16.msrb.mxu0 %v6176_v52 }
 0x220   : > { %6010 = vmatmul.msk.bf16.gmra.mxu3 %vm9043_vm10, %v6009_v36  ;;  %6034 = vmatmul.msk.bf16.gmra.mxu0 %vm9043_vm10, %v6009_v36  ;;  %v9119_v36 = vadd.f32 %v8741_v4, %v8731_v46  ;;  %v11309_v46 = vld [vmem:[#allocation19_spill] sm:$0xff]  ;;  %v11311_v4 = vmov 0 }
 0x221   : > { %6122 = vmatmul.msk.bf16.gmra.mxu1 %vm8064_vm15, %v6121_v59  ;;  %6146 = vmatmul.msk.bf16.gmra.mxu2 %vm8064_vm15, %v6121_v59  ;;  %vm11310_vm13 = vcmp.ge.s32.totalorder %v11309_v46, 1 }
 0x222   : > { %11305 = vst [vmem:[#allocation13_spill] sm:$0xff] %v9119_v36  ;;  %v2014_v54 = vrot.slane %v9119_v36, 7  ;;  %v1942_v34 = vrot.slane %v9119_v36, 6  ;;  %v2436_v20 = vpack.c.bf16 %v8755_v13, %v9119_v36 }
 0x224   : > { %v2016_v16 = vsel %vm11115_vm11, %v2014_v54, %v2015_v18  ;;  %v1944_v59 = vsel %vm11306_vm4, %v1942_v34, %v1943_v5  ;;  %v2017_v11 = vsel %vm11115_vm11, %v2013_v2, %v2014_v54 }
 0x225   : > { %v6015_v6 = vpack.c.bf16 %v2016_v16, %v2017_v11  ;;  %v2431_v11 = vpack.c.bf16 %v8857_v22, %v8861_v39 }
 0x230   : > { %6013 = vmatmul.msk.bf16.gmra.mxu3 %vm9103_vm12, %v6012_v48  ;;  %6037 = vmatmul.msk.bf16.gmra.mxu0 %vm9103_vm12, %v6012_v48  ;;  %vm11314_vm12 = vmmov %vm11306_vm4 }
 0x231   : > { %6125 = vmatmul.msk.bf16.gmra.mxu1 %vm8118_vm6, %v6124_v63  ;;  %6149 = vmatmul.msk.bf16.gmra.mxu2 %vm8118_vm6, %v6124_v63  ;;  %vm9137_vm6 = vmpackc.low %vm11310_vm13, %vm11308_vm14  ;;  %v1945_v18 = vsel %vm11314_vm12, %v1941_v9, %v1942_v34 }
 0x232   : > { %v11312_v4 = vsel %vm9137_vm6, 4294967295, %v11311_v4  ;;  %v6127_v47 = vpack.c.bf16 %v1944_v59, %v1945_v18 }
 0x233   : > { %11313 = vst [vmem:[#allocation38_spill] sm:$0xff] %v11312_v4  ;;  %v2433_v4 = vpack.c.bf16 %v8966_v28, %v8970_v60 }
 0x240   : > { %6016 = vmatmul.msk.bf16.gmra.mxu3 %vm9137_vm6, %v6015_v6  ;;  %6040 = vmatmul.msk.bf16.gmra.mxu0 %vm9137_vm6, %v6015_v6 }
 0x241   : > { %6128 = vmatmul.msk.bf16.gmra.mxu1 %vm8170_vm7, %v6127_v47  ;;  %6152 = vmatmul.msk.bf16.gmra.mxu2 %vm8170_vm7, %v6127_v47 }
 0x24d   : > { %v2211_v49 = vpop.f32.mrf.mxu0 }
 0x24e   : > { %v2340_v24 = vpop.f32.mrf.mxu1 }
 0x250   : > { %2542 = vmatmul.bf16.vlgmr.msrb.gmra.mxu3 %v2429_v21  ;;  %2591 = vmatmul.bf16.vlgmr.msrb.gmra.mxu0 %v2429_v21 }
 0x253   : > { %v2162_v30 = vpop.f32.mrf.mxu3 }
 0x254   : > { %v9153_v32 = vadd.f32 %v2340_v24, %v2162_v30  ;;  %v2389_v2 = vpop.f32.mrf.mxu2 }
 0x255   : > { %v9155_v9 = vadd.f32 %v2389_v2, %v2211_v49  ;;  %v9157_v61 = vpop.f32.mrf.mxu0 }
 0x256   : > { %v9159_v56 = vpop.f32.mrf.mxu1 }
 0x25b   : > { %v9161_v58 = vpop.f32.mrf.mxu3 }
 0x25c   : > { %v9163_v8 = vpop.f32.mrf.mxu2 }
 0x25d   : > { %v2216_v38 = vpop.f32.mrf.mxu0 }
 0x25e   : > { %v2345_v62 = vpop.f32.mrf.mxu1 }
 0x260   : > { %2547 = vmatmul.bf16.gmra.mxu3 %v2430_v0  ;;  %2596 = vmatmul.bf16.gmra.mxu0 %v2430_v0 }
 0x263   : > { %v2167_v3 = vpop.f32.mrf.mxu3 }
 0x264   : > { %v9167_v33 = vadd.f32 %v2345_v62, %v2167_v3  ;;  %v2394_v52 = vpop.f32.mrf.mxu2 }
 0x265   : > { %v9169_v48 = vadd.f32 %v2394_v52, %v2216_v38  ;;  %v9171_v43 = vpop.f32.mrf.mxu0  ;;  %v2432_v38 = vpack.c.bf16 %v8912_v41, %v8916_v53 }
 0x266   : > { %v9173_v63 = vpop.f32.mrf.mxu1 }
 0x26b   : > { %v9175_v54 = vpop.f32.mrf.mxu3 }
 0x26c   : > { %v9177_v34 = vpop.f32.mrf.mxu2 }
 0x26d   : > { %v2221_v16 = vpop.f32.mrf.mxu0 }
 0x26e   : > { %v2350_v59 = vpop.f32.mrf.mxu1 }
 0x270   : > { %2552 = vmatmul.bf16.gmra.mxu3 %v2431_v11  ;;  %2601 = vmatmul.bf16.gmra.mxu0 %v2431_v11 }
 0x273   : > { %v2172_v23 = vpop.f32.mrf.mxu3 }
 0x274   : > { %v9181_v46 = vadd.f32 %v2350_v59, %v2172_v23  ;;  %v2399_v6 = vpop.f32.mrf.mxu2 }
 0x275   : > { %v9183_v18 = vadd.f32 %v2399_v6, %v2221_v16  ;;  %v9185_v47 = vpop.f32.mrf.mxu0 }
 0x276   : > { %v9187_v49 = vpop.f32.mrf.mxu1 }
 0x27b   : > { %v9189_v21 = vpop.f32.mrf.mxu3 }
 0x27c   : > { %v9191_v24 = vpop.f32.mrf.mxu2 }
 0x27d   : > { %v2226_v30 = vpop.f32.mrf.mxu0 }
 0x27e   : > { %v2355_v2 = vpop.f32.mrf.mxu1 }
 0x280   : > { %2557 = vmatmul.bf16.gmra.mxu3 %v2432_v38  ;;  %2606 = vmatmul.bf16.gmra.mxu0 %v2432_v38 }
 0x283   : > { %v2177_v62 = vpop.f32.mrf.mxu3 }
 0x284   : > { %v9195_v0 = vadd.f32 %v2355_v2, %v2177_v62  ;;  %v2404_v3 = vpop.f32.mrf.mxu2 }
 0x285   : > { %v9197_v52 = vadd.f32 %v2404_v3, %v2226_v30  ;;  %v9199_v16 = vpop.f32.mrf.mxu0 }
 0x286   : > { %v9201_v59 = vpop.f32.mrf.mxu1 }
 0x28b   : > { %v9203_v11 = vpop.f32.mrf.mxu3 }
 0x28c   : > { %v9205_v23 = vpop.f32.mrf.mxu2 }
 0x28d   : > { %v2231_v6 = vpop.f32.mrf.mxu0 }
 0x28e   : > { %v2360_v5 = vpop.f32.mrf.mxu1 }
 0x290   : > { %2562 = vmatmul.bf16.gmra.mxu3 %v2433_v4  ;;  %2611 = vmatmul.bf16.gmra.mxu0 %v2433_v4 }
 0x293   : > { %v2182_v2 = vpop.f32.mrf.mxu3 }
 0x294   : > { %v9209_v38 = vadd.f32 %v2360_v5, %v2182_v2  ;;  %v2409_v30 = vpop.f32.mrf.mxu2 }
 0x295   : > { %v9211_v62 = vadd.f32 %v2409_v30, %v2231_v6  ;;  %v9213_v3 = vpop.f32.mrf.mxu0 }
 0x296   : > { %11316 = vst [vmem:[#allocation27_spill] sm:$0xff] %v9213_v3  ;;  %v9215_v7 = vpop.f32.mrf.mxu1 }
 0x29b   : > { %v9217_v40 = vpop.f32.mrf.mxu3 }
 0x29c   : > { %v9219_v12 = vpop.f32.mrf.mxu2 }
 0x29d   : > { %11317 = vst [vmem:[#allocation31_spill] sm:$0xff] %v9219_v12  ;;  %v2236_v14 = vpop.f32.mrf.mxu0 }
 0x29e   : > { %v2365_v31 = vpop.f32.mrf.mxu1 }
 0x2a0   : > { %2567 = vmatmul.bf16.gmra.mxu3 %v2434_v35  ;;  %2616 = vmatmul.bf16.gmra.mxu0 %v2434_v35 }
 0x2a3   : > { %v2187_v4 = vpop.f32.mrf.mxu3 }
 0x2a4   : > { %v9223_v5 = vadd.f32 %v2365_v31, %v2187_v4  ;;  %v2414_v6 = vpop.f32.mrf.mxu2 }
 0x2a5   : > { %v9225_v2 = vadd.f32 %v2414_v6, %v2236_v14  ;;  %v9227_v30 = vpop.f32.mrf.mxu0 }
 0x2a6   : > { %11318 = vst [vmem:[#allocation32_spill] sm:$0xff] %v9227_v30  ;;  %v9229_v42 = vpop.f32.mrf.mxu1 }
 0x2a7   : > { %11319 = vst [vmem:[#allocation36_spill] sm:$0xff] %v9229_v42 }
 0x2ab   : > { %v9231_v17 = vpop.f32.mrf.mxu3 }
 0x2ac   : > { %11320 = vst [vmem:[#allocation34_spill] sm:$0xff] %v9231_v17  ;;  %v9233_v28 = vpop.f32.mrf.mxu2 }
 0x2ad   : > { %11321 = vst [vmem:[#allocation33_spill] sm:$0xff] %v9233_v28  ;;  %v2241_v12 = vpop.f32.mrf.mxu0 }
 0x2ae   : > { %v2370_v3 = vpop.f32.mrf.mxu1 }
 0x2b0   : > { %2572 = vmatmul.bf16.gmra.mxu3 %v2435_v44  ;;  %2621 = vmatmul.bf16.gmra.mxu0 %v2435_v44 }
 0x2b3   : > { %v2192_v35 = vpop.f32.mrf.mxu3 }
 0x2b4   : > { %v9237_v31 = vadd.f32 %v2370_v3, %v2192_v35  ;;  %v2419_v14 = vpop.f32.mrf.mxu2 }
 0x2b5   : > { %v9239_v4 = vadd.f32 %v2419_v14, %v2241_v12  ;;  %v9241_v6 = vpop.f32.mrf.mxu0 }
 0x2b6   : > { %11322 = vst [vmem:[#allocation16_spill] sm:$0xff] %v9241_v6  ;;  %v9243_v30 = vpop.f32.mrf.mxu1 }
 0x2b7   : > { %11323 = vst [vmem:[#allocation17_spill] sm:$0xff] %v9243_v30  ;;  %v2665_v30 = vperm.slane %v8729_v27, 1 }
 0x2bb   : > { %v9245_v37 = vpop.f32.mrf.mxu3 }
 0x2bc   : > { %11324 = vst [vmem:[#allocation14_spill] sm:$0xff] %v9245_v37  ;;  %v9247_v28 = vpop.f32.mrf.mxu2  ;;  %v9261_v37 = vperm.slane %v2665_v30, 1 }
 0x2bd   : > { %11325 = vst [vmem:[#allocation15_spill] sm:$0xff] %v9247_v28  ;;  %v2246_v51 = vpop.f32.mrf.mxu0 }
 0x2be   : > { %v2375_v44 = vpop.f32.mrf.mxu1 }
 0x2c0   : > { %2577 = vmatmul.bf16.gmra.mxu3 %v2436_v20  ;;  %2626 = vmatmul.bf16.gmra.mxu0 %v2436_v20 }
 0x2c3   : > { %v2197_v3 = vpop.f32.mrf.mxu3 }
 0x2c4   : > { %v9251_v35 = vadd.f32 %v2375_v44, %v2197_v3  ;;  %v2424_v12 = vpop.f32.mrf.mxu2 }
 0x2c5   : > { %v9253_v14 = vadd.f32 %v2424_v12, %v2246_v51  ;;  %v9255_v6 = vpop.f32.mrf.mxu0  ;;  %v2343_v51 = vadd.f32 %v9159_v56, %v9161_v58 }
 0x2c6   : > { %11326 = vst [vmem:[#allocation18_spill] sm:$0xff] %v9255_v6 }
 0x2cb   : > { %v9257_v55 = vpop.f32.mrf.mxu3 }
 0x2cd   : > { %v2592_v50 = vpop.f32.mrf.mxu0 }
 0x2ce   : > { %v2633_v28 = vadd.f32 %v2592_v50, %v9155_v9 }
 0x2d3   : > { %v2543_v29 = vpop.f32.mrf.mxu3 }
 0x2d4   : > { %v2632_v20 = vadd.f32 %v2543_v29, %v9153_v32 }
 0x2d5   : > { %v2594_v26 = vpop.f32.mrf.mxu0 }
 0x2d6   : > { %v2671_v44 = vadd.f32 %v9261_v37, %v2632_v20 }
 0x2d8   : > { %v6233_v3 = vmul.f32 -1.442695, %v2671_v44 }
 0x2da   : > { %7095 = vpow2.f32 %v6233_v3 }
 0x2db   : > { %v2545_v12 = vpop.f32.mrf.mxu3 }
 0x2dc   : > { %v2634_v1 = vadd.f32 %v2545_v12, %v2343_v51 }
 0x2dd   : > { %v2597_v42 = vpop.f32.mrf.mxu0 }
 0x2de   : > { %v2673_v50 = vadd.f32 %v9261_v37, %v2634_v1  ;;  %v9269_v9 = vadd.f32 %v2597_v42, %v9169_v48  ;;  %v2666_v1 = vperm.slane %v8729_v27, 5  ;;  %v2348_v42 = vadd.f32 %v9173_v63, %v9175_v54 }
 0x2e0   : > { %v7096_v30 = vpop.eup %7095  ;;  %v6234_v17 = vmul.f32 -1.442695, %v2673_v50 }
 0x2e1   : > { %v2751_v13 = vadd.f32 1.0, %v7096_v30 }
 0x2e2   : > { %7097 = vpow2.f32 %v6234_v17 }
 0x2e3   : > { %7099 = vrcp.f32 %v2751_v13  ;;  %v2548_v29 = vpop.f32.mrf.mxu3  ;;  %v2776_v30 = vand.u32 2147483647, %v2751_v13  ;;  %vm2772_vm4 = vweird.f32 %v2751_v13 }
 0x2e4   : > { %v2636_v32 = vadd.f32 %v2548_v29, %v9167_v33  ;;  %v9278_v33 = vperm.slane %v2666_v1, 1  ;;  %v2778_v29 = vand.u32 2147483648, %v2751_v13 }
 0x2e5   : > { %v9272_v20 = vpop.f32.mrf.mxu0  ;;  %vm2777_vm13 = vcmp.eq.f32.partialorder %v2776_v30, 8.507059e+37 }
 0x2e6   : > { %v2675_v56 = vadd.f32 %v9261_v37, %v2636_v32  ;;  %v2779_v1 = vor.u32 1.1754944e-38, %v2778_v29 }
 0x2e8   : > { %v7098_v58 = vpop.eup %7097  ;;  %v6235_v44 = vmul.f32 -1.442695, %v2675_v56 }
 0x2e9   : > { %v7100_v3 = vpop.eup %7099  ;;  %v2752_v51 = vadd.f32 1.0, %v7098_v58 }
 0x2ea   : > { %v2768_v48 = vmul.f32 %v7100_v3, %v2751_v13  ;;  %7101 = vpow2.f32 %v6235_v44  ;;  %vm2773_vm12 = vweird.f32 %v7100_v3 }
 0x2eb   : > { %7103 = vrcp.f32 %v2752_v51  ;;  %v2550_v17 = vpop.f32.mrf.mxu3  ;;  %vm2774_vm14 = vmor %vm2772_vm4, %vm2773_vm12  ;;  %vm2787_vm4 = vweird.f32 %v2752_v51 }
 0x2ec   : > { %v2769_v12 = vsub.f32 1.0, %v2768_v48  ;;  %v2638_v50 = vadd.f32 %v2550_v17, %v2348_v42  ;;  %v2672_v48 = vadd.f32 %v9278_v33, %v2633_v28  ;;  %v2793_v28 = vand.u32 2147483648, %v2752_v51 }
 0x2ed   : > { %v2602_v32 = vpop.f32.mrf.mxu0 }
 0x2ee   : > { %v2770_v36 = vmul.f32 %v7100_v3, %v2769_v12  ;;  %v2677_v56 = vadd.f32 %v9261_v37, %v2638_v50  ;;  %v9282_v27 = vadd.f32 %v2602_v32, %v9183_v18  ;;  %v2392_v50 = vadd.f32 %v9163_v8, %v9157_v61  ;;  %v6307_v8 = vld [vmem:[#allocation2 + $0xf0] sm:$0xf] }
 0x2f0   : > { %v7102_v58 = vpop.eup %7101  ;;  %v2771_v63 = vadd.f32 %v7100_v3, %v2770_v36  ;;  %v6236_v54 = vmul.f32 -1.442695, %v2677_v56  ;;  %v2635_v6 = vadd.f32 %v2594_v26, %v2392_v50 }
 0x2f1   : > { %v7104_v44 = vpop.eup %7103  ;;  %v9285_v42 = vadd.f32 1.0, %v7102_v58 }
 0x2f2   : > { %v2775_v17 = vsel %vm2774_vm14, %v7100_v3, %v2771_v63  ;;  %v2783_v12 = vmul.f32 %v7104_v44, %v2752_v51  ;;  %7105 = vpow2.f32 %v6236_v54  ;;  %vm2788_vm12 = vweird.f32 %v7104_v44  ;;  %v6955_v54 = vld [vmem:[#allocation2 + $0xf4] sm:$0xf0] }
 0x2f3   : > { %v2780_v18 = vsel %vm2777_vm13, %v2779_v1, %v2775_v17  ;;  %7107 = vrcp.f32 %v9285_v42  ;;  %v2553_v36 = vpop.f32.mrf.mxu3  ;;  %v2791_v63 = vand.u32 2147483647, %v2752_v51  ;;  %v6308_v26 = vor.u32 %v6955_v54, %v6307_v8  ;;  %vm2789_vm14 = vmor %vm2787_vm4, %vm2788_vm12 }
 0x2f4   : > { %v3007_v13 = vmul.f32 %v2780_v18, %v2672_v48  ;;  %v3023_v32 = vsub.f32 1.0, %v2780_v18  ;;  %v2784_v56 = vsub.f32 1.0, %v2783_v12  ;;  %v2640_v29 = vadd.f32 %v2553_v36, %v9181_v46 }
 0x2f5   : > { %v9291_v58 = vpop.f32.mrf.mxu0  ;;  %v2794_v46 = vor.u32 1.1754944e-38, %v2793_v28  ;;  %vm2792_vm13 = vcmp.eq.f32.partialorder %v2791_v63, 8.507059e+37  ;;  %3312 = vmatpush.bf16.msra.mxu1 %v6308_v26  ;;  %vm2802_vm4 = vweird.f32 %v9285_v42 }
 0x2f6   : > { %v3039_v3 = vmul.f32 %v3023_v32, %v8748_v45  ;;  %v2785_v30 = vmul.f32 %v7104_v44, %v2784_v56  ;;  %v2679_v61 = vadd.f32 %v9261_v37, %v2640_v29  ;;  %v2674_v45 = vadd.f32 %v9278_v33, %v2635_v6 }
 0x2f8   : > { %v7106_v1 = vpop.eup %7105  ;;  %v9295_v17 = vadd.f32 %v3039_v3, %v3007_v13  ;;  %v2786_v48 = vadd.f32 %v7104_v44, %v2785_v30  ;;  %v6237_v18 = vmul.f32 -1.442695, %v2679_v61  ;;  %v2353_v13 = vadd.f32 %v9187_v49, %v9189_v21 }
 0x2f9   : > { %v7108_v12 = vpop.eup %7107  ;;  %v9297_v50 = vadd.f32 1.0, %v7106_v1  ;;  %v2806_v30 = vand.u32 2147483647, %v9285_v42  ;;  %v2808_v61 = vand.u32 2147483648, %v9285_v42 }
 0x2fa   : > { %v2790_v36 = vsel %vm2789_vm14, %v7104_v44, %v2786_v48  ;;  %v2798_v32 = vmul.f32 %v7108_v12, %v9285_v42  ;;  %vm2803_vm12 = vweird.f32 %v7108_v12 }
 0x2fb   : > { %v2795_v56 = vsel %vm2792_vm13, %v2794_v46, %v2790_v36  ;;  %7109 = vrcp.f32 %v9297_v50  ;;  %v2555_v51 = vpop.f32.mrf.mxu3  ;;  %vm2804_vm14 = vmor %vm2802_vm4, %vm2803_vm12  ;;  %v2809_v26 = vor.u32 1.1754944e-38, %v2808_v61  ;;  %vm2807_vm13 = vcmp.eq.f32.partialorder %v2806_v30, 8.507059e+37  ;;  %v6299_v30 = vld [vmem:[#allocation2 + $0xe0] sm:$0xf]  ;;  %v6953_v61 = vld [vmem:[#allocation2 + $0xe4] sm:$0xf0] }
 0x2fc   : > { %v3008_v29 = vmul.f32 %v2795_v56, %v2674_v45  ;;  %v3024_v3 = vsub.f32 1.0, %v2795_v56  ;;  %v2799_v28 = vsub.f32 1.0, %v2798_v32  ;;  %7111 = vpow2.f32 %v6237_v18 }
 0x2fd   : > { %v2642_v6 = vadd.f32 %v2555_v51, %v2353_v13  ;;  %v2607_v44 = vpop.f32.mrf.mxu0  ;;  %v2676_v18 = vadd.f32 %v9278_v33, %v9269_v9  ;;  %v2397_v36 = vadd.f32 %v9177_v34, %v9171_v43  ;;  %v2823_v9 = vand.u32 2147483648, %v9297_v50 }
 0x2fe   : > { %v3040_v63 = vmul.f32 %v3024_v3, %v8744_v19  ;;  %v2800_v8 = vmul.f32 %v7108_v12, %v2799_v28  ;;  %v9308_v49 = vadd.f32 %v2607_v44, %v9197_v52  ;;  %v2821_v43 = vand.u32 2147483647, %v9297_v50 }
 0x2ff   : > { %v2681_v21 = vadd.f32 %v9261_v37, %v2642_v6  ;;  %v2639_v3 = vadd.f32 %v9272_v20, %v2397_v36  ;;  %v6300_v44 = vor.u32 %v6953_v61, %v6299_v30  ;;  %vm2817_vm4 = vweird.f32 %v9297_v50 }
 0x300   : > { %v9311_v54 = vadd.f32 %v3040_v63, %v3008_v29  ;;  %v2801_v1 = vadd.f32 %v7108_v12, %v2800_v8  ;;  %v2824_v8 = vor.u32 1.1754944e-38, %v2823_v9 }
 0x301   : > { %v7110_v48 = vpop.eup %7109  ;;  %v6238_v46 = vmul.f32 -1.442695, %v2681_v21  ;;  %3313 = vmatpush.bf16.msra.mxu1 %v6300_v44 }
 0x302   : > { %v2805_v19 = vsel %vm2804_vm14, %v7108_v12, %v2801_v1  ;;  %v2813_v45 = vmul.f32 %v7110_v48, %v9297_v50  ;;  %v7112_v52 = vpop.eup %7111  ;;  %vm2818_vm12 = vweird.f32 %v7110_v48  ;;  %v2678_v1 = vadd.f32 %v9278_v33, %v2639_v3 }
 0x303   : > { %v2810_v32 = vsel %vm2807_vm13, %v2809_v26, %v2805_v19  ;;  %7113 = vpow2.f32 %v6238_v46  ;;  %v2558_v13 = vpop.f32.mrf.mxu3  ;;  %v9319_v51 = vadd.f32 1.0, %v7112_v52  ;;  %vm2819_vm14 = vmor %vm2817_vm4, %vm2818_vm12  ;;  %vm2822_vm13 = vcmp.eq.f32.partialorder %v2821_v43, 8.507059e+37 }
 0x304   : > { %v3009_v56 = vmul.f32 %v2810_v32, %v2676_v18  ;;  %v2814_v42 = vsub.f32 1.0, %v2813_v45  ;;  %v3025_v29 = vsub.f32 1.0, %v2810_v32  ;;  %v2644_v12 = vadd.f32 %v2558_v13, %v9195_v0 }
 0x305   : > { %v9324_v28 = vpop.f32.mrf.mxu0  ;;  %7115 = vrcp.f32 %v9319_v51  ;;  %v2358_v50 = vadd.f32 %v9201_v59, %v9203_v11  ;;  %v2836_v9 = vand.u32 2147483647, %v9319_v51  ;;  %v6309_v11 = vld [vmem:[#allocation2 + $0xf8] sm:$0xf0]  ;;  %vm2832_vm4 = vweird.f32 %v9319_v51 }
 0x306   : > { %v2815_v6 = vmul.f32 %v7110_v48, %v2814_v42  ;;  %v2683_v34 = vadd.f32 %v9261_v37, %v2644_v12  ;;  %v3041_v21 = vmul.f32 %v3025_v29, %v8817_v15  ;;  %v2838_v12 = vand.u32 2147483648, %v9319_v51 }
 0x308   : > { %v2816_v63 = vadd.f32 %v7110_v48, %v2815_v6  ;;  %v6239_v0 = vmul.f32 -1.442695, %v2683_v34  ;;  %v9334_v45 = vadd.f32 %v3041_v21, %v3009_v56  ;;  %v6954_v56 = vld [vmem:[#allocation2 + $0xf4] sm:$0xf]  ;;  %v2839_v21 = vor.u32 1.1754944e-38, %v2838_v12 }
 0x309   : > { %v7114_v20 = vpop.eup %7113  ;;  %v6312_v43 = vor.u32 %v6954_v56, %v6309_v11 }
 0x30a   : > { %v2820_v26 = vsel %vm2819_vm14, %v7110_v48, %v2816_v63  ;;  %v9332_v46 = vadd.f32 1.0, %v7114_v20  ;;  %7117 = vpow2.f32 %v6239_v0  ;;  %v2680_v0 = vadd.f32 %v9278_v33, %v9282_v27 }
 0x30b   : > { %v2825_v18 = vsel %vm2822_vm13, %v2824_v8, %v2820_v26  ;;  %v2560_v19 = vpop.f32.mrf.mxu3  ;;  %v7116_v52 = vpop.eup %7115  ;;  %3361 = vmatpush.bf16.msra.mxu2 %v6312_v43  ;;  %vm2837_vm13 = vcmp.eq.f32.partialorder %v2836_v9, 8.507059e+37 }
 0x30c   : > { %v3010_v36 = vmul.f32 %v2825_v18, %v2678_v1  ;;  %v3026_v32 = vsub.f32 1.0, %v2825_v18  ;;  %7119 = vrcp.f32 %v9332_v46  ;;  %v2828_v15 = vmul.f32 %v7116_v52, %v9319_v51  ;;  %v6291_v51 = vld [vmem:[#allocation2 + $0xd0] sm:$0xf]  ;;  %v6951_v18 = vld [vmem:[#allocation2 + $0xd4] sm:$0xf0] }
 0x30d   : > { %v2612_v13 = vpop.f32.mrf.mxu0  ;;  %v2646_v48 = vadd.f32 %v2560_v19, %v2358_v50  ;;  %vm2833_vm12 = vweird.f32 %v7116_v52  ;;  %v2853_v27 = vand.u32 2147483648, %v9332_v46 }
 0x30e   : > { %v9341_v42 = vadd.f32 %v2612_v13, %v9211_v62  ;;  %v3042_v29 = vmul.f32 %v3026_v32, %v8813_v57  ;;  %v2829_v3 = vsub.f32 1.0, %v2828_v15  ;;  %v2402_v57 = vadd.f32 %v9191_v24, %v9185_v47  ;;  %vm2834_vm14 = vmor %vm2832_vm4, %vm2833_vm12 }
 0x30f   : > { %v2685_v59 = vadd.f32 %v9261_v37, %v2646_v48  ;;  %v6292_v48 = vor.u32 %v6951_v18, %v6291_v51  ;;  %vm2847_vm4 = vweird.f32 %v9332_v46 }
 0x310   : > { %v9347_v30 = vadd.f32 %v3042_v29, %v3010_v36  ;;  %v7118_v61 = vpop.eup %7117  ;;  %v2830_v6 = vmul.f32 %v7116_v52, %v2829_v3  ;;  %v2643_v50 = vadd.f32 %v9291_v58, %v2402_v57  ;;  %v2851_v36 = vand.u32 2147483647, %v9332_v46 }
 0x311   : > { %v9349_v62 = vadd.f32 1.0, %v7118_v61  ;;  %v6240_v44 = vmul.f32 -1.442695, %v2685_v59  ;;  %v2854_v58 = vor.u32 1.1754944e-38, %v2853_v27  ;;  %3314 = vmatpush.bf16.msra.mxu1 %v6292_v48 }
 0x312   : > { %v7120_v34 = vpop.eup %7119  ;;  %v2831_v63 = vadd.f32 %v7116_v52, %v2830_v6  ;;  %v2682_v56 = vadd.f32 %v9278_v33, %v2643_v50 }
 0x313   : > { %v2843_v20 = vmul.f32 %v7120_v34, %v9332_v46  ;;  %v2563_v8 = vpop.f32.mrf.mxu3  ;;  %7121 = vrcp.f32 %v9349_v62  ;;  %vm2848_vm12 = vweird.f32 %v7120_v34 }
 0x314   : > { %v2835_v1 = vsel %vm2834_vm14, %v7116_v52, %v2831_v63  ;;  %7123 = vpow2.f32 %v6240_v44  ;;  %v2648_v47 = vadd.f32 %v2563_v8, %v9209_v38  ;;  %vm2849_vm14 = vmor %vm2847_vm4, %vm2848_vm12  ;;  %v6301_v8 = vld [vmem:[#allocation2 + $0xe8] sm:$0xf0]  ;;  %vm2862_vm4 = vweird.f32 %v9349_v62 }
 0x315   : > { %v2844_v26 = vsub.f32 1.0, %v2843_v20  ;;  %v9359_v24 = vpop.f32.mrf.mxu0  ;;  %v2840_v19 = vsel %vm2837_vm13, %v2839_v21, %v2835_v1  ;;  %vm2852_vm13 = vcmp.eq.f32.partialorder %v2851_v36, 8.507059e+37  ;;  %v6952_v20 = vld [vmem:[#allocation2 + $0xe4] sm:$0xf] }
 0x316   : > { %v3011_v32 = vmul.f32 %v2840_v19, %v2680_v0  ;;  %v2687_v52 = vadd.f32 %v9261_v37, %v2648_v47  ;;  %v3027_v13 = vsub.f32 1.0, %v2840_v19  ;;  %v2866_v0 = vand.u32 2147483647, %v9349_v62 }
 0x317   : > { %v2845_v15 = vmul.f32 %v7120_v34, %v2844_v26  ;;  %v6304_v26 = vor.u32 %v6952_v20, %v6301_v8 }
 0x318   : > { %v6241_v38 = vmul.f32 -1.442695, %v2687_v52  ;;  %v3043_v43 = vmul.f32 %v3027_v13, %v8861_v39 }
 0x319   : > { %v2846_v29 = vadd.f32 %v7120_v34, %v2845_v15  ;;  %v7122_v3 = vpop.eup %7121  ;;  %3362 = vmatpush.bf16.msra.mxu2 %v6304_v26 }
 0x31a   : > { %v7124_v9 = vpop.eup %7123  ;;  %v2858_v59 = vmul.f32 %v7122_v3, %v9349_v62  ;;  %7125 = vpow2.f32 %v6241_v38  ;;  %vm2863_vm12 = vweird.f32 %v7122_v3  ;;  %v9377_v39 = vadd.f32 %v3043_v43, %v3011_v32 }
 0x31b   : > { %v2850_v12 = vsel %vm2849_vm14, %v7120_v34, %v2846_v29  ;;  %v9368_v11 = vpop.f32.mrf.mxu3  ;;  %v2758_v6 = vadd.f32 1.0, %v7124_v9  ;;  %v2868_v34 = vand.u32 2147483648, %v9349_v62  ;;  %vm2864_vm14 = vmor %vm2862_vm4, %vm2863_vm12  ;;  %v2407_v29 = vadd.f32 %v9205_v23, %v9199_v16 }
 0x31c   : > { %v2855_v61 = vsel %vm2852_vm13, %v2854_v58, %v2850_v12  ;;  %v2859_v57 = vsub.f32 1.0, %v2858_v59  ;;  %vm2867_vm13 = vcmp.eq.f32.partialorder %v2866_v0, 8.507059e+37  ;;  %v6283_v58 = vld [vmem:[#allocation2 + $0xc0] sm:$0xf] }
 0x31d   : > { %v3012_v46 = vmul.f32 %v2855_v61, %v2682_v56  ;;  %v3028_v44 = vsub.f32 1.0, %v2855_v61  ;;  %v2617_v63 = vpop.f32.mrf.mxu0  ;;  %7127 = vrcp.f32 %v2758_v6  ;;  %v2869_v19 = vor.u32 1.1754944e-38, %v2868_v34  ;;  %v6950_v34 = vld [vmem:[#allocation2 + $0xd4] sm:$0xf] }
 0x31e   : > { %v2860_v21 = vmul.f32 %v7122_v3, %v2859_v57  ;;  %v9374_v1 = vadd.f32 %v2617_v63, %v9225_v2  ;;  %v2684_v2 = vadd.f32 %v9278_v33, %v9308_v49  ;;  %v6949_v49 = vld [vmem:[#allocation2 + $0xc4] sm:$0xf0]  ;;  %v2647_v9 = vadd.f32 %v9324_v28, %v2407_v29 }
 0x31f   : > { %v3044_v47 = vmul.f32 %v3028_v44, %v8857_v22  ;;  %v2883_v12 = vand.u32 2147483648, %v2758_v6  ;;  %v6284_v61 = vor.u32 %v6949_v49, %v6283_v58  ;;  %vm2877_vm4 = vweird.f32 %v2758_v6 }
 0x320   : > { %v7126_v51 = vpop.eup %7125  ;;  %v2861_v18 = vadd.f32 %v7122_v3, %v2860_v21  ;;  %v6293_v21 = vld [vmem:[#allocation2 + $0xd8] sm:$0xf0] }
 0x321   : > { %v9380_v50 = vadd.f32 1.0, %v7126_v51  ;;  %v9382_v36 = vadd.f32 %v3044_v47, %v3012_v46  ;;  %v2881_v46 = vand.u32 2147483647, %v2758_v6  ;;  %3315 = vmatpush.bf16.msra.mxu1 %v6284_v61  ;;  %v2884_v28 = vor.u32 1.1754944e-38, %v2883_v12  ;;  %v6419_v61 = vld [vmem:[#allocation2 + $0x70] sm:$0xf] }
 0x322   : > { %v2865_v27 = vsel %vm2864_vm14, %v7122_v3, %v2861_v18 }
 0x323   : > { %v2568_v15 = vpop.f32.mrf.mxu3  ;;  %v7128_v22 = vpop.eup %7127  ;;  %v2870_v32 = vsel %vm2867_vm13, %v2869_v19, %v2865_v27  ;;  %7129 = vrcp.f32 %v9380_v50  ;;  %vm2882_vm13 = vcmp.eq.f32.partialorder %v2881_v46, 8.507059e+37  ;;  %v2896_v47 = vand.u32 2147483647, %v9380_v50  ;;  %v6938_v46 = vld [vmem:[#allocation2 + $0x74] sm:$0xf] }
 0x324   : > { %v3013_v52 = vmul.f32 %v2870_v32, %v2684_v2  ;;  %v3029_v13 = vsub.f32 1.0, %v2870_v32  ;;  %v2873_v62 = vmul.f32 %v7128_v22, %v2758_v6  ;;  %v2652_v38 = vadd.f32 %v2568_v15, %v9223_v5 }
 0x325   : > { %v9387_v48 = vpop.f32.mrf.mxu0  ;;  %vm2878_vm12 = vweird.f32 %v7128_v22  ;;  %v2898_v6 = vand.u32 2147483648, %v9380_v50  ;;  %v6296_v27 = vor.u32 %v6950_v34, %v6293_v21 }
 0x326   : > { %v2874_v56 = vsub.f32 1.0, %v2873_v62  ;;  %v3045_v3 = vmul.f32 %v3029_v13, %v8916_v53  ;;  %v2691_v59 = vadd.f32 %v9261_v37, %v2652_v38  ;;  %v2686_v53 = vadd.f32 %v9278_v33, %v2647_v9  ;;  %vm2879_vm14 = vmor %vm2877_vm4, %vm2878_vm12 }
 0x327   : > { %vm2892_vm4 = vweird.f32 %v9380_v50  ;;  %3363 = vmatpush.bf16.msra.mxu2 %v6296_v27  ;;  %v2688_v13 = vadd.f32 %v9278_v33, %v9341_v42  ;;  %v6936_v27 = vld [vmem:[#allocation2 + $0x64] sm:$0xf] }
 0x328   : > { %v2875_v43 = vmul.f32 %v7128_v22, %v2874_v56  ;;  %v6243_v57 = vmul.f32 -1.442695, %v2691_v59  ;;  %v9395_v16 = vadd.f32 %v3045_v3, %v3013_v52  ;;  %v6947_v3 = vld [vmem:[#allocation2 + $0xb4] sm:$0xf0] }
 0x329   : > { %v7130_v44 = vpop.eup %7129 }
 0x32a   : > { %v2876_v23 = vadd.f32 %v7128_v22, %v2875_v43  ;;  %v2888_v5 = vmul.f32 %v7130_v44, %v9380_v50  ;;  %7131 = vpow2.f32 %v6243_v57  ;;  %vm2893_vm12 = vweird.f32 %v7130_v44  ;;  %v6939_v43 = vld [vmem:[#allocation2 + $0x74] sm:$0xf0] }
 0x32b   : > { %v9398_v63 = vpop.f32.mrf.mxu3  ;;  %v6420_v34 = vor.u32 %v6939_v43, %v6419_v61  ;;  %v6405_v61 = vld [vmem:[#allocation2 + $0x58] sm:$0xf0] }
 0x32c   : > { %v2880_v20 = vsel %vm2879_vm14, %v7128_v22, %v2876_v23  ;;  %v2889_v8 = vsub.f32 1.0, %v2888_v5  ;;  %vm2894_vm14 = vmor %vm2892_vm4, %vm2893_vm12  ;;  %v2899_v22 = vor.u32 1.1754944e-38, %v2898_v6  ;;  %v6937_v6 = vld [vmem:[#allocation2 + $0x64] sm:$0xf0] }
 0x32d   : > { %v2622_v0 = vpop.f32.mrf.mxu0  ;;  %v2885_v26 = vsel %vm2882_vm13, %v2884_v28, %v2880_v20  ;;  %vm2897_vm13 = vcmp.eq.f32.partialorder %v2896_v47, 8.507059e+37  ;;  %v6411_v47 = vld [vmem:[#allocation2 + $0x60] sm:$0xf]  ;;  %3490 = vmatpush.bf16.msra.mxu3 %v6420_v34 }
 0x32e   : > { %v9404_v51 = vadd.f32 %v2622_v0, %v9239_v4  ;;  %v3014_v18 = vmul.f32 %v2885_v26, %v2686_v53  ;;  %v3030_v19 = vsub.f32 1.0, %v2885_v26  ;;  %v2890_v2 = vmul.f32 %v7130_v44, %v2889_v8  ;;  %v6948_v8 = vld [vmem:[#allocation2 + $0xc4] sm:$0xf]  ;;  %v6285_v0 = vld [vmem:[#allocation2 + $0xc8] sm:$0xf0] }
 0x32f   : > { %v6288_v26 = vor.u32 %v6948_v8, %v6285_v0  ;;  %v6932_v8 = vld [vmem:[#allocation2 + $0x44] sm:$0xf]  ;;  %v2377_v0 = vpop.f32.mrf.mxu1 }
 0x330   : > { %v2891_v15 = vadd.f32 %v7130_v44, %v2890_v2  ;;  %v3046_v32 = vmul.f32 %v3030_v19, %v8912_v41  ;;  %v7132_v52 = vpop.eup %7131  ;;  %v6275_v41 = vld [vmem:[#allocation2 + $0xb0] sm:$0xf]  ;;  %v6412_v2 = vor.u32 %v6937_v6, %v6411_v47 }
 0x331   : > { %v2761_v38 = vadd.f32 1.0, %v7132_v52  ;;  %v6276_v9 = vor.u32 %v6947_v3, %v6275_v41  ;;  %3364 = vmatpush.bf16.msra.mxu2 %v6288_v26  ;;  %v6935_v41 = vld [vmem:[#allocation2 + $0x54] sm:$0xf0]  ;;  %v6934_v3 = vld [vmem:[#allocation2 + $0x54] sm:$0xf] }
 0x332   : > { %v2895_v62 = vsel %vm2894_vm14, %v7130_v44, %v2891_v15  ;;  %v9413_v58 = vadd.f32 %v3046_v32, %v3014_v18  ;;  %v6421_v44 = vld [vmem:[#allocation2 + $0x78] sm:$0xf0]  ;;  %v6413_v15 = vld [vmem:[#allocation2 + $0x68] sm:$0xf0]  ;;  %3491 = vmatpush.bf16.msra.mxu3 %v6412_v2 }
 0x333   : > { %v2573_v4 = vpop.f32.mrf.mxu3  ;;  %v9410_v29 = vsel %vm2897_vm13, %v2899_v22, %v2895_v62  ;;  %7133 = vrcp.f32 %v2761_v38  ;;  %3316 = vmatpush.bf16.msra.mxu1 %v6276_v9  ;;  %v2926_v5 = vand.u32 2147483647, %v2761_v38  ;;  %v2928_v20 = vand.u32 2147483648, %v2761_v38  ;;  %v6267_v9 = vld [vmem:[#allocation2 + $0xa0] sm:$0xf] }
 0x334   : > { %v2656_v56 = vadd.f32 %v2573_v4, %v9237_v31  ;;  %v9416_v50 = vmul.f32 %v9410_v29, %v2688_v13  ;;  %v6424_v21 = vor.u32 %v6938_v46, %v6421_v44  ;;  %vm2922_vm4 = vweird.f32 %v2761_v38  ;;  %v6277_v2 = vld [vmem:[#allocation2 + $0xb8] sm:$0xf0] }
 0x335   : > { %v9418_v49 = vpop.f32.mrf.mxu0  ;;  %v6416_v32 = vor.u32 %v6936_v27, %v6413_v15  ;;  %vm2927_vm13 = vcmp.eq.f32.partialorder %v2926_v5, 8.507059e+37  ;;  %v2929_v62 = vor.u32 1.1754944e-38, %v2928_v20  ;;  %v6933_v5 = vld [vmem:[#allocation2 + $0x44] sm:$0xf0]  ;;  %v6408_v20 = vor.u32 %v6934_v3, %v6405_v61  ;;  %v6387_v15 = vld [vmem:[#allocation2 + $0x30] sm:$0xf] }
 0x336   : > { %v2695_v42 = vadd.f32 %v9261_v37, %v2656_v56  ;;  %3539 = vmatpush.bf16.msra.mxu0 %v6424_v21  ;;  %v6403_v56 = vld [vmem:[#allocation2 + $0x50] sm:$0xf]  ;;  %v2378_v21 = vadd.f32 %v2377_v0, %v9257_v55  ;;  %v6930_v55 = vld [vmem:[#allocation2 + $0x34] sm:$0xf] }
 0x338   : > { %v6245_v12 = vmul.f32 -1.442695, %v2695_v42 }
 0x339   : > { %v7134_v31 = vpop.eup %7133 }
 0x33a   : > { %7135 = vpow2.f32 %v6245_v12  ;;  %v2918_v57 = vmul.f32 %v7134_v31, %v2761_v38  ;;  %vm2923_vm12 = vweird.f32 %v7134_v31  ;;  %v6945_v12 = vld [vmem:[#allocation2 + $0xa4] sm:$0xf0]  ;;  %3540 = vmatpush.bf16.msra.mxu0 %v6416_v32 }
 0x33b   : > { %v9421_v59 = vpop.f32.mrf.mxu3  ;;  %vm9430_vm14 = vmor %vm2922_vm4, %vm2923_vm12 }
 0x33c   : > { %v2919_v28 = vsub.f32 1.0, %v2918_v57 }
 0x33d   : > { %v2627_v23 = vpop.f32.mrf.mxu0 }
 0x33e   : > { %v9424_v53 = vadd.f32 %v2627_v23, %v9253_v14  ;;  %v2920_v19 = vmul.f32 %v7134_v31, %v2919_v28  ;;  %v3031_v14 = vsub.f32 1.0, %v9410_v29  ;;  %v2692_v29 = vadd.f32 %v9278_v33, %v9374_v1  ;;  %v6395_v23 = vld [vmem:[#allocation2 + $0x40] sm:$0xf]  ;;  %3541 = vmatpush.bf16.msra.mxu0 %v6408_v20 }
 0x33f   : > { %v6268_v28 = vor.u32 %v6945_v12, %v6267_v9  ;;  %v6404_v1 = vor.u32 %v6935_v41, %v6403_v56  ;;  %v6396_v47 = vor.u32 %v6933_v5, %v6395_v23  ;;  %v6379_v12 = vld [vmem:[#allocation2 + $0x20] sm:$0xf]  ;;  %v2696_v23 = vadd.f32 %v9278_v33, %v9404_v51  ;;  %v6943_v51 = vld [vmem:[#allocation2 + $0x94] sm:$0xf0] }
 0x340   : > { %v7136_v18 = vpop.eup %7135  ;;  %v2921_v52 = vadd.f32 %v7134_v31, %v2920_v19  ;;  %v3047_v46 = vmul.f32 %v3031_v14, %v8970_v60  ;;  %v6946_v19 = vld [vmem:[#allocation2 + $0xb4] sm:$0xf] }
 0x341   : > { %v9427_v22 = vadd.f32 1.0, %v7136_v18  ;;  %3317 = vmatpush.bf16.msra.mxu1 %v6268_v28  ;;  %3492 = vmatpush.bf16.msra.mxu3 %v6404_v1  ;;  %v6280_v32 = vor.u32 %v6946_v19, %v6277_v2  ;;  %v6381_v28 = vld [vmem:[#allocation2 + $0x28] sm:$0xf0]  ;;  %v6261_v19 = vld [vmem:[#allocation2 + $0x98] sm:$0xf0] }
 0x342   : > { %v2925_v38 = vsel %vm9430_vm14, %v7134_v31, %v2921_v52  ;;  %v6397_v31 = vld [vmem:[#allocation2 + $0x48] sm:$0xf0]  ;;  %v9444_v60 = vadd.f32 %v3047_v46, %v9416_v50  ;;  %v6931_v52 = vld [vmem:[#allocation2 + $0x34] sm:$0xf0]  ;;  %v6928_v46 = vld [vmem:[#allocation2 + $0x24] sm:$0xf] }
 0x343   : > { %v2578_v4 = vpop.f32.mrf.mxu3  ;;  %7137 = vrcp.f32 %v9427_v22  ;;  %v2930_v43 = vsel %vm2927_vm13, %v2929_v62, %v2925_v38  ;;  %v6400_v27 = vor.u32 %v6932_v8, %v6397_v31  ;;  %v6389_v62 = vld [vmem:[#allocation2 + $0x38] sm:$0xf0]  ;;  %v2958_v50 = vand.u32 2147483648, %v9427_v22  ;;  %3365 = vmatpush.bf16.msra.mxu2 %v6280_v32  ;;  %v6944_v38 = vld [vmem:[#allocation2 + $0xa4] sm:$0xf] }
 0x344   : > { %v2660_v42 = vadd.f32 %v2578_v4, %v9251_v35  ;;  %v3017_v44 = vmul.f32 %v2930_v43, %v2692_v29  ;;  %v3033_v26 = vsub.f32 1.0, %v2930_v43  ;;  %v2956_v4 = vand.u32 2147483647, %v9427_v22  ;;  %v6929_v43 = vld [vmem:[#allocation2 + $0x24] sm:$0xf0] }
 0x345   : > { %3493 = vmatpush.bf16.msra.mxu3 %v6396_v47  ;;  %v6388_v56 = vor.u32 %v6931_v52, %v6387_v15  ;;  %3542 = vmatpush.bf16.msra.mxu0 %v6400_v27  ;;  %v6392_v9 = vor.u32 %v6930_v55, %v6389_v62  ;;  %vm2952_vm4 = vweird.f32 %v9427_v22  ;;  %v2959_v1 = vor.u32 1.1754944e-38, %v2958_v50  ;;  %v6942_v47 = vld [vmem:[#allocation2 + $0x94] sm:$0xf]  ;;  %v6371_v2 = vld [vmem:[#allocation2 + $0x10] sm:$0xf] }
 0x346   : > { %v2699_v57 = vadd.f32 %v9261_v37, %v2660_v42  ;;  %v3049_v41 = vmul.f32 %v3033_v26, %v9024_v25  ;;  %v6269_v42 = vld [vmem:[#allocation2 + $0xa8] sm:$0xf0]  ;;  %v6380_v8 = vor.u32 %v6929_v43, %v6379_v12  ;;  %vm2957_vm13 = vcmp.eq.f32.partialorder %v2956_v4, 8.507059e+37  ;;  %v6251_v26 = vld [vmem:[#allocation2 + $0x80] sm:$0xf] }
 0x347   : > { %v6272_v61 = vor.u32 %v6944_v38, %v6269_v42  ;;  %v6926_v15 = vld [vmem:[#allocation2 + $0x14] sm:$0xf]  ;;  %v6373_v32 = vld [vmem:[#allocation2 + $0x18] sm:$0xf0]  ;;  %v6940_v52 = vld [vmem:[#allocation2 + $0x84] sm:$0xf] }
 0x348   : > { %v6247_v35 = vmul.f32 -1.442695, %v2699_v57  ;;  %v9457_v31 = vadd.f32 %v3049_v41, %v3017_v44  ;;  %v6927_v44 = vld [vmem:[#allocation2 + $0x14] sm:$0xf0]  ;;  %v6376_v62 = vor.u32 %v6926_v15, %v6373_v32  ;;  %v6253_v4 = vld [vmem:[#allocation2 + $0x88] sm:$0xf0] }
 0x349   : > { %v7138_v34 = vpop.eup %7137  ;;  %3366 = vmatpush.bf16.msra.mxu2 %v6272_v61  ;;  %3494 = vmatpush.bf16.msra.mxu3 %v6388_v56  ;;  %v6363_v50 = vld [vmem:[#allocation2] sm:$0xf]  ;;  %v6256_v41 = vor.u32 %v6940_v52, %v6253_v4  ;;  %v6365_v38 = vld [vmem:[#allocation2 + $0x8] sm:$0xf0]  ;;  %v11330_v52 = vld [vmem:[#allocation13_spill] sm:$0xff] }
 0x34a   : > { %v2948_v6 = vmul.f32 %v7138_v34, %v9427_v22  ;;  %7139 = vpow2.f32 %v6247_v35  ;;  %vm2953_vm12 = vweird.f32 %v7138_v34  ;;  %v6259_v35 = vld [vmem:[#allocation2 + $0x90] sm:$0xf]  ;;  %3543 = vmatpush.bf16.msra.mxu0 %v6392_v9 }
 0x34b   : > { %v2580_v18 = vpop.f32.mrf.mxu3  ;;  %vm2954_vm14 = vmor %vm2952_vm4, %vm2953_vm12  ;;  %v6260_v27 = vor.u32 %v6943_v51, %v6259_v35 }
 0x34c   : > { %v2662_v14 = vadd.f32 %v2580_v18, %v2378_v21  ;;  %v2949_v13 = vsub.f32 1.0, %v2948_v6  ;;  %v6384_v21 = vor.u32 %v6928_v46, %v6381_v28  ;;  %v6941_v18 = vld [vmem:[#allocation2 + $0x84] sm:$0xf0]  ;;  %v6531_v46 = vld [vmem:[#allocation2 + $0x170] sm:$0xf] }
 0x34d   : > { %3495 = vmatpush.bf16.msra.mxu3 %v6380_v8  ;;  %3318 = vmatpush.bf16.msra.mxu1 %v6260_v27 }
 0x34e   : > { %v2950_v3 = vmul.f32 %v7138_v34, %v2949_v13  ;;  %v2701_v29 = vadd.f32 %v9261_v37, %v2662_v14  ;;  %3544 = vmatpush.bf16.msra.mxu0 %v6384_v21  ;;  %v6372_v14 = vor.u32 %v6927_v44, %v6371_v2  ;;  %v6252_v13 = vor.u32 %v6941_v18, %v6251_v26  ;;  %v2629_v44 = vpop.f32.mrf.mxu0 }
 0x34f   : > { %v2700_v21 = vadd.f32 %v9278_v33, %v9424_v53 }
 0x350   : > { %v7140_v57 = vpop.eup %7139  ;;  %v2951_v5 = vadd.f32 %v7138_v34, %v2950_v3  ;;  %v6248_v25 = vmul.f32 -1.442695, %v2701_v29  ;;  %v6925_v3 = vld [vmem:[#allocation2 + $0x4] sm:$0xf0]  ;;  %v6924_v29 = vld [vmem:[#allocation2 + $0x4] sm:$0xf] }
 0x351   : > { %v9455_v20 = vadd.f32 1.0, %v7140_v57  ;;  %3496 = vmatpush.bf16.msra.mxu3 %v6372_v14  ;;  %v6364_v12 = vor.u32 %v6925_v3, %v6363_v50  ;;  %v6368_v43 = vor.u32 %v6924_v29, %v6365_v38  ;;  %v6971_v57 = vld [vmem:[#allocation2 + $0x174] sm:$0xf0]  ;;  %3319 = vmatpush.bf16.msra.mxu1 %v6252_v13  ;;  %v6533_v38 = vld [vmem:[#allocation2 + $0x178] sm:$0xf0] }
 0x352   : > { %v2955_v0 = vsel %vm2954_vm14, %v7138_v34, %v2951_v5  ;;  %7141 = vpow2.f32 %v6248_v25  ;;  %v6264_v34 = vor.u32 %v6942_v47, %v6261_v19  ;;  %3545 = vmatpush.bf16.msra.mxu0 %v6376_v62  ;;  %v6532_v25 = vor.u32 %v6971_v57, %v6531_v46  ;;  %v2426_v47 = vpop.f32.mrf.mxu2  ;;  %v11331_v46 = vld [vmem:[#allocation39_spill] sm:$0xff] }
 0x353   : > { %v2960_v22 = vsel %vm2957_vm13, %v2959_v1, %v2955_v0  ;;  %7143 = vrcp.f32 %v9455_v20  ;;  %v2988_v28 = vand.u32 2147483648, %v9455_v20  ;;  %v2986_v8 = vand.u32 2147483647, %v9455_v20 }
 0x354   : > { %v3019_v6 = vmul.f32 %v2960_v22, %v2696_v23  ;;  %v3035_v55 = vsub.f32 1.0, %v2960_v22  ;;  %3367 = vmatpush.bf16.msra.mxu2 %v6264_v34  ;;  %vm2982_vm4 = vweird.f32 %v9455_v20  ;;  %v11329_v34 = vld [vmem:[#allocation18_spill] sm:$0xff] }
 0x355   : > { %3497 = vmatpush.bf16.msra.mxu3 %v6364_v12  ;;  %3693 = vmatpush.bf16.msrb.mxu1 %v6532_v25  ;;  %vm2987_vm13 = vcmp.eq.f32.partialorder %v2986_v8, 8.507059e+37  ;;  %v2427_v14 = vadd.f32 %v2426_v47, %v11329_v34 }
 0x356   : > { %v3051_v23 = vmul.f32 %v3035_v55, %v9081_v10  ;;  %3546 = vmatpush.bf16.msra.mxu0 %v6368_v43  ;;  %v2989_v10 = vor.u32 1.1754944e-38, %v2988_v28 }
 0x357   : > { %v2663_v13 = vadd.f32 %v2629_v44, %v2427_v14  ;;  %v6515_v14 = vld [vmem:[#allocation2 + $0x150] sm:$0xf] }
 0x358   : > { %v7142_v56 = vpop.eup %7141  ;;  %3368 = vmatpush.bf16.msra.mxu2 %v6256_v41  ;;  %v9464_v0 = vadd.f32 %v3051_v23, %v3019_v6  ;;  %v2363_v6 = vadd.f32 %v9215_v7, %v9217_v40  ;;  %v6523_v7 = vld [vmem:[#allocation2 + $0x160] sm:$0xf]  ;;  %v6970_v41 = vld [vmem:[#allocation2 + $0x174] sm:$0xf]  ;;  %v9483_v23 = vmax.f32 %v9295_v17, 0.0  ;;  %v11334_v17 = vld [vmem:[#allocation36_spill] sm:$0xff] }
 0x359   : > { %v7144_v42 = vpop.eup %7143  ;;  %v2766_v9 = vadd.f32 1.0, %v7142_v56  ;;  %v6969_v56 = vld [vmem:[#allocation2 + $0x164] sm:$0xf0]  ;;  %v2702_v12 = vadd.f32 %v9278_v33, %v2663_v13  ;;  %v9518_v13 = vmax.f32 %v9347_v30, 0.0 }
 0x35a   : > { %v2978_v61 = vmul.f32 %v7144_v42, %v9455_v20  ;;  %vm2983_vm12 = vweird.f32 %v7144_v42  ;;  %v2650_v55 = vadd.f32 %v9368_v11, %v2363_v6  ;;  %v6524_v29 = vor.u32 %v6969_v56, %v6523_v7 }
 0x35b   : > { %7145 = vrcp.f32 %v2766_v9  ;;  %vm2984_vm14 = vmor %vm2982_vm4, %vm2983_vm12  ;;  %v3001_v15 = vand.u32 2147483647, %v2766_v9  ;;  %v3003_v20 = vand.u32 2147483648, %v2766_v9  ;;  %vm2997_vm4 = vweird.f32 %v2766_v9 }
 0x35c   : > { %v2979_v5 = vsub.f32 1.0, %v2978_v61  ;;  %v6536_v61 = vor.u32 %v6970_v41, %v6533_v38  ;;  %3694 = vmatpush.bf16.msrb.mxu1 %v6524_v29  ;;  %v3162_v56 = vrot.slane %v9518_v13, 7  ;;  %v3090_v41 = vrot.slane %v9518_v13, 6  ;;  %v11341_v38 = vld [vmem:[#allocation14_spill] sm:$0xff] }
 0x35d   : > { %v3004_v50 = vor.u32 1.1754944e-38, %v3003_v20 }
 0x35e   : > { %v2980_v1 = vmul.f32 %v7144_v42, %v2979_v5  ;;  %3742 = vmatpush.bf16.msrb.mxu2 %v6536_v61 }
 0x360   : > { %v2981_v35 = vadd.f32 %v7144_v42, %v2980_v1 }
 0x361   : > { %v7146_v51 = vpop.eup %7145 }
 0x362   : > { %v2985_v22 = vsel %vm2984_vm14, %v7144_v42, %v2981_v35  ;;  %v2993_v26 = vmul.f32 %v7146_v51, %v2766_v9  ;;  %vm2998_vm12 = vweird.f32 %v7146_v51  ;;  %v2689_v42 = vadd.f32 %v9261_v37, %v2650_v55  ;;  %v6525_v55 = vld [vmem:[#allocation2 + $0x168] sm:$0xf0] }
 0x363   : > { %v2990_v18 = vsel %vm2987_vm13, %v2989_v10, %v2985_v22  ;;  %vm2999_vm14 = vmor %vm2997_vm4, %vm2998_vm12  ;;  %vm3002_vm13 = vcmp.eq.f32.partialorder %v3001_v15, 8.507059e+37  ;;  %v9479_v9 = vmax.f32 %v9311_v54, 0.0  ;;  %v3159_v35 = vrot.slane %v9483_v23, 7 }
 0x364   : > { %v3021_v19 = vmul.f32 %v2990_v18, %v2700_v21  ;;  %v3037_v2 = vsub.f32 1.0, %v2990_v18  ;;  %v2994_v27 = vsub.f32 1.0, %v2993_v26  ;;  %v6242_v5 = vmul.f32 -1.442695, %v2689_v42  ;;  %v11333_v21 = vld [vmem:[#allocation34_spill] sm:$0xff]  ;;  %v11335_v26 = vld [vmem:[#allocation11_spill] sm:$0xff] }
 0x365   : > { %v3160_v1 = vrot.slane %v9479_v9, 7  ;;  %v3088_v8 = vrot.slane %v9479_v9, 6  ;;  %v2368_v22 = vadd.f32 %v11334_v17, %v11333_v21  ;;  %vm11336_vm12 = vcmp.lt.s32.totalorder %v11335_v26, 2  ;;  %v11342_v42 = vld [vmem:[#allocation17_spill] sm:$0xff]  ;;  %v6965_v21 = vld [vmem:[#allocation2 + $0x144] sm:$0xf0] }
 0x366   : > { %v2995_v32 = vmul.f32 %v7146_v51, %v2994_v27  ;;  %v3053_v53 = vmul.f32 %v3037_v2, %v11330_v52  ;;  %7147 = vpow2.f32 %v6242_v5  ;;  %vm11337_vm4 = vmmov %vm11336_vm12  ;;  %v6968_v52 = vld [vmem:[#allocation2 + $0x164] sm:$0xf] }
 0x367   : > { %v3189_v47 = vsel %vm11115_vm11, %v3159_v35, %v3160_v1  ;;  %v2654_v44 = vadd.f32 %v9398_v63, %v2368_v22  ;;  %v6517_v22 = vld [vmem:[#allocation2 + $0x158] sm:$0xf0] }
 0x368   : > { %v2996_v62 = vadd.f32 %v7146_v51, %v2995_v32  ;;  %v9474_v4 = vadd.f32 %v3053_v53, %v3021_v19  ;;  %v6967_v32 = vld [vmem:[#allocation2 + $0x154] sm:$0xf0] }
 0x369   : > { %v6516_v53 = vor.u32 %v6967_v32, %v6515_v14  ;;  %v2693_v63 = vadd.f32 %v9261_v37, %v2654_v44 }
 0x36a   : > { %v3000_v40 = vsel %vm2999_vm14, %v7146_v51, %v2996_v62  ;;  %v3087_v51 = vrot.slane %v9483_v23, 6  ;;  %v6528_v62 = vor.u32 %v6968_v52, %v6525_v55  ;;  %vm11340_vm14 = vmmov %vm11337_vm4 }
 0x36b   : > { %v3005_v3 = vsel %vm3002_vm13, %v3004_v50, %v3000_v40  ;;  %3695 = vmatpush.bf16.msrb.mxu1 %v6516_v53  ;;  %v9523_v40 = vmax.f32 %v9334_v45, 0.0  ;;  %v6244_v7 = vmul.f32 -1.442695, %v2693_v63  ;;  %vm11343_vm13 = vmmov %vm11337_vm4 }
 0x36c   : > { %v3038_v11 = vsub.f32 1.0, %v3005_v3  ;;  %v3022_v43 = vmul.f32 %v3005_v3, %v2702_v12  ;;  %v3117_v19 = vsel %vm11336_vm12, %v3087_v51, %v3088_v8  ;;  %v7148_v20 = vpop.eup %7147  ;;  %3743 = vmatpush.bf16.msrb.mxu2 %v6528_v62  ;;  %v2373_v12 = vadd.f32 %v11342_v42, %v11341_v38  ;;  %vm11346_vm12 = vmmov %vm11337_vm4 }
 0x36d   : > { %v9520_v50 = vadd.f32 1.0, %v7148_v20  ;;  %v3161_v3 = vrot.slane %v9523_v40, 7  ;;  %v3089_v30 = vrot.slane %v9523_v40, 6 }
 0x36e   : > { %v3054_v57 = vmul.f32 %v3038_v11, %v11331_v46 }
 0x36f   : > { %7149 = vrcp.f32 %v9520_v50  ;;  %v3187_v29 = vsel %vm11115_vm11, %v3161_v3, %v3162_v56  ;;  %v3115_v45 = vsel %vm11340_vm14, %v3089_v30, %v3090_v41  ;;  %v3188_v11 = vsel %vm11115_vm11, %v3160_v1, %v3161_v3  ;;  %vm11347_vm14 = vmmov %vm11346_vm12 }
 0x370   : > { %v3070_v25 = vadd.f32 %v3054_v57, %v3022_v43  ;;  %7151 = vpow2.f32 %v6244_v7  ;;  %v6317_v43 = vpack.c.bf16 %v3187_v29, %v3188_v11  ;;  %v3116_v46 = vsel %vm11343_vm13, %v3088_v8, %v3089_v30  ;;  %v6507_v8 = vld [vmem:[#allocation2 + $0x140] sm:$0xf]  ;;  %v6963_v11 = vld [vmem:[#allocation2 + $0x134] sm:$0xf0] }
 0x371   : > { %v2658_v57 = vadd.f32 %v9421_v59, %v2373_v12  ;;  %v6429_v5 = vpack.c.bf16 %v3115_v45, %v3116_v46  ;;  %v6966_v59 = vld [vmem:[#allocation2 + $0x154] sm:$0xf]  ;;  %v6508_v17 = vor.u32 %v6965_v21, %v6507_v8  ;;  %v2913_v62 = vand.u32 2147483648, %v9520_v50  ;;  %v6499_v12 = vld [vmem:[#allocation2 + $0x130] sm:$0xf]  ;;  %v11353_v21 = vld [vmem:[#allocation27_spill] sm:$0xff] }
 0x372   : > { %v9485_v28 = vmax.f32 %v3070_v25, 0.0  ;;  %vm2907_vm13 = vweird.f32 %v9520_v50  ;;  %v2911_v30 = vand.u32 2147483647, %v9520_v50 }
 0x373   : > { %3696 = vmatpush.bf16.msrb.mxu1 %v6508_v17  ;;  %v2914_v46 = vor.u32 1.1754944e-38, %v2913_v62 }
 0x374   : > { %11332 = vst [vmem:[#allocation19_spill] sm:$0xff] %v9485_v28  ;;  %v3174_v54 = vrot.slane %v9485_v28, 7  ;;  %v3102_v10 = vrot.slane %v9485_v28, 6 }
 0x375   : > { %v9538_v61 = vpop.eup %7149 }
 0x376   : > { %v3190_v18 = vsel %vm11115_vm11, %v3174_v54, %v3159_v35  ;;  %v3118_v2 = vsel %vm11337_vm4, %v3102_v10, %v3087_v51  ;;  %v7152_v35 = vpop.eup %7151  ;;  %v2903_v51 = vmul.f32 %v9538_v61, %v9520_v50  ;;  %vm2908_vm4 = vweird.f32 %v9538_v61  ;;  %v11351_v50 = vld [vmem:[#allocation21_spill] sm:$0xff] }
 0x377   : > { %v6314_v27 = vpack.c.bf16 %v3189_v47, %v3190_v18  ;;  %v6426_v6 = vpack.c.bf16 %v3117_v19, %v3118_v2  ;;  %v2697_v47 = vadd.f32 %v9261_v37, %v2658_v57  ;;  %v9555_v18 = vmax.f32 %v9382_v36, 0.0 }
 0x378   : > { %v6520_v19 = vor.u32 %v6966_v59, %v6517_v22  ;;  %v9557_v2 = vadd.f32 1.0, %v7152_v35  ;;  %v6500_v57 = vor.u32 %v6963_v11, %v6499_v12  ;;  %v9601_v35 = vmax.f32 %v9413_v58, 0.0  ;;  %v11354_v59 = vld [vmem:[#allocation31_spill] sm:$0xff] }
 0x379   : > { %6315 = vmatmul.msk.bf16.vlgmr.msra.gmra.mxu1 %vm8779_vm0, %v6314_v27  ;;  %6339 = vmatmul.msk.bf16.vlgmr.msra.gmra.mxu2 %vm8779_vm0, %v6314_v27  ;;  %v2904_v27 = vsub.f32 1.0, %v2903_v51  ;;  %v6246_v44 = vmul.f32 -1.442695, %v2697_v47  ;;  %v3164_v20 = vrot.slane %v9555_v18, 7  ;;  %v3092_v14 = vrot.slane %v9555_v18, 6 }
 0x37a   : > { %6427 = vmatmul.msk.bf16.vlgmr.msra.gmra.mxu3 %vm8787_vm2, %v6426_v6  ;;  %6451 = vmatmul.msk.bf16.vlgmr.msra.gmra.mxu0 %vm8787_vm2, %v6426_v6  ;;  %v9560_v6 = vmax.f32 %v9377_v39, 0.0  ;;  %7153 = vrcp.f32 %v9557_v2  ;;  %v2412_v17 = vadd.f32 %v11354_v59, %v11353_v21  ;;  %v9608_v47 = vmax.f32 %v9395_v16, 0.0 }
 0x37b   : > { %3744 = vmatpush.bf16.msrb.mxu2 %v6520_v19  ;;  %v2905_v37 = vmul.f32 %v9538_v61, %v2904_v27  ;;  %7155 = vpow2.f32 %v6246_v44  ;;  %3697 = vmatpush.bf16.msrb.mxu1 %v6500_v57  ;;  %v3166_v44 = vrot.slane %v9601_v35, 7  ;;  %v3094_v58 = vrot.slane %v9601_v35, 6  ;;  %v6962_v57 = vld [vmem:[#allocation2 + $0x134] sm:$0xf] }
 0x37c   : > { %v3163_v36 = vrot.slane %v9560_v6, 7  ;;  %v3091_v32 = vrot.slane %v9560_v6, 6  ;;  %v2651_v19 = vadd.f32 %v9359_v24, %v2412_v17  ;;  %v11364_v17 = vld [vmem:[#allocation32_spill] sm:$0xff] }
 0x37d   : > { %v2906_v53 = vadd.f32 %v9538_v61, %v2905_v37 }
 0x37e   : > { %v3185_v52 = vsel %vm11115_vm11, %v3163_v36, %v3164_v20  ;;  %v3113_v39 = vsel %vm11346_vm12, %v3091_v32, %v3092_v14  ;;  %v3186_v55 = vsel %vm11115_vm11, %v3162_v56, %v3163_v36  ;;  %v3114_v3 = vsel %vm11347_vm14, %v3090_v41, %v3091_v32  ;;  %vm9583_vm12 = vmor %vm2907_vm13, %vm2908_vm4 }
 0x37f   : > { %v6320_v7 = vpack.c.bf16 %v3185_v52, %v3186_v55  ;;  %v6432_v29 = vpack.c.bf16 %v3113_v39, %v3114_v3  ;;  %v2910_v41 = vsel %vm9583_vm12, %v9538_v61, %v2906_v53  ;;  %vm11352_vm14 = vnez %v11351_v50  ;;  %v11355_v39 = vld [vmem:[#allocation44_spill] sm:$0xff] }
 0x380   : > { %v9576_v63 = vpop.eup %7153  ;;  %vm2912_vm4 = vcmp.eq.f32.partialorder %v2911_v30, 8.507059e+37  ;;  %v3165_v36 = vrot.slane %v9608_v47, 7  ;;  %v3093_v32 = vrot.slane %v9608_v47, 6  ;;  %v2690_v52 = vadd.f32 %v9278_v33, %v2651_v19 }
 0x381   : > { %v7156_v56 = vpop.eup %7155  ;;  %v2933_v42 = vmul.f32 %v9576_v63, %v9557_v2  ;;  %v2915_v51 = vsel %vm2912_vm4, %v2914_v46, %v2910_v41  ;;  %vm11356_vm13 = vcmp.lt.s32.totalorder %v11335_v26, 2  ;;  %vm2938_vm12 = vweird.f32 %v9576_v63  ;;  %v6961_v46 = vld [vmem:[#allocation2 + $0x124] sm:$0xf0] }
 0x382   : > { %v9603_v8 = vadd.f32 1.0, %v7156_v56  ;;  %v3032_v27 = vsub.f32 1.0, %v2915_v51  ;;  %v3183_v16 = vsel %vm11115_vm11, %v3165_v36, %v3166_v44  ;;  %v3111_v53 = vsel %vm11356_vm13, %v3093_v32, %v3094_v58  ;;  %vm11357_vm4 = vmmov %vm11356_vm13 }
 0x383   : > { %v2934_v22 = vsub.f32 1.0, %v2933_v42  ;;  %v3016_v55 = vmul.f32 %v2915_v51, %v2690_v52  ;;  %v2943_v30 = vand.u32 2147483648, %v9557_v2  ;;  %v3112_v45 = vsel %vm11357_vm4, %v3092_v14, %v3093_v32  ;;  %v6501_v51 = vld [vmem:[#allocation2 + $0x138] sm:$0xf0] }
 0x384   : > { %7157 = vrcp.f32 %v9603_v8  ;;  %v3048_v24 = vmul.f32 %v3032_v27, %v11355_v39  ;;  %v2941_v56 = vand.u32 2147483647, %v9557_v2  ;;  %v6435_v41 = vpack.c.bf16 %v3111_v53, %v3112_v45 }
 0x385   : > { %v2935_v37 = vmul.f32 %v9576_v63, %v2934_v22  ;;  %v6504_v59 = vor.u32 %v6962_v57, %v6501_v51  ;;  %v11365_v22 = vld [vmem:[#allocation33_spill] sm:$0xff]  ;;  %v2971_v12 = vand.u32 2147483647, %v9603_v8  ;;  %v6959_v57 = vld [vmem:[#allocation2 + $0x114] sm:$0xf0] }
 0x386   : > { %v3064_v42 = vadd.f32 %v3048_v24, %v3016_v55  ;;  %v2417_v19 = vadd.f32 %v11365_v22, %v11364_v17 }
 0x387   : > { %v2936_v62 = vadd.f32 %v9576_v63, %v2935_v37  ;;  %v9656_v37 = vmax.f32 %v9444_v60, 0.0 }
 0x388   : > { %v9651_v21 = vmax.f32 %v3064_v42, 0.0 }
 0x389   : > { %6318 = vmatmul.msk.bf16.gmra.mxu1 %vm8261_vm8, %v6317_v43  ;;  %6342 = vmatmul.msk.bf16.gmra.mxu2 %vm8261_vm8, %v6317_v43  ;;  %v6964_v43 = vld [vmem:[#allocation2 + $0x144] sm:$0xf]  ;;  %v3167_v24 = vrot.slane %v9656_v37, 7  ;;  %v3095_v53 = vrot.slane %v9656_v37, 6 }
 0x38a   : > { %6430 = vmatmul.msk.bf16.gmra.mxu3 %vm7872_vm3, %v6429_v5  ;;  %6454 = vmatmul.msk.bf16.gmra.mxu0 %vm7872_vm3, %v6429_v5  ;;  %v6509_v5 = vld [vmem:[#allocation2 + $0x148] sm:$0xf0]  ;;  %v9627_v3 = vpop.eup %7157  ;;  %11363 = vst [vmem:[#allocation18_spill] sm:$0xff] %v9651_v21  ;;  %v3168_v52 = vrot.slane %v9651_v21, 7 }
 0x38b   : > { %v6512_v61 = vor.u32 %v6964_v43, %v6509_v5  ;;  %v2963_v14 = vmul.f32 %v9627_v3, %v9603_v8  ;;  %v6491_v43 = vld [vmem:[#allocation2 + $0x120] sm:$0xf]  ;;  %v2944_v5 = vor.u32 1.1754944e-38, %v2943_v30  ;;  %v3182_v45 = vsel %vm11115_vm11, %v3166_v44, %v3167_v24 }
 0x38c   : > { %v3181_v60 = vsel %vm11115_vm11, %v3167_v24, %v3168_v52 }
 0x38d   : > { %3745 = vmatpush.bf16.msrb.mxu2 %v6512_v61  ;;  %v6492_v61 = vor.u32 %v6961_v46, %v6491_v43  ;;  %v2964_v27 = vsub.f32 1.0, %v2963_v14 }
 0x38f   : > { %3698 = vmatpush.bf16.msrb.mxu1 %v6492_v61  ;;  %v2965_v39 = vmul.f32 %v9627_v3, %v2964_v27 }
 0x391   : > { %3746 = vmatpush.bf16.msrb.mxu2 %v6504_v59  ;;  %v6493_v59 = vld [vmem:[#allocation2 + $0x128] sm:$0xf0] }
 0x399   : > { %6321 = vmatmul.msk.bf16.gmra.mxu1 %vm8881_vm5, %v6320_v7  ;;  %6345 = vmatmul.msk.bf16.gmra.mxu2 %vm8881_vm5, %v6320_v7  ;;  %v3184_v7 = vsel %vm11115_vm11, %v3164_v20, %v3165_v36  ;;  %v2655_v36 = vadd.f32 %v9387_v48, %v2417_v19  ;;  %v11375_v19 = vld [vmem:[#allocation16_spill] sm:$0xff] }
 0x39a   : > { %6433 = vmatmul.msk.bf16.gmra.mxu3 %vm11352_vm14, %v6432_v29  ;;  %6457 = vmatmul.msk.bf16.gmra.mxu0 %vm11352_vm14, %v6432_v29  ;;  %v6323_v29 = vpack.c.bf16 %v3183_v16, %v3184_v7  ;;  %vm2937_vm14 = vweird.f32 %v9557_v2  ;;  %v11361_v2 = vld [vmem:[#allocation22_spill] sm:$0xff]  ;;  %v3096_v16 = vrot.slane %v9651_v21, 6 }
 0x39b   : > { %vm9634_vm13 = vmor %vm2937_vm14, %vm2938_vm12  ;;  %vm11362_vm4 = vnez %v11361_v2  ;;  %vm2942_vm14 = vcmp.eq.f32.partialorder %v2941_v56, 8.507059e+37  ;;  %v2694_v55 = vadd.f32 %v9278_v33, %v2655_v36  ;;  %vm11367_vm12 = vcmp.lt.s32.totalorder %v11335_v26, 2 }
 0x39c   : > { %v2940_v20 = vsel %vm9634_vm13, %v9576_v63, %v2936_v62  ;;  %v11366_v62 = vld [vmem:[#allocation30_spill] sm:$0xff]  ;;  %v3109_v48 = vsel %vm11367_vm12, %v3095_v53, %v3096_v16  ;;  %vm2968_vm13 = vweird.f32 %v9627_v3  ;;  %v2973_v56 = vand.u32 2147483648, %v9603_v8 }
 0x39d   : > { %v2945_v63 = vsel %vm2942_vm14, %v2944_v5, %v2940_v20  ;;  %vm11368_vm14 = vmmov %vm11367_vm12  ;;  %v6960_v5 = vld [vmem:[#allocation2 + $0x124] sm:$0xf]  ;;  %v9699_v36 = vmax.f32 %v9457_v31, 0.0 }
 0x39e   : > { %v3034_v32 = vsub.f32 1.0, %v2945_v63  ;;  %v3018_v30 = vmul.f32 %v2945_v63, %v2694_v55  ;;  %v3110_v42 = vsel %vm11368_vm14, %v3094_v58, %v3095_v53  ;;  %v11372_v58 = vld [vmem:[#allocation23_spill] sm:$0xff]  ;;  %v2974_v61 = vor.u32 1.1754944e-38, %v2973_v56 }
 0x39f   : > { %v6438_v20 = vpack.c.bf16 %v3109_v48, %v3110_v42  ;;  %vm11373_vm14 = vnez %v11372_v58  ;;  %v6496_v17 = vor.u32 %v6960_v5, %v6493_v59  ;;  %11377 = vst [vmem:[#allocation39_spill] sm:$0xff] %v9699_v36  ;;  %v3169_v55 = vrot.slane %v9699_v36, 7  ;;  %v11378_v48 = vld [vmem:[#allocation37_spill] sm:$0xff] }
 0x3a0   : > { %v3050_v7 = vmul.f32 %v3034_v32, %v11366_v62 }
 0x3a1   : > { %3747 = vmatpush.bf16.msrb.mxu2 %v6496_v17 }
 0x3a2   : > { %v3066_v14 = vadd.f32 %v3050_v7, %v3018_v30 }
 0x3a4   : > { %v9694_v63 = vmax.f32 %v3066_v14, 0.0  ;;  %v6958_v14 = vld [vmem:[#allocation2 + $0x114] sm:$0xf] }
 0x3a6   : > { %11374 = vst [vmem:[#allocation13_spill] sm:$0xff] %v9694_v63  ;;  %v3170_v24 = vrot.slane %v9694_v63, 7  ;;  %v3098_v53 = vrot.slane %v9694_v63, 6  ;;  %v3593_v58 = vpack.c.bf16 %v9694_v63, %v9699_v36 }
 0x3a8   : > { %v3179_v7 = vsel %vm11115_vm11, %v3169_v55, %v3170_v24 }
 0x3a9   : > { %6324 = vmatmul.msk.bf16.gmra.mxu1 %vm8935_vm1, %v6323_v29  ;;  %6348 = vmatmul.msk.bf16.gmra.mxu2 %vm8935_vm1, %v6323_v29  ;;  %v2966_v29 = vadd.f32 %v9627_v3, %v2965_v39 }
 0x3aa   : > { %6436 = vmatmul.msk.bf16.gmra.mxu3 %vm11362_vm4, %v6435_v41  ;;  %6460 = vmatmul.msk.bf16.gmra.mxu0 %vm11362_vm4, %v6435_v41  ;;  %v6326_v41 = vpack.c.bf16 %v3181_v60, %v3182_v45  ;;  %vm2967_vm4 = vweird.f32 %v9603_v8  ;;  %v6483_v8 = vld [vmem:[#allocation2 + $0x110] sm:$0xf]  ;;  %v3097_v60 = vrot.slane %v9699_v36, 6 }
 0x3ab   : > { %vm9679_vm12 = vmor %vm2967_vm4, %vm2968_vm13  ;;  %v6484_v51 = vor.u32 %v6959_v57, %v6483_v8  ;;  %vm2972_vm4 = vcmp.eq.f32.partialorder %v2971_v12, 8.507059e+37  ;;  %vm11379_vm13 = vcmp.lt.s32.totalorder %v11335_v26, 2  ;;  %v9727_v57 = vmax.f32 %v9464_v0, 0.0 }
 0x3ac   : > { %v2970_v44 = vsel %vm9679_vm12, %v9627_v3, %v2966_v29  ;;  %v11376_v3 = vld [vmem:[#allocation15_spill] sm:$0xff]  ;;  %v3107_v30 = vsel %vm11379_vm13, %v3097_v60, %v3098_v53  ;;  %v3180_v29 = vsel %vm11115_vm11, %v3168_v52, %v3169_v55  ;;  %vm11380_vm12 = vmmov %vm11379_vm13  ;;  %v6957_v52 = vld [vmem:[#allocation2 + $0x104] sm:$0xf0] }
 0x3ad   : > { %v2975_v22 = vsel %vm2972_vm4, %v2974_v61, %v2970_v44  ;;  %3699 = vmatpush.bf16.msrb.mxu1 %v6484_v51  ;;  %v2422_v27 = vadd.f32 %v11376_v3, %v11375_v19  ;;  %v6329_v45 = vpack.c.bf16 %v3179_v7, %v3180_v29  ;;  %v3108_v56 = vsel %vm11380_vm12, %v3096_v16, %v3097_v60  ;;  %v6485_v44 = vld [vmem:[#allocation2 + $0x118] sm:$0xf0]  ;;  %vm11385_vm4 = vmmov %vm11380_vm12  ;;  %v11387_v60 = vld [vmem:[#allocation12_spill] sm:$0xff] }
 0x3ae   : > { %v3036_v39 = vsub.f32 1.0, %v2975_v22  ;;  %v6488_v8 = vor.u32 %v6958_v14, %v6485_v44  ;;  %11384 = vst [vmem:[#allocation36_spill] sm:$0xff] %v9727_v57  ;;  %v3171_v51 = vrot.slane %v9727_v57, 7  ;;  %v3099_v59 = vrot.slane %v9727_v57, 6  ;;  %vm11386_vm13 = vmmov %vm11385_vm4 }
 0x3af   : > { %v2659_v32 = vadd.f32 %v9418_v49, %v2422_v27  ;;  %v6956_v27 = vld [vmem:[#allocation2 + $0x104] sm:$0xf]  ;;  %vm11388_vm12 = vnez %v11387_v60 }
 0x3b0   : > { %v3052_v31 = vmul.f32 %v3036_v39, %v11378_v48  ;;  %3748 = vmatpush.bf16.msrb.mxu2 %v6488_v8  ;;  %v3178_v19 = vsel %vm11115_vm11, %v3170_v24, %v3171_v51  ;;  %v3106_v3 = vsel %vm11386_vm13, %v3098_v53, %v3099_v59  ;;  %v9750_v24 = vmax.f32 %v9474_v4, 0.0  ;;  %vm11392_vm13 = vmmov %vm11385_vm4 }
 0x3b1   : > { %v2698_v62 = vadd.f32 %v9278_v33, %v2659_v32  ;;  %v6477_v32 = vld [vmem:[#allocation2 + $0x108] sm:$0xf0] }
 0x3b2   : > { %v6480_v55 = vor.u32 %v6956_v27, %v6477_v32  ;;  %11391 = vst [vmem:[#allocation14_spill] sm:$0xff] %v9750_v24  ;;  %v3173_v53 = vrot.slane %v9750_v24, 7  ;;  %v3101_v7 = vrot.slane %v9750_v24, 6 }
 0x3b3   : > { %v3020_v49 = vmul.f32 %v2975_v22, %v2698_v62  ;;  %v11389_v62 = vld [vmem:[#allocation25_spill] sm:$0xff] }
 0x3b4   : > { %3749 = vmatpush.bf16.msrb.mxu2 %v6480_v55  ;;  %v3175_v48 = vsel %vm11115_vm11, %v3173_v53, %v3174_v54  ;;  %v3592_v54 = vpack.c.bf16 %v9651_v21, %v9656_v37 }
 0x3b5   : > { %v3068_v42 = vadd.f32 %v3052_v31, %v3020_v49  ;;  %v3103_v31 = vsel %vm11385_vm4, %v3101_v7, %v3102_v10 }
 0x3b7   : > { %v9724_v16 = vmax.f32 %v3068_v42, 0.0 }
 0x3b9   : > { %6327 = vmatmul.msk.bf16.gmra.mxu1 %vm8989_vm9, %v6326_v41  ;;  %6351 = vmatmul.msk.bf16.gmra.mxu2 %vm8989_vm9, %v6326_v41  ;;  %v6441_v41 = vpack.c.bf16 %v3107_v30, %v3108_v56  ;;  %11383 = vst [vmem:[#allocation34_spill] sm:$0xff] %v9724_v16  ;;  %v3172_v5 = vrot.slane %v9724_v16, 7  ;;  %v3100_v61 = vrot.slane %v9724_v16, 6  ;;  %v3594_v38 = vpack.c.bf16 %v9724_v16, %v9727_v57 }
 0x3ba   : > { %6439 = vmatmul.msk.bf16.gmra.mxu3 %vm11373_vm14, %v6438_v20  ;;  %6463 = vmatmul.msk.bf16.gmra.mxu0 %vm11373_vm14, %v6438_v20  ;;  %v6475_v20 = vld [vmem:[#allocation2 + $0x100] sm:$0xf]  ;;  %v3595_v16 = vpack.c.bf16 %v9485_v28, %v9750_v24 }
 0x3bb   : > { %v6476_v43 = vor.u32 %v6957_v52, %v6475_v20  ;;  %v3177_v17 = vsel %vm11115_vm11, %v3171_v51, %v3172_v5  ;;  %v3105_v22 = vsel %vm11385_vm4, %v3099_v59, %v3100_v61  ;;  %v3176_v30 = vsel %vm11115_vm11, %v3172_v5, %v3173_v53 }
 0x3bc   : > { %v6332_v0 = vpack.c.bf16 %v3177_v17, %v3178_v19  ;;  %v6444_v39 = vpack.c.bf16 %v3105_v22, %v3106_v3  ;;  %v6335_v49 = vpack.c.bf16 %v3175_v48, %v3176_v30  ;;  %v3104_v4 = vsel %vm11392_vm13, %v3100_v61, %v3101_v7 }
 0x3bd   : > { %3700 = vmatpush.bf16.msrb.mxu1 %v6476_v43  ;;  %v6447_v29 = vpack.c.bf16 %v3103_v31, %v3104_v4  ;;  %v3589_v59 = vpack.c.bf16 %v9518_v13, %v9523_v40  ;;  %v3590_v7 = vpack.c.bf16 %v9555_v18, %v9560_v6 }
 0x3c9   : > { %6330 = vmatmul.msk.bf16.gmra.mxu1 %vm9043_vm10, %v6329_v45  ;;  %6354 = vmatmul.msk.bf16.gmra.mxu2 %vm9043_vm10, %v6329_v45 }
 0x3ca   : > { %6442 = vmatmul.msk.bf16.gmra.mxu3 %vm8064_vm15, %v6441_v41  ;;  %6466 = vmatmul.msk.bf16.gmra.mxu0 %vm8064_vm15, %v6441_v41  ;;  %vm11390_vm15 = vnez %v11389_v62  ;;  %v3588_v41 = vpack.c.bf16 %v9479_v9, %v9483_v23 }
 0x3d9   : > { %6333 = vmatmul.msk.bf16.gmra.mxu1 %vm11388_vm12, %v6332_v0  ;;  %6357 = vmatmul.msk.bf16.gmra.mxu2 %vm11388_vm12, %v6332_v0 }
 0x3da   : > { %6445 = vmatmul.msk.bf16.gmra.mxu3 %vm11390_vm15, %v6444_v39  ;;  %6469 = vmatmul.msk.bf16.gmra.mxu0 %vm11390_vm15, %v6444_v39 }
 0x3e9   : > { %6336 = vmatmul.msk.bf16.gmra.mxu1 %vm9137_vm6, %v6335_v49  ;;  %6360 = vmatmul.msk.bf16.gmra.mxu2 %vm9137_vm6, %v6335_v49 }
 0x3ea   : > { %6448 = vmatmul.msk.bf16.gmra.mxu3 %vm8170_vm7, %v6447_v29  ;;  %6472 = vmatmul.msk.bf16.gmra.mxu0 %vm8170_vm7, %v6447_v29 }
 0x3f6   : > { %v3321_v10 = vpop.f32.mrf.mxu1 }
 0x3f7   : > { %v3548_v56 = vpop.f32.mrf.mxu0 }
 0x3f9   : > { %3701 = vmatmul.bf16.vlgmr.msrb.gmra.mxu1 %v3588_v41  ;;  %3750 = vmatmul.bf16.vlgmr.msrb.gmra.mxu2 %v3588_v41 }
 0x3fc   : > { %v3370_v42 = vpop.f32.mrf.mxu2 }
 0x3fd   : > { %v9776_v20 = vadd.f32 %v3548_v56, %v3370_v42  ;;  %v3499_v52 = vpop.f32.mrf.mxu3 }
 0x3fe   : > { %v9778_v14 = vadd.f32 %v3499_v52, %v3321_v10  ;;  %v9780_v43 = vpop.f32.mrf.mxu1  ;;  %v3591_v52 = vpack.c.bf16 %v9601_v35, %v9608_v47 }
 0x3ff   : > { %v9782_v44 = vpop.f32.mrf.mxu0 }
 0x404   : > { %v9784_v8 = vpop.f32.mrf.mxu2 }
 0x405   : > { %v9786_v5 = vpop.f32.mrf.mxu3 }
 0x406   : > { %v3326_v61 = vpop.f32.mrf.mxu1 }
 0x407   : > { %v3553_v51 = vpop.f32.mrf.mxu0 }
 0x409   : > { %3706 = vmatmul.bf16.gmra.mxu1 %v3589_v59  ;;  %3755 = vmatmul.bf16.gmra.mxu2 %v3589_v59 }
 0x40c   : > { %v3375_v17 = vpop.f32.mrf.mxu2 }
 0x40d   : > { %v9790_v22 = vadd.f32 %v3553_v51, %v3375_v17  ;;  %v3504_v19 = vpop.f32.mrf.mxu3 }
 0x40e   : > { %v9792_v0 = vadd.f32 %v3504_v19, %v3326_v61  ;;  %v9794_v3 = vpop.f32.mrf.mxu1 }
 0x40f   : > { %v9796_v27 = vpop.f32.mrf.mxu0 }
 0x414   : > { %v9798_v32 = vpop.f32.mrf.mxu2 }
 0x415   : > { %v9800_v39 = vpop.f32.mrf.mxu3 }
 0x416   : > { %v3331_v55 = vpop.f32.mrf.mxu1 }
 0x417   : > { %v3558_v53 = vpop.f32.mrf.mxu0 }
 0x419   : > { %3711 = vmatmul.bf16.gmra.mxu1 %v3590_v7  ;;  %3760 = vmatmul.bf16.gmra.mxu2 %v3590_v7 }
 0x41c   : > { %v3380_v48 = vpop.f32.mrf.mxu2 }
 0x41d   : > { %v9804_v31 = vadd.f32 %v3558_v53, %v3380_v48  ;;  %v3509_v30 = vpop.f32.mrf.mxu3 }
 0x41e   : > { %v9806_v49 = vadd.f32 %v3509_v30, %v3331_v55  ;;  %v9808_v4 = vpop.f32.mrf.mxu1 }
 0x41f   : > { %v9810_v29 = vpop.f32.mrf.mxu0 }
 0x424   : > { %v9812_v10 = vpop.f32.mrf.mxu2 }
 0x425   : > { %v9814_v56 = vpop.f32.mrf.mxu3 }
 0x426   : > { %v3336_v41 = vpop.f32.mrf.mxu1 }
 0x427   : > { %v3563_v42 = vpop.f32.mrf.mxu0 }
 0x429   : > { %3716 = vmatmul.bf16.gmra.mxu1 %v3591_v52  ;;  %3765 = vmatmul.bf16.gmra.mxu2 %v3591_v52 }
 0x42c   : > { %v3385_v61 = vpop.f32.mrf.mxu2 }
 0x42d   : > { %v9818_v51 = vadd.f32 %v3563_v42, %v3385_v61  ;;  %v3514_v59 = vpop.f32.mrf.mxu3 }
 0x42e   : > { %v9820_v17 = vadd.f32 %v3514_v59, %v3336_v41  ;;  %v9822_v19 = vpop.f32.mrf.mxu1 }
 0x42f   : > { %v9824_v55 = vpop.f32.mrf.mxu0 }
 0x434   : > { %v9826_v53 = vpop.f32.mrf.mxu2 }
 0x435   : > { %v9828_v7 = vpop.f32.mrf.mxu3 }
 0x436   : > { %v3341_v48 = vpop.f32.mrf.mxu1 }
 0x437   : > { %v3568_v30 = vpop.f32.mrf.mxu0 }
 0x439   : > { %3721 = vmatmul.bf16.gmra.mxu1 %v3592_v54  ;;  %3770 = vmatmul.bf16.gmra.mxu2 %v3592_v54 }
 0x43c   : > { %v3390_v42 = vpop.f32.mrf.mxu2 }
 0x43d   : > { %v9832_v52 = vadd.f32 %v3568_v30, %v3390_v42  ;;  %v3519_v41 = vpop.f32.mrf.mxu3 }
 0x43e   : > { %v9834_v61 = vadd.f32 %v3519_v41, %v3341_v48  ;;  %v9836_v59 = vpop.f32.mrf.mxu1 }
 0x43f   : > { %v9838_v45 = vpop.f32.mrf.mxu0 }
 0x444   : > { %v9840_v62 = vpop.f32.mrf.mxu2 }
 0x445   : > { %v9842_v60 = vpop.f32.mrf.mxu3 }
 0x446   : > { %v3346_v33 = vpop.f32.mrf.mxu1 }
 0x447   : > { %v3573_v12 = vpop.f32.mrf.mxu0 }
 0x449   : > { %3726 = vmatmul.bf16.gmra.mxu1 %v3593_v58  ;;  %3775 = vmatmul.bf16.gmra.mxu2 %v3593_v58 }
 0x44c   : > { %v3395_v54 = vpop.f32.mrf.mxu2 }
 0x44d   : > { %v9846_v30 = vadd.f32 %v3573_v12, %v3395_v54  ;;  %v3524_v48 = vpop.f32.mrf.mxu3 }
 0x44e   : > { %v9848_v42 = vadd.f32 %v3524_v48, %v3346_v33  ;;  %v9850_v41 = vpop.f32.mrf.mxu1 }
 0x44f   : > { %v9852_v46 = vpop.f32.mrf.mxu0 }
 0x450   : > { %11395 = vst [vmem:[#allocation17_spill] sm:$0xff] %v9852_v46 }
 0x454   : > { %v9854_v2 = vpop.f32.mrf.mxu2 }
 0x455   : > { %11396 = vst [vmem:[#allocation27_spill] sm:$0xff] %v9854_v2  ;;  %v9856_v11 = vpop.f32.mrf.mxu3 }
 0x456   : > { %v3351_v50 = vpop.f32.mrf.mxu1 }
 0x457   : > { %v3578_v1 = vpop.f32.mrf.mxu0 }
 0x459   : > { %3731 = vmatmul.bf16.gmra.mxu1 %v3594_v38  ;;  %3780 = vmatmul.bf16.gmra.mxu2 %v3594_v38 }
 0x45c   : > { %v3400_v58 = vpop.f32.mrf.mxu2 }
 0x45d   : > { %v9860_v12 = vadd.f32 %v3578_v1, %v3400_v58  ;;  %v3529_v33 = vpop.f32.mrf.mxu3 }
 0x45e   : > { %v9862_v54 = vadd.f32 %v3529_v33, %v3351_v50  ;;  %v9864_v48 = vpop.f32.mrf.mxu1 }
 0x45f   : > { %v9866_v25 = vpop.f32.mrf.mxu0 }
 0x460   : > { %11397 = vst [vmem:[#allocation31_spill] sm:$0xff] %v9866_v25  ;;  %v7300_v25 = vld [vmem:[%s10997_s6] sm:$0xff] }
 0x464   : > { %v9868_v34 = vpop.f32.mrf.mxu2 }
 0x465   : > { %11398 = vst [vmem:[#allocation44_spill] sm:$0xff] %v9868_v34  ;;  %v9870_v15 = vpop.f32.mrf.mxu3  ;;  %v3823_v34 = vperm.slane %v7300_v25, 2 }
 0x466   : > { %11399 = vst [vmem:[#allocation32_spill] sm:$0xff] %v9870_v15  ;;  %v3356_v26 = vpop.f32.mrf.mxu1 }
 0x467   : > { %v3583_v38 = vpop.f32.mrf.mxu0  ;;  %v9885_v36 = vperm.slane %v3823_v34, 2 }
 0x469   : > { %3736 = vmatmul.bf16.gmra.mxu1 %v3595_v16  ;;  %3785 = vmatmul.bf16.gmra.mxu2 %v3595_v16 }
 0x46c   : > { %v3405_v1 = vpop.f32.mrf.mxu2 }
 0x46d   : > { %v9874_v58 = vadd.f32 %v3583_v38, %v3405_v1  ;;  %v3534_v50 = vpop.f32.mrf.mxu3 }
 0x46e   : > { %v9876_v33 = vadd.f32 %v3534_v50, %v3356_v26  ;;  %v9878_v57 = vpop.f32.mrf.mxu1  ;;  %v3502_v26 = vadd.f32 %v9786_v5, %v9780_v43 }
 0x46f   : > { %11400 = vst [vmem:[#allocation33_spill] sm:$0xff] %v9874_v58 }
 0x470   : > { %11401 = vst [vmem:[#allocation30_spill] sm:$0xff] %v9876_v33 }
 0x471   : > { %11402 = vst [vmem:[#allocation16_spill] sm:$0xff] %v9878_v57 }
 0x474   : > { %v9883_v63 = vpop.f32.mrf.mxu2 }
 0x475   : > { %11403 = vst [vmem:[#allocation15_spill] sm:$0xff] %v9883_v63 }
 0x476   : > { %v3702_v28 = vpop.f32.mrf.mxu1 }
 0x477   : > { %v3791_v16 = vadd.f32 %v3702_v28, %v9778_v14 }
 0x479   : > { %v3829_v38 = vadd.f32 %v9885_v36, %v3791_v16 }
 0x47b   : > { %v6537_v1 = vmul.f32 -1.442695, %v3829_v38 }
 0x47c   : > { %v3751_v24 = vpop.f32.mrf.mxu2 }
 0x47d   : > { %7159 = vpow2.f32 %v6537_v1  ;;  %v3792_v50 = vadd.f32 %v3751_v24, %v9776_v20  ;;  %v3824_v1 = vperm.slane %v7300_v25, 6 }
 0x47e   : > { %v3704_v57 = vpop.f32.mrf.mxu1 }
 0x47f   : > { %v3793_v58 = vadd.f32 %v3704_v57, %v3502_v26  ;;  %v3507_v57 = vadd.f32 %v9800_v39, %v9794_v3 }
 0x481   : > { %v3831_v33 = vadd.f32 %v9885_v36, %v3793_v58 }
 0x483   : > { %v7160_v63 = vpop.eup %7159  ;;  %v6538_v34 = vmul.f32 -1.442695, %v3831_v33 }
 0x484   : > { %v3909_v21 = vadd.f32 1.0, %v7160_v63  ;;  %v3753_v46 = vpop.f32.mrf.mxu2 }
 0x485   : > { %7161 = vpow2.f32 %v6538_v34  ;;  %v9900_v34 = vperm.slane %v3824_v1, 2 }
 0x486   : > { %7163 = vrcp.f32 %v3909_v21  ;;  %v3707_v28 = vpop.f32.mrf.mxu1  ;;  %v3934_v25 = vand.u32 2147483647, %v3909_v21  ;;  %vm3930_vm13 = vweird.f32 %v3909_v21 }
 0x487   : > { %v3795_v14 = vadd.f32 %v3707_v28, %v9792_v0  ;;  %v3936_v28 = vand.u32 2147483648, %v3909_v21 }
 0x488   : > { %vm3935_vm7 = vcmp.eq.f32.partialorder %v3934_v25, 8.507059e+37 }
 0x489   : > { %v3833_v16 = vadd.f32 %v9885_v36, %v3795_v14 }
 0x48b   : > { %v7162_v38 = vpop.eup %7161  ;;  %v6539_v43 = vmul.f32 -1.442695, %v3833_v16 }
 0x48c   : > { %v7164_v5 = vpop.eup %7163  ;;  %v3910_v24 = vadd.f32 1.0, %v7162_v38  ;;  %v3756_v20 = vpop.f32.mrf.mxu2 }
 0x48d   : > { %v3926_v58 = vmul.f32 %v7164_v5, %v3909_v21  ;;  %7165 = vpow2.f32 %v6539_v43  ;;  %v9898_v63 = vadd.f32 %v3756_v20, %v9790_v22  ;;  %vm3931_vm4 = vweird.f32 %v7164_v5 }
 0x48e   : > { %7167 = vrcp.f32 %v3910_v24  ;;  %v3709_v33 = vpop.f32.mrf.mxu1  ;;  %v3830_v22 = vadd.f32 %v9900_v34, %v3792_v50  ;;  %vm3932_vm11 = vmor %vm3930_vm13, %vm3931_vm4  ;;  %v3937_v43 = vor.u32 1.1754944e-38, %v3936_v28  ;;  %v3951_v28 = vand.u32 2147483648, %v3910_v24 }
 0x48f   : > { %v3927_v26 = vsub.f32 1.0, %v3926_v58  ;;  %v3797_v0 = vadd.f32 %v3709_v33, %v3507_v57  ;;  %v3551_v33 = vadd.f32 %v9782_v44, %v9784_v8 }
 0x491   : > { %v3928_v14 = vmul.f32 %v7164_v5, %v3927_v26  ;;  %v3835_v16 = vadd.f32 %v9885_v36, %v3797_v0 }
 0x493   : > { %v7166_v38 = vpop.eup %7165  ;;  %v3929_v2 = vadd.f32 %v7164_v5, %v3928_v14  ;;  %v6540_v3 = vmul.f32 -1.442695, %v3835_v16  ;;  %v3794_v16 = vadd.f32 %v3753_v46, %v3551_v33 }
 0x494   : > { %v7168_v39 = vpop.eup %7167  ;;  %v9904_v20 = vadd.f32 1.0, %v7166_v38  ;;  %v9906_v57 = vpop.f32.mrf.mxu2 }
 0x495   : > { %v3933_v1 = vsel %vm3932_vm11, %v7164_v5, %v3929_v2  ;;  %v3941_v58 = vmul.f32 %v7168_v39, %v3910_v24  ;;  %7169 = vpow2.f32 %v6540_v3  ;;  %vm3946_vm11 = vweird.f32 %v7168_v39 }
 0x496   : > { %v3938_v26 = vsel %vm3935_vm7, %v3937_v43, %v3933_v1  ;;  %7171 = vrcp.f32 %v9904_v20  ;;  %v3712_v21 = vpop.f32.mrf.mxu1  ;;  %v3949_v5 = vand.u32 2147483647, %v3910_v24  ;;  %vm3945_vm7 = vweird.f32 %v3910_v24 }
 0x497   : > { %v4165_v0 = vmul.f32 %v3938_v26, %v3830_v22  ;;  %v4181_v14 = vsub.f32 1.0, %v3938_v26  ;;  %v3942_v50 = vsub.f32 1.0, %v3941_v58  ;;  %v3799_v38 = vadd.f32 %v3712_v21, %v9806_v49  ;;  %vm3947_vm4 = vmor %vm3945_vm7, %vm3946_vm11 }
 0x498   : > { %v3952_v22 = vor.u32 1.1754944e-38, %v3951_v28  ;;  %v3832_v49 = vadd.f32 %v9900_v34, %v3794_v16  ;;  %vm3950_vm13 = vcmp.eq.f32.partialorder %v3949_v5, 8.507059e+37  ;;  %v3512_v24 = vadd.f32 %v9814_v56, %v9808_v4  ;;  %v6611_v16 = vld [vmem:[#allocation5 + $0xf0] sm:$0xf] }
 0x499   : > { %v4197_v15 = vmul.f32 %v4181_v14, %v9483_v23  ;;  %v3943_v2 = vmul.f32 %v7168_v39, %v3942_v50  ;;  %v3837_v25 = vadd.f32 %v9885_v36, %v3799_v38  ;;  %v3966_v28 = vand.u32 2147483648, %v9904_v20  ;;  %v7003_v38 = vld [vmem:[#allocation5 + $0xf4] sm:$0xf0] }
 0x49a   : > { %vm3960_vm7 = vweird.f32 %v9904_v20 }
 0x49b   : > { %v7170_v3 = vpop.eup %7169  ;;  %v9914_v44 = vadd.f32 %v4197_v15, %v4165_v0  ;;  %v3944_v8 = vadd.f32 %v7168_v39, %v3943_v2  ;;  %v6541_v46 = vmul.f32 -1.442695, %v3837_v25  ;;  %v3964_v25 = vand.u32 2147483647, %v9904_v20 }
 0x49c   : > { %v7172_v43 = vpop.eup %7171  ;;  %v9916_v1 = vadd.f32 1.0, %v7170_v3  ;;  %v3761_v58 = vpop.f32.mrf.mxu2  ;;  %v6612_v3 = vor.u32 %v7003_v38, %v6611_v16 }
 0x49d   : > { %v3948_v23 = vsel %vm3947_vm4, %v7168_v39, %v3944_v8  ;;  %v3956_v33 = vmul.f32 %v7172_v43, %v9904_v20  ;;  %v9926_v39 = vadd.f32 %v3761_v58, %v9804_v31  ;;  %vm3961_vm11 = vweird.f32 %v7172_v43 }
 0x49e   : > { %v3953_v26 = vsel %vm3950_vm13, %v3952_v22, %v3948_v23  ;;  %7173 = vrcp.f32 %v9916_v1  ;;  %v3714_v15 = vpop.f32.mrf.mxu1  ;;  %4470 = vmatpush.bf16.msrb.mxu3 %v6612_v3  ;;  %v3556_v31 = vadd.f32 %v9796_v27, %v9798_v32  ;;  %vm3962_vm4 = vmor %vm3960_vm7, %vm3961_vm11  ;;  %vm3965_vm13 = vcmp.eq.f32.partialorder %v3964_v25, 8.507059e+37 }
 0x49f   : > { %v4166_v21 = vmul.f32 %v3953_v26, %v3832_v49  ;;  %v4182_v0 = vsub.f32 1.0, %v3953_v26  ;;  %v3957_v14 = vsub.f32 1.0, %v3956_v33  ;;  %7175 = vpow2.f32 %v6541_v46 }
 0x4a0   : > { %v3801_v2 = vadd.f32 %v3714_v15, %v3512_v24  ;;  %v3967_v46 = vor.u32 1.1754944e-38, %v3966_v28  ;;  %v3834_v33 = vadd.f32 %v9900_v34, %v9898_v63  ;;  %v3798_v20 = vadd.f32 %v9906_v57, %v3556_v31 }
 0x4a1   : > { %v4198_v50 = vmul.f32 %v4182_v0, %v9479_v9  ;;  %v3958_v5 = vmul.f32 %v7172_v43, %v3957_v14  ;;  %v3981_v0 = vand.u32 2147483648, %v9916_v1  ;;  %v3979_v28 = vand.u32 2147483647, %v9916_v1 }
 0x4a2   : > { %v3839_v56 = vadd.f32 %v9885_v36, %v3801_v2  ;;  %vm3975_vm7 = vweird.f32 %v9916_v1  ;;  %v3836_v2 = vadd.f32 %v9900_v34, %v3798_v20 }
 0x4a3   : > { %v9929_v4 = vadd.f32 %v4198_v50, %v4166_v21  ;;  %v3959_v22 = vadd.f32 %v7172_v43, %v3958_v5  ;;  %v3982_v5 = vor.u32 1.1754944e-38, %v3981_v0 }
 0x4a4   : > { %v7174_v8 = vpop.eup %7173  ;;  %v9933_v9 = vpop.f32.mrf.mxu2  ;;  %v6542_v49 = vmul.f32 -1.442695, %v3839_v56 }
 0x4a5   : > { %v3971_v58 = vmul.f32 %v7174_v8, %v9916_v1  ;;  %v7176_v23 = vpop.eup %7175  ;;  %v3963_v26 = vsel %vm3962_vm4, %v7172_v43, %v3959_v22  ;;  %vm3976_vm11 = vweird.f32 %v7174_v8  ;;  %v3517_v22 = vadd.f32 %v9828_v7, %v9822_v19 }
 0x4a6   : > { %v3717_v15 = vpop.f32.mrf.mxu1  ;;  %v3968_v24 = vsel %vm3965_vm13, %v3967_v46, %v3963_v26  ;;  %v3913_v32 = vadd.f32 1.0, %v7176_v23  ;;  %7177 = vpow2.f32 %v6542_v49  ;;  %vm3977_vm4 = vmor %vm3975_vm7, %vm3976_vm11  ;;  %vm3980_vm13 = vcmp.eq.f32.partialorder %v3979_v28, 8.507059e+37  ;;  %v6603_v23 = vld [vmem:[#allocation5 + $0xe0] sm:$0xf] }
 0x4a7   : > { %v3972_v21 = vsub.f32 1.0, %v3971_v58  ;;  %v4167_v14 = vmul.f32 %v3968_v24, %v3834_v33  ;;  %v4183_v27 = vsub.f32 1.0, %v3968_v24  ;;  %v3803_v16 = vadd.f32 %v3717_v15, %v9820_v17  ;;  %v7001_v33 = vld [vmem:[#allocation5 + $0xe4] sm:$0xf0] }
 0x4a8   : > { %7179 = vrcp.f32 %v3913_v32  ;;  %v6604_v15 = vor.u32 %v7001_v33, %v6603_v23  ;;  %v3996_v7 = vand.u32 2147483648, %v3913_v32  ;;  %v3994_v28 = vand.u32 2147483647, %v3913_v32 }
 0x4a9   : > { %v3973_v50 = vmul.f32 %v7174_v8, %v3972_v21  ;;  %v4199_v63 = vmul.f32 %v4183_v27, %v9523_v40  ;;  %v3841_v57 = vadd.f32 %v9885_v36, %v3803_v16  ;;  %vm3990_vm7 = vweird.f32 %v3913_v32 }
 0x4aa   : > { %4471 = vmatpush.bf16.msrb.mxu3 %v6604_v15 }
 0x4ab   : > { %v3974_v43 = vadd.f32 %v7174_v8, %v3973_v50  ;;  %v9947_v38 = vadd.f32 %v4199_v63, %v4167_v14  ;;  %v6543_v56 = vmul.f32 -1.442695, %v3841_v57 }
 0x4ac   : > { %v3766_v25 = vpop.f32.mrf.mxu2  ;;  %v7178_v40 = vpop.eup %7177 }
 0x4ad   : > { %v3978_v3 = vsel %vm3977_vm4, %v7174_v8, %v3974_v43  ;;  %v9951_v17 = vadd.f32 %v3766_v25, %v9818_v51  ;;  %v3914_v49 = vadd.f32 1.0, %v7178_v40  ;;  %7181 = vpow2.f32 %v6543_v56 }
 0x4ae   : > { %v3983_v1 = vsel %vm3980_vm13, %v3982_v5, %v3978_v3  ;;  %v3719_v31 = vpop.f32.mrf.mxu1  ;;  %v7180_v26 = vpop.eup %7179  ;;  %v3838_v25 = vadd.f32 %v9900_v34, %v9926_v39  ;;  %vm3995_vm13 = vcmp.eq.f32.partialorder %v3994_v28, 8.507059e+37  ;;  %v3561_v40 = vadd.f32 %v9810_v29, %v9812_v10 }
 0x4af   : > { %v4168_v46 = vmul.f32 %v3983_v1, %v3836_v2  ;;  %v4184_v58 = vsub.f32 1.0, %v3983_v1  ;;  %v3805_v8 = vadd.f32 %v3719_v31, %v3517_v22  ;;  %v3986_v20 = vmul.f32 %v7180_v26, %v3913_v32 }
 0x4b0   : > { %7183 = vrcp.f32 %v3914_v49  ;;  %vm3991_vm11 = vweird.f32 %v7180_v26  ;;  %v3997_v2 = vor.u32 1.1754944e-38, %v3996_v7  ;;  %v4009_v32 = vand.u32 2147483647, %v3914_v49 }
 0x4b1   : > { %v4200_v24 = vmul.f32 %v4184_v58, %v9518_v13  ;;  %v3843_v51 = vadd.f32 %v9885_v36, %v3805_v8  ;;  %v3987_v19 = vsub.f32 1.0, %v3986_v20  ;;  %vm3992_vm4 = vmor %vm3990_vm7, %vm3991_vm11  ;;  %v3802_v23 = vadd.f32 %v9933_v9, %v3561_v40 }
 0x4b2   : > { %vm4005_vm7 = vweird.f32 %v3914_v49 }
 0x4b3   : > { %v9957_v21 = vadd.f32 %v4200_v24, %v4168_v46  ;;  %v6544_v0 = vmul.f32 -1.442695, %v3843_v51  ;;  %v7182_v27 = vpop.eup %7181  ;;  %v3988_v50 = vmul.f32 %v7180_v26, %v3987_v19  ;;  %v4011_v46 = vand.u32 2147483648, %v3914_v49 }
 0x4b4   : > { %v9959_v14 = vpop.f32.mrf.mxu2  ;;  %v9961_v16 = vadd.f32 1.0, %v7182_v27  ;;  %v3840_v7 = vadd.f32 %v9900_v34, %v3802_v23  ;;  %v7002_v27 = vld [vmem:[#allocation5 + $0xf4] sm:$0xf] }
 0x4b5   : > { %7185 = vpow2.f32 %v6544_v0  ;;  %v3989_v43 = vadd.f32 %v7180_v26, %v3988_v50  ;;  %v4012_v9 = vor.u32 1.1754944e-38, %v4011_v46  ;;  %v6613_v50 = vld [vmem:[#allocation5 + $0xf8] sm:$0xf0] }
 0x4b6   : > { %v3722_v13 = vpop.f32.mrf.mxu1  ;;  %v7184_v63 = vpop.eup %7183  ;;  %7187 = vrcp.f32 %v9961_v16  ;;  %v6616_v40 = vor.u32 %v7002_v27, %v6613_v50 }
 0x4b7   : > { %v3807_v57 = vadd.f32 %v3722_v13, %v9834_v61  ;;  %v4001_v5 = vmul.f32 %v7184_v63, %v3914_v49  ;;  %v3993_v3 = vsel %vm3992_vm4, %v7180_v26, %v3989_v43  ;;  %vm4006_vm11 = vweird.f32 %v7184_v63 }
 0x4b8   : > { %v3998_v22 = vsel %vm3995_vm13, %v3997_v2, %v3993_v3  ;;  %vm4010_vm4 = vcmp.eq.f32.partialorder %v4009_v32, 8.507059e+37  ;;  %vm4007_vm13 = vmor %vm4005_vm7, %vm4006_vm11  ;;  %v3522_v49 = vadd.f32 %v9842_v60, %v9836_v59  ;;  %v4024_v43 = vand.u32 2147483647, %v9961_v16  ;;  %4519 = vmatpush.bf16.msrb.mxu0 %v6616_v40 }
 0x4b9   : > { %v3845_v56 = vadd.f32 %v9885_v36, %v3807_v57  ;;  %v4002_v1 = vsub.f32 1.0, %v4001_v5  ;;  %v4169_v31 = vmul.f32 %v3998_v22, %v3838_v25  ;;  %v4185_v61 = vsub.f32 1.0, %v3998_v22 }
 0x4ba   : > { %v4026_v5 = vand.u32 2147483648, %v9961_v16  ;;  %vm4020_vm7 = vweird.f32 %v9961_v16 }
 0x4bb   : > { %v7186_v58 = vpop.eup %7185  ;;  %v4003_v33 = vmul.f32 %v7184_v63, %v4002_v1  ;;  %v6545_v15 = vmul.f32 -1.442695, %v3845_v56  ;;  %v4201_v26 = vmul.f32 %v4185_v61, %v9560_v6  ;;  %v6595_v6 = vld [vmem:[#allocation5 + $0xd0] sm:$0xf]  ;;  %v3566_v61 = vadd.f32 %v9824_v55, %v9826_v53 }
 0x4bc   : > { %v3771_v39 = vpop.f32.mrf.mxu2  ;;  %v9972_v8 = vadd.f32 1.0, %v7186_v58  ;;  %v7188_v29 = vpop.eup %7187 }
 0x4bd   : > { %v9975_v24 = vadd.f32 %v3771_v39, %v9832_v52  ;;  %v4004_v10 = vadd.f32 %v7184_v63, %v4003_v33  ;;  %7189 = vpow2.f32 %v6545_v15  ;;  %v9977_v51 = vadd.f32 %v4201_v26, %v4169_v31  ;;  %v6999_v52 = vld [vmem:[#allocation5 + $0xd4] sm:$0xf0] }
 0x4be   : > { %v3724_v20 = vpop.f32.mrf.mxu1  ;;  %v4016_v19 = vmul.f32 %v7188_v29, %v9961_v16  ;;  %7191 = vrcp.f32 %v9972_v8  ;;  %vm4021_vm11 = vweird.f32 %v7188_v29  ;;  %v6596_v3 = vor.u32 %v6999_v52, %v6595_v6 }
 0x4bf   : > { %v4008_v0 = vsel %vm4007_vm13, %v7184_v63, %v4004_v10  ;;  %v3809_v56 = vadd.f32 %v3724_v20, %v3522_v49  ;;  %v3842_v16 = vadd.f32 %v9900_v34, %v9951_v17  ;;  %vm4025_vm13 = vcmp.eq.f32.partialorder %v4024_v43, 8.507059e+37 }
 0x4c0   : > { %v4013_v28 = vsel %vm4010_vm4, %v4012_v9, %v4008_v0  ;;  %v4017_v13 = vsub.f32 1.0, %v4016_v19  ;;  %4472 = vmatpush.bf16.msrb.mxu3 %v6596_v3  ;;  %vm4022_vm4 = vmor %vm4020_vm7, %vm4021_vm11  ;;  %v3806_v39 = vadd.f32 %v9959_v14, %v3566_v61  ;;  %v4041_v10 = vand.u32 2147483648, %v9972_v8  ;;  %v6997_v3 = vld [vmem:[#allocation5 + $0xc4] sm:$0xf0] }
 0x4c1   : > { %v4170_v57 = vmul.f32 %v4013_v28, %v3840_v7  ;;  %v4186_v2 = vsub.f32 1.0, %v4013_v28  ;;  %v3847_v31 = vadd.f32 %v9885_v36, %v3809_v56  ;;  %v4039_v19 = vand.u32 2147483647, %v9972_v8 }
 0x4c2   : > { %v4018_v25 = vmul.f32 %v7188_v29, %v4017_v13  ;;  %vm4035_vm7 = vweird.f32 %v9972_v8  ;;  %v3844_v50 = vadd.f32 %v9900_v34, %v3806_v39  ;;  %v4042_v49 = vor.u32 1.1754944e-38, %v4041_v10 }
 0x4c3   : > { %v7190_v63 = vpop.eup %7189  ;;  %v4202_v22 = vmul.f32 %v4186_v2, %v9555_v18  ;;  %v4027_v18 = vor.u32 1.1754944e-38, %v4026_v5  ;;  %v6546_v20 = vmul.f32 -1.442695, %v3847_v31  ;;  %v3846_v39 = vadd.f32 %v9900_v34, %v9975_v24 }
 0x4c4   : > { %v9987_v1 = vpop.f32.mrf.mxu2  ;;  %v7192_v32 = vpop.eup %7191  ;;  %v4019_v60 = vadd.f32 %v7188_v29, %v4018_v25  ;;  %v9990_v59 = vadd.f32 1.0, %v7190_v63  ;;  %v6587_v25 = vld [vmem:[#allocation5 + $0xc0] sm:$0xf] }
 0x4c5   : > { %v9995_v46 = vadd.f32 %v4202_v22, %v4170_v57  ;;  %v4031_v58 = vmul.f32 %v7192_v32, %v9972_v8  ;;  %vm4036_vm11 = vweird.f32 %v7192_v32  ;;  %v6588_v40 = vor.u32 %v6997_v3, %v6587_v25  ;;  %v7000_v22 = vld [vmem:[#allocation5 + $0xe4] sm:$0xf]  ;;  %v6998_v25 = vld [vmem:[#allocation5 + $0xd4] sm:$0xf]  ;;  %v6597_v3 = vld [vmem:[#allocation5 + $0xd8] sm:$0xf0] }
 0x4c6   : > { %v3727_v23 = vpop.f32.mrf.mxu1  ;;  %v4023_v33 = vsel %vm4022_vm4, %v7188_v29, %v4019_v60  ;;  %7193 = vrcp.f32 %v9990_v59  ;;  %v3527_v29 = vadd.f32 %v9856_v11, %v9850_v41  ;;  %vm4037_vm4 = vmor %vm4035_vm7, %vm4036_vm11  ;;  %v4054_v13 = vand.u32 2147483647, %v9990_v59 }
 0x4c7   : > { %v4028_v15 = vsel %vm4025_vm13, %v4027_v18, %v4023_v33  ;;  %v4032_v26 = vsub.f32 1.0, %v4031_v58  ;;  %v3811_v6 = vadd.f32 %v3727_v23, %v9848_v42  ;;  %7195 = vpow2.f32 %v6546_v20  ;;  %4473 = vmatpush.bf16.msrb.mxu3 %v6588_v40 }
 0x4c8   : > { %v4171_v55 = vmul.f32 %v4028_v15, %v3842_v16  ;;  %v4187_v53 = vsub.f32 1.0, %v4028_v15  ;;  %vm4040_vm13 = vcmp.eq.f32.partialorder %v4039_v19, 8.507059e+37  ;;  %vm4050_vm7 = vweird.f32 %v9990_v59 }
 0x4c9   : > { %v4033_v9 = vmul.f32 %v7192_v32, %v4032_v26  ;;  %v3849_v14 = vadd.f32 %v9885_v36, %v3811_v6  ;;  %v3571_v6 = vadd.f32 %v9838_v45, %v9840_v62  ;;  %v11404_v62 = vld [vmem:[#allocation32_spill] sm:$0xff]  ;;  %v6600_v40 = vor.u32 %v6998_v25, %v6597_v3 }
 0x4ca   : > { %v4203_v17 = vmul.f32 %v4187_v53, %v9608_v47  ;;  %v11411_v25 = vld [vmem:[#allocation16_spill] sm:$0xff] }
 0x4cb   : > { %v4034_v7 = vadd.f32 %v7192_v32, %v4033_v9  ;;  %v6547_v41 = vmul.f32 -1.442695, %v3849_v14 }
 0x4cc   : > { %v3776_v0 = vpop.f32.mrf.mxu2  ;;  %v7194_v52 = vpop.eup %7193  ;;  %v10011_v27 = vadd.f32 %v4203_v17, %v4171_v55 }
 0x4cd   : > { %v10015_v42 = vadd.f32 %v3776_v0, %v9846_v30  ;;  %v4038_v47 = vsel %vm4037_vm4, %v7192_v32, %v4034_v7  ;;  %v4046_v11 = vmul.f32 %v7194_v52, %v9990_v59  ;;  %7197 = vpow2.f32 %v6547_v41  ;;  %v7196_v56 = vpop.eup %7195  ;;  %v6605_v32 = vld [vmem:[#allocation5 + $0xe8] sm:$0xf0] }
 0x4ce   : > { %v3729_v28 = vpop.f32.mrf.mxu1  ;;  %v4043_v8 = vsel %vm4040_vm13, %v4042_v49, %v4038_v47  ;;  %vm4051_vm11 = vweird.f32 %v7194_v52  ;;  %v4056_v30 = vand.u32 2147483648, %v9990_v59  ;;  %v10022_v61 = vadd.f32 1.0, %v7196_v56 }
 0x4cf   : > { %v3813_v43 = vadd.f32 %v3729_v28, %v3527_v29  ;;  %v4172_v57 = vmul.f32 %v4043_v8, %v3844_v50  ;;  %v4188_v2 = vsub.f32 1.0, %v4043_v8  ;;  %v4047_v5 = vsub.f32 1.0, %v4046_v11  ;;  %vm4052_vm4 = vmor %vm4050_vm7, %vm4051_vm11  ;;  %v6579_v8 = vld [vmem:[#allocation5 + $0xb0] sm:$0xf] }
 0x4d0   : > { %v6608_v18 = vor.u32 %v7000_v22, %v6605_v32  ;;  %7199 = vrcp.f32 %v10022_v61  ;;  %v4057_v15 = vor.u32 1.1754944e-38, %v4056_v30  ;;  %vm4055_vm13 = vcmp.eq.f32.partialorder %v4054_v13, 8.507059e+37  ;;  %v6995_v13 = vld [vmem:[#allocation5 + $0xb4] sm:$0xf0] }
 0x4d1   : > { %v3851_v63 = vadd.f32 %v9885_v36, %v3813_v43  ;;  %v4204_v60 = vmul.f32 %v4188_v2, %v9601_v35  ;;  %v4048_v31 = vmul.f32 %v7194_v52, %v4047_v5  ;;  %v3810_v0 = vadd.f32 %v9987_v1, %v3571_v6  ;;  %v11405_v43 = vld [vmem:[#allocation27_spill] sm:$0xff]  ;;  %v11407_v6 = vld [vmem:[#allocation18_spill] sm:$0xff] }
 0x4d2   : > { %4520 = vmatpush.bf16.msrb.mxu0 %v6608_v18  ;;  %v4071_v45 = vand.u32 2147483648, %v10022_v61  ;;  %v4069_v1 = vand.u32 2147483647, %v10022_v61  ;;  %v6580_v5 = vor.u32 %v6995_v13, %v6579_v8  ;;  %vm4065_vm7 = vweird.f32 %v10022_v61 }
 0x4d3   : > { %v6548_v58 = vmul.f32 -1.442695, %v3851_v63  ;;  %v10024_v23 = vadd.f32 %v4204_v60, %v4172_v57  ;;  %v4049_v16 = vadd.f32 %v7194_v52, %v4048_v31  ;;  %v7198_v35 = vpop.eup %7197  ;;  %v11406_v57 = vld [vmem:[#allocation17_spill] sm:$0xff]  ;;  %v3848_v2 = vadd.f32 %v9900_v34, %v3810_v0 }
 0x4d4   : > { %v10028_v33 = vpop.f32.mrf.mxu2  ;;  %v10033_v10 = vadd.f32 1.0, %v7198_v35  ;;  %v4072_v63 = vor.u32 1.1754944e-38, %v4071_v45  ;;  %v3850_v22 = vadd.f32 %v9900_v34, %v10015_v42  ;;  %4474 = vmatpush.bf16.msrb.mxu3 %v6580_v5 }
 0x4d5   : > { %7201 = vpow2.f32 %v6548_v58  ;;  %v4053_v26 = vsel %vm4052_vm4, %v7194_v52, %v4049_v16 }
 0x4d6   : > { %v3732_v55 = vpop.f32.mrf.mxu1  ;;  %v4058_v53 = vsel %vm4055_vm13, %v4057_v15, %v4053_v26  ;;  %7203 = vrcp.f32 %v10033_v10  ;;  %v7200_v19 = vpop.eup %7199  ;;  %v4084_v60 = vand.u32 2147483647, %v10033_v10  ;;  %vm4070_vm13 = vcmp.eq.f32.partialorder %v4069_v1, 8.507059e+37  ;;  %4521 = vmatpush.bf16.msrb.mxu0 %v6600_v40  ;;  %v11409_v1 = vld [vmem:[#allocation39_spill] sm:$0xff] }
 0x4d7   : > { %v4173_v59 = vmul.f32 %v4058_v53, %v3846_v39  ;;  %v4189_v20 = vsub.f32 1.0, %v4058_v53  ;;  %v3815_v9 = vadd.f32 %v3732_v55, %v9862_v54  ;;  %v4061_v7 = vmul.f32 %v7200_v19, %v10022_v61 }
 0x4d8   : > { %vm4066_vm11 = vweird.f32 %v7200_v19  ;;  %v4086_v18 = vand.u32 2147483648, %v10033_v10 }
 0x4d9   : > { %v4205_v17 = vmul.f32 %v4189_v20, %v9656_v37  ;;  %v3853_v24 = vadd.f32 %v9885_v36, %v3815_v9  ;;  %v4062_v49 = vsub.f32 1.0, %v4061_v7  ;;  %v3532_v37 = vadd.f32 %v11404_v62, %v9864_v48  ;;  %vm4067_vm4 = vmor %vm4065_vm7, %vm4066_vm11 }
 0x4da   : > { %vm4080_vm11 = vweird.f32 %v10033_v10  ;;  %vm4085_vm7 = vcmp.eq.f32.partialorder %v4084_v60, 8.507059e+37 }
 0x4db   : > { %v7202_v29 = vpop.eup %7201  ;;  %v10042_v14 = vadd.f32 %v4205_v17, %v4173_v59  ;;  %v6549_v54 = vmul.f32 -1.442695, %v3853_v24  ;;  %v4063_v28 = vmul.f32 %v7200_v19, %v4062_v49  ;;  %v4087_v24 = vor.u32 1.1754944e-38, %v4086_v18  ;;  %v6993_v18 = vld [vmem:[#allocation5 + $0xa4] sm:$0xf0] }
 0x4dc   : > { %v10045_v52 = vadd.f32 1.0, %v7202_v29  ;;  %v3781_v50 = vpop.f32.mrf.mxu2  ;;  %v7204_v41 = vpop.eup %7203  ;;  %v11408_v29 = vld [vmem:[#allocation30_spill] sm:$0xff] }
 0x4dd   : > { %v10048_v47 = vadd.f32 %v3781_v50, %v9860_v12  ;;  %v3576_v12 = vadd.f32 %v11406_v57, %v11405_v43  ;;  %v4076_v48 = vmul.f32 %v7204_v41, %v10033_v10  ;;  %v4064_v56 = vadd.f32 %v7200_v19, %v4063_v28 }
 0x4de   : > { %7205 = vrcp.f32 %v10045_v52  ;;  %v3734_v11 = vpop.f32.mrf.mxu1  ;;  %vm4081_vm6 = vweird.f32 %v7204_v41  ;;  %v4101_v10 = vand.u32 2147483648, %v10045_v52 }
 0x4df   : > { %7207 = vpow2.f32 %v6549_v54  ;;  %v3817_v30 = vadd.f32 %v3734_v11, %v3532_v37  ;;  %v4077_v32 = vsub.f32 1.0, %v4076_v48  ;;  %v4068_v31 = vsel %vm4067_vm4, %v7200_v19, %v4064_v56  ;;  %vm4082_vm4 = vmor %vm4080_vm11, %vm4081_vm6  ;;  %v3536_v11 = vpop.f32.mrf.mxu3 }
 0x4e0   : > { %v4073_v16 = vsel %vm4070_vm13, %v4072_v63, %v4068_v31  ;;  %v3814_v35 = vadd.f32 %v10028_v33, %v3576_v12  ;;  %v4099_v54 = vand.u32 2147483647, %v10045_v52  ;;  %vm4095_vm6 = vweird.f32 %v10045_v52  ;;  %v6571_v31 = vld [vmem:[#allocation5 + $0xa0] sm:$0xf] }
 0x4e1   : > { %v3855_v58 = vadd.f32 %v9885_v36, %v3817_v30  ;;  %v4078_v15 = vmul.f32 %v7204_v41, %v4077_v32  ;;  %v4174_v26 = vmul.f32 %v4073_v16, %v3848_v2  ;;  %v4190_v55 = vsub.f32 1.0, %v4073_v16  ;;  %v11410_v2 = vld [vmem:[#allocation33_spill] sm:$0xff] }
 0x4e2   : > { %v4102_v8 = vor.u32 1.1754944e-38, %v4101_v10  ;;  %v3852_v57 = vadd.f32 %v9900_v34, %v3814_v35  ;;  %v3537_v3 = vadd.f32 %v3536_v11, %v11411_v25 }
 0x4e3   : > { %v4079_v59 = vadd.f32 %v7204_v41, %v4078_v15  ;;  %v6550_v9 = vmul.f32 -1.442695, %v3855_v58  ;;  %v4206_v17 = vmul.f32 %v4190_v55, %v11407_v6  ;;  %v6589_v55 = vld [vmem:[#allocation5 + $0xc8] sm:$0xf0] }
 0x4e4   : > { %v7206_v61 = vpop.eup %7205  ;;  %v10067_v39 = vpop.f32.mrf.mxu2 }
 0x4e5   : > { %v7208_v42 = vpop.eup %7207  ;;  %v4091_v53 = vmul.f32 %v7206_v61, %v10045_v52  ;;  %v4083_v0 = vsel %vm4082_vm4, %v7204_v41, %v4079_v59  ;;  %v10078_v50 = vadd.f32 %v4206_v17, %v4174_v26  ;;  %vm4096_vm13 = vweird.f32 %v7206_v61  ;;  %v6996_v26 = vld [vmem:[#allocation5 + $0xc4] sm:$0xf] }
 0x4e6   : > { %v10071_v20 = vadd.f32 1.0, %v7208_v42  ;;  %v3737_v19 = vpop.f32.mrf.mxu1  ;;  %v4088_v49 = vsel %vm4085_vm7, %v4087_v24, %v4083_v0  ;;  %vm4097_vm11 = vmor %vm4095_vm6, %vm4096_vm13  ;;  %vm4100_vm7 = vcmp.eq.f32.partialorder %v4099_v54, 8.507059e+37  ;;  %v6572_v42 = vor.u32 %v6993_v18, %v6571_v31 }
 0x4e7   : > { %v4092_v33 = vsub.f32 1.0, %v4091_v53  ;;  %v3819_v7 = vadd.f32 %v3737_v19, %v11408_v29  ;;  %v4175_v37 = vmul.f32 %v4088_v49, %v3850_v22  ;;  %v4191_v45 = vsub.f32 1.0, %v4088_v49  ;;  %v6563_v49 = vld [vmem:[#allocation5 + $0x90] sm:$0xf] }
 0x4e8   : > { %7209 = vrcp.f32 %v10071_v20  ;;  %v4114_v53 = vand.u32 2147483647, %v10071_v20  ;;  %v4116_v59 = vand.u32 2147483648, %v10071_v20  ;;  %v6592_v19 = vor.u32 %v6996_v26, %v6589_v55  ;;  %4475 = vmatpush.bf16.msrb.mxu3 %v6572_v42  ;;  %v6717_v26 = vld [vmem:[#allocation5 + $0x68] sm:$0xf0] }
 0x4e9   : > { %v4093_v62 = vmul.f32 %v7206_v61, %v4092_v33  ;;  %7211 = vpow2.f32 %v6550_v9  ;;  %v4207_v41 = vmul.f32 %v4191_v45, %v11409_v1  ;;  %v3857_v13 = vadd.f32 %v9885_v36, %v3819_v7  ;;  %v6986_v1 = vld [vmem:[#allocation5 + $0x74] sm:$0xf]  ;;  %v6707_v55 = vld [vmem:[#allocation5 + $0x50] sm:$0xf] }
 0x4ea   : > { %4522 = vmatpush.bf16.msrb.mxu0 %v6592_v19  ;;  %vm4110_vm13 = vweird.f32 %v10071_v20  ;;  %v4117_v7 = vor.u32 1.1754944e-38, %v4116_v59 }
 0x4eb   : > { %v4094_v28 = vadd.f32 %v7206_v61, %v4093_v62  ;;  %v10088_v56 = vadd.f32 %v4207_v41, %v4175_v37  ;;  %v6551_v30 = vmul.f32 -1.442695, %v3857_v13  ;;  %v6991_v62 = vld [vmem:[#allocation5 + $0x94] sm:$0xf0]  ;;  %v6723_v37 = vld [vmem:[#allocation5 + $0x70] sm:$0xf] }
 0x4ec   : > { %v3786_v43 = vpop.f32.mrf.mxu2  ;;  %v11413_v13 = vld [vmem:[#allocation36_spill] sm:$0xff] }
 0x4ed   : > { %v4098_v12 = vsel %vm4097_vm11, %v7206_v61, %v4094_v28  ;;  %v10085_v48 = vadd.f32 %v3786_v43, %v11410_v2  ;;  %7213 = vpow2.f32 %v6551_v30  ;;  %v11412_v61 = vld [vmem:[#allocation13_spill] sm:$0xff]  ;;  %vm4115_vm11 = vcmp.eq.f32.partialorder %v4114_v53, 8.507059e+37  ;;  %v6983_v53 = vld [vmem:[#allocation5 + $0x54] sm:$0xf0] }
 0x4ee   : > { %v7210_v5 = vpop.eup %7209  ;;  %v4103_v52 = vsel %vm4100_vm7, %v4102_v8, %v4098_v12  ;;  %v3739_v40 = vpop.f32.mrf.mxu1  ;;  %v6725_v8 = vld [vmem:[#allocation5 + $0x78] sm:$0xf0]  ;;  %v6564_v43 = vor.u32 %v6991_v62, %v6563_v49  ;;  %v6994_v2 = vld [vmem:[#allocation5 + $0xb4] sm:$0xf]  ;;  %v6981_v62 = vld [vmem:[#allocation5 + $0x44] sm:$0xf0] }
 0x4ef   : > { %v4176_v63 = vmul.f32 %v4103_v52, %v3852_v57  ;;  %v4192_v22 = vsub.f32 1.0, %v4103_v52  ;;  %v4106_v32 = vmul.f32 %v7210_v5, %v10071_v20  ;;  %v7212_v60 = vpop.eup %7211  ;;  %v3821_v58 = vadd.f32 %v3739_v40, %v3537_v3  ;;  %v6987_v20 = vld [vmem:[#allocation5 + $0x74] sm:$0xf0]  ;;  %v11414_v3 = vld [vmem:[#allocation44_spill] sm:$0xff]  ;;  %v11415_v52 = vld [vmem:[#allocation31_spill] sm:$0xff] }
 0x4f0   : > { %v10092_v35 = vadd.f32 1.0, %v7212_v60  ;;  %vm4111_vm4 = vweird.f32 %v7210_v5  ;;  %v6724_v57 = vor.u32 %v6987_v20, %v6723_v37  ;;  %v6728_v12 = vor.u32 %v6986_v1, %v6725_v8  ;;  %4476 = vmatpush.bf16.msrb.mxu3 %v6564_v43  ;;  %v6989_v20 = vld [vmem:[#allocation5 + $0x84] sm:$0xf0]  ;;  %v3585_v1 = vpop.f32.mrf.mxu0 }
 0x4f1   : > { %v4208_v16 = vmul.f32 %v4192_v22, %v11412_v61  ;;  %v4107_v15 = vsub.f32 1.0, %v4106_v32  ;;  %v3859_v9 = vadd.f32 %v9885_v36, %v3821_v58  ;;  %vm4112_vm6 = vmor %vm4110_vm13, %vm4111_vm4  ;;  %v3854_v36 = vadd.f32 %v9900_v34, %v10048_v47  ;;  %v6715_v32 = vld [vmem:[#allocation5 + $0x60] sm:$0xf]  ;;  %v6985_v58 = vld [vmem:[#allocation5 + $0x64] sm:$0xf0] }
 0x4f2   : > { %7215 = vrcp.f32 %v10092_v35  ;;  %v3581_v30 = vadd.f32 %v11415_v52, %v11414_v3  ;;  %v4131_v31 = vand.u32 2147483648, %v10092_v35  ;;  %4648 = vmatpush.bf16.msra.mxu1 %v6724_v57  ;;  %v6984_v61 = vld [vmem:[#allocation5 + $0x64] sm:$0xf]  ;;  %4697 = vmatpush.bf16.msra.mxu2 %v6728_v12  ;;  %v6716_v42 = vor.u32 %v6985_v58, %v6715_v32  ;;  %v6573_v3 = vld [vmem:[#allocation5 + $0xa8] sm:$0xf0]  ;;  %v11417_v52 = vld [vmem:[#allocation34_spill] sm:$0xff] }
 0x4f3   : > { %v10097_v6 = vadd.f32 %v4208_v16, %v4176_v63  ;;  %v4108_v17 = vmul.f32 %v7210_v5, %v4107_v15  ;;  %v6552_v24 = vmul.f32 -1.442695, %v3859_v9  ;;  %v7214_v29 = vpop.eup %7213  ;;  %v4129_v63 = vand.u32 2147483647, %v10092_v35  ;;  %v11416_v12 = vld [vmem:[#allocation15_spill] sm:$0xff] }
 0x4f4   : > { %v10103_v54 = vadd.f32 1.0, %v7214_v29  ;;  %v3818_v16 = vadd.f32 %v10067_v39, %v3581_v30  ;;  %vm4125_vm4 = vweird.f32 %v10092_v35  ;;  %v6709_v39 = vld [vmem:[#allocation5 + $0x58] sm:$0xf0]  ;;  %v6708_v29 = vor.u32 %v6983_v53, %v6707_v55  ;;  %v6691_v32 = vld [vmem:[#allocation5 + $0x30] sm:$0xf] }
 0x4f5   : > { %v4109_v33 = vadd.f32 %v7210_v5, %v4108_v17  ;;  %7217 = vpow2.f32 %v6552_v24  ;;  %v6982_v17 = vld [vmem:[#allocation5 + $0x54] sm:$0xf]  ;;  %v4132_v24 = vor.u32 1.1754944e-38, %v4131_v31  ;;  %v6979_v31 = vld [vmem:[#allocation5 + $0x34] sm:$0xf0]  ;;  %v3858_v58 = vadd.f32 %v9900_v34, %v10085_v48  ;;  %v3788_v48 = vpop.f32.mrf.mxu2 }
 0x4f6   : > { %7219 = vrcp.f32 %v10103_v54  ;;  %4649 = vmatpush.bf16.msra.mxu1 %v6716_v42  ;;  %v4146_v49 = vand.u32 2147483648, %v10103_v54  ;;  %v6565_v42 = vld [vmem:[#allocation5 + $0x98] sm:$0xf0] }
 0x4f7   : > { %v4113_v0 = vsel %vm4112_vm6, %v7210_v5, %v4109_v33  ;;  %v6581_v5 = vld [vmem:[#allocation5 + $0xb8] sm:$0xf0]  ;;  %vm4130_vm6 = vcmp.eq.f32.partialorder %v4129_v63, 8.507059e+37  ;;  %v6720_v33 = vor.u32 %v6984_v61, %v6717_v26 }
 0x4f8   : > { %v4118_v10 = vsel %vm4115_vm11, %v4117_v7, %v4113_v0  ;;  %v7216_v45 = vpop.eup %7215  ;;  %v6584_v22 = vor.u32 %v6994_v2, %v6581_v5  ;;  %v6699_v7 = vld [vmem:[#allocation5 + $0x40] sm:$0xf]  ;;  %v3586_v2 = vadd.f32 %v3585_v1, %v11416_v12  ;;  %v4147_v63 = vor.u32 1.1754944e-38, %v4146_v49  ;;  %v6557_v49 = vld [vmem:[#allocation5 + $0x88] sm:$0xf0] }
 0x4f9   : > { %v4177_v11 = vmul.f32 %v4118_v10, %v3854_v36  ;;  %v4193_v28 = vsub.f32 1.0, %v4118_v10  ;;  %v4121_v41 = vmul.f32 %v7216_v45, %v10092_v35  ;;  %vm4126_vm7 = vweird.f32 %v7216_v45  ;;  %v6555_v35 = vld [vmem:[#allocation5 + $0x80] sm:$0xf]  ;;  %4698 = vmatpush.bf16.msra.mxu2 %v6720_v33 }
 0x4fa   : > { %4523 = vmatpush.bf16.msrb.mxu0 %v6584_v22  ;;  %vm4127_vm13 = vmor %vm4125_vm4, %vm4126_vm7  ;;  %v3856_v36 = vadd.f32 %v9900_v34, %v3818_v16  ;;  %v6556_v43 = vor.u32 %v6989_v20, %v6555_v35  ;;  %vm4140_vm7 = vweird.f32 %v10103_v54  ;;  %4650 = vmatpush.bf16.msra.mxu1 %v6708_v29  ;;  %v6700_v5 = vor.u32 %v6981_v62, %v6699_v7  ;;  %v6683_v33 = vld [vmem:[#allocation5 + $0x20] sm:$0xf]  ;;  %v6977_v29 = vld [vmem:[#allocation5 + $0x24] sm:$0xf0] }
 0x4fb   : > { %v4209_v47 = vmul.f32 %v4193_v28, %v11413_v13  ;;  %v7218_v25 = vpop.eup %7217  ;;  %v4122_v40 = vsub.f32 1.0, %v4121_v41  ;;  %v6712_v28 = vor.u32 %v6982_v17, %v6709_v39  ;;  %v3822_v20 = vadd.f32 %v3788_v48, %v3586_v2  ;;  %v6975_v2 = vld [vmem:[#allocation5 + $0x14] sm:$0xf0] }
 0x4fc   : > { %v10114_v18 = vadd.f32 1.0, %v7218_v25  ;;  %v10117_v59 = vpop.eup %7219  ;;  %v6992_v25 = vld [vmem:[#allocation5 + $0xa4] sm:$0xf]  ;;  %4477 = vmatpush.bf16.msrb.mxu3 %v6556_v43  ;;  %v6675_v43 = vld [vmem:[#allocation5 + $0x10] sm:$0xf] }
 0x4fd   : > { %v10111_v60 = vadd.f32 %v4209_v47, %v4177_v11  ;;  %v4123_v15 = vmul.f32 %v7216_v45, %v4122_v40  ;;  %v4136_v19 = vmul.f32 %v10117_v59, %v10103_v54  ;;  %vm4141_vm11 = vweird.f32 %v10117_v59  ;;  %v6980_v47 = vld [vmem:[#allocation5 + $0x44] sm:$0xf]  ;;  %4699 = vmatpush.bf16.msra.mxu2 %v6712_v28 }
 0x4fe   : > { %7221 = vrcp.f32 %v10114_v18  ;;  %v4144_v11 = vand.u32 2147483647, %v10103_v54  ;;  %vm4142_vm4 = vmor %vm4140_vm7, %vm4141_vm11  ;;  %v4159_v54 = vand.u32 2147483647, %v10114_v18  ;;  %v6576_v16 = vor.u32 %v6992_v25, %v6573_v3  ;;  %4651 = vmatpush.bf16.msra.mxu1 %v6700_v5 }
 0x4ff   : > { %v4124_v9 = vadd.f32 %v7216_v45, %v4123_v15  ;;  %v4137_v10 = vsub.f32 1.0, %v4136_v19  ;;  %v6990_v15 = vld [vmem:[#allocation5 + $0x94] sm:$0xf]  ;;  %v6693_v19 = vld [vmem:[#allocation5 + $0x38] sm:$0xf0]  ;;  %v4161_v39 = vand.u32 2147483648, %v10114_v18  ;;  %vm4155_vm7 = vweird.f32 %v10114_v18 }
 0x500   : > { %4524 = vmatpush.bf16.msrb.mxu0 %v6576_v16  ;;  %v6568_v7 = vor.u32 %v6990_v15, %v6565_v42  ;;  %vm10147_vm11 = vcmp.eq.f32.partialorder %v4159_v54, 8.507059e+37  ;;  %v6676_v54 = vor.u32 %v6975_v2, %v6675_v43  ;;  %v11421_v16 = vld [vmem:[#allocation19_spill] sm:$0xff]  ;;  %v10199_v43 = vmax.f32 %v9947_v38, 0.0 }
 0x501   : > { %v4128_v0 = vsel %vm4127_vm13, %v7216_v45, %v4124_v9  ;;  %v4138_v13 = vmul.f32 %v10117_v59, %v4137_v10  ;;  %v6701_v45 = vld [vmem:[#allocation5 + $0x48] sm:$0xf0]  ;;  %vm4145_vm13 = vcmp.eq.f32.partialorder %v4144_v11, 8.507059e+37  ;;  %v6978_v9 = vld [vmem:[#allocation5 + $0x34] sm:$0xf]  ;;  %v11420_v11 = vld [vmem:[#allocation14_spill] sm:$0xff] }
 0x502   : > { %v4133_v37 = vsel %vm4130_vm6, %v4132_v24, %v4128_v0  ;;  %v6704_v61 = vor.u32 %v6980_v47, %v6701_v45  ;;  %v6692_v24 = vor.u32 %v6979_v31, %v6691_v32  ;;  %v6696_v35 = vor.u32 %v6978_v9, %v6693_v19  ;;  %v6974_v31 = vld [vmem:[#allocation5 + $0x14] sm:$0xf]  ;;  %v6667_v42 = vld [vmem:[#allocation5] sm:$0xf]  ;;  %v6972_v19 = vld [vmem:[#allocation5 + $0x4] sm:$0xf] }
 0x503   : > { %v4178_v41 = vmul.f32 %v4133_v37, %v3856_v36  ;;  %v4194_v8 = vsub.f32 1.0, %v4133_v37  ;;  %v4139_v40 = vadd.f32 %v10117_v59, %v4138_v13  ;;  %v6976_v37 = vld [vmem:[#allocation5 + $0x24] sm:$0xf]  ;;  %v7019_v13 = vld [vmem:[#allocation5 + $0x174] sm:$0xf0]  ;;  %v4162_v47 = vor.u32 1.1754944e-38, %v4161_v39 }
 0x504   : > { %v10128_v57 = vpop.eup %7221  ;;  %4700 = vmatpush.bf16.msra.mxu2 %v6704_v61  ;;  %4652 = vmatpush.bf16.msra.mxu1 %v6692_v24  ;;  %v6684_v45 = vor.u32 %v6977_v29, %v6683_v33  ;;  %v10165_v9 = vmax.f32 %v9914_v44, 0.0  ;;  %v4247_v2 = vrot.slane %v10199_v43, 6 }
 0x505   : > { %v4210_v30 = vmul.f32 %v4194_v8, %v11417_v52  ;;  %v4151_v22 = vmul.f32 %v10128_v57, %v10114_v18  ;;  %v4143_v55 = vsel %vm4142_vm4, %v10117_v59, %v4139_v40  ;;  %vm4156_vm6 = vweird.f32 %v10128_v57  ;;  %v6988_v59 = vld [vmem:[#allocation5 + $0x84] sm:$0xf]  ;;  %v6835_v8 = vld [vmem:[#allocation5 + $0x170] sm:$0xf]  ;;  %4525 = vmatpush.bf16.msrb.mxu0 %v6568_v7  ;;  %v6827_v52 = vld [vmem:[#allocation5 + $0x160] sm:$0xf] }
 0x506   : > { %v4148_v17 = vsel %vm4145_vm13, %v4147_v63, %v4143_v55  ;;  %vm4157_vm4 = vmor %vm4155_vm7, %vm4156_vm6  ;;  %v6560_v12 = vor.u32 %v6988_v59, %v6557_v49  ;;  %v6836_v5 = vor.u32 %v7019_v13, %v6835_v8  ;;  %v6973_v55 = vld [vmem:[#allocation5 + $0x4] sm:$0xf0]  ;;  %v4245_v29 = vrot.slane %v10165_v9, 6  ;;  %v6837_v13 = vld [vmem:[#allocation5 + $0x178] sm:$0xf0] }
 0x507   : > { %v10141_v26 = vadd.f32 %v4210_v30, %v4178_v41  ;;  %v4152_v53 = vsub.f32 1.0, %v4151_v22  ;;  %v4179_v36 = vmul.f32 %v4148_v17, %v3858_v58  ;;  %v4195_v0 = vsub.f32 1.0, %v4148_v17  ;;  %v6685_v41 = vld [vmem:[#allocation5 + $0x28] sm:$0xf0]  ;;  %v7017_v30 = vld [vmem:[#allocation5 + $0x164] sm:$0xf0] }
 0x508   : > { %4701 = vmatpush.bf16.msra.mxu2 %v6696_v35  ;;  %v6688_v40 = vor.u32 %v6976_v37, %v6685_v41  ;;  %4851 = vmatpush.bf16.msra.mxu3 %v6836_v5  ;;  %v6828_v63 = vor.u32 %v7017_v30, %v6827_v52  ;;  %v3860_v22 = vadd.f32 %v9900_v34, %v3822_v20  ;;  %v6677_v58 = vld [vmem:[#allocation5 + $0x18] sm:$0xf0]  ;;  %v6669_v17 = vld [vmem:[#allocation5 + $0x8] sm:$0xf0]  ;;  %v4317_v7 = vrot.slane %v10165_v9, 7 }
 0x509   : > { %v4153_v10 = vmul.f32 %v10128_v57, %v4152_v53  ;;  %v4211_v28 = vmul.f32 %v4195_v0, %v11420_v11  ;;  %4653 = vmatpush.bf16.msra.mxu1 %v6684_v45  ;;  %4526 = vmatpush.bf16.msrb.mxu0 %v6560_v12  ;;  %v6680_v53 = vor.u32 %v6974_v31, %v6677_v58  ;;  %v11423_v0 = vld [vmem:[#allocation11_spill] sm:$0xff]  ;;  %v6819_v20 = vld [vmem:[#allocation5 + $0x150] sm:$0xf]  ;;  %v7018_v41 = vld [vmem:[#allocation5 + $0x174] sm:$0xf]  ;;  %v10251_v11 = vmax.f32 %v10011_v27, 0.0 }
 0x50a   : > { %v6668_v48 = vor.u32 %v6973_v55, %v6667_v42  ;;  %v6672_v33 = vor.u32 %v6972_v19, %v6669_v17  ;;  %vm11424_vm13 = vcmp.lt.s32.totalorder %v11423_v0, 1  ;;  %v6840_v45 = vor.u32 %v7018_v41, %v6837_v13  ;;  %v7013_v31 = vld [vmem:[#allocation5 + $0x144] sm:$0xf0]  ;;  %v7016_v58 = vld [vmem:[#allocation5 + $0x164] sm:$0xf] }
 0x50b   : > { %v4154_v1 = vadd.f32 %v10128_v57, %v4153_v10  ;;  %v10154_v25 = vadd.f32 %v4211_v28, %v4179_v36  ;;  %vm11425_vm6 = vmmov %vm11424_vm13  ;;  %v10225_v42 = vmax.f32 %v9977_v51, 0.0  ;;  %v4251_v41 = vrot.slane %v10251_v11, 6 }
 0x50c   : > { %4702 = vmatpush.bf16.msra.mxu2 %v6688_v40  ;;  %4852 = vmatpush.bf16.msra.mxu3 %v6828_v63  ;;  %v10277_v63 = vmax.f32 %v10042_v14, 0.0 }
 0x50d   : > { %v4158_v3 = vsel %vm4157_vm4, %v10128_v57, %v4154_v1  ;;  %v10161_v57 = vmax.f32 %v9929_v4, 0.0  ;;  %4654 = vmatpush.bf16.msra.mxu1 %v6676_v54  ;;  %v7015_v1 = vld [vmem:[#allocation5 + $0x154] sm:$0xf0]  ;;  %4900 = vmatpush.bf16.msra.mxu0 %v6840_v45  ;;  %v4249_v19 = vrot.slane %v10225_v42, 6 }
 0x50e   : > { %v4163_v18 = vsel %vm10147_vm11, %v4162_v47, %v4158_v3  ;;  %vm11426_vm11 = vcmp.lt.s32.totalorder %v11423_v0, 2  ;;  %v6820_v8 = vor.u32 %v7015_v1, %v6819_v20  ;;  %v10196_v47 = vmax.f32 %v9957_v21, 0.0  ;;  %11452 = vst [vmem:[#allocation17_spill] sm:$0xff] %v10277_v63 }
 0x50f   : > { %v4196_v32 = vsub.f32 1.0, %v4163_v18  ;;  %v4180_v61 = vmul.f32 %v4163_v18, %v3860_v22  ;;  %v4246_v39 = vrot.slane %v10161_v57, 6  ;;  %v4318_v4 = vrot.slane %v10161_v57, 7  ;;  %vm11427_vm7 = vmmov %vm11426_vm11 }
 0x510   : > { %4703 = vmatpush.bf16.msra.mxu2 %v6680_v53  ;;  %4853 = vmatpush.bf16.msra.mxu3 %v6820_v8  ;;  %v4320_v12 = vrot.slane %v10196_v47, 7  ;;  %v4248_v5 = vrot.slane %v10196_v47, 6  ;;  %v4319_v3 = vrot.slane %v10199_v43, 7  ;;  %v4323_v1 = vrot.slane %v10251_v11, 7 }
 0x511   : > { %v4212_v15 = vmul.f32 %v4196_v32, %v11421_v16  ;;  %4655 = vmatpush.bf16.msra.mxu1 %v6668_v48  ;;  %v4347_v10 = vsel %vm11424_vm13, %v4317_v7, %v4318_v4  ;;  %v4275_v49 = vsel %vm11426_vm11, %v4245_v29, %v4246_v39  ;;  %v6811_v32 = vld [vmem:[#allocation5 + $0x140] sm:$0xf]  ;;  %v10222_v16 = vmax.f32 %v9995_v46, 0.0 }
 0x512   : > { %v6812_v54 = vor.u32 %v7013_v31, %v6811_v32  ;;  %v4325_v31 = vrot.slane %v10277_v63, 7  ;;  %v4746_v0 = vpack.c.bf16 %v10161_v57, %v10165_v9 }
 0x513   : > { %v4228_v34 = vadd.f32 %v4212_v15, %v4180_v61  ;;  %v6829_v61 = vld [vmem:[#allocation5 + $0x168] sm:$0xf0]  ;;  %v4322_v55 = vrot.slane %v10222_v16, 7  ;;  %v4250_v53 = vrot.slane %v10222_v16, 6 }
 0x514   : > { %4704 = vmatpush.bf16.msra.mxu2 %v6672_v33  ;;  %v6832_v15 = vor.u32 %v7016_v58, %v6829_v61  ;;  %4854 = vmatpush.bf16.msra.mxu3 %v6812_v54  ;;  %v4253_v58 = vrot.slane %v10277_v63, 6  ;;  %v10303_v33 = vmax.f32 %v10088_v56, 0.0 }
 0x515   : > { %v10169_v24 = vmax.f32 %v4228_v34, 0.0  ;;  %v4321_v34 = vrot.slane %v10225_v42, 7 }
 0x516   : > { %4901 = vmatpush.bf16.msra.mxu0 %v6832_v15  ;;  %11460 = vst [vmem:[#allocation30_spill] sm:$0xff] %v10303_v33 }
 0x517   : > { %11422 = vst [vmem:[#allocation37_spill] sm:$0xff] %v10169_v24  ;;  %v4260_v44 = vrot.slane %v10169_v24, 6  ;;  %v4332_v36 = vrot.slane %v10169_v24, 7 }
 0x519   : > { %v4348_v59 = vsel %vm11425_vm6, %v4332_v36, %v4317_v7  ;;  %v4276_v62 = vsel %vm11427_vm7, %v4260_v44, %v4245_v29  ;;  %v11441_v29 = vld [vmem:[#allocation21_spill] sm:$0xff] }
 0x51a   : > { %v6618_v35 = vpack.c.bf16 %v4347_v10, %v4348_v59  ;;  %v6730_v37 = vpack.c.bf16 %v4275_v49, %v4276_v62  ;;  %v6803_v7 = vld [vmem:[#allocation5 + $0x130] sm:$0xf]  ;;  %v7011_v10 = vld [vmem:[#allocation5 + $0x134] sm:$0xf0]  ;;  %v7014_v59 = vld [vmem:[#allocation5 + $0x154] sm:$0xf] }
 0x51b   : > { %v6804_v49 = vor.u32 %v7011_v10, %v6803_v7  ;;  %v6821_v62 = vld [vmem:[#allocation5 + $0x158] sm:$0xf0]  ;;  %v4327_v10 = vrot.slane %v10303_v33, 7 }
 0x51c   : > { %6619 = vmatmul.msk.bf16.vlgmr.msrb.gmra.mxu3 %vm8779_vm0, %v6618_v35  ;;  %6643 = vmatmul.msk.bf16.vlgmr.msrb.gmra.mxu0 %vm8779_vm0, %v6618_v35  ;;  %vm11431_vm0 = vmmov %vm11427_vm7  ;;  %vm11442_vm7 = vnez %v11441_v29  ;;  %v10248_v35 = vmax.f32 %v10024_v23, 0.0 }
 0x51d   : > { %6731 = vmatmul.msk.bf16.vlgmr.msra.gmra.mxu1 %vm8787_vm2, %v6730_v37  ;;  %6755 = vmatmul.msk.bf16.vlgmr.msra.gmra.mxu2 %vm8787_vm2, %v6730_v37  ;;  %vm11430_vm2 = vmmov %vm11425_vm6  ;;  %v4273_v21 = vsel %vm11431_vm0, %v4247_v2, %v4248_v5  ;;  %v6824_v37 = vor.u32 %v7014_v59, %v6821_v62  ;;  %v4255_v59 = vrot.slane %v10303_v33, 6 }
 0x51e   : > { %v4345_v52 = vsel %vm11430_vm2, %v4319_v3, %v4320_v12  ;;  %vm11432_vm4 = vmmov %vm11430_vm2  ;;  %11443 = vst [vmem:[#allocation32_spill] sm:$0xff] %v10248_v35  ;;  %4855 = vmatpush.bf16.msra.mxu3 %v6804_v49  ;;  %v4324_v28 = vrot.slane %v10248_v35, 7  ;;  %v4252_v20 = vrot.slane %v10248_v35, 6 }
 0x51f   : > { %v4346_v30 = vsel %vm11432_vm4, %v4318_v4, %v4319_v3  ;;  %vm11433_vm13 = vmmov %vm11431_vm0  ;;  %4902 = vmatpush.bf16.msra.mxu0 %v6824_v37  ;;  %v11449_v3 = vld [vmem:[#allocation22_spill] sm:$0xff] }
 0x520   : > { %v6621_v38 = vpack.c.bf16 %v4345_v52, %v4346_v30  ;;  %v4274_v18 = vsel %vm11433_vm13, %v4246_v39, %v4247_v2  ;;  %vm11438_vm6 = vmmov %vm11430_vm2  ;;  %vm11450_vm13 = vnez %v11449_v3  ;;  %v6795_v2 = vld [vmem:[#allocation5 + $0x120] sm:$0xf]  ;;  %v7009_v52 = vld [vmem:[#allocation5 + $0x124] sm:$0xf0] }
 0x521   : > { %v6733_v40 = vpack.c.bf16 %v4273_v21, %v4274_v18  ;;  %v4344_v48 = vsel %vm11438_vm6, %v4320_v12, %v4321_v34  ;;  %vm11439_vm11 = vmmov %vm11431_vm0  ;;  %v7012_v21 = vld [vmem:[#allocation5 + $0x144] sm:$0xf]  ;;  %v6796_v30 = vor.u32 %v7009_v52, %v6795_v2  ;;  %v10274_v18 = vmax.f32 %v10078_v50, 0.0 }
 0x522   : > { %v4272_v39 = vsel %vm11439_vm11, %v4248_v5, %v4249_v19  ;;  %v10326_v5 = vmax.f32 %v10141_v26, 0.0  ;;  %v10329_v2 = vmax.f32 %v10111_v60, 0.0 }
 0x523   : > { %11451 = vst [vmem:[#allocation27_spill] sm:$0xff] %v10274_v18  ;;  %4856 = vmatpush.bf16.msra.mxu3 %v6796_v30  ;;  %v4326_v22 = vrot.slane %v10274_v18, 7  ;;  %v4254_v32 = vrot.slane %v10274_v18, 6 }
 0x524   : > { %11468 = vst [vmem:[#allocation39_spill] sm:$0xff] %v10326_v5  ;;  %v4258_v30 = vrot.slane %v10326_v5, 6 }
 0x525   : > { %11469 = vst [vmem:[#allocation33_spill] sm:$0xff] %v10329_v2 }
 0x52c   : > { %6622 = vmatmul.msk.bf16.gmra.mxu3 %vm8261_vm8, %v6621_v38  ;;  %6646 = vmatmul.msk.bf16.gmra.mxu0 %vm8261_vm8, %v6621_v38  ;;  %vm11437_vm8 = vmmov %vm11431_vm0  ;;  %v6813_v38 = vld [vmem:[#allocation5 + $0x148] sm:$0xf0] }
 0x52d   : > { %6734 = vmatmul.msk.bf16.gmra.mxu1 %vm7872_vm3, %v6733_v40  ;;  %6758 = vmatmul.msk.bf16.gmra.mxu2 %vm7872_vm3, %v6733_v40  ;;  %vm11436_vm3 = vmmov %vm11430_vm2  ;;  %v4271_v46 = vsel %vm11437_vm8, %v4249_v19, %v4250_v53  ;;  %v6816_v40 = vor.u32 %v7012_v21, %v6813_v38  ;;  %v6787_v19 = vld [vmem:[#allocation5 + $0x110] sm:$0xf]  ;;  %v4330_v21 = vrot.slane %v10326_v5, 7  ;;  %v4329_v38 = vrot.slane %v10329_v2, 7 }
 0x52e   : > { %v4343_v17 = vsel %vm11436_vm3, %v4321_v34, %v4322_v55  ;;  %v6736_v4 = vpack.c.bf16 %v4271_v46, %v4272_v39  ;;  %v7010_v46 = vld [vmem:[#allocation5 + $0x134] sm:$0xf]  ;;  %v10300_v39 = vmax.f32 %v10097_v6, 0.0 }
 0x52f   : > { %v6624_v51 = vpack.c.bf16 %v4343_v17, %v4344_v48  ;;  %4903 = vmatpush.bf16.msra.mxu0 %v6816_v40  ;;  %v7007_v17 = vld [vmem:[#allocation5 + $0x114] sm:$0xf0]  ;;  %v4257_v40 = vrot.slane %v10329_v2, 6 }
 0x530   : > { %v6788_v48 = vor.u32 %v7007_v17, %v6787_v19  ;;  %11459 = vst [vmem:[#allocation18_spill] sm:$0xff] %v10300_v39  ;;  %v4328_v29 = vrot.slane %v10300_v39, 7  ;;  %v4256_v7 = vrot.slane %v10300_v39, 6 }
 0x532   : > { %4857 = vmatpush.bf16.msra.mxu3 %v6788_v48 }
 0x53c   : > { %6625 = vmatmul.msk.bf16.gmra.mxu3 %vm8881_vm5, %v6624_v51  ;;  %6649 = vmatmul.msk.bf16.gmra.mxu0 %vm8881_vm5, %v6624_v51  ;;  %vm11444_vm5 = vmmov %vm11430_vm2  ;;  %v6805_v51 = vld [vmem:[#allocation5 + $0x138] sm:$0xf0] }
 0x53d   : > { %6737 = vmatmul.msk.bf16.gmra.mxu1 %vm11442_vm7, %v6736_v4  ;;  %6761 = vmatmul.msk.bf16.gmra.mxu2 %vm11442_vm7, %v6736_v4  ;;  %v4341_v8 = vsel %vm11444_vm5, %v4323_v1, %v4324_v28  ;;  %vm11445_vm2 = vmmov %vm11431_vm0  ;;  %v6808_v4 = vor.u32 %v7010_v46, %v6805_v51 }
 0x53e   : > { %v4269_v23 = vsel %vm11445_vm2, %v4251_v41, %v4252_v20  ;;  %vm11446_vm0 = vmmov %vm11436_vm3 }
 0x53f   : > { %v4342_v13 = vsel %vm11446_vm0, %v4322_v55, %v4323_v1  ;;  %vm11447_vm4 = vmmov %vm11445_vm2  ;;  %4904 = vmatpush.bf16.msra.mxu0 %v6808_v4  ;;  %v11466_v1 = vld [vmem:[#allocation24_spill] sm:$0xff]  ;;  %v4336_v60 = vsel %vm11446_vm0, %v4328_v29, %v4329_v38  ;;  %v11479_v4 = vld [vmem:[#allocation38_spill] sm:$0xff] }
 0x540   : > { %v6627_v27 = vpack.c.bf16 %v4341_v8, %v4342_v13  ;;  %v4270_v45 = vsel %vm11447_vm4, %v4250_v53, %v4251_v41  ;;  %vm11454_vm3 = vmmov %vm11445_vm2  ;;  %vm11467_vm5 = vnez %v11466_v1  ;;  %v6779_v41 = vld [vmem:[#allocation5 + $0x100] sm:$0xf]  ;;  %v7005_v8 = vld [vmem:[#allocation5 + $0x104] sm:$0xf0]  ;;  %v4748_v1 = vpack.c.bf16 %v10222_v16, %v10225_v42 }
 0x541   : > { %v6739_v12 = vpack.c.bf16 %v4269_v23, %v4270_v45  ;;  %v4267_v50 = vsel %vm11454_vm3, %v4253_v58, %v4254_v32  ;;  %vm11455_vm8 = vmmov %vm11446_vm0  ;;  %v7008_v23 = vld [vmem:[#allocation5 + $0x124] sm:$0xf]  ;;  %v6780_v13 = vor.u32 %v7005_v8, %v6779_v41  ;;  %v7006_v45 = vld [vmem:[#allocation5 + $0x114] sm:$0xf]  ;;  %vm11480_vm3 = vnez %v11479_v4 }
 0x542   : > { %v4340_v61 = vsel %vm11455_vm8, %v4324_v28, %v4325_v31  ;;  %vm11456_vm6 = vmmov %vm11445_vm2  ;;  %v5404_v41 = vld [vmem:[%s10397_s17 + $0x8] sm:$0xff] }
 0x543   : > { %v4268_v15 = vsel %vm11456_vm6, %v4252_v20, %v4253_v58  ;;  %vm11463_vm11 = vmmov %vm11446_vm0  ;;  %4858 = vmatpush.bf16.msra.mxu3 %v6780_v13  ;;  %v7004_v58 = vld [vmem:[#allocation5 + $0x104] sm:$0xf]  ;;  %v5405_v13 = vld [vmem:[%s10397_s17 + $0x10] sm:$0xff] }
 0x544   : > { %v6742_v55 = vpack.c.bf16 %v4267_v50, %v4268_v15  ;;  %v4338_v62 = vsel %vm11463_vm11, %v4326_v22, %v4327_v10  ;;  %vm11464_vm7 = vmmov %vm11445_vm2 }
 0x545   : > { %v4266_v37 = vsel %vm11464_vm7, %v4254_v32, %v4255_v59  ;;  %vm11471_vm4 = vmmov %vm11445_vm2 }
 0x54c   : > { %6628 = vmatmul.msk.bf16.gmra.mxu3 %vm8935_vm1, %v6627_v27  ;;  %6652 = vmatmul.msk.bf16.gmra.mxu0 %vm8935_vm1, %v6627_v27  ;;  %vm11453_vm1 = vmmov %vm11446_vm0  ;;  %v6797_v27 = vld [vmem:[#allocation5 + $0x128] sm:$0xf0] }
 0x54d   : > { %6740 = vmatmul.msk.bf16.gmra.mxu1 %vm11450_vm13, %v6739_v12  ;;  %6764 = vmatmul.msk.bf16.gmra.mxu2 %vm11450_vm13, %v6739_v12  ;;  %v4339_v54 = vsel %vm11453_vm1, %v4325_v31, %v4326_v22  ;;  %v6789_v12 = vld [vmem:[#allocation5 + $0x118] sm:$0xf0]  ;;  %v6800_v3 = vor.u32 %v7008_v23, %v6797_v27  ;;  %v4263_v22 = vsel %vm11445_vm2, %v4257_v40, %v4258_v30  ;;  %vm11475_vm13 = vmmov %vm11446_vm0 }
 0x54e   : > { %v6630_v14 = vpack.c.bf16 %v4339_v54, %v4340_v61  ;;  %v6792_v52 = vor.u32 %v7006_v45, %v6789_v12  ;;  %v4264_v31 = vsel %vm11471_vm4, %v4256_v7, %v4257_v40  ;;  %v6781_v54 = vld [vmem:[#allocation5 + $0x108] sm:$0xf0]  ;;  %vm11478_vm1 = vmmov %vm11445_vm2  ;;  %v4749_v12 = vpack.c.bf16 %v10248_v35, %v10251_v11 }
 0x54f   : > { %4905 = vmatpush.bf16.msra.mxu0 %v6800_v3  ;;  %v6748_v50 = vpack.c.bf16 %v4263_v22, %v4264_v31  ;;  %v6784_v61 = vor.u32 %v7004_v58, %v6781_v54  ;;  %v5406_v3 = vld [vmem:[%s10397_s17 + $0x18] sm:$0xff]  ;;  %v4750_v22 = vpack.c.bf16 %v10274_v18, %v10277_v63  ;;  %v5407_v54 = vld [vmem:[%s10397_s17 + $0x20] sm:$0xff] }
 0x553   : > { %4906 = vmatpush.bf16.msra.mxu0 %v6792_v52 }
 0x557   : > { %4907 = vmatpush.bf16.msra.mxu0 %v6784_v61 }
 0x55c   : > { %6631 = vmatmul.msk.bf16.gmra.mxu3 %vm8989_vm9, %v6630_v14  ;;  %6655 = vmatmul.msk.bf16.gmra.mxu0 %vm8989_vm9, %v6630_v14  ;;  %vm11461_vm9 = vmmov %vm11446_vm0 }
 0x55d   : > { %6743 = vmatmul.msk.bf16.gmra.mxu1 %vm11373_vm14, %v6742_v55  ;;  %6767 = vmatmul.msk.bf16.gmra.mxu2 %vm11373_vm14, %v6742_v55  ;;  %v4337_v49 = vsel %vm11461_vm9, %v4327_v10, %v4328_v29  ;;  %vm11462_vm14 = vmmov %vm11445_vm2  ;;  %v10352_v55 = vmax.f32 %v10154_v25, 0.0 }
 0x55e   : > { %v4265_v6 = vsel %vm11462_vm14, %v4255_v59, %v4256_v7  ;;  %v6633_v56 = vpack.c.bf16 %v4337_v49, %v4338_v62  ;;  %v4747_v49 = vpack.c.bf16 %v10196_v47, %v10199_v43 }
 0x55f   : > { %v6745_v28 = vpack.c.bf16 %v4265_v6, %v4266_v37  ;;  %11474 = vst [vmem:[#allocation16_spill] sm:$0xff] %v10352_v55  ;;  %v4331_v53 = vrot.slane %v10352_v55, 7  ;;  %v4259_v34 = vrot.slane %v10352_v55, 6  ;;  %v7438_v37 = vmov 0  }
 0x560   : > { %7092 = vset.pattern.permute.xlu0 %v7438_v37  ;;  %7093 = vset.pattern.permute.xlu1 %v7438_v37 }
 0x561   : > { %v4333_v19 = vsel %vm11475_vm13, %v4331_v53, %v4332_v36  ;;  %v4262_v25 = vsel %vm11478_vm1, %v4258_v30, %v4259_v34  ;;  %v11481_v36 = vld [vmem:[#allocation26_spill] sm:$0xff]  ;;  %7094 = vset.pattern.permute.xlu2 %v7438_v37  ;;  %5431 = vperm.xlu1 %7093, %v5405_v13   ;;  %v5411_v30 = vld [vmem:[%s10397_s17 + $0x40] sm:$0xff]  ;;  %v5416_v37 = vld [vmem:[%s10397_s17 + $0x68] sm:$0xff]  ;;  %vm5627_vm1 = vcmask 1041409  }
 0x562   : > { %vm11482_vm8 = vnez %v11481_v36  ;;  %5441 = vperm.xlu2 %7094, %v5407_v54  }
 0x569   : > { %5436 = vperm.xlu1 %7093, %v5406_v3  }
 0x56c   : > { %6634 = vmatmul.msk.bf16.gmra.mxu3 %vm9043_vm10, %v6633_v56  ;;  %6658 = vmatmul.msk.bf16.gmra.mxu0 %vm9043_vm10, %v6633_v56  ;;  %vm11470_vm10 = vmmov %vm11446_vm0  ;;  %v5403_v56 = vld [vmem:[%s10397_s17] sm:$0xff] }
 0x56d   : > { %6746 = vmatmul.msk.bf16.gmra.mxu1 %vm11467_vm5, %v6745_v28  ;;  %6770 = vmatmul.msk.bf16.gmra.mxu2 %vm11467_vm5, %v6745_v28  ;;  %v4335_v26 = vsel %vm11470_vm10, %v4329_v38, %v4330_v21 }
 0x56e   : > { %v6636_v32 = vpack.c.bf16 %v4335_v26, %v4336_v60  ;;  %5421 = vperm.xlu0 %7092, %v5403_v56   ;;  %v5414_v60 = vld [vmem:[%s10397_s17 + $0x58] sm:$0xff]  ;;  %v5412_v56 = vld [vmem:[%s10397_s17 + $0x48] sm:$0xff] }
 0x571   : > { %5466 = vperm.xlu1 %7093, %v5412_v56  }
 0x576   : > { %5426 = vperm.xlu0 %7092, %v5404_v41  }
 0x57c   : > { %6637 = vmatmul.msk.bf16.gmra.mxu3 %vm11388_vm12, %v6636_v32  ;;  %6661 = vmatmul.msk.bf16.gmra.mxu0 %vm11388_vm12, %v6636_v32  ;;  %vm11476_vm12 = vmmov %vm11445_vm2 }
 0x57d   : > { %6749 = vmatmul.msk.bf16.gmra.mxu1 %vm11390_vm15, %v6748_v50  ;;  %6773 = vmatmul.msk.bf16.gmra.mxu2 %vm11390_vm15, %v6748_v50  ;;  %v4261_v17 = vsel %vm11476_vm12, %v4259_v34, %v4260_v44  ;;  %vm11477_vm15 = vmmov %vm11446_vm0  ;;  %v5409_v50 = vld [vmem:[%s10397_s17 + $0x30] sm:$0xff] }
 0x57e   : > { %v4334_v46 = vsel %vm11477_vm15, %v4330_v21, %v4331_v53  ;;  %v6751_v51 = vpack.c.bf16 %v4261_v17, %v4262_v25  ;;  %5461 = vperm.xlu0 %7092, %v5411_v30   ;;  %v4751_v53 = vpack.c.bf16 %v10300_v39, %v10303_v33  ;;  %v5413_v25 = vld [vmem:[%s10397_s17 + $0x50] sm:$0xff] }
 0x57f   : > { %v6639_v48 = vpack.c.bf16 %v4333_v19, %v4334_v46  ;;  %v5408_v19 = vld [vmem:[%s10397_s17 + $0x28] sm:$0xff] }
 0x580   : > { %5446 = vperm.xlu2 %7094, %v5408_v19   ;;  %v5410_v19 = vld [vmem:[%s10397_s17 + $0x38] sm:$0xff] }
 0x586   : > { %5476 = vperm.xlu0 %7092, %v5414_v60   ;;  %v4753_v60 = vpack.c.bf16 %v10169_v24, %v10352_v55  ;;  %v5417_v24 = vld [vmem:[%s10397_s17 + $0x70] sm:$0xff] }
 0x588   : > { %5471 = vperm.xlu2 %7094, %v5413_v25   ;;  %v5418_v25 = vld [vmem:[%s10397_s17 + $0x78] sm:$0xff] }
 0x58c   : > { %6640 = vmatmul.msk.bf16.gmra.mxu3 %vm11480_vm3, %v6639_v48  ;;  %6664 = vmatmul.msk.bf16.gmra.mxu0 %vm11480_vm3, %v6639_v48 }
 0x58d   : > { %6752 = vmatmul.msk.bf16.gmra.mxu1 %vm11482_vm8, %v6751_v51  ;;  %6776 = vmatmul.msk.bf16.gmra.mxu2 %vm11482_vm8, %v6751_v51 }
 0x58e   : > { %5451 = vperm.xlu0 %7092, %v5409_v50  }
 0x590   : > { %5486 = vperm.xlu2 %7094, %v5416_v37  }
 0x596   : > { %5496 = vperm.xlu0 %7092, %v5418_v25  }
 0x598   : > { %5456 = vperm.xlu2 %7094, %v5410_v19  }
 0x599   : > { %v10376_v44 = vpop.f32.mrf.mxu0 }
 0x59a   : > { %v10430_v26 = vpop.f32.mrf.mxu1 }
 0x59c   : > { %4859 = vmatmul.bf16.vlgmr.msra.gmra.mxu3 %v4746_v0  ;;  %4908 = vmatmul.bf16.vlgmr.msra.gmra.mxu0 %v4746_v0 }
 0x59f   : > { %v10380_v29 = vpop.f32.mrf.mxu3 }
 0x5a0   : > { %v10439_v58 = vpop.f32.mrf.mxu2 }
 0x5a1   : > { %v10382_v7 = vpop.f32.mrf.mxu0 }
 0x5a2   : > { %v4659_v61 = vpop.f32.mrf.mxu1 }
 0x5a7   : > { %v10384_v10 = vpop.f32.mrf.mxu3 }
 0x5a8   : > { %v10449_v34 = vpop.f32.mrf.mxu2  ;;  %v4660_v18 = vadd.f32 %v4659_v61, %v10384_v10 }
 0x5a9   : > { %v10386_v59 = vpop.f32.mrf.mxu0 }
 0x5aa   : > { %v10452_v17 = vpop.f32.mrf.mxu1 }
 0x5ac   : > { %4864 = vmatmul.bf16.gmra.mxu3 %v4747_v49  ;;  %4913 = vmatmul.bf16.gmra.mxu0 %v4747_v49  ;;  %v4752_v49 = vpack.c.bf16 %v10326_v5, %v10329_v2 }
 0x5af   : > { %v10390_v6 = vpop.f32.mrf.mxu3 }
 0x5b0   : > { %v10459_v51 = vpop.f32.mrf.mxu2 }
 0x5b1   : > { %v10399_v62 = vpop.f32.mrf.mxu0 }
 0x5b2   : > { %v10463_v36 = vpop.f32.mrf.mxu1 }
 0x5b7   : > { %v10402_v28 = vpop.f32.mrf.mxu3 }
 0x5b8   : > { %v10473_v41 = vpop.f32.mrf.mxu2 }
 0x5b9   : > { %v10404_v20 = vpop.f32.mrf.mxu0 }
 0x5bc   : > { %4869 = vmatmul.bf16.gmra.mxu3 %v4748_v1  ;;  %4918 = vmatmul.bf16.gmra.mxu0 %v4748_v1 }
 0x5bf   : > { %v10409_v8 = vpop.f32.mrf.mxu3 }
 0x5c1   : > { %v10411_v23 = vpop.f32.mrf.mxu0 }
 0x5c7   : > { %v10414_v27 = vpop.f32.mrf.mxu3 }
 0x5c9   : > { %v10416_v45 = vpop.f32.mrf.mxu0 }
 0x5cc   : > { %4874 = vmatmul.bf16.gmra.mxu3 %v4749_v12  ;;  %4923 = vmatmul.bf16.gmra.mxu0 %v4749_v12  ;;  %v10477_v12 = vpop.f32.mrf.mxu1 }
 0x5cf   : > { %v10421_v52 = vpop.f32.mrf.mxu3 }
 0x5d1   : > { %v10423_v21 = vpop.f32.mrf.mxu0 }
 0x5d4   : > { %v10487_v54 = vpop.f32.mrf.mxu1 }
 0x5d7   : > { %v10426_v38 = vpop.f32.mrf.mxu3 }
 0x5d9   : > { %v10428_v40 = vpop.f32.mrf.mxu0 }
 0x5dc   : > { %4879 = vmatmul.bf16.gmra.mxu3 %v4750_v22  ;;  %4928 = vmatmul.bf16.gmra.mxu0 %v4750_v22  ;;  %v10483_v22 = vpop.f32.mrf.mxu2  ;;  %v10498_v37 = vpop.f32.mrf.mxu1 }
 0x5df   : > { %v10435_v32 = vpop.f32.mrf.mxu3 }
 0x5e1   : > { %v10437_v31 = vpop.f32.mrf.mxu0 }
 0x5e4   : > { %v10496_v56 = vpop.f32.mrf.mxu2  ;;  %v10512_v2 = vpop.f32.mrf.mxu1 }
 0x5e7   : > { %v10443_v14 = vpop.f32.mrf.mxu3 }
 0x5e9   : > { %v10445_v15 = vpop.f32.mrf.mxu0 }
 0x5ec   : > { %4884 = vmatmul.bf16.gmra.mxu3 %v4751_v53  ;;  %4933 = vmatmul.bf16.gmra.mxu0 %v4751_v53  ;;  %v5415_v53 = vld [vmem:[%s10397_s17 + $0x60] sm:$0xff]  ;;  %v10508_v19 = vpop.f32.mrf.mxu2 }
 0x5ed   : > { %5481 = vperm.xlu1 %7093, %v5415_v53   ;;  %v4658_v53 = vadd.f32 %v10430_v26, %v10380_v29 }
 0x5ef   : > { %v10454_v46 = vpop.f32.mrf.mxu3 }
 0x5f1   : > { %v10456_v48 = vpop.f32.mrf.mxu0 }
 0x5f5   : > { %5491 = vperm.xlu1 %7093, %v5417_v24  }
 0x5f7   : > { %v10461_v4 = vpop.f32.mrf.mxu3 }
 0x5f9   : > { %v10465_v0 = vpop.f32.mrf.mxu0 }
 0x5fa   : > { %11483 = vst [vmem:[#allocation13_spill] sm:$0xff] %v10465_v0 }
 0x5fc   : > { %4889 = vmatmul.bf16.gmra.mxu3 %v4752_v49  ;;  %4938 = vmatmul.bf16.gmra.mxu0 %v4752_v49 }
 0x5ff   : > { %v10471_v1 = vpop.f32.mrf.mxu3 }
 0x600   : > { %11484 = vst [vmem:[#allocation36_spill] sm:$0xff] %v10471_v1 }
 0x601   : > { %v10475_v13 = vpop.f32.mrf.mxu0 }
 0x602   : > { %11485 = vst [vmem:[#allocation44_spill] sm:$0xff] %v10475_v13 }
 0x607   : > { %v10479_v3 = vpop.f32.mrf.mxu3 }
 0x608   : > { %11486 = vst [vmem:[#allocation31_spill] sm:$0xff] %v10479_v3 }
 0x609   : > { %v10481_v30 = vpop.f32.mrf.mxu0 }
 0x60a   : > { %11487 = vst [vmem:[#allocation15_spill] sm:$0xff] %v10481_v30 }
 0x60c   : > { %4894 = vmatmul.bf16.gmra.mxu3 %v4753_v60  ;;  %4943 = vmatmul.bf16.gmra.mxu0 %v4753_v60  ;;  %v7301_v60 = vld [vmem:[%s10997_s6] sm:$0xff] }
 0x60d   : > { %v4981_v30 = vperm.slane %v7301_v60, 3 }
 0x60f   : > { %v10489_v50 = vpop.f32.mrf.mxu3  ;;  %v10510_v25 = vperm.slane %v4981_v30, 3  ;;  %v10522_v30 = vpop.f32.mrf.mxu1 }
 0x610   : > { %11488 = vst [vmem:[#allocation34_spill] sm:$0xff] %v10489_v50  ;;  %v10518_v50 = vpop.f32.mrf.mxu2 }
 0x611   : > { %v10494_v49 = vpop.f32.mrf.mxu0 }
 0x612   : > { %11489 = vst [vmem:[#allocation14_spill] sm:$0xff] %v10494_v49 }
 0x617   : > { %v10500_v5 = vpop.f32.mrf.mxu3  ;;  %v10532_v63 = vpop.f32.mrf.mxu1 }
 0x618   : > { %11490 = vst [vmem:[#allocation19_spill] sm:$0xff] %v10500_v5 }
 0x619   : > { %v4909_v55 = vpop.f32.mrf.mxu0 }
 0x61f   : > { %v4860_v49 = vpop.f32.mrf.mxu3 }
 0x620   : > { %v4949_v39 = vadd.f32 %v4860_v49, %v4658_v53 }
 0x621   : > { %v10514_v5 = vpop.f32.mrf.mxu0 }
 0x622   : > { %v4987_v24 = vadd.f32 %v10510_v25, %v4949_v39  ;;  %v4663_v39 = vadd.f32 %v10452_v17, %v10390_v6  ;;  %v4665_v6 = vadd.f32 %v10463_v36, %v10402_v28 }
 0x624   : > { %v6841_v13 = vmul.f32 -1.442695, %v4987_v24  ;;  %v10529_v24 = vpop.f32.mrf.mxu2 }
 0x626   : > { %7223 = vpow2.f32 %v6841_v13 }
 0x627   : > { %v4862_v33 = vpop.f32.mrf.mxu3 }
 0x628   : > { %v4951_v29 = vadd.f32 %v4862_v33, %v4660_v18 }
 0x629   : > { %v10520_v26 = vpop.f32.mrf.mxu0 }
 0x62a   : > { %v4989_v3 = vadd.f32 %v10510_v25, %v4951_v29 }
 0x62c   : > { %v7224_v0 = vpop.eup %7223  ;;  %v6842_v49 = vmul.f32 -1.442695, %v4989_v3  ;;  %v4982_v3 = vperm.slane %v7301_v60, 7  ;;  %v10545_v60 = vadd.f32 %v10459_v51, %v10386_v59  ;;  %v10564_v59 = vadd.f32 %v10487_v54, %v10414_v27 }
 0x62d   : > { %v5067_v53 = vadd.f32 1.0, %v7224_v0 }
 0x62e   : > { %7225 = vpow2.f32 %v6842_v49  ;;  %v4707_v49 = vadd.f32 %v10439_v58, %v10376_v44  ;;  %v10547_v1 = vperm.slane %v4982_v3, 3  ;;  %v10568_v3 = vadd.f32 %v10496_v56, %v10411_v23 }
 0x62f   : > { %7227 = vrcp.f32 %v5067_v53  ;;  %v4865_v10 = vpop.f32.mrf.mxu3  ;;  %v5094_v36 = vand.u32 2147483648, %v5067_v53  ;;  %vm5088_vm9 = vweird.f32 %v5067_v53  ;;  %v10581_v56 = vadd.f32 %v10508_v19, %v10416_v45 }
 0x630   : > { %v4953_v61 = vadd.f32 %v4865_v10, %v4663_v39  ;;  %v4709_v10 = vadd.f32 %v10449_v34, %v10382_v7  ;;  %v10554_v7 = vadd.f32 %v10473_v41, %v10399_v62  ;;  %v4668_v34 = vadd.f32 %v10477_v12, %v10409_v8 }
 0x631   : > { %v10527_v13 = vpop.f32.mrf.mxu0  ;;  %v10572_v8 = vadd.f32 %v10498_v37, %v10421_v52  ;;  %v5095_v27 = vor.u32 1.1754944e-38, %v5094_v36  ;;  %v10585_v52 = vadd.f32 %v10512_v2, %v10426_v38 }
 0x632   : > { %v4991_v18 = vadd.f32 %v10510_v25, %v4953_v61 }
 0x634   : > { %v7226_v33 = vpop.eup %7225  ;;  %v6843_v29 = vmul.f32 -1.442695, %v4991_v18 }
 0x635   : > { %v7228_v35 = vpop.eup %7227  ;;  %v10534_v0 = vadd.f32 1.0, %v7226_v33  ;;  %v4950_v33 = vadd.f32 %v4909_v55, %v4707_v49  ;;  %v10560_v55 = vadd.f32 %v10483_v22, %v10404_v20  ;;  %v4682_v22 = vpop.f32.mrf.mxu1 }
 0x636   : > { %7229 = vpow2.f32 %v6843_v29  ;;  %v5084_v17 = vmul.f32 %v7228_v35, %v5067_v53  ;;  %vm5089_vm6 = vweird.f32 %v7228_v35  ;;  %v5092_v29 = vand.u32 2147483647, %v5067_v53 }
 0x637   : > { %7231 = vrcp.f32 %v10534_v0  ;;  %v4867_v39 = vpop.f32.mrf.mxu3  ;;  %v4988_v20 = vadd.f32 %v10547_v1, %v4950_v33  ;;  %vm5090_vm14 = vmor %vm5088_vm9, %vm5089_vm6  ;;  %v4952_v33 = vadd.f32 %v10514_v5, %v4709_v10  ;;  %v5107_v19 = vand.u32 2147483647, %v10534_v0  ;;  %v5422_v10 = vpop.permute.xlu0 %5421 }
 0x638   : > { %v4955_v61 = vadd.f32 %v4867_v39, %v4665_v6  ;;  %v5085_v18 = vsub.f32 1.0, %v5084_v17  ;;  %v4728_v6 = vpop.f32.mrf.mxu2  ;;  %vm5093_vm11 = vcmp.eq.f32.partialorder %v5092_v29, 8.507059e+37  ;;  %v5109_v2 = vand.u32 2147483648, %v10534_v0 }
 0x639   : > { %v10549_v28 = vpop.f32.mrf.mxu0  ;;  %v10607_v5 = vadd.f32 %v10532_v63, %v10443_v14  ;;  %vm5103_vm5 = vweird.f32 %v10534_v0  ;;  %vm5108_vm2 = vcmp.eq.f32.partialorder %v5107_v19, 8.507059e+37 }
 0x63a   : > { %v4993_v44 = vadd.f32 %v10510_v25, %v4955_v61  ;;  %v5086_v58 = vmul.f32 %v7228_v35, %v5085_v18  ;;  %v4958_v19 = vadd.f32 %v10549_v28, %v10560_v55 }
 0x63c   : > { %v7230_v51 = vpop.eup %7229  ;;  %v6844_v17 = vmul.f32 -1.442695, %v4993_v44  ;;  %v5087_v62 = vadd.f32 %v7228_v35, %v5086_v58  ;;  %v10599_v58 = vadd.f32 %v10522_v30, %v10435_v32  ;;  %v4990_v30 = vadd.f32 %v10547_v1, %v4952_v33 }
 0x63d   : > { %v7232_v41 = vpop.eup %7231  ;;  %v10575_v12 = vadd.f32 1.0, %v7230_v51 }
 0x63e   : > { %7233 = vpow2.f32 %v6844_v17  ;;  %v5091_v23 = vsel %vm5090_vm14, %v7228_v35, %v5087_v62  ;;  %v5099_v54 = vmul.f32 %v7232_v41, %v10534_v0  ;;  %v10590_v35 = vadd.f32 %v10518_v50, %v10423_v21 }
 0x63f   : > { %7235 = vrcp.f32 %v10575_v12  ;;  %v4870_v37 = vpop.f32.mrf.mxu3  ;;  %v5096_v53 = vsel %vm5093_vm11, %v5095_v27, %v5091_v23  ;;  %vm5104_vm7 = vweird.f32 %v7232_v41  ;;  %v10603_v21 = vadd.f32 %v10529_v24, %v10428_v40  ;;  %v4684_v27 = vpop.f32.mrf.mxu1 }
 0x640   : > { %v4957_v49 = vadd.f32 %v4870_v37, %v4668_v34  ;;  %v5323_v39 = vmul.f32 %v5096_v53, %v4988_v20  ;;  %v5339_v61 = vsub.f32 1.0, %v5096_v53  ;;  %v5100_v18 = vsub.f32 1.0, %v5099_v54  ;;  %vm5105_vm10 = vmor %vm5103_vm5, %vm5104_vm7  ;;  %v4731_v63 = vpop.f32.mrf.mxu2 }
 0x641   : > { %v4921_v45 = vpop.f32.mrf.mxu0  ;;  %v10610_v50 = vadd.f32 %v4728_v6, %v10437_v31  ;;  %v5110_v40 = vor.u32 1.1754944e-38, %v5109_v2  ;;  %v10618_v6 = vadd.f32 %v4682_v22, %v10454_v46  ;;  %v4954_v0 = vadd.f32 %v10520_v26, %v10545_v60 }
 0x642   : > { %v4995_v38 = vadd.f32 %v10510_v25, %v4957_v49  ;;  %v5355_v36 = vmul.f32 %v5339_v61, %v10165_v9  ;;  %v5101_v44 = vmul.f32 %v7232_v41, %v5100_v18  ;;  %v10628_v49 = vadd.f32 %v4684_v27, %v10461_v4 }
 0x643   : > { %v5122_v26 = vand.u32 2147483647, %v10575_v12  ;;  %v4992_v18 = vadd.f32 %v10547_v1, %v4954_v0  ;;  %vm5118_vm4 = vweird.f32 %v10575_v12  ;;  %vm5629_vm7 = vcmask 1042434  }
 0x644   : > { %v7234_v29 = vpop.eup %7233  ;;  %v6845_v9 = vmul.f32 -1.442695, %v4995_v38  ;;  %v5371_v34 = vadd.f32 %v5355_v36, %v5323_v39  ;;  %v5102_v51 = vadd.f32 %v7232_v41, %v5101_v44 }
 0x645   : > { %v7236_v32 = vpop.eup %7235  ;;  %v10614_v17 = vadd.f32 1.0, %v7234_v29  ;;  %v5427_v29 = vpop.permute.xlu0 %5426  ;;  %vm5123_vm12 = vcmp.eq.f32.partialorder %v5122_v26, 8.507059e+37 }
 0x646   : > { %7237 = vpow2.f32 %v6845_v9  ;;  %v5387_v14 = vmax.f32 %v5371_v34, 0.0  ;;  %v5106_v31 = vsel %vm5105_vm10, %v7232_v41, %v5102_v51  ;;  %v5114_v24 = vmul.f32 %v7236_v32, %v10575_v12 }
 0x647   : > { %7239 = vrcp.f32 %v10614_v17  ;;  %v4872_v62 = vpop.f32.mrf.mxu3  ;;  %v5111_v20 = vsel %vm5108_vm2, %v5110_v40, %v5106_v31  ;;  %v10625_v41 = vadd.f32 %v4731_v63, %v10445_v15  ;;  %v4956_v15 = vadd.f32 %v10527_v13, %v10554_v7 }
 0x648   : > { %v5499_v23 = vmul.f32 %v5422_v10, %v5387_v14  ;;  %v4959_v54 = vadd.f32 %v4872_v62, %v10564_v59  ;;  %v5324_v37 = vmul.f32 %v5111_v20, %v4990_v30  ;;  %v5340_v53 = vsub.f32 1.0, %v5111_v20 }
 0x649   : > { %v10630_v46 = vpop.f32.mrf.mxu0  ;;  %v5115_v22 = vsub.f32 1.0, %v5114_v24  ;;  %v5124_v59 = vand.u32 2147483648, %v10575_v12  ;;  %vm5119_vm0 = vweird.f32 %v7236_v32  ;;  %v5137_v40 = vand.u32 2147483647, %v10614_v17 }
 0x64a   : > { %v5515_v60 = vrot.slane %v5499_v23, 4  ;;  %v4997_v39 = vadd.f32 %v10510_v25, %v4959_v54  ;;  %v5356_v61 = vmul.f32 %v5340_v53, %v10161_v57  ;;  %v4960_v57 = vadd.f32 %v4921_v45, %v10568_v3  ;;  %vm5120_vm13 = vmor %vm5118_vm4, %vm5119_vm0 }
 0x64b   : > { %v5116_v33 = vmul.f32 %v7236_v32, %v5115_v22  ;;  %v5125_v7 = vor.u32 1.1754944e-38, %v5124_v59  ;;  %v10653_v12 = vadd.f32 %v10547_v1, %v4956_v15  ;;  %v10656_v63 = vadd.f32 %v10547_v1, %v4958_v19 }
 0x64c   : > { %v7238_v4 = vpop.eup %7237  ;;  %v5516_v2 = vmax.f32 %v5499_v23, %v5515_v60  ;;  %v6846_v38 = vmul.f32 -1.442695, %v4997_v39  ;;  %v5372_v36 = vadd.f32 %v5356_v61, %v5324_v37  ;;  %v10659_v24 = vadd.f32 %v10547_v1, %v4960_v57 }
 0x64d   : > { %v10641_v44 = vpop.eup %7239  ;;  %v10643_v10 = vadd.f32 1.0, %v7238_v4  ;;  %v5117_v9 = vadd.f32 %v7236_v32, %v5116_v33  ;;  %vm5133_vm15 = vweird.f32 %v10614_v17  ;;  %v5139_v23 = vand.u32 2147483648, %v10614_v17 }
 0x64e   : > { %7241 = vpow2.f32 %v6846_v38  ;;  %v5388_v13 = vmax.f32 %v5372_v36, 0.0  ;;  %v5517_v28 = vrot.slane %v5516_v2, 2  ;;  %v5129_v51 = vmul.f32 %v10641_v44, %v10614_v17 }
 0x64f   : > { %7243 = vrcp.f32 %v10643_v10  ;;  %v4875_v55 = vpop.f32.mrf.mxu3  ;;  %v5121_v34 = vsel %vm5120_vm13, %v7236_v32, %v5117_v9  ;;  %v5152_v22 = vand.u32 2147483647, %v10643_v10  ;;  %vm10668_vm3 = vcmp.eq.f32.partialorder %v5137_v40, 8.507059e+37 }
 0x650   : > { %v5500_v30 = vmul.f32 %v5427_v29, %v5388_v13  ;;  %v4961_v3 = vadd.f32 %v4875_v55, %v10572_v8  ;;  %v5126_v45 = vsel %vm5123_vm12, %v5125_v7, %v5121_v34  ;;  %v5518_v8 = vmax.f32 %v5516_v2, %v5517_v28  ;;  %v4733_v7 = vpop.f32.mrf.mxu2 }
 0x651   : > { %v5325_v14 = vmul.f32 %v5126_v45, %v4992_v18  ;;  %v5341_v31 = vsub.f32 1.0, %v5126_v45  ;;  %v10662_v62 = vpop.f32.mrf.mxu0  ;;  %v5130_v27 = vsub.f32 1.0, %v5129_v51  ;;  %vm5134_vm8 = vweird.f32 %v10641_v44  ;;  %v5432_v18 = vpop.permute.xlu1 %5431 }
 0x652   : > { %v5521_v32 = vrot.slane %v5500_v30, 4  ;;  %v4999_v0 = vadd.f32 %v10510_v25, %v4961_v3  ;;  %v5154_v33 = vand.u32 2147483648, %v10643_v10  ;;  %v5519_v4 = vrot.slane %v5518_v8, 1  ;;  %vm5135_vm6 = vmor %vm5133_vm15, %vm5134_vm8  ;;  %v10690_v3 = vpop.permute.xlu2 %5441 }
 0x653   : > { %v5357_v20 = vmul.f32 %v5341_v31, %v10199_v43  ;;  %v5131_v59 = vmul.f32 %v10641_v44, %v5130_v27  ;;  %v5140_v9 = vor.u32 1.1754944e-38, %v5139_v23  ;;  %vm5148_vm9 = vweird.f32 %v10643_v10 }
 0x654   : > { %v7242_v54 = vpop.eup %7241  ;;  %v5522_v37 = vmax.f32 %v5500_v30, %v5521_v32  ;;  %v6847_v53 = vmul.f32 -1.442695, %v4999_v0  ;;  %vm10684_vm14 = vcmp.eq.f32.partialorder %v5152_v22, 8.507059e+37  ;;  %v5155_v17 = vor.u32 1.1754944e-38, %v5154_v33 }
 0x655   : > { %v7244_v60 = vpop.eup %7243  ;;  %v10672_v39 = vadd.f32 1.0, %v7242_v54  ;;  %v5373_v61 = vadd.f32 %v5357_v20, %v5325_v14  ;;  %v5132_v38 = vadd.f32 %v10641_v44, %v5131_v59  ;;  %vm5631_vm13 = vcmask 1043459  }
 0x656   : > { %v5523_v43 = vrot.slane %v5522_v37, 2  ;;  %7245 = vpow2.f32 %v6847_v53  ;;  %v5144_v15 = vmul.f32 %v7244_v60, %v10643_v10  ;;  %vm5149_vm11 = vweird.f32 %v7244_v60 }
 0x657   : > { %7247 = vrcp.f32 %v10672_v39  ;;  %v5389_v19 = vmax.f32 %v5373_v61, 0.0  ;;  %v4877_v2 = vpop.f32.mrf.mxu3  ;;  %v5136_v28 = vsel %vm5135_vm6, %v10641_v44, %v5132_v38  ;;  %v5167_v0 = vand.u32 2147483647, %v10672_v39  ;;  %vm5150_vm5 = vmor %vm5148_vm9, %vm5149_vm11 }
 0x658   : > { %v5524_v36 = vmax.f32 %v5522_v37, %v5523_v43  ;;  %v4963_v57 = vadd.f32 %v4877_v2, %v10585_v52  ;;  %v5145_v29 = vsub.f32 1.0, %v5144_v15  ;;  %v5520_v52 = vmax.f32 %v5518_v8, %v5519_v4 }
 0x659   : > { %v5501_v13 = vmul.f32 %v5432_v18, %v5389_v19  ;;  %v5141_v45 = vsel %vm10668_vm3, %v5140_v9, %v5136_v28  ;;  %v10694_v32 = vpop.f32.mrf.mxu0  ;;  %v5169_v19 = vand.u32 2147483648, %v10672_v39  ;;  %v5437_v38 = vpop.permute.xlu1 %5436  ;;  %vm5163_vm2 = vweird.f32 %v10672_v39 }
 0x65a   : > { %v5525_v55 = vrot.slane %v5524_v36, 1  ;;  %v5001_v34 = vadd.f32 %v10510_v25, %v4963_v57  ;;  %v5146_v51 = vmul.f32 %v7244_v60, %v5145_v29  ;;  %v5326_v23 = vmul.f32 %v5141_v45, %v10653_v12 }
 0x65b   : > { %v5527_v30 = vrot.slane %v5501_v13, 4  ;;  %v5342_v54 = vsub.f32 1.0, %v5141_v45  ;;  %vm10719_vm0 = vcmp.eq.f32.partialorder %v5167_v0, 8.507059e+37  ;;  %vm5633_vm15 = vcmask 1044484  }
 0x65c   : > { %v7246_v40 = vpop.eup %7245  ;;  %v5526_v14 = vmax.f32 %v5524_v36, %v5525_v55  ;;  %v6848_v31 = vmul.f32 -1.442695, %v5001_v34  ;;  %v5147_v44 = vadd.f32 %v7244_v60, %v5146_v51  ;;  %vm5635_vm9 = vcmask 1045509  }
 0x65d   : > { %v7248_v20 = vpop.eup %7247  ;;  %v10697_v27 = vadd.f32 1.0, %v7246_v40  ;;  %v5528_v8 = vmax.f32 %v5501_v13, %v5527_v30  ;;  %v5358_v59 = vmul.f32 %v5342_v54, %v10196_v47  ;;  %v10730_v30 = vpop.permute.xlu0 %5461 }
 0x65e   : > { %v5628_v37 = vsel %vm5627_vm1, %v5526_v14, %v5520_v52  ;;  %7249 = vpow2.f32 %v6848_v31  ;;  %v5151_v53 = vsel %vm5150_vm5, %v7244_v60, %v5147_v44  ;;  %v5159_v22 = vmul.f32 %v7248_v20, %v10672_v39 }
 0x65f   : > { %7251 = vrcp.f32 %v10697_v27  ;;  %v5529_v26 = vrot.slane %v5528_v8, 2  ;;  %v5156_v61 = vsel %vm10684_vm14, %v5155_v17, %v5151_v53  ;;  %v4880_v43 = vpop.f32.mrf.mxu3  ;;  %v4962_v60 = vadd.f32 %v10630_v46, %v10581_v56 }
 0x660   : > { %v5327_v10 = vmul.f32 %v5156_v61, %v10656_v63  ;;  %v5343_v18 = vsub.f32 1.0, %v5156_v61  ;;  %v4965_v12 = vadd.f32 %v4880_v43, %v10599_v58  ;;  %v5160_v15 = vsub.f32 1.0, %v5159_v22 }
 0x661   : > { %v5530_v33 = vmax.f32 %v5528_v8, %v5529_v26  ;;  %v5374_v4 = vadd.f32 %v5358_v59, %v5326_v23  ;;  %vm5164_vm10 = vweird.f32 %v7248_v20  ;;  %v4964_v63 = vadd.f32 %v10662_v62, %v10590_v35  ;;  %v5447_v35 = vpop.permute.xlu2 %5446  ;;  %v10728_v51 = vpop.f32.mrf.mxu0 }
 0x662   : > { %v5359_v2 = vmul.f32 %v5343_v18, %v10225_v42  ;;  %v5003_v36 = vadd.f32 %v10510_v25, %v4965_v12  ;;  %v5161_v47 = vmul.f32 %v7248_v20, %v5160_v15  ;;  %vm5165_vm4 = vmor %vm5163_vm2, %vm5164_vm10  ;;  %v5170_v62 = vor.u32 1.1754944e-38, %v5169_v19 }
 0x663   : > { %v5531_v57 = vrot.slane %v5530_v33, 1  ;;  %v5390_v58 = vmax.f32 %v5374_v4, 0.0  ;;  %v10742_v23 = vadd.f32 %v4733_v7, %v10456_v48  ;;  %v5000_v54 = vadd.f32 %v10547_v1, %v4962_v60  ;;  %v10759_v4 = vpop.f32.mrf.mxu1 }
 0x664   : > { %v7250_v29 = vpop.eup %7249  ;;  %v5375_v56 = vadd.f32 %v5359_v2, %v5327_v10  ;;  %v6849_v46 = vmul.f32 -1.442695, %v5003_v36  ;;  %v5162_v9 = vadd.f32 %v7248_v20, %v5161_v47  ;;  %v10746_v22 = vadd.f32 %v10547_v1, %v4964_v63 }
 0x665   : > { %v10723_v42 = vpop.eup %7251  ;;  %v5532_v28 = vmax.f32 %v5530_v33, %v5531_v57  ;;  %v10725_v55 = vadd.f32 1.0, %v7250_v29  ;;  %v5502_v34 = vmul.f32 %v5437_v38, %v5390_v58  ;;  %v5184_v33 = vand.u32 2147483648, %v10697_v27 }
 0x666   : > { %v5391_v39 = vmax.f32 %v5375_v56, 0.0  ;;  %7253 = vpow2.f32 %v6849_v46  ;;  %v5166_v52 = vsel %vm5165_vm4, %v7248_v20, %v5162_v9  ;;  %v5174_v17 = vmul.f32 %v10723_v42, %v10697_v27  ;;  %v10771_v46 = vpop.permute.xlu0 %5476 }
 0x667   : > { %v5630_v45 = vsel %vm5629_vm7, %v5532_v28, %v5628_v37  ;;  %7255 = vrcp.f32 %v10725_v55  ;;  %v5533_v40 = vrot.slane %v5502_v34, 4  ;;  %v5171_v14 = vsel %vm10719_vm0, %v5170_v62, %v5166_v52  ;;  %v4882_v31 = vpop.f32.mrf.mxu3 }
 0x668   : > { %v5503_v44 = vmul.f32 %v10690_v3, %v5391_v39  ;;  %v5328_v0 = vmul.f32 %v5171_v14, %v10659_v24  ;;  %v5344_v8 = vsub.f32 1.0, %v5171_v14  ;;  %v4967_v20 = vadd.f32 %v4882_v31, %v10607_v5 }
 0x669   : > { %v5534_v37 = vmax.f32 %v5502_v34, %v5533_v40  ;;  %v5175_v53 = vsub.f32 1.0, %v5174_v17  ;;  %v5182_v5 = vand.u32 2147483647, %v10697_v27  ;;  %vm5179_vm12 = vweird.f32 %v10723_v42  ;;  %v10764_v47 = vpop.permute.xlu2 %5471  ;;  %v10769_v56 = vpop.f32.mrf.mxu0 }
 0x66a   : > { %v5539_v26 = vrot.slane %v5503_v44, 4  ;;  %v5360_v61 = vmul.f32 %v5344_v8, %v10222_v16  ;;  %v5005_v3 = vadd.f32 %v10510_v25, %v4967_v20  ;;  %vm5178_vm3 = vweird.f32 %v10697_v27 }
 0x66b   : > { %v5535_v24 = vrot.slane %v5534_v37, 2  ;;  %v5176_v59 = vmul.f32 %v10723_v42, %v5175_v53  ;;  %v4966_v57 = vadd.f32 %v10694_v32, %v10603_v21  ;;  %vm5180_vm8 = vmor %vm5178_vm3, %vm5179_vm12  ;;  %v5185_v28 = vor.u32 1.1754944e-38, %v5184_v33 }
 0x66c   : > { %v7254_v48 = vpop.eup %7253  ;;  %v5540_v43 = vmax.f32 %v5503_v44, %v5539_v26  ;;  %v5376_v10 = vadd.f32 %v5360_v61, %v5328_v0  ;;  %v6850_v18 = vmul.f32 -1.442695, %v5005_v3  ;;  %vm5183_vm6 = vcmp.eq.f32.partialorder %v5182_v5, 8.507059e+37  ;;  %v4689_v3 = vpop.f32.mrf.mxu1 }
 0x66d   : > { %v10753_v12 = vpop.eup %7255  ;;  %v5536_v15 = vmax.f32 %v5534_v37, %v5535_v24  ;;  %v10755_v60 = vadd.f32 1.0, %v7254_v48  ;;  %v5177_v16 = vadd.f32 %v10723_v42, %v5176_v59  ;;  %vm5193_vm14 = vweird.f32 %v10725_v55 }
 0x66e   : > { %v5541_v19 = vrot.slane %v5540_v43, 2  ;;  %v5392_v2 = vmax.f32 %v5376_v10, 0.0  ;;  %7257 = vpow2.f32 %v6850_v18  ;;  %v5189_v38 = vmul.f32 %v10753_v12, %v10725_v55 }
 0x66f   : > { %v5537_v36 = vrot.slane %v5536_v15, 1  ;;  %7259 = vrcp.f32 %v10755_v60  ;;  %v4885_v63 = vpop.f32.mrf.mxu3  ;;  %v5181_v7 = vsel %vm5180_vm8, %v10723_v42, %v5177_v16  ;;  %v5004_v42 = vadd.f32 %v10547_v1, %v4966_v57 }
 0x670   : > { %v5542_v58 = vmax.f32 %v5540_v43, %v5541_v19  ;;  %v5504_v29 = vmul.f32 %v5447_v35, %v5392_v2  ;;  %v4969_v9 = vadd.f32 %v4885_v63, %v10618_v6  ;;  %v5190_v34 = vsub.f32 1.0, %v5189_v38  ;;  %v5452_v19 = vpop.permute.xlu0 %5451 }
 0x671   : > { %v5538_v13 = vmax.f32 %v5536_v15, %v5537_v36  ;;  %v5186_v35 = vsel %vm5183_vm6, %v5185_v28, %v5181_v7  ;;  %v5212_v53 = vand.u32 2147483647, %v10755_v60  ;;  %vm5194_vm11 = vweird.f32 %v10753_v12  ;;  %v10792_v48 = vpop.permute.xlu2 %5486  ;;  %v4936_v33 = vpop.f32.mrf.mxu0 }
 0x672   : > { %v5543_v27 = vrot.slane %v5542_v58, 1  ;;  %v5545_v62 = vrot.slane %v5504_v29, 4  ;;  %v5007_v21 = vadd.f32 %v10510_v25, %v4969_v9  ;;  %v5191_v39 = vmul.f32 %v10753_v12, %v5190_v34  ;;  %vm10797_vm10 = vmor %vm5193_vm14, %vm5194_vm11 }
 0x673   : > { %v5632_v32 = vsel %vm5631_vm13, %v5538_v13, %v5630_v45  ;;  %v5329_v14 = vmul.f32 %v5186_v35, %v5000_v54  ;;  %v5345_v0 = vsub.f32 1.0, %v5186_v35  ;;  %v5197_v61 = vand.u32 2147483647, %v10725_v55  ;;  %v11499_v35 = vld [vmem:[#allocation36_spill] sm:$0xff] }
 0x674   : > { %v7258_v6 = vpop.eup %7257  ;;  %v5544_v52 = vmax.f32 %v5542_v58, %v5543_v27  ;;  %v5546_v17 = vmax.f32 %v5504_v29, %v5545_v62  ;;  %v6851_v40 = vmul.f32 -1.442695, %v5007_v21  ;;  %v5192_v37 = vadd.f32 %v10753_v12, %v5191_v39 }
 0x675   : > { %v7260_v31 = vpop.eup %7259  ;;  %v10781_v44 = vadd.f32 1.0, %v7258_v6  ;;  %v5361_v26 = vmul.f32 %v5345_v0, %v10251_v11  ;;  %v5214_v5 = vand.u32 2147483648, %v10755_v60  ;;  %v5199_v18 = vand.u32 2147483648, %v10725_v55  ;;  %v4736_v6 = vpop.f32.mrf.mxu2 }
 0x676   : > { %v5547_v8 = vrot.slane %v5546_v17, 2  ;;  %v5634_v45 = vsel %vm5633_vm15, %v5544_v52, %v5632_v32  ;;  %v5204_v20 = vmul.f32 %v7260_v31, %v10755_v60  ;;  %7261 = vpow2.f32 %v6851_v40  ;;  %v11500_v40 = vld [vmem:[#allocation32_spill] sm:$0xff] }
 0x677   : > { %v4887_v54 = vpop.f32.mrf.mxu3  ;;  %vm5209_vm5 = vweird.f32 %v7260_v31  ;;  %v5377_v43 = vadd.f32 %v5361_v26, %v5329_v14  ;;  %7263 = vrcp.f32 %v10781_v44  ;;  %v5196_v2 = vsel %vm10797_vm10, %v10753_v12, %v5192_v37 }
 0x678   : > { %v5548_v24 = vmax.f32 %v5546_v17, %v5547_v8  ;;  %v5205_v59 = vsub.f32 1.0, %v5204_v20  ;;  %v4971_v10 = vadd.f32 %v4887_v54, %v10628_v49  ;;  %vm5208_vm2 = vweird.f32 %v10755_v60  ;;  %v4692_v8 = vpop.f32.mrf.mxu1  ;;  %v11503_v54 = vld [vmem:[#allocation31_spill] sm:$0xff] }
 0x679   : > { %v5393_v49 = vmax.f32 %v5377_v43, 0.0  ;;  %v5200_v36 = vor.u32 1.1754944e-38, %v5199_v18  ;;  %vm5213_vm0 = vcmp.eq.f32.partialorder %v5212_v53, 8.507059e+37  ;;  %vm5198_vm4 = vcmp.eq.f32.partialorder %v5197_v61, 8.507059e+37  ;;  %vm5210_vm12 = vmor %vm5208_vm2, %vm5209_vm5 }
 0x67a   : > { %v5549_v15 = vrot.slane %v5548_v24, 1  ;;  %v5206_v16 = vmul.f32 %v7260_v31, %v5205_v59  ;;  %v5009_v38 = vadd.f32 %v10510_v25, %v4971_v10  ;;  %v5215_v55 = vor.u32 1.1754944e-38, %v5214_v5 }
 0x67b   : > { %v5505_v58 = vmul.f32 %v5452_v19, %v5393_v49  ;;  %v5201_v9 = vsel %vm5198_vm4, %v5200_v36, %v5196_v2  ;;  %v4688_v39 = vadd.f32 %v10759_v4, %v11499_v35  ;;  %v4972_v0 = vadd.f32 %v4936_v33, %v10742_v23  ;;  %v4939_v23 = vpop.f32.mrf.mxu0 }
 0x67c   : > { %v5550_v63 = vmax.f32 %v5548_v24, %v5549_v15  ;;  %v5207_v57 = vadd.f32 %v7260_v31, %v5206_v16  ;;  %v6852_v29 = vmul.f32 -1.442695, %v5009_v38  ;;  %v7262_v13 = vpop.eup %7261  ;;  %v5330_v60 = vmul.f32 %v5201_v9, %v10746_v22  ;;  %v11504_v24 = vld [vmem:[#allocation34_spill] sm:$0xff] }
 0x67d   : > { %v5346_v28 = vsub.f32 1.0, %v5201_v9  ;;  %v10813_v27 = vadd.f32 1.0, %v7262_v13  ;;  %v5551_v62 = vrot.slane %v5505_v58, 4  ;;  %v10815_v32 = vpop.eup %7263  ;;  %v4968_v22 = vadd.f32 %v10728_v51, %v10610_v50  ;;  %v5457_v50 = vpop.permute.xlu2 %5456 }
 0x67e   : > { %v10810_v7 = vsel %vm5635_vm9, %v5550_v63, %v5634_v45  ;;  %v5211_v12 = vsel %vm5210_vm12, %v7260_v31, %v5207_v57  ;;  %7265 = vpow2.f32 %v6852_v29  ;;  %v4970_v31 = vadd.f32 %v10769_v56, %v10625_v41  ;;  %v11501_v45 = vld [vmem:[#allocation17_spill] sm:$0xff] }
 0x67f   : > { %v5216_v34 = vsel %vm5213_vm0, %v5215_v55, %v5211_v12  ;;  %v4890_v21 = vpop.f32.mrf.mxu3  ;;  %v5362_v14 = vmul.f32 %v5346_v28, %v11500_v40  ;;  %7267 = vrcp.f32 %v10813_v27  ;;  %v5552_v37 = vmax.f32 %v5505_v58, %v5551_v62 }
 0x680   : > { %v5331_v52 = vmul.f32 %v5216_v34, %v5004_v42  ;;  %v5347_v17 = vsub.f32 1.0, %v5216_v34  ;;  %v4973_v53 = vadd.f32 %v4890_v21, %v4688_v39  ;;  %v11502_v42 = vld [vmem:[#allocation13_spill] sm:$0xff]  ;;  %v4690_v61 = vadd.f32 %v4689_v3, %v11503_v54 }
 0x681   : > { %v5378_v4 = vadd.f32 %v5362_v14, %v5330_v60  ;;  %v4737_v26 = vadd.f32 %v4736_v6, %v11502_v42  ;;  %v10830_v59 = vadd.f32 %v4692_v8, %v11504_v24  ;;  %v5219_v41 = vmul.f32 %v10815_v32, %v10781_v44 }
 0x682   : > { %v5363_v20 = vmul.f32 %v5347_v17, %v11501_v45  ;;  %v5553_v56 = vrot.slane %v5552_v37, 2  ;;  %v5011_v43 = vadd.f32 %v10510_v25, %v4973_v53  ;;  %v10836_v11 = vadd.f32 %v10547_v1, %v4968_v22 }
 0x683   : > { %v5394_v5 = vmax.f32 %v5378_v4, 0.0  ;;  %v5008_v18 = vadd.f32 %v10547_v1, %v4970_v31  ;;  %v10840_v3 = vadd.f32 %v10547_v1, %v4972_v0  ;;  %v5220_v15 = vsub.f32 1.0, %v5219_v41 }
 0x684   : > { %v5379_v51 = vadd.f32 %v5363_v20, %v5331_v52  ;;  %v7266_v10 = vpop.eup %7265  ;;  %v5554_v33 = vmax.f32 %v5552_v37, %v5553_v56  ;;  %vm5637_vm3 = vcmask 1046534   ;;  %v10844_v38 = vadd.f32 %v4939_v23, %v4737_v26 }
 0x685   : > { %v10842_v19 = vadd.f32 1.0, %v7266_v10  ;;  %v5506_v2 = vmul.f32 %v5457_v50, %v5394_v5  ;;  %v7268_v49 = vpop.eup %7267  ;;  %v6853_v36 = vmul.f32 -1.442695, %v5011_v43  ;;  %vm5223_vm8 = vweird.f32 %v10781_v44  ;;  %v11509_v43 = vld [vmem:[#allocation30_spill] sm:$0xff] }
 0x686   : > { %v5395_v16 = vmax.f32 %v5379_v51, 0.0  ;;  %v5234_v55 = vmul.f32 %v7268_v49, %v10813_v27  ;;  %v5555_v58 = vrot.slane %v5554_v33, 1  ;;  %v5227_v29 = vand.u32 2147483647, %v10781_v44 }
 0x687   : > { %v4892_v63 = vpop.f32.mrf.mxu3  ;;  %v5242_v9 = vand.u32 2147483647, %v10813_v27  ;;  %7269 = vrcp.f32 %v10842_v19  ;;  %v5221_v13 = vmul.f32 %v10815_v32, %v5220_v15  ;;  %v5229_v12 = vand.u32 2147483648, %v10781_v44 }
 0x688   : > { %v5507_v57 = vmul.f32 %v10730_v30, %v5395_v16  ;;  %v5235_v60 = vsub.f32 1.0, %v5234_v55  ;;  %v5244_v28 = vand.u32 2147483648, %v10813_v27  ;;  %v5556_v34 = vmax.f32 %v5554_v33, %v5555_v58 }
 0x689   : > { %v5557_v62 = vrot.slane %v5506_v2, 4  ;;  %vm5239_vm6 = vweird.f32 %v7268_v49  ;;  %7271 = vpow2.f32 %v6853_v36  ;;  %v4975_v30 = vadd.f32 %v4892_v63, %v4690_v61  ;;  %v4738_v36 = vpop.f32.mrf.mxu2 }
 0x68a   : > { %vm5224_vm14 = vweird.f32 %v10815_v32  ;;  %v5563_v21 = vrot.slane %v5507_v57, 4  ;;  %v5236_v35 = vmul.f32 %v7268_v49, %v5235_v60  ;;  %v5638_v39 = vsel %vm5637_vm3, %v5556_v34, %v10810_v7  ;;  %v5467_v60 = vpop.permute.xlu1 %5466  ;;  %v11513_v34 = vld [vmem:[#allocation44_spill] sm:$0xff] }
 0x68b   : > { %v5558_v6 = vmax.f32 %v5506_v2, %v5557_v62  ;;  %vm5639_vm11 = vcmask 1047559   ;;  %v5013_v52 = vadd.f32 %v10510_v25, %v4975_v30  ;;  %v5222_v17 = vadd.f32 %v10815_v32, %v5221_v13  ;;  %vm10867_vm0 = vmor %vm5223_vm8, %vm5224_vm14  ;;  %v11510_v2 = vld [vmem:[#allocation27_spill] sm:$0xff]  ;;  %v4694_v30 = vpop.f32.mrf.mxu1 }
 0x68c   : > { %vm10860_vm5 = vcmp.eq.f32.partialorder %v5227_v29, 8.507059e+37  ;;  %v5237_v14 = vadd.f32 %v7268_v49, %v5236_v35  ;;  %vm5238_vm10 = vweird.f32 %v10813_v27  ;;  %vm5243_vm2 = vcmp.eq.f32.partialorder %v5242_v9, 8.507059e+37 }
 0x68d   : > { %v5559_v22 = vrot.slane %v5558_v6, 2  ;;  %v7270_v7 = vpop.eup %7269  ;;  %vm5240_vm4 = vmor %vm5238_vm10, %vm5239_vm6  ;;  %v5245_v0 = vor.u32 1.1754944e-38, %v5244_v28  ;;  %v6854_v8 = vmul.f32 -1.442695, %v5013_v52  ;;  %v5226_v45 = vsel %vm10867_vm0, %v10815_v32, %v5222_v17  ;;  %v11514_v52 = vld [vmem:[#allocation19_spill] sm:$0xff] }
 0x68e   : > { %v5230_v27 = vor.u32 1.1754944e-38, %v5229_v12  ;;  %v5564_v20 = vmax.f32 %v5507_v57, %v5563_v21  ;;  %v5241_v37 = vsel %vm5240_vm4, %v7268_v49, %v5237_v14  ;;  %v5249_v44 = vmul.f32 %v7270_v7, %v10842_v19 }
 0x68f   : > { %v5257_v4 = vand.u32 2147483647, %v10842_v19  ;;  %v7272_v53 = vpop.eup %7271  ;;  %v5246_v42 = vsel %vm5243_vm2, %v5245_v0, %v5241_v37  ;;  %v5560_v26 = vmax.f32 %v5558_v6, %v5559_v22  ;;  %7273 = vpow2.f32 %v6854_v8  ;;  %v4895_v61 = vpop.f32.mrf.mxu3 }
 0x690   : > { %v5231_v54 = vsel %vm10860_vm5, %v5230_v27, %v5226_v45  ;;  %v5333_v24 = vmul.f32 %v5246_v42, %v5008_v18  ;;  %v5349_v50 = vsub.f32 1.0, %v5246_v42  ;;  %v5250_v41 = vsub.f32 1.0, %v5249_v44  ;;  %v4941_v6 = vpop.f32.mrf.mxu0  ;;  %v11515_v27 = vld [vmem:[#allocation18_spill] sm:$0xff] }
 0x691   : > { %v5259_v32 = vand.u32 2147483648, %v10842_v19  ;;  %v5561_v51 = vrot.slane %v5560_v26, 1  ;;  %v10883_v56 = vadd.f32 1.0, %v7272_v53  ;;  %v5332_v23 = vmul.f32 %v5231_v54, %v10836_v11 }
 0x692   : > { %v5348_v5 = vsub.f32 1.0, %v5231_v54  ;;  %v5365_v10 = vmul.f32 %v5349_v50, %v11509_v43  ;;  %v5251_v15 = vmul.f32 %v7270_v7, %v5250_v41  ;;  %vm5254_vm12 = vweird.f32 %v7270_v7 }
 0x693   : > { %v4977_v16 = vadd.f32 %v4895_v61, %v10830_v59  ;;  %v5565_v33 = vrot.slane %v5564_v20, 2  ;;  %v5562_v18 = vmax.f32 %v5560_v26, %v5561_v51  ;;  %7275 = vrcp.f32 %v10883_v56 }
 0x694   : > { %v5364_v49 = vmul.f32 %v5348_v5, %v11510_v2  ;;  %v5381_v63 = vadd.f32 %v5365_v10, %v5333_v24  ;;  %v5252_v57 = vadd.f32 %v7270_v7, %v5251_v15  ;;  %vm5253_vm8 = vweird.f32 %v10842_v19 }
 0x695   : > { %v5015_v11 = vadd.f32 %v10510_v25, %v4977_v16  ;;  %v7274_v55 = vpop.eup %7273  ;;  %vm10892_vm6 = vmor %vm5253_vm8, %vm5254_vm12  ;;  %vm5258_vm14 = vcmp.eq.f32.partialorder %v5257_v4, 8.507059e+37  ;;  %v5260_v59 = vor.u32 1.1754944e-38, %v5259_v32  ;;  %v5640_v29 = vsel %vm5639_vm11, %v5562_v18, %v5638_v39 }
 0x696   : > { %v5380_v9 = vadd.f32 %v5364_v49, %v5332_v23  ;;  %v5397_v13 = vmax.f32 %v5381_v63, 0.0  ;;  %v5256_v12 = vsel %vm10892_vm6, %v7270_v7, %v5252_v57  ;;  %5650 = vst [vmem:[%s10899_s20] sm:$0xff] %v5640_v29  ;;  %v10902_v19 = vadd.f32 1.0, %v7274_v55 }
 0x697   : > { %v6855_v28 = vmul.f32 -1.442695, %v5015_v11  ;;  %v4739_v62 = vadd.f32 %v4738_v36, %v11513_v34  ;;  %v5566_v21 = vmax.f32 %v5564_v20, %v5565_v33  ;;  %v5261_v35 = vsel %vm5258_vm14, %v5260_v59, %v5256_v12  ;;  %v4897_v45 = vpop.f32.mrf.mxu3  ;;  %v4741_v34 = vpop.f32.mrf.mxu2 }
 0x698   : > { %v5396_v39 = vmax.f32 %v5380_v9, 0.0  ;;  %v4695_v17 = vadd.f32 %v4694_v30, %v11514_v52  ;;  %v5334_v40 = vmul.f32 %v5261_v35, %v10840_v3  ;;  %v5350_v14 = vsub.f32 1.0, %v5261_v35 }
 0x699   : > { %7277 = vrcp.f32 %v10902_v19  ;;  %v7276_v22 = vpop.eup %7275  ;;  %v5012_v31 = vadd.f32 %v10547_v1, %v10844_v38  ;;  %v5509_v0 = vmul.f32 %v10764_v47, %v5397_v13  ;;  %v5272_v8 = vand.u32 2147483647, %v10883_v56 }
 0x69a   : > { %v5508_v7 = vmul.f32 %v5467_v60, %v5396_v39  ;;  %v5366_v20 = vmul.f32 %v5350_v14, %v11515_v27  ;;  %v4976_v37 = vadd.f32 %v4941_v6, %v4739_v62  ;;  %7279 = vpow2.f32 %v6855_v28  ;;  %v11518_v14 = vld [vmem:[#allocation33_spill] sm:$0xff] }
 0x69b   : > { %v5264_v44 = vmul.f32 %v7276_v22, %v10883_v56  ;;  %v5567_v3 = vrot.slane %v5566_v21, 1  ;;  %v5575_v53 = vrot.slane %v5509_v0, 4  ;;  %vm5268_vm5 = vweird.f32 %v10883_v56 }
 0x69c   : > { %v5569_v4 = vrot.slane %v5508_v7, 4  ;;  %v5382_v42 = vadd.f32 %v5366_v20, %v5334_v40  ;;  %v5274_v38 = vand.u32 2147483648, %v10883_v56  ;;  %v4979_v54 = vadd.f32 %v4897_v45, %v4695_v17  ;;  %v4944_v17 = vpop.f32.mrf.mxu0 }
 0x69d   : > { %v5265_v26 = vsub.f32 1.0, %v5264_v44  ;;  %v5287_v47 = vand.u32 2147483647, %v10902_v19  ;;  %v5576_v24 = vmax.f32 %v5509_v0, %v5575_v53  ;;  %vm10917_vm10 = vcmp.eq.f32.partialorder %v5272_v8, 8.507059e+37  ;;  %v11519_v44 = vld [vmem:[#allocation15_spill] sm:$0xff] }
 0x69e   : > { %v5570_v61 = vmax.f32 %v5508_v7, %v5569_v4  ;;  %v5398_v32 = vmax.f32 %v5382_v42, 0.0  ;;  %vm5269_vm2 = vweird.f32 %v7276_v22  ;;  %v5017_v23 = vadd.f32 %v10510_v25, %v4979_v54  ;;  %v11520_v4 = vld [vmem:[#allocation39_spill] sm:$0xff] }
 0x69f   : > { %v7278_v41 = vpop.eup %7277  ;;  %v5266_v51 = vmul.f32 %v7276_v22, %v5265_v26  ;;  %v5289_v43 = vand.u32 2147483648, %v10902_v19  ;;  %v5577_v15 = vrot.slane %v5576_v24, 2  ;;  %v5275_v18 = vor.u32 1.1754944e-38, %v5274_v38  ;;  %vm5270_vm0 = vmor %vm5268_vm5, %vm5269_vm2 }
 0x6a0   : > { %v5279_v5 = vmul.f32 %v7278_v41, %v10902_v19  ;;  %v5571_v10 = vrot.slane %v5570_v61, 2  ;;  %v7280_v16 = vpop.eup %7279  ;;  %v5510_v2 = vmul.f32 %v10771_v46, %v5398_v32  ;;  %v6856_v49 = vmul.f32 -1.442695, %v5017_v23 }
 0x6a1   : > { %v5267_v33 = vadd.f32 %v7276_v22, %v5266_v51  ;;  %v5578_v57 = vmax.f32 %v5576_v24, %v5577_v15  ;;  %v10925_v11 = vadd.f32 1.0, %v7280_v16  ;;  %vm5284_vm4 = vweird.f32 %v7278_v41 }
 0x6a2   : > { %v5280_v36 = vsub.f32 1.0, %v5279_v5  ;;  %v5572_v63 = vmax.f32 %v5570_v61, %v5571_v10  ;;  %v5581_v55 = vrot.slane %v5510_v2, 4  ;;  %7281 = vpow2.f32 %v6856_v49  ;;  %v5482_v61 = vpop.permute.xlu1 %5481  ;;  %v4743_v5 = vpop.f32.mrf.mxu2 }
 0x6a3   : > { %v5271_v25 = vsel %vm5270_vm0, %v7276_v22, %v5267_v33  ;;  %v5579_v29 = vrot.slane %v5578_v57, 1  ;;  %7283 = vrcp.f32 %v10925_v11  ;;  %v5568_v46 = vmax.f32 %v5566_v21, %v5567_v3 }
 0x6a4   : > { %v5281_v58 = vmul.f32 %v7278_v41, %v5280_v36  ;;  %v5573_v59 = vrot.slane %v5572_v63, 1  ;;  %vm5283_vm12 = vweird.f32 %v10902_v19  ;;  %v5276_v9 = vsel %vm10917_vm10, %v5275_v18, %v5271_v25 }
 0x6a5   : > { %v5582_v13 = vmax.f32 %v5510_v2, %v5581_v55  ;;  %v5580_v56 = vmax.f32 %v5578_v57, %v5579_v29  ;;  %v5335_v28 = vmul.f32 %v5276_v9, %v5012_v31  ;;  %vm5285_vm8 = vmor %vm5283_vm12, %vm5284_vm4  ;;  %v5290_v62 = vor.u32 1.1754944e-38, %v5289_v43  ;;  %v4946_v2 = vpop.f32.mrf.mxu0  ;;  %v11521_v57 = vld [vmem:[#allocation14_spill] sm:$0xff] }
 0x6a6   : > { %v5282_v12 = vadd.f32 %v7278_v41, %v5281_v58  ;;  %v5574_v60 = vmax.f32 %v5572_v63, %v5573_v59  ;;  %v5351_v30 = vsub.f32 1.0, %v5276_v9  ;;  %v5014_v6 = vadd.f32 %v10547_v1, %v4976_v37 }
 0x6a7   : > { %v5583_v35 = vrot.slane %v5582_v13, 2  ;;  %vm5288_vm6 = vcmp.eq.f32.partialorder %v5287_v47, 8.507059e+37  ;;  %v4742_v3 = vadd.f32 %v4741_v34, %v11519_v44  ;;  %v5302_v24 = vand.u32 2147483647, %v10925_v11 }
 0x6a8   : > { %v5286_v39 = vsel %vm5285_vm8, %v7278_v41, %v5282_v12  ;;  %v5641_v19 = vsel %vm5627_vm1, %v5574_v60, %v5568_v46  ;;  %v7282_v21 = vpop.eup %7281  ;;  %v5367_v22 = vmul.f32 %v5351_v30, %v11518_v14  ;;  %v5304_v50 = vand.u32 2147483648, %v10925_v11 }
 0x6a9   : > { %v5291_v52 = vsel %vm5288_vm6, %v5290_v62, %v5286_v39  ;;  %v5642_v40 = vsel %vm5629_vm7, %v5580_v56, %v5641_v19  ;;  %v5584_v31 = vmax.f32 %v5582_v13, %v5583_v35  ;;  %v7284_v7 = vpop.eup %7283  ;;  %v5082_v45 = vadd.f32 1.0, %v7282_v21 }
 0x6aa   : > { %v5336_v0 = vmul.f32 %v5291_v52, %v5014_v6  ;;  %v5352_v8 = vsub.f32 1.0, %v5291_v52  ;;  %v5383_v27 = vadd.f32 %v5367_v22, %v5335_v28  ;;  %v5294_v37 = vmul.f32 %v7284_v7, %v10925_v11  ;;  %v5492_v22 = vpop.permute.xlu1 %5491 }
 0x6ab   : > { %v5585_v20 = vrot.slane %v5584_v31, 1  ;;  %7285 = vrcp.f32 %v5082_v45  ;;  %v4978_v47 = vadd.f32 %v4944_v17, %v4742_v3  ;;  %vm5299_vm1 = vweird.f32 %v7284_v7 }
 0x6ac   : > { %v5368_v53 = vmul.f32 %v5352_v8, %v11520_v4  ;;  %v5399_v42 = vmax.f32 %v5383_v27, 0.0  ;;  %v5295_v38 = vsub.f32 1.0, %v5294_v37  ;;  %vm5298_vm7 = vweird.f32 %v10925_v11 }
 0x6ad   : > { %v5586_v26 = vmax.f32 %v5584_v31, %v5585_v20  ;;  %v5016_v16 = vadd.f32 %v10547_v1, %v4978_v47  ;;  %vm5300_vm14 = vmor %vm5298_vm7, %vm5299_vm1  ;;  %v5305_v33 = vor.u32 1.1754944e-38, %v5304_v50  ;;  %v4744_v25 = vadd.f32 %v4743_v5, %v11521_v57 }
 0x6ae   : > { %v5384_v54 = vadd.f32 %v5368_v53, %v5336_v0  ;;  %v5511_v41 = vmul.f32 %v5482_v61, %v5399_v42  ;;  %v5296_v51 = vmul.f32 %v7284_v7, %v5295_v38  ;;  %v5317_v13 = vand.u32 2147483647, %v5082_v45 }
 0x6af   : > { %v5643_v32 = vsel %vm5631_vm13, %v5586_v26, %v5642_v40  ;;  %vm5303_vm13 = vcmp.eq.f32.partialorder %v5302_v24, 8.507059e+37  ;;  %v4980_v9 = vadd.f32 %v4946_v2, %v4744_v25  ;;  %v5319_v12 = vand.u32 2147483648, %v5082_v45  ;;  %v5497_v26 = vpop.permute.xlu0 %5496 }
 0x6b0   : > { %v5400_v23 = vmax.f32 %v5384_v54, 0.0  ;;  %v5587_v43 = vrot.slane %v5511_v41, 4  ;;  %v5297_v10 = vadd.f32 %v7284_v7, %v5296_v51  ;;  %vm5313_vm10 = vweird.f32 %v5082_v45 }
 0x6b1   : > { %v7286_v15 = vpop.eup %7285  ;;  %v5018_v39 = vadd.f32 %v10547_v1, %v4980_v9  ;;  %v5320_v19 = vor.u32 1.1754944e-38, %v5319_v12  ;;  %vm5318_vm0 = vcmp.eq.f32.partialorder %v5317_v13, 8.507059e+37 }
 0x6b2   : > { %v5512_v18 = vmul.f32 %v10792_v48, %v5400_v23  ;;  %v5588_v49 = vmax.f32 %v5511_v41, %v5587_v43  ;;  %v5309_v36 = vmul.f32 %v7286_v15, %v5082_v45  ;;  %v5301_v63 = vsel %vm5300_vm14, %v7284_v7, %v5297_v10  ;;  %v11522_v48 = vld [vmem:[#allocation16_spill] sm:$0xff]  ;;  %v11523_v45 = vld [vmem:[#allocation37_spill] sm:$0xff] }
 0x6b3   : > { %v5306_v55 = vsel %vm5303_vm13, %v5305_v33, %v5301_v63  ;;  %vm5314_vm5 = vweird.f32 %v7286_v15 }
 0x6b4   : > { %v5593_v58 = vrot.slane %v5512_v18, 4  ;;  %v5589_v59 = vrot.slane %v5588_v49, 2  ;;  %v5310_v29 = vsub.f32 1.0, %v5309_v36  ;;  %v5337_v46 = vmul.f32 %v5306_v55, %v5016_v16  ;;  %vm5315_vm2 = vmor %vm5313_vm10, %vm5314_vm5 }
 0x6b5   : > { %v5353_v11 = vsub.f32 1.0, %v5306_v55 }
 0x6b6   : > { %v5594_v60 = vmax.f32 %v5512_v18, %v5593_v58  ;;  %v5590_v56 = vmax.f32 %v5588_v49, %v5589_v59  ;;  %v5311_v28 = vmul.f32 %v7286_v15, %v5310_v29 }
 0x6b7   : > { %v5369_v34 = vmul.f32 %v5353_v11, %v11522_v48 }
 0x6b8   : > { %v5595_v62 = vrot.slane %v5594_v60, 2  ;;  %v5591_v30 = vrot.slane %v5590_v56, 1  ;;  %v5312_v35 = vadd.f32 %v7286_v15, %v5311_v28 }
 0x6b9   : > { %v5385_v6 = vadd.f32 %v5369_v34, %v5337_v46 }
 0x6ba   : > { %v5596_v21 = vmax.f32 %v5594_v60, %v5595_v62  ;;  %v5592_v52 = vmax.f32 %v5590_v56, %v5591_v30  ;;  %v5316_v17 = vsel %vm5315_vm2, %v7286_v15, %v5312_v35 }
 0x6bb   : > { %v5401_v40 = vmax.f32 %v5385_v6, 0.0  ;;  %v5321_v14 = vsel %vm5318_vm0, %v5320_v19, %v5316_v17 }
 0x6bc   : > { %v5597_v31 = vrot.slane %v5596_v21, 1  ;;  %v5644_v7 = vsel %vm5633_vm15, %v5592_v52, %v5643_v32  ;;  %v5338_v0 = vmul.f32 %v5321_v14, %v5018_v39  ;;  %v5354_v8 = vsub.f32 1.0, %v5321_v14 }
 0x6bd   : > { %v5513_v27 = vmul.f32 %v5492_v22, %v5401_v40 }
 0x6be   : > { %v5598_v20 = vmax.f32 %v5596_v21, %v5597_v31  ;;  %v5370_v37 = vmul.f32 %v5354_v8, %v11523_v45 }
 0x6bf   : > { %v5599_v1 = vrot.slane %v5513_v27, 4 }
 0x6c0   : > { %v5645_v44 = vsel %vm5635_vm9, %v5598_v20, %v5644_v7  ;;  %v5386_v3 = vadd.f32 %v5370_v37, %v5338_v0 }
 0x6c1   : > { %v5600_v4 = vmax.f32 %v5513_v27, %v5599_v1 }
 0x6c2   : > { %v5402_v53 = vmax.f32 %v5386_v3, 0.0 }
 0x6c3   : > { %v5601_v42 = vrot.slane %v5600_v4, 2 }
 0x6c4   : > { %v5514_v38 = vmul.f32 %v5497_v26, %v5402_v53 }
 0x6c5   : > { %v5602_v54 = vmax.f32 %v5600_v4, %v5601_v42 }
 0x6c6   : > { %v5605_v61 = vrot.slane %v5514_v38, 4 }
 0x6c7   : > { %v5603_v47 = vrot.slane %v5602_v54, 1 }
 0x6c8   : > { %v5606_v50 = vmax.f32 %v5514_v38, %v5605_v61 }
 0x6c9   : > { %v5604_v24 = vmax.f32 %v5602_v54, %v5603_v47 }
 0x6ca   : > { %v5607_v41 = vrot.slane %v5606_v50, 2 }
 0x6cb   : > { %v5646_v32 = vsel %vm5637_vm3, %v5604_v24, %v5645_v44 }
 0x6cc   : > { %v5608_v51 = vmax.f32 %v5606_v50, %v5607_v41 }
 0x6ce   : > { %v5609_v23 = vrot.slane %v5608_v51, 1 }
 0x6d0   : > { %v5610_v5 = vmax.f32 %v5608_v51, %v5609_v23 }
 0x6d2   : > { %v5647_v43 = vsel %vm5639_vm11, %v5610_v5, %v5646_v32 }
 0x6d3   : > { %5651 = vst [vmem:[%s10899_s20 + $0x8] sm:$0xff] %v5647_v43 }
 0x6d4   : > { %7389 = shalt.err (!%p7386_p8)
}
 0x6d5   : > { %s7439_s18 = smov 128   ;;  %s7440_s20 = smov 8  }
 0x6d6   : > { %7035 = dma.vmem_to_hbm [thread:$0]  (%p7519_p5), %s5666_s29, 256, %s5668_s8, %s5653_s28, %s7439_s18, %s7439_s18, %s7440_s20  }
 0x6d7 PF: > { %p7052_p9 = scmp.ge.s32.totalorder %s7432_s27, 2  ;;  %s5682_s21 = sand.u32 1, %s7420_s24  }
 0x6d8   : > { %s5683_s22 = scalar_lea.sflag [#allocation4], %s5682_s21 }
 0x6d9   : > { %p7045_p10 = pnand %p7052_p9, %p7523_p6 }
 0x6db   : > { %p7046_p11 = pneg %p7045_p10 }
 0x6dd   : > { %7415 = dma.done.wait (%p7046_p11), %s5683_s22, 256  }
 0x6de   : > { %7417 = vsyncadd (%p7046_p11), %s5683_s22, 4294967040  ;;  %p19_p12 = scmp.ge.s32.totalorder %s7506_s30, 4   ;;  %s11524_s24 = smov %s7424_s25 }
 0x6df   : > { %s11525_s25 = smov %s7428_s26  ;;  %s11526_s26 = smov %s7517_s10 }
 0x6e0   : > { %s11527_s27 = smov %s7506_s30  ;;  %21 = sbr.rel (!%p19_p12) target bundleno = 5 (0x5), region = 107 }
 0x6e5   :  { %5689 = vsyncpa [#allocation3], 1 }
 0x6e6   :  { %5691 = vsyncpa [#allocation3 + $0x1], 1 }
 0x6e7   :  { %5692 = vsyncpa [#allocation6], 1 }
 0x6e8   :  { %5693 = vsyncpa [#allocation4], 1 }
 0x6e9   :  { %5695 = vsyncpa [#allocation4 + $0x1], 1 }

</bundles_post_ra>
